<compile_context>
chip_gen: v7x
topology: tpu7x:2x2x1
jax: 0.10.0
libtpu: 0.0.40
codegen_flags: <defaults>
</compile_context>

<pallas_src>
import functools

import jax
import jax.numpy as jnp
from jax import lax
from jax.experimental import pallas as pl
from jax.experimental.pallas import tpu as pltpu

EPS = 1e-5


def _stn3d_core_kernel(
    # ---- inputs --------------------------------------------------------------
    h1n_ref,                  # (1, T, 64) bf16 tile of relu(bn1(conv1(x)))
    bn2s_ref, bn2t_ref,       # (1, 128) f32 bn2 scale / shift (conv2 bias folded in)
    w2_ref,                   # (64, 128) bf16
    w3_ref,                   # (128, 1024) bf16
    b3_ref, g3_ref, be3_ref,  # (1, 1024) f32 conv3 bias, bn3 gamma / beta
    # ---- output --------------------------------------------------------------
    pooled_ref,               # (B, 1024) f32 global-max-pooled, post bn3+relu
    # ---- scratch (persists across the whole grid) -----------------------------
    s2n_sum,                  # (1, 128)  f32  running sum of (bf16-rounded) h2n
    g2_acc,                   # (128, 128) f32 running Gram of h2n
    z3max, z3min,             # (B, 1024) f32 per-batch running max / min of z3
    *, inv_rows):
  f32 = jnp.float32
  b = pl.program_id(0)
  t = pl.program_id(1)
  last = (b == pl.num_programs(0) - 1) & (t == pl.num_programs(1) - 1)

  @pl.when((b == 0) & (t == 0))
  def _init():
    s2n_sum[...] = jnp.zeros_like(s2n_sum)
    g2_acc[...] = jnp.zeros_like(g2_acc)
    z3max[...] = jnp.full(z3max.shape, -jnp.inf, f32)
    z3min[...] = jnp.full(z3min.shape, jnp.inf, f32)

  h1n = h1n_ref[0]                                            # (T, 64) bf16

  # conv2 (64 -> 128): bf16 operands, f32 accumulation on the MXU.  bn2's training
  # statistics were precomputed in the wrapper; the conv2 bias is folded into the
  # bn2 shift so no per-element bias add is needed.
  z2 = jnp.dot(h1n, w2_ref[...], preferred_element_type=f32)  # (T, 128)
  h2n = jnp.maximum(z2 * bn2s_ref[...] + bn2t_ref[...], 0.0)
  h2n_bf = h2n.astype(jnp.bfloat16)

  # bn3 statistics without ever reducing the (T, 1024) conv3 tile:
  #   sum_rows(z3)   = (sum_rows h2n) @ W3                  (finalized in epilogue)
  #   sum_rows(z3^2) = diag(W3^T (h2n^T h2n) W3)            (finalized in epilogue)
  # Both identities are exact in real arithmetic; h2n >= 0 so the accumulations are
  # cancellation-free (the E[x^2]-E[x]^2 step below is clamped; use compensated
  # accumulation if B*N grows far beyond ~10^6).
  s2n_sum[...] += jnp.sum(h2n_bf.astype(f32), axis=0, keepdims=True)
  g2_acc[...] += lax.dot_general(h2n_bf, h2n_bf, (((0,), (0,)), ((), ())),
                                 preferred_element_type=f32)

  # conv3 (128 -> 1024): the dominant GEMM.  b3 is folded into the finalize, so the
  # only per-element work on the (T, 1024) tile is the running max / min.
  z3 = jnp.dot(h2n_bf, w3_ref[...], preferred_element_type=f32)
  row = pl.ds(b, 1)
  z3max[row, :] = jnp.maximum(z3max[row, :], jnp.max(z3, axis=0, keepdims=True))
  z3min[row, :] = jnp.minimum(z3min[row, :], jnp.min(z3, axis=0, keepdims=True))

  # ---- epilogue: finalize bn3 and recover the global max-pool -----------------
  @pl.when(last)
  def _epilogue():
    w3f = w3_ref[...].astype(f32)
    b3 = b3_ref[...]
    dot_hi = functools.partial(jnp.dot, preferred_element_type=f32,
                               precision=lax.Precision.HIGHEST)
    sum_z3 = dot_hi(s2n_sum[...], w3f)                        # (1, 1024)
    mean_z3 = sum_z3 * inv_rows
    e_z3sq = jnp.sum(dot_hi(g2_acc[...], w3f) * w3f,
                     axis=0, keepdims=True) * inv_rows        # E[z3^2]
    mean3 = mean_z3 + b3                                      # E[h3],  h3 = z3 + b3
    var3 = jnp.maximum(
        e_z3sq + (2.0 * b3) * mean_z3 + b3 * b3 - mean3 * mean3, 0.0)
    scale3 = g3_ref[...] * lax.rsqrt(var3 + EPS)
    shift3 = be3_ref[...] + (b3 - mean3) * scale3
    # max_t relu(z3*scale3 + shift3) == relu(max(scale3*z3max + shift3,
    #                                            scale3*z3min + shift3))
    # because the per-channel affine map is monotone and relu is monotone.
    pooled_ref[...] = jnp.maximum(
        jnp.maximum(z3max[...] * scale3 + shift3,
                    z3min[...] * scale3 + shift3), 0.0)


def stn3d_forward(x, params, *, block_points=2048,
                  vmem_limit_bytes=48 * 1024 * 1024):
  """STN3d forward (training-mode BatchNorm).  x: (B, 3, N) f32.  Returns (B, 3, 3).

  block_points guidance: <=2048 on v7x (64 MiB VMEM); up to 4096 on v5e/v6e
  (raise vmem_limit_bytes to ~96 MiB).  The conv1/bn1/bn2-stat prologue and the
  tiny fc stack run in plain XLA; conv2, conv3, bn3 statistics and the global
  max-pool run in the Pallas kernel.
  """
  (w1, b1, g1, be1, w2, b2, g2, be2, w3, b3, g3, be3,
   wf1, bf1, g4, be4, wf2, bf2, g5, be5, wf3, bf3) = params
  B, C, N = x.shape
  assert C == 3
  tp = min(block_points, N)
  assert N % tp == 0 and tp % 16 == 0, "point tile must divide N, multiple of 16"
  n_tiles = N // tp
  R = B * N
  f32, bf16 = jnp.float32, jnp.bfloat16

  dot_hi = functools.partial(jnp.dot, preferred_element_type=f32,
                             precision=lax.Precision.HIGHEST)

  def bn_affine(m, v, g, be):
    s = g * lax.rsqrt(v + EPS)
    return s, be - m * s

  # ---- XLA prologue: conv1 + bn1 + relu, and bn2 batch statistics -------------
  x_rows = jnp.transpose(x, (0, 2, 1)).reshape(R, C)           # (R, 3), lane-dense
  h1 = dot_hi(x_rows, w1) + b1                                 # (R, 64) f32
  m1 = jnp.mean(h1, axis=0, keepdims=True)
  v1 = jnp.maximum(jnp.mean(h1 * h1, axis=0, keepdims=True) - m1 * m1, 0.0)
  s1, t1 = bn_affine(m1, v1, g1, be1)
  h1n = jnp.maximum(h1 * s1 + t1, 0.0).astype(bf16)            # (R, 64) bf16

  w2b = w2.astype(bf16)
  w3b = w3.astype(bf16)

  # bn2's training statistics need conv2 over all rows; conv2 is ~6% of conv3's
  # FLOPs so one throwaway XLA pass is cheap and matches the kernel's per-tile
  # conv2 numerics (same bf16 operands, f32 accumulation).
  h2_stats = jnp.dot(h1n, w2b, preferred_element_type=f32) + b2
  m2 = jnp.mean(h2_stats, axis=0, keepdims=True)
  v2 = jnp.maximum(jnp.mean(h2_stats * h2_stats, axis=0, keepdims=True) - m2 * m2,
                   0.0)
  s2, t2 = bn_affine(m2, v2, g2, be2)
  t2 = t2 + b2 * s2                     # fold the conv2 bias into the bn2 shift

  h1n3 = h1n.reshape(B, N, 64)

  # ---- Pallas kernel: conv2 -> bn2+relu -> conv3, bn3 stats + global max-pool --
  args = (h1n3, s2, t2, w2b, w3b, b3, g3, be3)

  def full(a):  # whole array resident in VMEM, constant block index
    return pl.BlockSpec(a.shape, lambda bb, tt: (0,) * a.ndim)

  in_specs = [pl.BlockSpec((1, tp, 64), lambda bb, tt: (bb, tt, 0))]
  in_specs += [full(a) for a in args[1:]]

  pooled = pl.pallas_call(
      functools.partial(_stn3d_core_kernel, inv_rows=1.0 / float(R)),
      out_shape=jax.ShapeDtypeStruct((B, 1024), f32),
      grid_spec=pltpu.PrefetchScalarGridSpec(
          num_scalar_prefetch=0,
          grid=(B, n_tiles),
          in_specs=in_specs,
          out_specs=pl.BlockSpec((B, 1024), lambda bb, tt: (0, 0)),
          scratch_shapes=[
              pltpu.VMEM((1, 128), f32),      # sum of h2n
              pltpu.VMEM((128, 128), f32),    # Gram of h2n
              pltpu.VMEM((B, 1024), f32),     # per-batch running max of z3
              pltpu.VMEM((B, 1024), f32),     # per-batch running min of z3
          ]),
      compiler_params=pltpu.CompilerParams(
          # Both axes carry streaming state (bn3 stats / running max-min), so they
          # must run sequentially on one TensorCore.
          dimension_semantics=("arbitrary", "arbitrary"),
          vmem_limit_bytes=vmem_limit_bytes,
      ),
  )(*args)

  # ---- XLA epilogue: tiny fc stack with training-mode bn4/bn5 ------------------
  def bn_rows(h, g, be):
    m = jnp.mean(h, axis=0, keepdims=True)
    v = jnp.maximum(jnp.mean(h * h, axis=0, keepdims=True) - m * m, 0.0)
    s = g * lax.rsqrt(v + EPS)
    return h * s + (be - m * s)

  h4 = jnp.maximum(bn_rows(dot_hi(pooled, wf1) + bf1, g4, be4), 0.0)
  h5 = jnp.maximum(bn_rows(dot_hi(h4, wf2) + bf2, g5, be5), 0.0)
  out = dot_hi(h5, wf3) + bf3
  iden = jnp.array([1, 0, 0, 0, 1, 0, 0, 0, 1], f32)
  return (out + iden[None, :]).reshape(B, 3, 3)


def init_params(key):
  """Deterministic synthetic parameters matching the PyTorch module shapes."""
  def linear(k, cin, cout):
    kw, kb = jax.random.split(k)
    bound = 1.0 / (cin ** 0.5)
    w = jax.random.uniform(kw, (cin, cout), jnp.float32, -bound, bound)  # W.T
    bb = jax.random.uniform(kb, (1, cout), jnp.float32, -bound, bound)
    return w, bb

  def bn(c):
    return jnp.ones((1, c), jnp.float32), jnp.zeros((1, c), jnp.float32)

  ks = jax.random.split(key, 6)
  w1, b1 = linear(ks[0], 3, 64);       g1, be1 = bn(64)
  w2, b2 = linear(ks[1], 64, 128);     g2, be2 = bn(128)
  w3, b3 = linear(ks[2], 128, 1024);   g3, be3 = bn(1024)
  wf1, bf1 = linear(ks[3], 1024, 512); g4, be4 = bn(512)
  wf2, bf2 = linear(ks[4], 512, 256);  g5, be5 = bn(256)
  wf3, bf3 = linear(ks[5], 256, 9)
  return (w1, b1, g1, be1, w2, b2, g2, be2, w3, b3, g3, be3,
          wf1, bf1, g4, be4, wf2, bf2, g5, be5, wf3, bf3)


def stn3d_ref(x, params):
  """Pure-JAX reference with the module's training-mode forward semantics.

  Uses the same numerics contract as the kernel (bf16 operands for conv2/conv3
  with f32 accumulation; bn3's second moment through the Gram identity
  sum_rows z3_j^2 = (W3^T (h2n^T h2n) W3)_jj, which is exact in real arithmetic)
  so the comparison is tight.  An all-f32 oracle is intentionally not asserted
  against: training-mode BatchNorm over a tiny batch (bn4/bn5) amplifies
  bf16-level perturbations into legitimately different normalized values.
  """
  (w1, b1, g1, be1, w2, b2, g2, be2, w3, b3, g3, be3,
   wf1, bf1, g4, be4, wf2, bf2, g5, be5, wf3, bf3) = params
  B, C, N = x.shape
  R = B * N
  f32, bf16 = jnp.float32, jnp.bfloat16
  dot_hi = functools.partial(jnp.dot, preferred_element_type=f32,
                             precision=lax.Precision.HIGHEST)

  def bn_train(h, g, be):
    m = jnp.mean(h, axis=0, keepdims=True)
    v = jnp.maximum(jnp.mean(h * h, axis=0, keepdims=True) - m * m, 0.0)
    s = g * lax.rsqrt(v + EPS)
    return h * s + (be - m * s)

  xr = jnp.transpose(x, (0, 2, 1)).reshape(R, C)
  h1n = jnp.maximum(bn_train(dot_hi(xr, w1) + b1, g1, be1), 0.0).astype(bf16)
  h2 = jnp.dot(h1n, w2.astype(bf16), preferred_element_type=f32) + b2
  h2n = jnp.maximum(bn_train(h2, g2, be2), 0.0).astype(bf16)
  z3 = jnp.dot(h2n, w3.astype(bf16), preferred_element_type=f32)
  h3 = z3 + b3
  # bn3: mean directly; E[h3^2] via the Gram identity (exact in real arithmetic).
  mean3 = jnp.mean(h3, axis=0, keepdims=True)
  mean_z3 = mean3 - b3
  gram2 = dot_hi(h2n.astype(f32).T, h2n.astype(f32))
  w3f = w3.astype(bf16).astype(f32)
  e_z3sq = jnp.sum(dot_hi(gram2, w3f) * w3f, axis=0, keepdims=True) / R
  var3 = jnp.maximum(e_z3sq + (2.0 * b3) * mean_z3 + b3 * b3 - mean3 * mean3, 0.0)
  scale3 = g3 * lax.rsqrt(var3 + EPS)
  h3n = jnp.maximum(h3 * scale3 + (be3 - mean3 * scale3), 0.0)
  pooled = jnp.max(h3n.reshape(B, N, 1024), axis=1)
  h4 = jnp.maximum(bn_train(dot_hi(pooled, wf1) + bf1, g4, be4), 0.0)
  h5 = jnp.maximum(bn_train(dot_hi(h4, wf2) + bf2, g5, be5), 0.0)
  out = dot_hi(h5, wf3) + bf3
  iden = jnp.array([1, 0, 0, 0, 1, 0, 0, 0, 1], f32)
  return (out + iden[None, :]).reshape(B, 3, 3)


if __name__ == "__main__":
  key = jax.random.PRNGKey(0)
  kx, kp = jax.random.split(key)
  B, N = 4, 512
  x = jax.random.normal(kx, (B, 3, N), jnp.float32)   # (batch, 3 coords, N points)
  params = init_params(kp)

  # Small point tile so the test exercises multi-tile streaming of the bn3 stats
  # and the per-batch running max/min across several grid steps (grid = (4, 4)).
  out = stn3d_forward(x, params, block_points=128)
  out = jax.block_until_ready(out)

  ref = stn3d_ref(x, params)
  assert out.shape == (B, 3, 3)
  err = float(jnp.max(jnp.abs(out - ref)))
  assert jnp.allclose(out, ref, atol=5e-3, rtol=5e-3), err
  print("KERNEL_OK")
</pallas_src>

<mosaic_0001>
module attributes {stable_mosaic.version = 11 : i64} {
  func.func @_stn3d_core_kernel(%arg0: i32, %arg1: i32, %arg2: memref<1x128x64xbf16, #tpu.memory_space<vmem>>, %arg3: memref<1x128xf32, #tpu.memory_space<vmem>>, %arg4: memref<1x128xf32, #tpu.memory_space<vmem>>, %arg5: memref<64x128xbf16, #tpu.memory_space<vmem>>, %arg6: memref<128x1024xbf16, #tpu.memory_space<vmem>>, %arg7: memref<1x1024xf32, #tpu.memory_space<vmem>>, %arg8: memref<1x1024xf32, #tpu.memory_space<vmem>>, %arg9: memref<1x1024xf32, #tpu.memory_space<vmem>>, %arg10: memref<4x1024xf32, #tpu.memory_space<vmem>>, %arg11: memref<1x128xf32, #tpu.memory_space<vmem>>, %arg12: memref<128x128xf32, #tpu.memory_space<vmem>>, %arg13: memref<4x1024xf32, #tpu.memory_space<vmem>>, %arg14: memref<4x1024xf32, #tpu.memory_space<vmem>>) attributes {dimension_semantics = [#tpu.dimension_semantics<arbitrary>, #tpu.dimension_semantics<arbitrary>], iteration_bounds = array<i64: 4, 4>, scalar_prefetch = 0 : i64, scratch_operands = 4 : i64, tpu.core_type = #tpu.core_type<tc>, window_params = [{transform_indices = @transform_0, window_bounds = array<i64: 1, 128, 64>}, {pipeline_mode = #tpu.pipeline_mode<synchronous>, transform_indices = @transform_1, window_bounds = array<i64: 1, 128>}, {pipeline_mode = #tpu.pipeline_mode<synchronous>, transform_indices = @transform_2, window_bounds = array<i64: 1, 128>}, {pipeline_mode = #tpu.pipeline_mode<synchronous>, transform_indices = @transform_3, window_bounds = array<i64: 64, 128>}, {pipeline_mode = #tpu.pipeline_mode<synchronous>, transform_indices = @transform_4, window_bounds = array<i64: 128, 1024>}, {pipeline_mode = #tpu.pipeline_mode<synchronous>, transform_indices = @transform_5, window_bounds = array<i64: 1, 1024>}, {pipeline_mode = #tpu.pipeline_mode<synchronous>, transform_indices = @transform_6, window_bounds = array<i64: 1, 1024>}, {pipeline_mode = #tpu.pipeline_mode<synchronous>, transform_indices = @transform_7, window_bounds = array<i64: 1, 1024>}, {pipeline_mode = #tpu.pipeline_mode<synchronous>, transform_indices = @transform_8, window_bounds = array<i64: 4, 1024>}]} {
    %c3_i32 = arith.constant 3 : i32
    %0 = arith.cmpi eq, %arg0, %c3_i32 : i32
    %c3_i32_0 = arith.constant 3 : i32
    %1 = arith.cmpi eq, %arg1, %c3_i32_0 : i32
    %2 = arith.andi %0, %1 : i1
    %c0_i32 = arith.constant 0 : i32
    %3 = arith.cmpi eq, %arg0, %c0_i32 : i32
    %c0_i32_1 = arith.constant 0 : i32
    %4 = arith.cmpi eq, %arg1, %c0_i32_1 : i32
    %5 = arith.andi %3, %4 : i1
    %6 = arith.extui %5 : i1 to i32
    %c0_i32_2 = arith.constant 0 : i32
    %7 = arith.cmpi ne, %6, %c0_i32_2 : i32
    scf.if %7 {
      %cst_32 = arith.constant 0.000000e+00 : f32
      %49 = vector.broadcast %cst_32 : f32 to vector<1x128xf32>
      %c0_33 = arith.constant 0 : index
      %c0_34 = arith.constant 0 : index
      %50 = vector.load %arg11[%c0_33, %c0_34] : memref<1x128xf32, #tpu.memory_space<vmem>>, vector<1x128xf32>
      tpu.vector_store %arg11[%c0_33, %c0_34], %49 {strides = array<i32>} : memref<1x128xf32, #tpu.memory_space<vmem>>, vector<1x128xf32>,
      %cst_35 = arith.constant 0.000000e+00 : f32
      %51 = vector.broadcast %cst_35 : f32 to vector<128x128xf32>
      %c0_36 = arith.constant 0 : index
      %c0_37 = arith.constant 0 : index
      %52 = vector.load %arg12[%c0_36, %c0_37] : memref<128x128xf32, #tpu.memory_space<vmem>>, vector<128x128xf32>
      tpu.vector_store %arg12[%c0_36, %c0_37], %51 {strides = array<i32>} : memref<128x128xf32, #tpu.memory_space<vmem>>, vector<128x128xf32>,
      %cst_38 = arith.constant 0xFF800000 : f32
      %53 = vector.broadcast %cst_38 : f32 to vector<4x1024xf32>
      %c0_39 = arith.constant 0 : index
      %c0_40 = arith.constant 0 : index
      %54 = vector.load %arg13[%c0_39, %c0_40] : memref<4x1024xf32, #tpu.memory_space<vmem>>, vector<4x1024xf32>
      tpu.vector_store %arg13[%c0_39, %c0_40], %53 {strides = array<i32>} : memref<4x1024xf32, #tpu.memory_space<vmem>>, vector<4x1024xf32>,
      %cst_41 = arith.constant 0x7F800000 : f32
      %55 = vector.broadcast %cst_41 : f32 to vector<4x1024xf32>
      %c0_42 = arith.constant 0 : index
      %c0_43 = arith.constant 0 : index
      %56 = vector.load %arg14[%c0_42, %c0_43] : memref<4x1024xf32, #tpu.memory_space<vmem>>, vector<4x1024xf32>
      tpu.vector_store %arg14[%c0_42, %c0_43], %55 {strides = array<i32>} : memref<4x1024xf32, #tpu.memory_space<vmem>>, vector<4x1024xf32>,
    } else {
    }
    %c0 = arith.constant 0 : index
    %c0_3 = arith.constant 0 : index
    %c0_4 = arith.constant 0 : index
    %8 = vector.load %arg2[%c0, %c0_3, %c0_4] : memref<1x128x64xbf16, #tpu.memory_space<vmem>>, vector<1x128x64xbf16>
    %9 = vector.shape_cast %8 : vector<1x128x64xbf16> to vector<128x64xbf16>
    %c0_5 = arith.constant 0 : index
    %c0_6 = arith.constant 0 : index
    %10 = vector.load %arg5[%c0_5, %c0_6] : memref<64x128xbf16, #tpu.memory_space<vmem>>, vector<64x128xbf16>
    %cst = arith.constant dense<0.000000e+00> : vector<128x128xf32>
    %11 = tpu.matmul %9, %10, %cst {dimension_numbers = #tpu.dot_dimension_numbers<[1], [0], [0], [1], [0, 0, 1, 1], [], []>} : vector<128x64xbf16>, vector<64x128xbf16>, vector<128x128xf32> -> vector<128x128xf32>
    %c0_7 = arith.constant 0 : index
    %c0_8 = arith.constant 0 : index
    %12 = vector.load %arg3[%c0_7, %c0_8] : memref<1x128xf32, #tpu.memory_space<vmem>>, vector<1x128xf32>
    %13 = vector.broadcast %12 : vector<1x128xf32> to vector<128x128xf32>
    %14 = arith.mulf %11, %13 : vector<128x128xf32>
    %c0_9 = arith.constant 0 : index
    %c0_10 = arith.constant 0 : index
    %15 = vector.load %arg4[%c0_9, %c0_10] : memref<1x128xf32, #tpu.memory_space<vmem>>, vector<1x128xf32>
    %16 = vector.broadcast %15 : vector<1x128xf32> to vector<128x128xf32>
    %17 = arith.addf %14, %16 : vector<128x128xf32>
    %cst_11 = arith.constant 0.000000e+00 : f32
    %18 = vector.broadcast %cst_11 : f32 to vector<128x128xf32>
    %19 = arith.maximumf %17, %18 : vector<128x128xf32>
    %20 = arith.truncf %19 : vector<128x128xf32> to vector<128x128xbf16>
    %c0_12 = arith.constant 0 : index
    %c0_13 = arith.constant 0 : index
    %21 = vector.load %arg11[%c0_12, %c0_13] : memref<1x128xf32, #tpu.memory_space<vmem>>, vector<1x128xf32>
    %22 = arith.extf %20 : vector<128x128xbf16> to vector<128x128xf32>
    %cst_14 = arith.constant dense<0.000000e+00> : vector<128xf32>
    %23 = vector.multi_reduction <add>, %22, %cst_14 [0] : vector<128x128xf32> to vector<128xf32>
    %24 = vector.shape_cast %23 : vector<128xf32> to vector<1x128xf32>
    %25 = arith.addf %21, %24 : vector<1x128xf32>
    %c0_15 = arith.constant 0 : index
    %c0_16 = arith.constant 0 : index
    %26 = vector.load %arg11[%c0_15, %c0_16] : memref<1x128xf32, #tpu.memory_space<vmem>>, vector<1x128xf32>
    tpu.vector_store %arg11[%c0_15, %c0_16], %25 {strides = array<i32>} : memref<1x128xf32, #tpu.memory_space<vmem>>, vector<1x128xf32>,
    %c0_17 = arith.constant 0 : index
    %c0_18 = arith.constant 0 : index
    %27 = vector.load %arg12[%c0_17, %c0_18] : memref<128x128xf32, #tpu.memory_space<vmem>>, vector<128x128xf32>
    %cst_19 = arith.constant dense<0.000000e+00> : vector<128x128xf32>
    %28 = tpu.matmul %20, %20, %cst_19 {dimension_numbers = #tpu.dot_dimension_numbers<[0], [0], [1], [1], [0, 1, 1, 1], [], []>} : vector<128x128xbf16>, vector<128x128xbf16>, vector<128x128xf32> -> vector<128x128xf32>
    %29 = arith.addf %27, %28 : vector<128x128xf32>
    %c0_20 = arith.constant 0 : index
    %c0_21 = arith.constant 0 : index
    %30 = vector.load %arg12[%c0_20, %c0_21] : memref<128x128xf32, #tpu.memory_space<vmem>>, vector<128x128xf32>
    tpu.vector_store %arg12[%c0_20, %c0_21], %29 {strides = array<i32>} : memref<128x128xf32, #tpu.memory_space<vmem>>, vector<128x128xf32>,
    %c0_22 = arith.constant 0 : index
    %c0_23 = arith.constant 0 : index
    %31 = vector.load %arg6[%c0_22, %c0_23] : memref<128x1024xbf16, #tpu.memory_space<vmem>>, vector<128x1024xbf16>
    %cst_24 = arith.constant dense<0.000000e+00> : vector<128x1024xf32>
    %32 = tpu.matmul %20, %31, %cst_24 {dimension_numbers = #tpu.dot_dimension_numbers<[1], [0], [0], [1], [0, 0, 1, 1], [], []>} : vector<128x128xbf16>, vector<128x1024xbf16>, vector<128x1024xf32> -> vector<128x1024xf32>
    %33 = arith.index_cast %arg0 : i32 to index
    %c0_25 = arith.constant 0 : index
    %34 = vector.load %arg13[%33, %c0_25] : memref<4x1024xf32, #tpu.memory_space<vmem>>, vector<1x1024xf32>
    %cst_26 = arith.constant dense<0xFF800000> : vector<1024xf32>
    %35 = vector.multi_reduction <maximumf>, %32, %cst_26 [0] : vector<128x1024xf32> to vector<1024xf32>
    %36 = vector.shape_cast %35 : vector<1024xf32> to vector<1x1024xf32>
    %37 = arith.maximumf %34, %36 : vector<1x1024xf32>
    %38 = arith.index_cast %arg0 : i32 to index
    %c0_27 = arith.constant 0 : index
    %39 = vector.load %arg13[%38, %c0_27] : memref<4x1024xf32, #tpu.memory_space<vmem>>, vector<1x1024xf32>
    tpu.vector_store %arg13[%38, %c0_27], %37 {strides = array<i32>} : memref<4x1024xf32, #tpu.memory_space<vmem>>, vector<1x1024xf32>,
    %40 = arith.index_cast %arg0 : i32 to index
    %c0_28 = arith.constant 0 : index
    %41 = vector.load %arg14[%40, %c0_28] : memref<4x1024xf32, #tpu.memory_space<vmem>>, vector<1x1024xf32>
    %cst_29 = arith.constant dense<0x7F800000> : vector<1024xf32>
    %42 = vector.multi_reduction <minimumf>, %32, %cst_29 [0] : vector<128x1024xf32> to vector<1024xf32>
    %43 = vector.shape_cast %42 : vector<1024xf32> to vector<1x1024xf32>
    %44 = arith.minimumf %41, %43 : vector<1x1024xf32>
    %45 = arith.index_cast %arg0 : i32 to index
    %c0_30 = arith.constant 0 : index
    %46 = vector.load %arg14[%45, %c0_30] : memref<4x1024xf32, #tpu.memory_space<vmem>>, vector<1x1024xf32>
    tpu.vector_store %arg14[%45, %c0_30], %44 {strides = array<i32>} : memref<4x1024xf32, #tpu.memory_space<vmem>>, vector<1x1024xf32>,
    %47 = arith.extui %2 : i1 to i32
    %c0_i32_31 = arith.constant 0 : i32
    %48 = arith.cmpi ne, %47, %c0_i32_31 : i32
    scf.if %48 {
      %c0_32 = arith.constant 0 : index
      %c0_33 = arith.constant 0 : index
      %49 = vector.load %arg6[%c0_32, %c0_33] : memref<128x1024xbf16, #tpu.memory_space<vmem>>, vector<128x1024xbf16>
      %50 = arith.extf %49 : vector<128x1024xbf16> to vector<128x1024xf32>
      %c0_34 = arith.constant 0 : index
      %c0_35 = arith.constant 0 : index
      %51 = vector.load %arg7[%c0_34, %c0_35] : memref<1x1024xf32, #tpu.memory_space<vmem>>, vector<1x1024xf32>
      %c0_36 = arith.constant 0 : index
      %c0_37 = arith.constant 0 : index
      %52 = vector.load %arg11[%c0_36, %c0_37] : memref<1x128xf32, #tpu.memory_space<vmem>>, vector<1x128xf32>
      %cst_38 = arith.constant dense<0.000000e+00> : vector<1x1024xf32>
      %53 = tpu.matmul %52, %50, %cst_38 {dimension_numbers = #tpu.dot_dimension_numbers<[1], [0], [0], [1], [0, 0, 1, 1], [], []>, precision = #tpu.contract_precision<fp32>} : vector<1x128xf32>, vector<128x1024xf32>, vector<1x1024xf32> -> vector<1x1024xf32>
      %cst_39 = arith.constant 4.8828125E-4 : f32
      %54 = vector.broadcast %cst_39 : f32 to vector<1x1024xf32>
      %55 = arith.mulf %53, %54 : vector<1x1024xf32>
      %c0_40 = arith.constant 0 : index
      %c0_41 = arith.constant 0 : index
      %56 = vector.load %arg12[%c0_40, %c0_41] : memref<128x128xf32, #tpu.memory_space<vmem>>, vector<128x128xf32>
      %cst_42 = arith.constant dense<0.000000e+00> : vector<128x1024xf32>
      %57 = tpu.matmul %56, %50, %cst_42 {dimension_numbers = #tpu.dot_dimension_numbers<[1], [0], [0], [1], [0, 0, 1, 1], [], []>, precision = #tpu.contract_precision<fp32>} : vector<128x128xf32>, vector<128x1024xf32>, vector<128x1024xf32> -> vector<128x1024xf32>
      %58 = arith.mulf %57, %50 : vector<128x1024xf32>
      %cst_43 = arith.constant dense<0.000000e+00> : vector<1024xf32>
      %59 = vector.multi_reduction <add>, %58, %cst_43 [0] : vector<128x1024xf32> to vector<1024xf32>
      %60 = vector.shape_cast %59 : vector<1024xf32> to vector<1x1024xf32>
      %cst_44 = arith.constant 4.8828125E-4 : f32
      %61 = vector.broadcast %cst_44 : f32 to vector<1x1024xf32>
      %62 = arith.mulf %60, %61 : vector<1x1024xf32>
      %63 = arith.addf %55, %51 : vector<1x1024xf32>
      %cst_45 = arith.constant 2.000000e+00 : f32
      %64 = vector.broadcast %cst_45 : f32 to vector<1x1024xf32>
      %65 = arith.mulf %64, %51 : vector<1x1024xf32>
      %66 = arith.mulf %65, %55 : vector<1x1024xf32>
      %67 = arith.addf %62, %66 : vector<1x1024xf32>
      %68 = arith.mulf %51, %51 : vector<1x1024xf32>
      %69 = arith.addf %67, %68 : vector<1x1024xf32>
      %70 = arith.mulf %63, %63 : vector<1x1024xf32>
      %71 = arith.subf %69, %70 : vector<1x1024xf32>
      %cst_46 = arith.constant 0.000000e+00 : f32
      %72 = vector.broadcast %cst_46 : f32 to vector<1x1024xf32>
      %73 = arith.maximumf %71, %72 : vector<1x1024xf32>
      %c0_47 = arith.constant 0 : index
      %c0_48 = arith.constant 0 : index
      %74 = vector.load %arg8[%c0_47, %c0_48] : memref<1x1024xf32, #tpu.memory_space<vmem>>, vector<1x1024xf32>
      %cst_49 = arith.constant 9.99999974E-6 : f32
      %75 = vector.broadcast %cst_49 : f32 to vector<1x1024xf32>
      %76 = arith.addf %73, %75 : vector<1x1024xf32>
      %77 = math.rsqrt %76 : vector<1x1024xf32>
      %78 = arith.mulf %74, %77 : vector<1x1024xf32>
      %c0_50 = arith.constant 0 : index
      %c0_51 = arith.constant 0 : index
      %79 = vector.load %arg9[%c0_50, %c0_51] : memref<1x1024xf32, #tpu.memory_space<vmem>>, vector<1x1024xf32>
      %80 = arith.subf %51, %63 : vector<1x1024xf32>
      %81 = arith.mulf %80, %78 : vector<1x1024xf32>
      %82 = arith.addf %79, %81 : vector<1x1024xf32>
      %c0_52 = arith.constant 0 : index
      %c0_53 = arith.constant 0 : index
      %83 = vector.load %arg13[%c0_52, %c0_53] : memref<4x1024xf32, #tpu.memory_space<vmem>>, vector<4x1024xf32>
      %84 = vector.broadcast %78 : vector<1x1024xf32> to vector<4x1024xf32>
      %85 = arith.mulf %83, %84 : vector<4x1024xf32>
      %86 = vector.broadcast %82 : vector<1x1024xf32> to vector<4x1024xf32>
      %87 = arith.addf %85, %86 : vector<4x1024xf32>
      %c0_54 = arith.constant 0 : index
      %c0_55 = arith.constant 0 : index
      %88 = vector.load %arg14[%c0_54, %c0_55] : memref<4x1024xf32, #tpu.memory_space<vmem>>, vector<4x1024xf32>
      %89 = vector.broadcast %78 : vector<1x1024xf32> to vector<4x1024xf32>
      %90 = arith.mulf %88, %89 : vector<4x1024xf32>
      %91 = vector.broadcast %82 : vector<1x1024xf32> to vector<4x1024xf32>
      %92 = arith.addf %90, %91 : vector<4x1024xf32>
      %93 = arith.maximumf %87, %92 : vector<4x1024xf32>
      %cst_56 = arith.constant 0.000000e+00 : f32
      %94 = vector.broadcast %cst_56 : f32 to vector<4x1024xf32>
      %95 = arith.maximumf %93, %94 : vector<4x1024xf32>
      %c0_57 = arith.constant 0 : index
      %c0_58 = arith.constant 0 : index
      %96 = vector.load %arg10[%c0_57, %c0_58] : memref<4x1024xf32, #tpu.memory_space<vmem>>, vector<4x1024xf32>
      tpu.vector_store %arg10[%c0_57, %c0_58], %95 {strides = array<i32>} : memref<4x1024xf32, #tpu.memory_space<vmem>>, vector<4x1024xf32>,
    } else {
    }
    return
  }
  func.func @transform_0(%arg0: i32, %arg1: i32) -> (i32, i32, i32) {
    %c0_i32 = arith.constant 0 : i32
    %c0_i32_0 = arith.constant 0 : i32
    return %arg0, %arg1, %c0_i32 : i32, i32, i32
  }
  func.func @transform_1(%arg0: i32, %arg1: i32) -> (i32, i32) {
    %c0_i32 = arith.constant 0 : i32
    %c0_i32_0 = arith.constant 0 : i32
    %c0_i32_1 = arith.constant 0 : i32
    return %c0_i32, %c0_i32_0 : i32, i32
  }
  func.func @transform_2(%arg0: i32, %arg1: i32) -> (i32, i32) {
    %c0_i32 = arith.constant 0 : i32
    %c0_i32_0 = arith.constant 0 : i32
    %c0_i32_1 = arith.constant 0 : i32
    return %c0_i32, %c0_i32_0 : i32, i32
  }
  func.func @transform_3(%arg0: i32, %arg1: i32) -> (i32, i32) {
    %c0_i32 = arith.constant 0 : i32
    %c0_i32_0 = arith.constant 0 : i32
    %c0_i32_1 = arith.constant 0 : i32
    return %c0_i32, %c0_i32_0 : i32, i32
  }
  func.func @transform_4(%arg0: i32, %arg1: i32) -> (i32, i32) {
    %c0_i32 = arith.constant 0 : i32
    %c0_i32_0 = arith.constant 0 : i32
    %c0_i32_1 = arith.constant 0 : i32
    return %c0_i32, %c0_i32_0 : i32, i32
  }
  func.func @transform_5(%arg0: i32, %arg1: i32) -> (i32, i32) {
    %c0_i32 = arith.constant 0 : i32
    %c0_i32_0 = arith.constant 0 : i32
    %c0_i32_1 = arith.constant 0 : i32
    return %c0_i32, %c0_i32_0 : i32, i32
  }
  func.func @transform_6(%arg0: i32, %arg1: i32) -> (i32, i32) {
    %c0_i32 = arith.constant 0 : i32
    %c0_i32_0 = arith.constant 0 : i32
    %c0_i32_1 = arith.constant 0 : i32
    return %c0_i32, %c0_i32_0 : i32, i32
  }
  func.func @transform_7(%arg0: i32, %arg1: i32) -> (i32, i32) {
    %c0_i32 = arith.constant 0 : i32
    %c0_i32_0 = arith.constant 0 : i32
    %c0_i32_1 = arith.constant 0 : i32
    return %c0_i32, %c0_i32_0 : i32, i32
  }
  func.func @transform_8(%arg0: i32, %arg1: i32) -> (i32, i32) {
    %c0_i32 = arith.constant 0 : i32
    %c0_i32_0 = arith.constant 0 : i32
    %c0_i32_1 = arith.constant 0 : i32
    return %c0_i32, %c0_i32_0 : i32, i32
  }
}

</mosaic_0001>

<bundles_post_ra>
// kernel: tpu_custom_call.1
= control target key start
LH: loop header
LB: loop body
LE: loop exit
PB: predicated region body
PF: predicated region fallthrough
CT: control target
= control target key end

     0   :  { %13 = vsyncpa [#allocation7], 0  ;;  %s14471_s27 = smov 0   ;;  %s14473_s28 = smov 0   ;;  %s20036_s0 = inlined_call_operand.vmem [shape: bf16[4,512,64], index: 0, kind: input, shape index: {}]   ;;  %s20037_s1 = inlined_call_operand.vmem [shape: f32[1,128], index: 1, kind: input, shape index: {}]   ;;  %s20038_s2 = inlined_call_operand.vmem [shape: f32[1,128], index: 2, kind: input, shape index: {}]   ;;  %s20039_s3 = inlined_call_operand.vmem [shape: bf16[64,128], index: 3, kind: input, shape index: {}]   ;;  %s20040_s4 = inlined_call_operand.vmem [shape: bf16[128,1024], index: 4, kind: input, shape index: {}]   ;;  %s20041_s5 = inlined_call_operand.vmem [shape: f32[1,1024], index: 5, kind: input, shape index: {}]   ;;  %s20042_s6 = inlined_call_operand.vmem [shape: f32[1,1024], index: 6, kind: input, shape index: {}]   ;;  %s20043_s7 = inlined_call_operand.vmem [shape: f32[1,1024], index: 7, kind: input, shape index: {}]   ;;  %s20044_s8 = inlined_call_operand.hbm [shape: f32[4,1024], index: 8, kind: output, shape index: {}]  }
   0x1   :  { %s14475_s29 = smov 0   ;;  %s14477_s30 = smov 0  }
   0x2   :  { %s14479_s9 = smov 0  }
   0x3 LB: > { %s11466_s10 = sadd.s32 4294967295, %s14417_s9   ;;  %s28_s11 = sadd.s32 1, %s14409_s29  ;;  %s14417_s9 = sphi %s14479_s9, %s19_s9   ;;  %s14413_s30 = sphi %s14477_s30, %s22382_s30   ;;  %s14409_s29 = sphi %s14475_s29, %s22381_s29   ;;  %s14405_s28 = sphi %s14473_s28, %s22380_s28   ;;  %s14401_s27 = sphi %s14471_s27, %s22379_s27  }
   0x4   : > { %p29_p0 = scmp.ge.s32.totalorder %s28_s11, 4  ;;  %s31_s12 = sadd.s32 1, %s14413_s30 }
   0x5   : > { %p11469_p1 = scmp.ge.s32.totalorder %s14417_s9, 1  ;;  %p277_p2 = scmp.lt.s32.totalorder %s14417_s9, 17 }
   0x6   : > { %s22384_s11 = smov (%p29_p0, %s28_s11), 0  ;;  %s22386_s12 = smov (!%p29_p0, %s31_s12), %s14413_s30 }
   0x7   : > { %p278_p3 = pnand %p11469_p1, %p277_p2  ;;  %p33_p4 = scmp.ge.s32.totalorder %s22386_s12, 4 }
   0x9   : > { %s22388_s12 = smov (%p33_p4, %s22386_s12), 0  ;;  %281 = sbr.rel (%p278_p3) target bundleno = 2327 (0x917), region = 52 }
  0x10   : > { %s11470_s13 = sshll.u32 %s14401_s27, 4  ;;  %p311_p5 = scmp.lt.s32.totalorder %s14405_s28, 3 }
  0x11   : > { %p313_p6 = scmp.lt.s32.totalorder %s11470_s13, 63  ;;  %p321_p7 = scmp.eq.s32.totalorder %s14405_s28, 3 }
  0x12   : > { %s312_s14 = scalar_select %p311_p5, %s14405_s28, 3 }
  0x13   : > { %s22390_s13 = smov (!%p313_p6, %s11470_s13), 63  ;;  %p322_p8 = scmp.eq.s32.totalorder %s14401_s27, 3 }
  0x14   : > { %s11471_s15 = sshll.u32 %s312_s14, 6  ;;  %p325_p9 = scmp.eq.s32.totalorder %s14405_s28, 0 }
  0x15   : > { %s316_s16 = sadd.s32 %s11471_s15, %s22390_s13  ;;  %p14512_p10 = pnand %p322_p8, %p321_p7 }
  0x16   : > { %s11472_s17 = sshll.u32 %s316_s16, 2  ;;  %p326_p11 = scmp.eq.s32.totalorder %s14401_s27, 0 }
  0x17   : > { %s14519_s21 = scalar_lea.vmem %s20036_s0, %s11472_s17 }
  0x18   : > { %p327_p12 = pnand %p326_p11, %p325_p9 }
  0x19   : > { %v14419_v0 = vmov (!%p327_p12), 0.0   ;;  %v14420_v1 = vmov (!%p327_p12), -inf   ;;  %v14421_v2 = vmov (!%p327_p12), inf  }
  0x1a   : > { %330 = sbr.rel (%p327_p12) target bundleno = 39 (0x27), region = 56  ;;  %331 = vst [vmem:[#allocation2] sm:$0x1] (!%p327_p12), %v14419_v0  ;;  %332 = vst [vmem:[#allocation3] sm:$0xff] (!%p327_p12), %v14419_v0 }
  0x1b   : > { %333 = vst [vmem:[#allocation3 + $0x8] sm:$0xff] (!%p327_p12), %v14419_v0  ;;  %334 = vst [vmem:[#allocation3 + $0x10] sm:$0xff] (!%p327_p12), %v14419_v0 }
  0x1c   : > { %335 = vst [vmem:[#allocation3 + $0x18] sm:$0xff] (!%p327_p12), %v14419_v0  ;;  %336 = vst [vmem:[#allocation3 + $0x20] sm:$0xff] (!%p327_p12), %v14419_v0 }
  0x1d   : > { %337 = vst [vmem:[#allocation3 + $0x28] sm:$0xff] (!%p327_p12), %v14419_v0  ;;  %338 = vst [vmem:[#allocation3 + $0x30] sm:$0xff] (!%p327_p12), %v14419_v0 }
  0x1e   : > { %339 = vst [vmem:[#allocation3 + $0x38] sm:$0xff] (!%p327_p12), %v14419_v0  ;;  %340 = vst [vmem:[#allocation3 + $0x40] sm:$0xff] (!%p327_p12), %v14419_v0 }
  0x1f   : > { %341 = vst [vmem:[#allocation3 + $0x48] sm:$0xff] (!%p327_p12), %v14419_v0  ;;  %342 = vst [vmem:[#allocation3 + $0x50] sm:$0xff] (!%p327_p12), %v14419_v0 }
  0x20   : > { %343 = vst [vmem:[#allocation3 + $0x58] sm:$0xff] (!%p327_p12), %v14419_v0  ;;  %344 = vst [vmem:[#allocation3 + $0x60] sm:$0xff] (!%p327_p12), %v14419_v0 }
  0x21   : > { %345 = vst [vmem:[#allocation3 + $0x68] sm:$0xff] %v14419_v0  ;;  %346 = vst [vmem:[#allocation3 + $0x70] sm:$0xff] %v14419_v0 }
  0x22   : > { %347 = vst [vmem:[#allocation3 + $0x78] sm:$0xff] %v14419_v0  ;;  %348 = vst [vmem:[#allocation4] sm:$0xff] %v14420_v1 }
  0x23   : > { %349 = vst [vmem:[#allocation4 + $0x8] sm:$0xff] %v14420_v1  ;;  %350 = vst [vmem:[#allocation4 + $0x10] sm:$0xff] %v14420_v1 }
  0x24   : > { %351 = vst [vmem:[#allocation4 + $0x18] sm:$0xff] %v14420_v1  ;;  %352 = vst [vmem:[#allocation5] sm:$0xff] %v14421_v2 }
  0x25   : > { %353 = vst [vmem:[#allocation5 + $0x8] sm:$0xff] %v14421_v2  ;;  %354 = vst [vmem:[#allocation5 + $0x10] sm:$0xff] %v14421_v2 }
  0x26   : > { %355 = vst [vmem:[#allocation5 + $0x18] sm:$0xff] %v14421_v2 }
  0x27 PF: > { %v14319_v3 = vld [vmem:[%s20039_s3] sm:$0xff]   ;;  %v14320_v4 = vld [vmem:[%s20039_s3 + $0x8] sm:$0xff]   ;;  %v14321_v5 = vld [vmem:[%s20039_s3 + $0x10] sm:$0xff]   ;;  %vm444_vm0 = vcmask 523264   ;;  %v14422_v47 = vmov 0   ;;  %s1673_s24 = sshra.s32 %s14405_s28, 2 }
  0x28   : > { %11594 = vmatprep.subr.bf16.mxu0 %v14319_v3  ;;  %v14323_v6 = vld [vmem:[%s14519_s21] sm:$0xff]   ;;  %v14322_v7 = vld [vmem:[%s20039_s3 + $0x18] sm:$0xff]   ;;  %v14324_v13 = vld [vmem:[%s14519_s21 + $0x8] sm:$0xff]   ;;  %s1676_s25 = sand.u32 3, %s14405_s28  ;;  %s11565_s26 = sshll.u32 %s1673_s24, 5 }
  0x29   : > { %11595 = vmatpush3.bf16.msra.mxu0 %v14319_v3  ;;  %11602 = vmatprep.mubr.msk.bf16.mxu0 %vm444_vm0, %v14323_v6  ;;  %v837_v8 = vld [vmem:[%s20040_s4] sm:$0xff]  ;;  %v14325_v14 = vld [vmem:[%s14519_s21 + $0x10] sm:$0xff]   ;;  %v14326_v23 = vld [vmem:[%s14519_s21 + $0x18] sm:$0xff]   ;;  %s1679_s27 = sadd.s32 %s11565_s26, %s1676_s25 }
  0x2a   : > { %11596 = vmatprep.subr.bf16.mxu0 %v14320_v4  ;;  %v841_v9 = vld [vmem:[%s20040_s4 + $0x20] sm:$0xff]  ;;  %v14328_v31 = vld [vmem:[%s14519_s21 + $0x28] sm:$0xff]   ;;  %v14329_v32 = vld [vmem:[%s14519_s21 + $0x30] sm:$0xff]   ;;  %s1680_s28 = scalar_lea.vmem [#allocation4], %s1679_s27  ;;  %s1910_s13 = scalar_lea.vmem [#allocation5], %s1679_s27 }
  0x2b   : > { %v11496_v10 = vcombine.high %v837_v8, %v841_v9  ;;  %v845_v11 = vld [vmem:[%s20040_s4 + $0x40] sm:$0xff]  ;;  %v11495_v15 = vcombine.low %v837_v8, %v841_v9  ;;  %v14330_v34 = vld [vmem:[%s14519_s21 + $0x38] sm:$0xff]   ;;  %v839_v48 = vld [vmem:[%s20040_s4 + $0x10] sm:$0xff] }
  0x2c   : > { %v849_v12 = vld [vmem:[%s20040_s4 + $0x60] sm:$0xff]  ;;  %v843_v49 = vld [vmem:[%s20040_s4 + $0x30] sm:$0xff]  ;;  %v14608_v52 = vld [vmem:[%s20040_s4 + $0x8] sm:$0xff] }
  0x2d   : > { %11597 = vmatpush3.bf16.msra.mxu0 %v14320_v4  ;;  %v11504_v16 = vcombine.high %v845_v11, %v849_v12  ;;  %v853_v17 = vld [vmem:[%s20040_s4 + $0x80] sm:$0xff]  ;;  %v11503_v19 = vcombine.low %v845_v11, %v849_v12  ;;  %v11500_v50 = vcombine.high %v839_v48, %v843_v49  ;;  %v11499_v51 = vcombine.low %v839_v48, %v843_v49  ;;  %v14613_v53 = vld [vmem:[%s20040_s4 + $0x28] sm:$0xff]  ;;  %v851_v11 = vld [vmem:[%s20040_s4 + $0x70] sm:$0xff] }
  0x2e   : > { %11598 = vmatprep.subr.bf16.mxu0 %v14321_v5  ;;  %v857_v18 = vld [vmem:[%s20040_s4 + $0xa0] sm:$0xff]  ;;  %v11497_v54 = vcombine.low %v14608_v52, %v14613_v53  ;;  %v14685_v48 = vld [vmem:[%s20040_s4 + $0xf0] sm:$0xff] }
  0x2f   : > { %v11512_v20 = vcombine.high %v853_v17, %v857_v18  ;;  %v861_v21 = vld [vmem:[%s20040_s4 + $0xc0] sm:$0xff]  ;;  %v11511_v25 = vcombine.low %v853_v17, %v857_v18 }
  0x30   : > { %v865_v22 = vld [vmem:[%s20040_s4 + $0xe0] sm:$0xff] }
  0x31   : > { %11599 = vmatpush3.bf16.msra.mxu0 %v14321_v5  ;;  %v14327_v24 = vld [vmem:[%s14519_s21 + $0x20] sm:$0xff]   ;;  %v11520_v26 = vcombine.high %v861_v21, %v865_v22  ;;  %v11519_v29 = vcombine.low %v861_v21, %v865_v22 }
  0x32   : > { %11600 = vmatprep.subr.bf16.mxu0 %v14322_v7  ;;  %v869_v27 = vld [vmem:[%s20040_s4 + $0x100] sm:$0xff] }
  0x33   : > { %v873_v28 = vld [vmem:[%s20040_s4 + $0x120] sm:$0xff] }
  0x34   : > { %v11528_v30 = vcombine.high %v869_v27, %v873_v28  ;;  %v11527_v33 = vcombine.low %v869_v27, %v873_v28  ;;  %v877_v35 = vld [vmem:[%s20040_s4 + $0x140] sm:$0xff] }
  0x35   : > { %11601 = vmatpush3.bf16.msra.mxu0 %v14322_v7  ;;  %v881_v36 = vld [vmem:[%s20040_s4 + $0x160] sm:$0xff] }
  0x36   : > { %1221 = vmatprep.subr.bf16.mxu0 %v11496_v10  ;;  %v11536_v37 = vcombine.high %v877_v35, %v881_v36  ;;  %v11535_v38 = vcombine.low %v877_v35, %v881_v36  ;;  %v885_v39 = vld [vmem:[%s20040_s4 + $0x180] sm:$0xff]  ;;  %v847_v10 = vld [vmem:[%s20040_s4 + $0x50] sm:$0xff] }
  0x37   : > { %v889_v40 = vld [vmem:[%s20040_s4 + $0x1a0] sm:$0xff]  ;;  %v11508_v21 = vcombine.high %v847_v10, %v851_v11 }
  0x38   : > { %11603 = vmatmul.mubr.msk.bf16.vlgmr.msra.gmra.mrb[0].mxu0 %vm444_vm0, %v14324_v13  ;;  %v11544_v41 = vcombine.high %v885_v39, %v889_v40  ;;  %v11543_v42 = vcombine.low %v885_v39, %v889_v40  ;;  %v893_v43 = vld [vmem:[%s20040_s4 + $0x1c0] sm:$0xff] }
  0x39   : > { %11606 = vmatprep.mubr.msk.bf16.mxu0 %vm444_vm0, %v14325_v14  ;;  %1222 = vmatpush1.bf16.msra.mxu0 %v11495_v15  ;;  %v897_v44 = vld [vmem:[%s20040_s4 + $0x1e0] sm:$0xff] }
  0x3a   : > { %1223 = vmatprep.subr.bf16.mxu0 %v11504_v16  ;;  %v11552_v45 = vcombine.high %v893_v43, %v897_v44  ;;  %v11551_v46 = vcombine.low %v893_v43, %v897_v44  ;;  %v14620_v55 = vld [vmem:[%s20037_s1] ss:$0 sm:$0xff] }
  0x3b   : > { %v14625_v57 = vld [vmem:[%s20038_s2] ss:$0 sm:$0xff] }
  0x3d   : > { %1224 = vmatpush1.bf16.msra.mxu0 %v11503_v19 }
  0x3e   : > { %1225 = vmatprep.subr.bf16.mxu0 %v11512_v20 }
  0x40   : > { %11607 = vmatmul.mubr.msk.bf16.gmra.mrb[4].mxu0 %vm444_vm0, %v14326_v23 }
  0x41   : > { %11610 = vmatprep.mubr.msk.bf16.mxu0 %vm444_vm0, %v14327_v24  ;;  %1226 = vmatpush1.bf16.msra.mxu0 %v11511_v25 }
  0x42   : > { %1227 = vmatprep.subr.bf16.mxu0 %v11520_v26 }
  0x45   : > { %1228 = vmatpush1.bf16.msra.mxu0 %v11519_v29 }
  0x46   : > { %1229 = vmatprep.subr.bf16.mxu0 %v11528_v30 }
  0x48   : > { %11611 = vmatmul.mubr.msk.bf16.gmra.mrb[8].mxu0 %vm444_vm0, %v14328_v31 }
  0x49   : > { %11614 = vmatprep.mubr.msk.bf16.mxu0 %vm444_vm0, %v14329_v32  ;;  %1230 = vmatpush1.bf16.msra.mxu0 %v11527_v33  ;;  %v11507_v32 = vcombine.low %v847_v10, %v851_v11 }
  0x4a   : > { %1231 = vmatprep.subr.bf16.mxu0 %v11536_v37  ;;  %v855_v37 = vld [vmem:[%s20040_s4 + $0x90] sm:$0xff] }
  0x4d   : > { %1232 = vmatpush1.bf16.msra.mxu0 %v11535_v38  ;;  %v859_v38 = vld [vmem:[%s20040_s4 + $0xb0] sm:$0xff] }
  0x4e   : > { %1233 = vmatprep.subr.bf16.mxu0 %v11544_v41 }
  0x50   : > { %11615 = vmatmul.mubr.msk.bf16.gmra.mrb[12].mxu0 %vm444_vm0, %v14330_v34 }
  0x51   : > { %1234 = vmatpush1.bf16.msra.mxu0 %v11543_v42  ;;  %1253 = vmatprep.mubr.bf16.mxu0 %v14422_v47 }
  0x52   : > { %1235 = vmatprep.subr.bf16.mxu0 %v11552_v45 }
  0x55   : > { %1236 = vmatpush1.bf16.msra.mxu0 %v11551_v46  ;;  %v14680_v46 = vld [vmem:[%s20040_s4 + $0xd0] sm:$0xff] }
  0x56   : > { %1447 = vmatprep.subr.bf16.mxu0 %v11500_v50 }
 0x10b   : > { %v11604_v56 = vpop.f32.mrb[0].mxu0 }
 0x10c   : > { %v575_v58 = vmul.f32 %v11604_v56, %v14620_v55  ;;  %v503_v59 = vpop.f32.mrb[1].mxu0  ;;  %v11515_v56 = vcombine.low %v855_v37, %v859_v38 }
 0x10d   : > { %v573_v60 = vmul.f32 %v14620_v55, %v503_v59  ;;  %v11605_v61 = vpop.f32.mrb[2].mxu0 }
 0x10e   : > { %v598_v62 = vadd.f32 %v14625_v57, %v575_v58  ;;  %v576_v63 = vmul.f32 %v11605_v61, %v14620_v55  ;;  %v506_v0 = vpop.f32.mrb[3].mxu0  ;;  %v11516_v58 = vcombine.high %v855_v37, %v859_v38 }
 0x10f   : > { %v596_v1 = vadd.f32 %v14625_v57, %v573_v60  ;;  %v574_v2 = vmul.f32 %v14620_v55, %v506_v0  ;;  %v11524_v0 = vcombine.high %v14680_v46, %v14685_v48 }
 0x110   : > { %v599_v3 = vadd.f32 %v14625_v57, %v576_v63  ;;  %v614_v5 = vmax.f32 %v598_v62, 0.0 }
 0x111   : > { %v597_v4 = vadd.f32 %v14625_v57, %v574_v2  ;;  %v612_v7 = vmax.f32 %v596_v1, 0.0 }
 0x112   : > { %v615_v6 = vmax.f32 %v599_v3, 0.0 }
 0x113   : > { %v613_v8 = vmax.f32 %v597_v4, 0.0  ;;  %v11608_v9 = vpop.f32.mrb[4].mxu0 }
 0x114   : > { %v14641_v12 = vpack.c.bf16 %v615_v6, %v614_v5  ;;  %v579_v13 = vmul.f32 %v11608_v9, %v14620_v55  ;;  %v519_v14 = vpop.f32.mrb[5].mxu0 }
 0x115   : > { %v14644_v15 = vpack.c.bf16 %v613_v8, %v612_v7  ;;  %v577_v16 = vmul.f32 %v14620_v55, %v519_v14  ;;  %v11609_v17 = vpop.f32.mrb[6].mxu0 }
 0x116   : > { %v602_v18 = vadd.f32 %v14625_v57, %v579_v13  ;;  %v580_v19 = vmul.f32 %v11609_v17, %v14620_v55  ;;  %v522_v20 = vpop.f32.mrb[7].mxu0  ;;  %v639_v27 = vunpack.c.l.bf16 %v14641_v12  ;;  %v640_v42 = vunpack.c.h.bf16 %v14641_v12  ;;  %v875_v17 = vld [vmem:[%s20040_s4 + $0x130] sm:$0xff] }
 0x117   : > { %v637_v22 = vunpack.c.l.bf16 %v14644_v15  ;;  %v638_v23 = vunpack.c.h.bf16 %v14644_v15  ;;  %v600_v24 = vadd.f32 %v14625_v57, %v577_v16  ;;  %v578_v25 = vmul.f32 %v14620_v55, %v522_v20  ;;  %692 = vxpose.xlu0.c.b16.start [1/8] %v14644_v15, 128  ;;  %11618 = vmatprep.subr.bf16.mxu1 %v14644_v15  ;;  %v871_v16 = vld [vmem:[%s20040_s4 + $0x110] sm:$0xff] }
 0x118   : > { %v603_v26 = vadd.f32 %v14625_v57, %v580_v19  ;;  %1254 = vmatmul.mubr.bf16.vlgmr.msra.gmra.mrb[16].mxu0 %v14644_v15  ;;  %11619 = vmatpush3.bf16.msra.mxu1 %v14644_v15  ;;  %v618_v30 = vmax.f32 %v602_v18, 0.0 }
 0x119   : > { %v653_v28 = vadd.f32 %v638_v23, %v637_v22  ;;  %v601_v29 = vadd.f32 %v14625_v57, %v578_v25  ;;  %11620 = vmatprep.subr.bf16.mxu1 %v14641_v12  ;;  %1263 = vmatprep.mubr.bf16.mxu0 %v14422_v47  ;;  %v616_v34 = vmax.f32 %v600_v24, 0.0 }
 0x11a   : > { %v619_v31 = vmax.f32 %v603_v26, 0.0  ;;  %1448 = vmatpush1.bf16.msra.mxu0 %v11499_v51  ;;  %v11523_v26 = vcombine.low %v14680_v46, %v14685_v48 }
 0x11b   : > { %v654_v33 = vadd.f32 %v653_v28, %v639_v27  ;;  %v617_v35 = vmax.f32 %v601_v29, 0.0  ;;  %v11612_v36 = vpop.f32.mrb[8].mxu0  ;;  %693 = vxpose.xlu0.c.b16.cont [2/8] %v14641_v12, 128  ;;  %1449 = vmatprep.subr.bf16.mxu0 %v11508_v21  ;;  %v11532_v29 = vcombine.high %v871_v16, %v875_v17 }
 0x11c   : > { %v14669_v39 = vpack.c.bf16 %v619_v31, %v618_v30  ;;  %v583_v40 = vmul.f32 %v11612_v36, %v14620_v55  ;;  %v535_v41 = vpop.f32.mrb[9].mxu0  ;;  %11621 = vmatpush3.bf16.msra.mxu1 %v14641_v12 }
 0x11d   : > { %v14674_v43 = vpack.c.bf16 %v617_v35, %v616_v34  ;;  %v581_v44 = vmul.f32 %v14620_v55, %v535_v41  ;;  %v11613_v45 = vpop.f32.mrb[10].mxu0  ;;  %v655_v60 = vadd.f32 %v654_v33, %v640_v42  ;;  %v879_v33 = vld [vmem:[%s20040_s4 + $0x150] sm:$0xff] }
 0x11e   : > { %v606_v49 = vadd.f32 %v14625_v57, %v583_v40  ;;  %v584_v50 = vmul.f32 %v11613_v45, %v14620_v55  ;;  %v538_v51 = vpop.f32.mrb[11].mxu0  ;;  %1450 = vmatpush1.bf16.msra.mxu0 %v11507_v32  ;;  %v643_v6 = vunpack.c.l.bf16 %v14669_v39  ;;  %v644_v18 = vunpack.c.h.bf16 %v14669_v39  ;;  %v883_v34 = vld [vmem:[%s20040_s4 + $0x170] sm:$0xff] }
 0x11f   : > { %v641_v59 = vunpack.c.l.bf16 %v14674_v43  ;;  %v604_v61 = vadd.f32 %v14625_v57, %v581_v44  ;;  %v582_v62 = vmul.f32 %v14620_v55, %v538_v51  ;;  %694 = vxpose.xlu0.c.b16.cont [3/8] %v14674_v43, 128  ;;  %11622 = vmatprep.subr.bf16.mxu1 %v14674_v43  ;;  %v642_v1 = vunpack.c.h.bf16 %v14674_v43  ;;  %v891_v51 = vld [vmem:[%s20040_s4 + $0x1b0] sm:$0xff] }
 0x120   : > { %v607_v63 = vadd.f32 %v14625_v57, %v584_v50  ;;  %1264 = vmatmul.mubr.bf16.gmra.mrb[20].mxu0 %v14641_v12  ;;  %11623 = vmatpush3.bf16.msra.mxu1 %v14674_v43  ;;  %v622_v4 = vmax.f32 %v606_v49, 0.0  ;;  %v11531_v40 = vcombine.low %v871_v16, %v875_v17  ;;  %v11540_v44 = vcombine.high %v879_v33, %v883_v34 }
 0x121   : > { %v656_v2 = vadd.f32 %v655_v60, %v641_v59  ;;  %v605_v3 = vadd.f32 %v14625_v57, %v582_v62  ;;  %11624 = vmatprep.subr.bf16.mxu1 %v14669_v39  ;;  %1273 = vmatprep.mubr.bf16.mxu0 %v14422_v47  ;;  %v620_v8 = vmax.f32 %v604_v61, 0.0  ;;  %v11539_v59 = vcombine.low %v879_v33, %v883_v34  ;;  %v895_v62 = vld [vmem:[%s20040_s4 + $0x1d0] sm:$0xff]  ;;  %v864_v34 = vld [vmem:[%s20040_s4 + $0xd8] sm:$0xff] }
 0x122   : > { %v623_v5 = vmax.f32 %v607_v63, 0.0  ;;  %1451 = vmatprep.subr.bf16.mxu0 %v11516_v58  ;;  %v899_v63 = vld [vmem:[%s20040_s4 + $0x1f0] sm:$0xff] }
 0x123   : > { %v657_v7 = vadd.f32 %v656_v2, %v642_v1  ;;  %v621_v9 = vmax.f32 %v605_v3, 0.0  ;;  %v11616_v10 = vpop.f32.mrb[12].mxu0  ;;  %695 = vxpose.xlu0.c.b16.cont [4/8] %v14669_v39, 128  ;;  %1452 = vmatpush1.bf16.msra.mxu0 %v11515_v56  ;;  %v11498_v2 = vcombine.high %v14608_v52, %v14613_v53 }
 0x124   : > { %v14705_v11 = vpack.c.bf16 %v623_v5, %v622_v4  ;;  %v587_v13 = vmul.f32 %v11616_v10, %v14620_v55  ;;  %v551_v14 = vpop.f32.mrb[13].mxu0  ;;  %11625 = vmatpush3.bf16.msra.mxu1 %v14669_v39  ;;  %1453 = vmatprep.subr.bf16.mxu0 %v11524_v0 }
 0x125   : > { %v658_v19 = vadd.f32 %v657_v7, %v643_v6  ;;  %v14716_v20 = vpack.c.bf16 %v621_v9, %v620_v8  ;;  %v585_v21 = vmul.f32 %v14620_v55, %v551_v14  ;;  %v11617_v22 = vpop.f32.mrb[14].mxu0  ;;  %v11556_v6 = vcombine.high %v895_v62, %v899_v63  ;;  %v840_v7 = vld [vmem:[%s20040_s4 + $0x18] sm:$0xff] }
 0x126   : > { %v610_v23 = vadd.f32 %v14625_v57, %v587_v13  ;;  %v588_v24 = vmul.f32 %v11617_v22, %v14620_v55  ;;  %v554_v25 = vpop.f32.mrb[15].mxu0  ;;  %v647_v41 = vunpack.c.l.bf16 %v14705_v11  ;;  %v648_v49 = vunpack.c.h.bf16 %v14705_v11  ;;  %v844_v8 = vld [vmem:[%s20040_s4 + $0x38] sm:$0xff] }
 0x127   : > { %v645_v27 = vunpack.c.l.bf16 %v14716_v20  ;;  %v659_v28 = vadd.f32 %v658_v19, %v644_v18  ;;  %696 = vxpose.xlu0.c.b16.cont [5/8] %v14716_v20, 128  ;;  %11626 = vmatprep.subr.bf16.mxu1 %v14716_v20  ;;  %v608_v30 = vadd.f32 %v14625_v57, %v585_v21  ;;  %v586_v32 = vmul.f32 %v14620_v55, %v554_v25 }
 0x128   : > { %v611_v31 = vadd.f32 %v14625_v57, %v588_v24  ;;  %1274 = vmatmul.mubr.bf16.gmra.mrb[24].mxu0 %v14674_v43  ;;  %11627 = vmatpush3.bf16.msra.mxu1 %v14716_v20  ;;  %v646_v35 = vunpack.c.h.bf16 %v14716_v20  ;;  %v626_v55 = vmax.f32 %v610_v23, 0.0  ;;  %v11555_v13 = vcombine.low %v895_v62, %v899_v63  ;;  %v636_v23 = vld [vmem:[#allocation2] sm:$0x1] }
 0x129   : > { %v660_v36 = vadd.f32 %v659_v28, %v645_v27  ;;  %11628 = vmatprep.subr.bf16.mxu1 %v14705_v11  ;;  %1283 = vmatprep.mubr.bf16.mxu0 %v14422_v47  ;;  %v609_v38 = vadd.f32 %v14625_v57, %v586_v32  ;;  %v624_v45 = vmax.f32 %v608_v30, 0.0  ;;  %v887_v57 = vld [vmem:[%s20040_s4 + $0x190] sm:$0xff]  ;;  %v14781_v16 = vcombine.high %v840_v7, %v844_v8  ;;  %v852_v27 = vld [vmem:[%s20040_s4 + $0x78] sm:$0xff] }
 0x12a   : > { %v627_v37 = vmax.f32 %v611_v31, 0.0  ;;  %1454 = vmatpush1.bf16.msra.mxu0 %v11523_v26  ;;  %v11548_v61 = vcombine.high %v887_v57, %v891_v51  ;;  %v11547_v3 = vcombine.low %v887_v57, %v891_v51  ;;  %v848_v26 = vld [vmem:[%s20040_s4 + $0x58] sm:$0xff]  ;;  %v14798_v28 = vcombine.low %v840_v7, %v844_v8 }
 0x12b   : > { %v661_v42 = vadd.f32 %v660_v36, %v646_v35  ;;  %697 = vxpose.xlu0.c.b16.cont [6/8] %v14705_v11, 128  ;;  %1455 = vmatprep.subr.bf16.mxu0 %v11532_v29  ;;  %v625_v48 = vmax.f32 %v609_v38, 0.0  ;;  %v14800_v29 = vcombine.high %v848_v26, %v852_v27  ;;  %v856_v30 = vld [vmem:[%s20040_s4 + $0x98] sm:$0xff]  ;;  %v14811_v32 = vcombine.low %v848_v26, %v852_v27  ;;  %v886_v26 = vld [vmem:[%s20040_s4 + $0x188] sm:$0xff] }
 0x12c   : > { %v14743_v46 = vpack.c.bf16 %v627_v37, %v626_v55  ;;  %11629 = vmatpush3.bf16.msra.mxu1 %v14705_v11  ;;  %v860_v31 = vld [vmem:[%s20040_s4 + $0xb8] sm:$0xff]  ;;  %v890_v27 = vld [vmem:[%s20040_s4 + $0x1a8] sm:$0xff] }
 0x12d   : > { %v662_v50 = vadd.f32 %v661_v42, %v647_v41  ;;  %v14753_v56 = vpack.c.bf16 %v625_v48, %v624_v45  ;;  %v14814_v33 = vcombine.high %v856_v30, %v860_v31  ;;  %v868_v35 = vld [vmem:[%s20040_s4 + $0xf8] sm:$0xff]  ;;  %v14823_v36 = vcombine.low %v856_v30, %v860_v31 }
 0x12e   : > { %1456 = vmatpush1.bf16.msra.mxu0 %v11531_v40  ;;  %v651_v4 = vunpack.c.l.bf16 %v14743_v46  ;;  %v652_v9 = vunpack.c.h.bf16 %v14743_v46  ;;  %v14826_v55 = vcombine.high %v864_v34, %v868_v35  ;;  %v872_v37 = vld [vmem:[%s20040_s4 + $0x118] sm:$0xff]  ;;  %v14837_v40 = vcombine.low %v864_v34, %v868_v35  ;;  %v894_v35 = vld [vmem:[%s20040_s4 + $0x1c8] sm:$0xff] }
 0x12f   : > { %v663_v58 = vadd.f32 %v662_v50, %v648_v49  ;;  %1457 = vmatprep.subr.bf16.mxu0 %v11540_v44  ;;  %v649_v60 = vunpack.c.l.bf16 %v14753_v56  ;;  %698 = vxpose.xlu0.c.b16.cont [7/8] %v14753_v56, 128  ;;  %v650_v0 = vunpack.c.h.bf16 %v14753_v56  ;;  %v876_v38 = vld [vmem:[%s20040_s4 + $0x138] sm:$0xff]  ;;  %v11546_v31 = vcombine.high %v886_v26, %v890_v27 }
 0x130   : > { %11630 = vmatprep.subr.bf16.mxu1 %v14753_v56  ;;  %1284 = vmatmul.mubr.bf16.gmra.mrb[28].mxu0 %v14669_v39  ;;  %v14840_v41 = vcombine.high %v872_v37, %v876_v38  ;;  %v880_v42 = vld [vmem:[%s20040_s4 + $0x158] sm:$0xff]  ;;  %v14849_v45 = vcombine.low %v872_v37, %v876_v38  ;;  %v898_v37 = vld [vmem:[%s20040_s4 + $0x1e8] sm:$0xff]  ;;  %v11545_v38 = vcombine.low %v886_v26, %v890_v27 }
 0x131   : > { %11631 = vmatpush3.bf16.msra.mxu1 %v14753_v56  ;;  %v664_v1 = vadd.f32 %v663_v58, %v649_v60  ;;  %1293 = vmatprep.mubr.bf16.mxu0 %v14422_v47  ;;  %v884_v44 = vld [vmem:[%s20040_s4 + $0x178] sm:$0xff] }
 0x132   : > { %11632 = vmatprep.subr.bf16.mxu1 %v14743_v46  ;;  %1458 = vmatpush1.bf16.msra.mxu0 %v11539_v59  ;;  %v14852_v48 = vcombine.high %v880_v42, %v884_v44  ;;  %v888_v49 = vld [vmem:[%s20040_s4 + $0x198] sm:$0xff]  ;;  %v14863_v57 = vcombine.low %v880_v42, %v884_v44  ;;  %v11554_v42 = vcombine.high %v894_v35, %v898_v37 }
 0x133   : > { %v665_v5 = vadd.f32 %v664_v1, %v650_v0  ;;  %699 = vxpose.xlu0.c.b16.end [8/8] %v14743_v46, 128  ;;  %1459 = vmatprep.subr.bf16.mxu0 %v11548_v61  ;;  %v892_v50 = vld [vmem:[%s20040_s4 + $0x1b8] sm:$0xff]  ;;  %v846_v0 = vld [vmem:[%s20040_s4 + $0x48] sm:$0xff] }
 0x134   : > { %v14866_v51 = vcombine.high %v888_v49, %v892_v50  ;;  %v896_v58 = vld [vmem:[%s20040_s4 + $0x1d8] sm:$0xff]  ;;  %v14875_v60 = vcombine.low %v888_v49, %v892_v50  ;;  %v850_v1 = vld [vmem:[%s20040_s4 + $0x68] sm:$0xff]  ;;  %v11553_v49 = vcombine.low %v894_v35, %v898_v37 }
 0x135   : > { %11633 = vmatpush3.bf16.msra.mxu1 %v14743_v46  ;;  %v666_v10 = vadd.f32 %v665_v5, %v651_v4  ;;  %v900_v59 = vld [vmem:[%s20040_s4 + $0x1f8] sm:$0xff]  ;;  %v854_v4 = vld [vmem:[%s20040_s4 + $0x88] sm:$0xff] }
 0x136   : > { %1334 = vmatprep.subr.bf16.mxu1 %v11498_v2  ;;  %1460 = vmatpush1.bf16.msra.mxu0 %v11547_v3  ;;  %v14878_v61 = vcombine.high %v896_v58, %v900_v59  ;;  %v14883_v62 = vcombine.low %v896_v58, %v900_v59  ;;  %v11506_v2 = vcombine.high %v846_v0, %v850_v1  ;;  %v858_v5 = vld [vmem:[%s20040_s4 + $0xa8] sm:$0xff] }
 0x137   : > { %v667_v14 = vadd.f32 %v666_v10, %v652_v9  ;;  %1461 = vmatprep.subr.bf16.mxu0 %v11556_v6  ;;  %v11505_v6 = vcombine.low %v846_v0, %v850_v1  ;;  %v11514_v7 = vcombine.high %v854_v4, %v858_v5  ;;  %v862_v9 = vld [vmem:[%s20040_s4 + $0xc8] sm:$0xff] }
 0x138   : > { %1294 = vmatmul.mubr.bf16.gmra.mrb[32].mxu0 %v14716_v20  ;;  %v866_v10 = vld [vmem:[%s20040_s4 + $0xe8] sm:$0xff] }
 0x139   : > { %v668_v17 = vrot.slane %v667_v14, 4  ;;  %1303 = vmatprep.mubr.bf16.mxu0 %v14422_v47  ;;  %v11522_v52 = vcombine.high %v862_v9, %v866_v10 }
 0x13a   : > { %1462 = vmatpush1.bf16.msra.mxu0 %v11555_v13  ;;  %v11513_v13 = vcombine.low %v854_v4, %v858_v5 }
 0x13b   : > { %v669_v18 = vadd.f32 %v668_v17, %v667_v14  ;;  %1560 = vmatprep.subr.bf16.mxu0 %v14781_v16  ;;  %v874_v14 = vld [vmem:[%s20040_s4 + $0x128] sm:$0xff]  ;;  %v11521_v17 = vcombine.low %v862_v9, %v866_v10 }
 0x13d   : > { %v670_v19 = vrot.slane %v669_v18, 2 }
 0x13f   : > { %v671_v21 = vadd.f32 %v670_v19, %v669_v18 }
 0x140   : > { %1304 = vmatmul.mubr.bf16.gmra.mrb[36].mxu0 %v14705_v11 }
 0x141   : > { %v672_v22 = vrot.slane %v671_v21, 1  ;;  %1313 = vmatprep.mubr.bf16.mxu0 %v14422_v47 }
 0x143   : > { %v673_v24 = vadd.f32 %v672_v22, %v671_v21  ;;  %v878_v21 = vld [vmem:[%s20040_s4 + $0x148] sm:$0xff] }
 0x144   : > { %v882_v22 = vld [vmem:[%s20040_s4 + $0x168] sm:$0xff] }
 0x145   : > { %v674_v25 = vadd.f32 %v673_v24, %v636_v23  ;;  %v11538_v24 = vcombine.high %v878_v21, %v882_v22  ;;  %v11537_v30 = vcombine.low %v878_v21, %v882_v22 }
 0x147   : > { %675 = vst [vmem:[#allocation2] sm:$0x1] %v674_v25 }
 0x148   : > { %1314 = vmatmul.mubr.bf16.gmra.mrb[40].mxu0 %v14753_v56 }
 0x149   : > { %1323 = vmatprep.mubr.bf16.mxu0 %v14422_v47 }
 0x150   : > { %1324 = vmatmul.mubr.bf16.gmra.mrb[44].mxu0 %v14743_v46 }
 0x151   : > { %1479 = vmatprep.mubr.bf16.mxu0 %v14422_v47 }
 0x158   : > { %1480 = vmatmul.mubr.bf16.vlgmr.msra.gmra.mrb[48].mxu0 %v14644_v15 }
 0x159   : > { %1489 = vmatprep.mubr.bf16.mxu0 %v14422_v47  ;;  %1561 = vmatpush1.bf16.msra.mxu0 %v14798_v28 }
 0x15a   : > { %1562 = vmatprep.subr.bf16.mxu0 %v14800_v29 }
 0x15d   : > { %1563 = vmatpush1.bf16.msra.mxu0 %v14811_v32 }
 0x15e   : > { %1564 = vmatprep.subr.bf16.mxu0 %v14814_v33 }
 0x160   : > { %1490 = vmatmul.mubr.bf16.gmra.mrb[52].mxu0 %v14641_v12 }
 0x161   : > { %1499 = vmatprep.mubr.bf16.mxu0 %v14422_v47  ;;  %1565 = vmatpush1.bf16.msra.mxu0 %v14823_v36 }
 0x162   : > { %1566 = vmatprep.subr.bf16.mxu0 %v14826_v55 }
 0x165   : > { %1567 = vmatpush1.bf16.msra.mxu0 %v14837_v40 }
 0x166   : > { %1568 = vmatprep.subr.bf16.mxu0 %v14840_v41 }
 0x168   : > { %1500 = vmatmul.mubr.bf16.gmra.mrb[56].mxu0 %v14674_v43 }
 0x169   : > { %1509 = vmatprep.mubr.bf16.mxu0 %v14422_v47  ;;  %1569 = vmatpush1.bf16.msra.mxu0 %v14849_v45 }
 0x16a   : > { %1570 = vmatprep.subr.bf16.mxu0 %v14852_v48 }
 0x16d   : > { %1571 = vmatpush1.bf16.msra.mxu0 %v14863_v57 }
 0x16e   : > { %1572 = vmatprep.subr.bf16.mxu0 %v14866_v51 }
 0x170   : > { %1510 = vmatmul.mubr.bf16.gmra.mrb[60].mxu0 %v14669_v39 }
 0x171   : > { %1519 = vmatprep.mubr.bf16.mxu0 %v14422_v47  ;;  %1573 = vmatpush1.bf16.msra.mxu0 %v14875_v60 }
 0x172   : > { %1574 = vmatprep.subr.bf16.mxu0 %v14878_v61 }
 0x175   : > { %1575 = vmatpush1.bf16.msra.mxu0 %v14883_v62 }
 0x178   : > { %1520 = vmatmul.mubr.bf16.gmra.mrb[64].mxu0 %v14716_v20 }
 0x179   : > { %1529 = vmatprep.mubr.bf16.mxu0 %v14422_v47 }
 0x17d   : > { %v700_v63 = vpop.trf.xlu0 }
 0x17e   : > { %11634 = vmatprep.mubr.bf16.mxu1 %v700_v63 }
 0x180   : > { %1530 = vmatmul.mubr.bf16.gmra.mrb[68].mxu0 %v14705_v11 }
 0x181   : > { %v701_v3 = vpop.trf.xlu0  ;;  %1539 = vmatprep.mubr.bf16.mxu0 %v14422_v47 }
 0x182   : > { %11635 = vmatmul.mubr.bf16.vlgmr.msra.gmra.mrb[0].mxu1 %v701_v3 }
 0x183   : > { %1335 = vmatpush1.bf16.msra.mxu1 %v11497_v54  ;;  %v870_v54 = vld [vmem:[%s20040_s4 + $0x108] sm:$0xff] }
 0x184   : > { %1336 = vmatprep.subr.bf16.mxu1 %v11506_v2  ;;  %v11530_v18 = vcombine.high %v870_v54, %v874_v14  ;;  %v11529_v23 = vcombine.low %v870_v54, %v874_v14 }
 0x185   : > { %v702_v8 = vpop.trf.xlu0 }
 0x186   : > { %11638 = vmatprep.mubr.bf16.mxu1 %v702_v8 }
 0x187   : > { %1337 = vmatpush1.bf16.msra.mxu1 %v11505_v6 }
 0x188   : > { %1540 = vmatmul.mubr.bf16.gmra.mrb[72].mxu0 %v14753_v56  ;;  %1338 = vmatprep.subr.bf16.mxu1 %v11514_v7 }
 0x189   : > { %v703_v53 = vpop.trf.xlu0  ;;  %1549 = vmatprep.mubr.bf16.mxu0 %v14422_v47 }
 0x18a   : > { %11639 = vmatmul.mubr.bf16.gmra.mrb[4].mxu1 %v703_v53 }
 0x18b   : > { %1339 = vmatpush1.bf16.msra.mxu1 %v11513_v13 }
 0x18c   : > { %1340 = vmatprep.subr.bf16.mxu1 %v11522_v52 }
 0x18d   : > { %v704_v19 = vpop.trf.xlu0 }
 0x18e   : > { %11642 = vmatprep.mubr.bf16.mxu1 %v704_v19 }
 0x18f   : > { %1341 = vmatpush1.bf16.msra.mxu1 %v11521_v17 }
 0x190   : > { %1550 = vmatmul.mubr.bf16.gmra.mrb[76].mxu0 %v14743_v46  ;;  %1342 = vmatprep.subr.bf16.mxu1 %v11530_v18 }
 0x191   : > { %v705_v25 = vpop.trf.xlu0  ;;  %1592 = vmatprep.mubr.bf16.mxu0 %v14422_v47 }
 0x192   : > { %11643 = vmatmul.mubr.bf16.gmra.mrb[8].mxu1 %v705_v25 }
 0x193   : > { %1343 = vmatpush1.bf16.msra.mxu1 %v11529_v23 }
 0x194   : > { %1344 = vmatprep.subr.bf16.mxu1 %v11538_v24 }
 0x195   : > { %v706_v34 = vpop.trf.xlu0 }
 0x196   : > { %11646 = vmatprep.mubr.bf16.mxu1 %v706_v34 }
 0x197   : > { %1345 = vmatpush1.bf16.msra.mxu1 %v11537_v30 }
 0x198   : > { %1593 = vmatmul.mubr.bf16.vlgmr.msra.gmra.mrb[80].mxu0 %v14644_v15  ;;  %1346 = vmatprep.subr.bf16.mxu1 %v11546_v31 }
 0x199   : > { %v707_v44 = vpop.trf.xlu0 }
 0x19a   : > { %11647 = vmatmul.mubr.bf16.gmra.mrb[12].mxu1 %v707_v44 }
 0x19b   : > { %1347 = vmatpush1.bf16.msra.mxu1 %v11545_v38  ;;  %1366 = vmatprep.mubr.bf16.mxu1 %v14422_v47 }
 0x19c   : > { %1348 = vmatprep.subr.bf16.mxu1 %v11554_v42 }
 0x19f   : > { %1349 = vmatpush1.bf16.msra.mxu1 %v11553_v49 }
 0x1a0   : > { %13186 = vmatprep.subr.bf16.mxu1 %v14781_v16 }
 0x1a2   : > { %1367 = vmatmul.mubr.bf16.vlgmr.msra.gmra.mrb[16].mxu1 %v14644_v15 }
 0x1a3   : > { %13194 = vmatpush1.bf16.msra.mxu1 %v14798_v28  ;;  %1376 = vmatprep.mubr.bf16.mxu1 %v14422_v47 }
 0x1a4   : > { %13187 = vmatprep.subr.bf16.mxu1 %v14800_v29 }
 0x1a7   : > { %13195 = vmatpush1.bf16.msra.mxu1 %v14811_v32 }
 0x1a8   : > { %13188 = vmatprep.subr.bf16.mxu1 %v14814_v33 }
 0x1aa   : > { %1377 = vmatmul.mubr.bf16.gmra.mrb[20].mxu1 %v14641_v12 }
 0x1ab   : > { %1386 = vmatprep.mubr.bf16.mxu1 %v14422_v47  ;;  %13196 = vmatpush1.bf16.msra.mxu1 %v14823_v36 }
 0x1ac   : > { %13189 = vmatprep.subr.bf16.mxu1 %v14826_v55 }
 0x1af   : > { %13197 = vmatpush1.bf16.msra.mxu1 %v14837_v40 }
 0x1b0   : > { %13190 = vmatprep.subr.bf16.mxu1 %v14840_v41 }
 0x1b2   : > { %1387 = vmatmul.mubr.bf16.gmra.mrb[24].mxu1 %v14674_v43 }
 0x1b3   : > { %1396 = vmatprep.mubr.bf16.mxu1 %v14422_v47  ;;  %13198 = vmatpush1.bf16.msra.mxu1 %v14849_v45 }
 0x1b4   : > { %13191 = vmatprep.subr.bf16.mxu1 %v14852_v48 }
 0x1b7   : > { %13199 = vmatpush1.bf16.msra.mxu1 %v14863_v57 }
 0x1b8   : > { %13192 = vmatprep.subr.bf16.mxu1 %v14866_v51 }
 0x1ba   : > { %1397 = vmatmul.mubr.bf16.gmra.mrb[28].mxu1 %v14669_v39 }
 0x1bb   : > { %1406 = vmatprep.mubr.bf16.mxu1 %v14422_v47  ;;  %13200 = vmatpush1.bf16.msra.mxu1 %v14875_v60 }
 0x1bc   : > { %13193 = vmatprep.subr.bf16.mxu1 %v14878_v61 }
 0x1bf   : > { %13201 = vmatpush1.bf16.msra.mxu1 %v14883_v62 }
 0x1c2   : > { %1407 = vmatmul.mubr.bf16.gmra.mrb[32].mxu1 %v14716_v20 }
 0x1c3   : > { %1416 = vmatprep.mubr.bf16.mxu1 %v14422_v47 }
 0x1ca   : > { %1417 = vmatmul.mubr.bf16.gmra.mrb[36].mxu1 %v14705_v11 }
 0x1cb   : > { %1426 = vmatprep.mubr.bf16.mxu1 %v14422_v47 }
 0x1d2   : > { %1427 = vmatmul.mubr.bf16.gmra.mrb[40].mxu1 %v14753_v56 }
 0x1d3   : > { %1436 = vmatprep.mubr.bf16.mxu1 %v14422_v47 }
 0x1da   : > { %1437 = vmatmul.mubr.bf16.gmra.mrb[44].mxu1 %v14743_v46 }
 0x1db   : > { %1602 = vmatprep.mubr.bf16.mxu1 %v14422_v47 }
 0x1e2   : > { %1603 = vmatmul.mubr.bf16.vlgmr.msra.gmra.mrb[48].mxu1 %v14641_v12 }
 0x1e3   : > { %1612 = vmatprep.mubr.bf16.mxu1 %v14422_v47 }
 0x1ea   : > { %1613 = vmatmul.mubr.bf16.gmra.mrb[52].mxu1 %v14674_v43 }
 0x1eb   : > { %v1255_v15 = vpop.f32.mrb[16].mxu0  ;;  %1622 = vmatprep.mubr.bf16.mxu1 %v14422_v47 }
 0x1ec   : > { %v1257_v16 = vpop.f32.mrb[17].mxu0 }
 0x1ed   : > { %v1259_v28 = vpop.f32.mrb[18].mxu0 }
 0x1ee   : > { %v1682_v29 = vmax.f32 %v1255_v15, %v1259_v28  ;;  %v1912_v32 = vmin.f32 %v1255_v15, %v1259_v28  ;;  %v1261_v33 = vpop.f32.mrb[19].mxu0 }
 0x1ef   : > { %v1703_v36 = vmax.f32 %v1257_v16, %v1261_v33  ;;  %v1933_v55 = vmin.f32 %v1257_v16, %v1261_v33 }
 0x1f2   : > { %1623 = vmatmul.mubr.bf16.gmra.mrb[56].mxu1 %v14669_v39 }
 0x1f3   : > { %v1265_v40 = vpop.f32.mrb[20].mxu0  ;;  %1632 = vmatprep.mubr.bf16.mxu1 %v14422_v47 }
 0x1f4   : > { %v1683_v41 = vmax.f32 %v1682_v29, %v1265_v40  ;;  %v1913_v45 = vmin.f32 %v1912_v32, %v1265_v40  ;;  %v1267_v12 = vpop.f32.mrb[21].mxu0 }
 0x1f5   : > { %v1704_v48 = vmax.f32 %v1703_v36, %v1267_v12  ;;  %v1934_v50 = vmin.f32 %v1933_v55, %v1267_v12  ;;  %v1269_v43 = vpop.f32.mrb[22].mxu0 }
 0x1f6   : > { %v1684_v57 = vmax.f32 %v1683_v41, %v1269_v43  ;;  %v1914_v51 = vmin.f32 %v1913_v45, %v1269_v43  ;;  %v1271_v58 = vpop.f32.mrb[23].mxu0 }
 0x1f7   : > { %v1705_v59 = vmax.f32 %v1704_v48, %v1271_v58  ;;  %v1935_v60 = vmin.f32 %v1934_v50, %v1271_v58 }
 0x1fa   : > { %1633 = vmatmul.mubr.bf16.gmra.mrb[60].mxu1 %v14716_v20 }
 0x1fb   : > { %v1275_v61 = vpop.f32.mrb[24].mxu0  ;;  %1642 = vmatprep.mubr.bf16.mxu1 %v14422_v47 }
 0x1fc   : > { %v1685_v62 = vmax.f32 %v1684_v57, %v1275_v61  ;;  %v1915_v63 = vmin.f32 %v1914_v51, %v1275_v61  ;;  %v1277_v0 = vpop.f32.mrb[25].mxu0 }
 0x1fd   : > { %v1706_v39 = vmax.f32 %v1705_v59, %v1277_v0  ;;  %v1936_v1 = vmin.f32 %v1935_v60, %v1277_v0  ;;  %v1279_v2 = vpop.f32.mrb[26].mxu0 }
 0x1fe   : > { %v1686_v3 = vmax.f32 %v1685_v62, %v1279_v2  ;;  %v1916_v4 = vmin.f32 %v1915_v63, %v1279_v2  ;;  %v1281_v5 = vpop.f32.mrb[27].mxu0 }
 0x1ff   : > { %v1707_v6 = vmax.f32 %v1706_v39, %v1281_v5  ;;  %v1937_v7 = vmin.f32 %v1936_v1, %v1281_v5 }
 0x202   : > { %1643 = vmatmul.mubr.bf16.gmra.mrb[64].mxu1 %v14705_v11 }
 0x203   : > { %v1285_v8 = vpop.f32.mrb[28].mxu0  ;;  %1652 = vmatprep.mubr.bf16.mxu1 %v14422_v47 }
 0x204   : > { %v1687_v9 = vmax.f32 %v1686_v3, %v1285_v8  ;;  %v1917_v20 = vmin.f32 %v1916_v4, %v1285_v8  ;;  %v1287_v10 = vpop.f32.mrb[29].mxu0 }
 0x205   : > { %v1708_v13 = vmax.f32 %v1707_v6, %v1287_v10  ;;  %v1938_v52 = vmin.f32 %v1937_v7, %v1287_v10  ;;  %v1289_v53 = vpop.f32.mrb[30].mxu0 }
 0x206   : > { %v1688_v54 = vmax.f32 %v1687_v9, %v1289_v53  ;;  %v1918_v14 = vmin.f32 %v1917_v20, %v1289_v53  ;;  %v1291_v17 = vpop.f32.mrb[31].mxu0 }
 0x207   : > { %v1709_v18 = vmax.f32 %v1708_v13, %v1291_v17  ;;  %v1939_v19 = vmin.f32 %v1938_v52, %v1291_v17 }
 0x20a   : > { %1653 = vmatmul.mubr.bf16.gmra.mrb[68].mxu1 %v14753_v56 }
 0x20b   : > { %v1295_v21 = vpop.f32.mrb[32].mxu0  ;;  %1662 = vmatprep.mubr.bf16.mxu1 %v14422_v47 }
 0x20c   : > { %v1689_v11 = vmax.f32 %v1688_v54, %v1295_v21  ;;  %v1919_v22 = vmin.f32 %v1918_v14, %v1295_v21  ;;  %v1297_v23 = vpop.f32.mrb[33].mxu0 }
 0x20d   : > { %v1710_v24 = vmax.f32 %v1709_v18, %v1297_v23  ;;  %v1940_v25 = vmin.f32 %v1939_v19, %v1297_v23  ;;  %v1299_v26 = vpop.f32.mrb[34].mxu0 }
 0x20e   : > { %v1690_v27 = vmax.f32 %v1689_v11, %v1299_v26  ;;  %v1920_v30 = vmin.f32 %v1919_v22, %v1299_v26  ;;  %v1301_v31 = vpop.f32.mrb[35].mxu0 }
 0x20f   : > { %v1711_v34 = vmax.f32 %v1710_v24, %v1301_v31  ;;  %v1941_v35 = vmin.f32 %v1940_v25, %v1301_v31 }
 0x212   : > { %1663 = vmatmul.mubr.bf16.gmra.mrb[72].mxu1 %v14743_v46 }
 0x213   : > { %v1305_v37 = vpop.f32.mrb[36].mxu0 }
 0x214   : > { %v1691_v38 = vmax.f32 %v1690_v27, %v1305_v37  ;;  %v1921_v42 = vmin.f32 %v1920_v30, %v1305_v37  ;;  %v1307_v56 = vpop.f32.mrb[37].mxu0 }
 0x215   : > { %v1712_v44 = vmax.f32 %v1711_v34, %v1307_v56  ;;  %v1942_v49 = vmin.f32 %v1941_v35, %v1307_v56  ;;  %v1309_v47 = vpop.f32.mrb[38].mxu0 }
 0x216   : > { %v1692_v15 = vmax.f32 %v1691_v38, %v1309_v47  ;;  %v1922_v16 = vmin.f32 %v1921_v42, %v1309_v47  ;;  %v1311_v28 = vpop.f32.mrb[39].mxu0 }
 0x217   : > { %v1713_v29 = vmax.f32 %v1712_v44, %v1311_v28  ;;  %v1943_v32 = vmin.f32 %v1942_v49, %v1311_v28 }
 0x21b   : > { %v1315_v33 = vpop.f32.mrb[40].mxu0 }
 0x21c   : > { %v1693_v36 = vmax.f32 %v1692_v15, %v1315_v33  ;;  %v1923_v55 = vmin.f32 %v1922_v16, %v1315_v33  ;;  %v1317_v40 = vpop.f32.mrb[41].mxu0 }
 0x21d   : > { %v1714_v41 = vmax.f32 %v1713_v29, %v1317_v40  ;;  %v1944_v45 = vmin.f32 %v1943_v32, %v1317_v40  ;;  %v1319_v12 = vpop.f32.mrb[42].mxu0 }
 0x21e   : > { %v1694_v46 = vmax.f32 %v1693_v36, %v1319_v12  ;;  %v1924_v48 = vmin.f32 %v1923_v55, %v1319_v12  ;;  %v1321_v50 = vpop.f32.mrb[43].mxu0 }
 0x21f   : > { %v1715_v43 = vmax.f32 %v1714_v41, %v1321_v50  ;;  %v1945_v57 = vmin.f32 %v1944_v45, %v1321_v50 }
 0x223   : > { %v1325_v51 = vpop.f32.mrb[44].mxu0 }
 0x224   : > { %v1695_v58 = vmax.f32 %v1694_v46, %v1325_v51  ;;  %v1925_v59 = vmin.f32 %v1924_v48, %v1325_v51  ;;  %v1327_v60 = vpop.f32.mrb[45].mxu0 }
 0x225   : > { %v1716_v61 = vmax.f32 %v1715_v43, %v1327_v60  ;;  %v1946_v62 = vmin.f32 %v1945_v57, %v1327_v60  ;;  %v1329_v63 = vpop.f32.mrb[46].mxu0 }
 0x226   : > { %v1696_v0 = vmax.f32 %v1695_v58, %v1329_v63  ;;  %v1926_v39 = vmin.f32 %v1925_v59, %v1329_v63  ;;  %v1331_v1 = vpop.f32.mrb[47].mxu0 }
 0x227   : > { %v1717_v2 = vmax.f32 %v1716_v61, %v1331_v1  ;;  %v1947_v3 = vmin.f32 %v1946_v62, %v1331_v1 }
 0x228   : > { %v1697_v4 = vrot.slane %v1696_v0, 4  ;;  %v1927_v5 = vrot.slane %v1926_v39, 4 }
 0x229   : > { %v1718_v6 = vrot.slane %v1717_v2, 4  ;;  %v1948_v7 = vrot.slane %v1947_v3, 4 }
 0x22a   : > { %v1698_v8 = vmax.f32 %v1696_v0, %v1697_v4  ;;  %v1928_v9 = vmin.f32 %v1926_v39, %v1927_v5 }
 0x22b   : > { %v1719_v20 = vmax.f32 %v1717_v2, %v1718_v6  ;;  %v1949_v10 = vmin.f32 %v1947_v3, %v1948_v7  ;;  %v1481_v13 = vpop.f32.mrb[48].mxu0 }
 0x22c   : > { %v1699_v52 = vrot.slane %v1698_v8, 2  ;;  %v1929_v53 = vrot.slane %v1928_v9, 2  ;;  %v1483_v54 = vpop.f32.mrb[49].mxu0 }
 0x22d   : > { %v1720_v14 = vrot.slane %v1719_v20, 2  ;;  %v1950_v17 = vrot.slane %v1949_v10, 2  ;;  %v1485_v18 = vpop.f32.mrb[50].mxu0 }
 0x22e   : > { %v1700_v19 = vmax.f32 %v1698_v8, %v1699_v52  ;;  %v1930_v21 = vmin.f32 %v1928_v9, %v1929_v53  ;;  %v1766_v11 = vmax.f32 %v1481_v13, %v1485_v18  ;;  %v1996_v22 = vmin.f32 %v1481_v13, %v1485_v18  ;;  %v1487_v23 = vpop.f32.mrb[51].mxu0 }
 0x22f   : > { %v1721_v24 = vmax.f32 %v1719_v20, %v1720_v14  ;;  %v1951_v25 = vmin.f32 %v1949_v10, %v1950_v17  ;;  %v1787_v26 = vmax.f32 %v1483_v54, %v1487_v23  ;;  %v2017_v27 = vmin.f32 %v1483_v54, %v1487_v23  ;;  %v678_v23 = vld [vmem:[#allocation3 + $0x10] sm:$0xff] }
 0x230   : > { %v1701_v30 = vrot.slane %v1700_v19, 1  ;;  %v1931_v31 = vrot.slane %v1930_v21, 1 }
 0x231   : > { %v1722_v34 = vrot.slane %v1721_v24, 1  ;;  %v1952_v35 = vrot.slane %v1951_v25, 1 }
 0x232   : > { %v14987_v37 = vmax.f32 %v1700_v19, %v1701_v30  ;;  %v14989_v38 = vmin.f32 %v1930_v21, %v1931_v31 }
 0x233   : > { %v14991_v42 = vmax.f32 %v1721_v24, %v1722_v34  ;;  %v14993_v56 = vmin.f32 %v1951_v25, %v1952_v35  ;;  %v1491_v44 = vpop.f32.mrb[52].mxu0 }
 0x234   : > { %v1767_v49 = vmax.f32 %v1766_v11, %v1491_v44  ;;  %v1997_v47 = vmin.f32 %v1996_v22, %v1491_v44  ;;  %v1493_v15 = vpop.f32.mrb[53].mxu0  ;;  %v679_v44 = vld [vmem:[#allocation3 + $0x18] sm:$0xff] }
 0x235   : > { %v1858_v16 = vcombine.low %v14987_v37, %v14991_v42  ;;  %v2088_v28 = vcombine.low %v14989_v38, %v14993_v56  ;;  %v1788_v29 = vmax.f32 %v1787_v26, %v1493_v15  ;;  %v2018_v32 = vmin.f32 %v2017_v27, %v1493_v15  ;;  %v1495_v33 = vpop.f32.mrb[54].mxu0  ;;  %v676_v27 = vld [vmem:[#allocation3] sm:$0xff] }
 0x236   : > { %v1768_v36 = vmax.f32 %v1767_v49, %v1495_v33  ;;  %v1998_v55 = vmin.f32 %v1997_v47, %v1495_v33  ;;  %v1497_v40 = vpop.f32.mrb[55].mxu0  ;;  %v677_v33 = vld [vmem:[#allocation3 + $0x8] sm:$0xff] }
 0x237   : > { %v1789_v41 = vmax.f32 %v1788_v29, %v1497_v40  ;;  %v2019_v45 = vmin.f32 %v2018_v32, %v1497_v40 }
 0x23b   : > { %v1501_v12 = vpop.f32.mrb[56].mxu0 }
 0x23c   : > { %v1769_v46 = vmax.f32 %v1768_v36, %v1501_v12  ;;  %v1999_v48 = vmin.f32 %v1998_v55, %v1501_v12  ;;  %v1503_v50 = vpop.f32.mrb[57].mxu0 }
 0x23d   : > { %v1790_v43 = vmax.f32 %v1789_v41, %v1503_v50  ;;  %v2020_v57 = vmin.f32 %v2019_v45, %v1503_v50  ;;  %v1505_v51 = vpop.f32.mrb[58].mxu0  ;;  %v682_v50 = vld [vmem:[#allocation3 + $0x30] sm:$0xff] }
 0x23e   : > { %v1770_v58 = vmax.f32 %v1769_v46, %v1505_v51  ;;  %v2000_v59 = vmin.f32 %v1999_v48, %v1505_v51  ;;  %v1507_v60 = vpop.f32.mrb[59].mxu0 }
 0x23f   : > { %v1791_v61 = vmax.f32 %v1790_v43, %v1507_v60  ;;  %v2021_v62 = vmin.f32 %v2020_v57, %v1507_v60 }
 0x243   : > { %v1511_v63 = vpop.f32.mrb[60].mxu0 }
 0x244   : > { %v1771_v0 = vmax.f32 %v1770_v58, %v1511_v63  ;;  %v2001_v39 = vmin.f32 %v2000_v59, %v1511_v63  ;;  %v1513_v1 = vpop.f32.mrb[61].mxu0  ;;  %v680_v58 = vld [vmem:[#allocation3 + $0x20] sm:$0xff]  ;;  %v683_v63 = vld [vmem:[#allocation3 + $0x38] sm:$0xff] }
 0x245   : > { %v1792_v2 = vmax.f32 %v1791_v61, %v1513_v1  ;;  %v2022_v3 = vmin.f32 %v2021_v62, %v1513_v1  ;;  %v1515_v4 = vpop.f32.mrb[62].mxu0 }
 0x246   : > { %v1772_v5 = vmax.f32 %v1771_v0, %v1515_v4  ;;  %v2002_v6 = vmin.f32 %v2001_v39, %v1515_v4  ;;  %v1517_v7 = vpop.f32.mrb[63].mxu0  ;;  %v681_v4 = vld [vmem:[#allocation3 + $0x28] sm:$0xff] }
 0x247   : > { %v1793_v8 = vmax.f32 %v1792_v2, %v1517_v7  ;;  %v2023_v9 = vmin.f32 %v2022_v3, %v1517_v7 }
 0x24b   : > { %v1521_v20 = vpop.f32.mrb[64].mxu0 }
 0x24c   : > { %v1773_v10 = vmax.f32 %v1772_v5, %v1521_v20  ;;  %v2003_v13 = vmin.f32 %v2002_v6, %v1521_v20  ;;  %v1523_v52 = vpop.f32.mrb[65].mxu0 }
 0x24d   : > { %v1794_v53 = vmax.f32 %v1793_v8, %v1523_v52  ;;  %v2024_v54 = vmin.f32 %v2023_v9, %v1523_v52  ;;  %v1525_v14 = vpop.f32.mrb[66].mxu0  ;;  %v686_v52 = vld [vmem:[#allocation3 + $0x50] sm:$0xff] }
 0x24e   : > { %v1774_v17 = vmax.f32 %v1773_v10, %v1525_v14  ;;  %v2004_v18 = vmin.f32 %v2003_v13, %v1525_v14  ;;  %v1527_v19 = vpop.f32.mrb[67].mxu0 }
 0x24f   : > { %v1795_v21 = vmax.f32 %v1794_v53, %v1527_v19  ;;  %v2025_v11 = vmin.f32 %v2024_v54, %v1527_v19 }
 0x253   : > { %v1531_v22 = vpop.f32.mrb[68].mxu0 }
 0x254   : > { %v1775_v24 = vmax.f32 %v1774_v17, %v1531_v22  ;;  %v2005_v25 = vmin.f32 %v2004_v18, %v1531_v22  ;;  %v1533_v26 = vpop.f32.mrb[69].mxu0  ;;  %v684_v17 = vld [vmem:[#allocation3 + $0x40] sm:$0xff]  ;;  %v687_v22 = vld [vmem:[#allocation3 + $0x58] sm:$0xff] }
 0x255   : > { %v1796_v30 = vmax.f32 %v1795_v21, %v1533_v26  ;;  %v2026_v31 = vmin.f32 %v2025_v11, %v1533_v26  ;;  %v1535_v34 = vpop.f32.mrb[70].mxu0  ;;  %v11636_v35 = vpop.f32.mrb[0].mxu1 }
 0x256   : > { %v1776_v49 = vmax.f32 %v1775_v24, %v1535_v34  ;;  %v2006_v47 = vmin.f32 %v2005_v25, %v1535_v34  ;;  %v807_v15 = vadd.f32 %v11636_v35, %v678_v23  ;;  %v1537_v29 = vpop.f32.mrb[71].mxu0  ;;  %v742_v32 = vpop.f32.mrb[1].mxu1 }
 0x257   : > { %v1797_v36 = vmax.f32 %v1796_v30, %v1537_v29  ;;  %v2027_v55 = vmin.f32 %v2026_v31, %v1537_v29  ;;  %v805_v40 = vadd.f32 %v742_v32, %v676_v27  ;;  %v11637_v41 = vpop.f32.mrb[2].mxu1  ;;  %v685_v30 = vld [vmem:[#allocation3 + $0x48] sm:$0xff] }
 0x258   : > { %823 = vst [vmem:[#allocation3 + $0x10] sm:$0xff] %v807_v15  ;;  %v808_v45 = vadd.f32 %v11637_v41, %v679_v44  ;;  %v745_v12 = vpop.f32.mrb[3].mxu1 }
 0x259   : > { %821 = vst [vmem:[#allocation3] sm:$0xff] %v805_v40  ;;  %v806_v46 = vadd.f32 %v745_v12, %v677_v33 }
 0x25a   : > { %824 = vst [vmem:[#allocation3 + $0x18] sm:$0xff] %v808_v45 }
 0x25b   : > { %822 = vst [vmem:[#allocation3 + $0x8] sm:$0xff] %v806_v46  ;;  %v1541_v48 = vpop.f32.mrb[72].mxu0 }
 0x25c   : > { %v1777_v43 = vmax.f32 %v1776_v49, %v1541_v48  ;;  %v2007_v57 = vmin.f32 %v2006_v47, %v1541_v48  ;;  %v1543_v51 = vpop.f32.mrb[73].mxu0 }
 0x25d   : > { %v1798_v59 = vmax.f32 %v1797_v36, %v1543_v51  ;;  %v2028_v60 = vmin.f32 %v2027_v55, %v1543_v51  ;;  %v1545_v61 = vpop.f32.mrb[74].mxu0  ;;  %v11640_v62 = vpop.f32.mrb[4].mxu1 }
 0x25e   : > { %v1778_v0 = vmax.f32 %v1777_v43, %v1545_v61  ;;  %v2008_v39 = vmin.f32 %v2007_v57, %v1545_v61  ;;  %v811_v1 = vadd.f32 %v11640_v62, %v682_v50  ;;  %v1547_v2 = vpop.f32.mrb[75].mxu0  ;;  %v758_v3 = vpop.f32.mrb[5].mxu1  ;;  %v690_v43 = vld [vmem:[#allocation3 + $0x70] sm:$0xff] }
 0x25f   : > { %v1799_v5 = vmax.f32 %v1798_v59, %v1547_v2  ;;  %v2029_v6 = vmin.f32 %v2028_v60, %v1547_v2  ;;  %v809_v7 = vadd.f32 %v758_v3, %v680_v58  ;;  %v11641_v8 = vpop.f32.mrb[6].mxu1  ;;  %v688_v60 = vld [vmem:[#allocation3 + $0x60] sm:$0xff]  ;;  %v691_v2 = vld [vmem:[#allocation3 + $0x78] sm:$0xff]  ;;  %v689_v3 = vld [vmem:[#allocation3 + $0x68] sm:$0xff] }
 0x260   : > { %827 = vst [vmem:[#allocation3 + $0x30] sm:$0xff] %v811_v1  ;;  %v812_v9 = vadd.f32 %v11641_v8, %v683_v63  ;;  %v761_v20 = vpop.f32.mrb[7].mxu1 }
 0x261   : > { %825 = vst [vmem:[#allocation3 + $0x20] sm:$0xff] %v809_v7  ;;  %v810_v10 = vadd.f32 %v761_v20, %v681_v4 }
 0x262   : > { %828 = vst [vmem:[#allocation3 + $0x38] sm:$0xff] %v812_v9 }
 0x263   : > { %826 = vst [vmem:[#allocation3 + $0x28] sm:$0xff] %v810_v10  ;;  %v1551_v13 = vpop.f32.mrb[76].mxu0 }
 0x264   : > { %v1779_v53 = vmax.f32 %v1778_v0, %v1551_v13  ;;  %v2009_v54 = vmin.f32 %v2008_v39, %v1551_v13  ;;  %v1553_v14 = vpop.f32.mrb[77].mxu0 }
 0x265   : > { %v1800_v18 = vmax.f32 %v1799_v5, %v1553_v14  ;;  %v2030_v19 = vmin.f32 %v2029_v6, %v1553_v14  ;;  %v1555_v21 = vpop.f32.mrb[78].mxu0  ;;  %v11644_v11 = vpop.f32.mrb[8].mxu1 }
 0x266   : > { %v1780_v23 = vmax.f32 %v1779_v53, %v1555_v21  ;;  %v2010_v24 = vmin.f32 %v2009_v54, %v1555_v21  ;;  %v815_v25 = vadd.f32 %v11644_v11, %v686_v52  ;;  %v1557_v26 = vpop.f32.mrb[79].mxu0  ;;  %v774_v27 = vpop.f32.mrb[9].mxu1 }
 0x267   : > { %v1801_v31 = vmax.f32 %v1800_v18, %v1557_v26  ;;  %v2031_v34 = vmin.f32 %v2030_v19, %v1557_v26  ;;  %v813_v35 = vadd.f32 %v774_v27, %v684_v17  ;;  %v11645_v44 = vpop.f32.mrb[10].mxu1 }
 0x268   : > { %v1781_v49 = vrot.slane %v1780_v23, 4  ;;  %v2011_v47 = vrot.slane %v2010_v24, 4  ;;  %831 = vst [vmem:[#allocation3 + $0x50] sm:$0xff] %v815_v25  ;;  %v816_v15 = vadd.f32 %v11645_v44, %v687_v22  ;;  %v777_v29 = vpop.f32.mrb[11].mxu1 }
 0x269   : > { %v1802_v32 = vrot.slane %v1801_v31, 4  ;;  %v2032_v33 = vrot.slane %v2031_v34, 4  ;;  %829 = vst [vmem:[#allocation3 + $0x40] sm:$0xff] %v813_v35  ;;  %v814_v36 = vadd.f32 %v777_v29, %v685_v30 }
 0x26a   : > { %v1782_v55 = vmax.f32 %v1780_v23, %v1781_v49  ;;  %v2012_v40 = vmin.f32 %v2010_v24, %v2011_v47  ;;  %832 = vst [vmem:[#allocation3 + $0x58] sm:$0xff] %v816_v15 }
 0x26b   : > { %v1803_v41 = vmax.f32 %v1801_v31, %v1802_v32  ;;  %v2033_v45 = vmin.f32 %v2031_v34, %v2032_v33  ;;  %830 = vst [vmem:[#allocation3 + $0x48] sm:$0xff] %v814_v36  ;;  %v14999_v12 = vpop.f32.mrb[80].mxu0 }
 0x26c   : > { %v1783_v46 = vrot.slane %v1782_v55, 2  ;;  %v2013_v48 = vrot.slane %v2012_v40, 2  ;;  %v15001_v50 = vpop.f32.mrb[81].mxu0 }
 0x26d   : > { %v1804_v57 = vrot.slane %v1803_v41, 2  ;;  %v2034_v51 = vrot.slane %v2033_v45, 2  ;;  %v15003_v58 = vpop.f32.mrb[82].mxu0  ;;  %v11648_v59 = vpop.f32.mrb[12].mxu1 }
 0x26e   : > { %v1784_v61 = vmax.f32 %v1782_v55, %v1783_v46  ;;  %v2014_v62 = vmin.f32 %v2012_v40, %v2013_v48  ;;  %v1808_v63 = vmax.f32 %v14999_v12, %v15003_v58  ;;  %v2038_v0 = vmin.f32 %v14999_v12, %v15003_v58  ;;  %v15009_v39 = vpop.f32.mrb[83].mxu0  ;;  %v790_v1 = vpop.f32.mrb[13].mxu1 }
 0x26f   : > { %v1805_v4 = vmax.f32 %v1803_v41, %v1804_v57  ;;  %v2035_v5 = vmin.f32 %v2033_v45, %v2034_v51  ;;  %v819_v6 = vadd.f32 %v11648_v59, %v690_v43  ;;  %v1829_v7 = vmax.f32 %v15001_v50, %v15009_v39  ;;  %v11649_v8 = vpop.f32.mrb[14].mxu1 }
 0x270   : > { %v1785_v9 = vrot.slane %v1784_v61, 1  ;;  %v2015_v20 = vrot.slane %v2014_v62, 1  ;;  %v2059_v10 = vmin.f32 %v15001_v50, %v15009_v39  ;;  %v817_v13 = vadd.f32 %v790_v1, %v688_v60  ;;  %v793_v52 = vpop.f32.mrb[15].mxu1 }
 0x271   : > { %v1806_v53 = vrot.slane %v1805_v4, 1  ;;  %v2036_v54 = vrot.slane %v2035_v5, 1  ;;  %835 = vst [vmem:[#allocation3 + $0x70] sm:$0xff] %v819_v6  ;;  %v820_v14 = vadd.f32 %v11649_v8, %v691_v2  ;;  %v818_v17 = vadd.f32 %v793_v52, %v689_v3 }
 0x272   : > { %v15015_v18 = vmax.f32 %v1784_v61, %v1785_v9  ;;  %v15017_v19 = vmin.f32 %v2014_v62, %v2015_v20  ;;  %833 = vst [vmem:[#allocation3 + $0x60] sm:$0xff] %v817_v13 }
 0x273   : > { %v15019_v21 = vmax.f32 %v1805_v4, %v1806_v53  ;;  %v15021_v11 = vmin.f32 %v2035_v5, %v2036_v54  ;;  %836 = vst [vmem:[#allocation3 + $0x78] sm:$0xff] %v820_v14  ;;  %834 = vst [vmem:[#allocation3 + $0x68] sm:$0xff] %v818_v17 }
 0x275   : > { %v1860_v22 = vcombine.low %v15015_v18, %v15019_v21  ;;  %v2090_v23 = vcombine.low %v15017_v19, %v15021_v11  ;;  %v1368_v24 = vpop.f32.mrb[16].mxu1  ;;  %v1681_v11 = vld [vmem:[%s1680_s28] ss:$4 sm:$0xff] }
 0x276   : > { %v1370_v25 = vpop.f32.mrb[17].mxu1 }
 0x277   : > { %v1372_v26 = vpop.f32.mrb[18].mxu1 }
 0x278   : > { %v1724_v27 = vmax.f32 %v1368_v24, %v1372_v26  ;;  %v1954_v30 = vmin.f32 %v1368_v24, %v1372_v26  ;;  %v1374_v31 = vpop.f32.mrb[19].mxu1 }
 0x279   : > { %v1745_v34 = vmax.f32 %v1370_v25, %v1374_v31  ;;  %v1975_v35 = vmin.f32 %v1370_v25, %v1374_v31 }
 0x27d   : > { %v1378_v44 = vpop.f32.mrb[20].mxu1 }
 0x27e   : > { %v1725_v49 = vmax.f32 %v1724_v27, %v1378_v44  ;;  %v1955_v47 = vmin.f32 %v1954_v30, %v1378_v44  ;;  %v1380_v15 = vpop.f32.mrb[21].mxu1 }
 0x27f   : > { %v1746_v29 = vmax.f32 %v1745_v34, %v1380_v15  ;;  %v1976_v32 = vmin.f32 %v1975_v35, %v1380_v15  ;;  %v1382_v33 = vpop.f32.mrb[22].mxu1 }
 0x280   : > { %v1726_v36 = vmax.f32 %v1725_v49, %v1382_v33  ;;  %v1956_v55 = vmin.f32 %v1955_v47, %v1382_v33  ;;  %v1384_v40 = vpop.f32.mrb[23].mxu1 }
 0x281   : > { %v1747_v41 = vmax.f32 %v1746_v29, %v1384_v40  ;;  %v1977_v45 = vmin.f32 %v1976_v32, %v1384_v40 }
 0x285   : > { %v1388_v46 = vpop.f32.mrb[24].mxu1 }
 0x286   : > { %v1727_v48 = vmax.f32 %v1726_v36, %v1388_v46  ;;  %v1957_v43 = vmin.f32 %v1956_v55, %v1388_v46  ;;  %v1390_v57 = vpop.f32.mrb[25].mxu1 }
 0x287   : > { %v1748_v51 = vmax.f32 %v1747_v41, %v1390_v57  ;;  %v1978_v59 = vmin.f32 %v1977_v45, %v1390_v57  ;;  %v1392_v60 = vpop.f32.mrb[26].mxu1 }
 0x288   : > { %v1728_v61 = vmax.f32 %v1727_v48, %v1392_v60  ;;  %v1958_v62 = vmin.f32 %v1957_v43, %v1392_v60  ;;  %v1394_v1 = vpop.f32.mrb[27].mxu1 }
 0x289   : > { %v1749_v2 = vmax.f32 %v1748_v51, %v1394_v1  ;;  %v1979_v3 = vmin.f32 %v1978_v59, %v1394_v1 }
 0x28d   : > { %v1398_v4 = vpop.f32.mrb[28].mxu1 }
 0x28e   : > { %v1729_v5 = vmax.f32 %v1728_v61, %v1398_v4  ;;  %v1959_v6 = vmin.f32 %v1958_v62, %v1398_v4  ;;  %v1400_v8 = vpop.f32.mrb[29].mxu1 }
 0x28f   : > { %v1750_v9 = vmax.f32 %v1749_v2, %v1400_v8  ;;  %v1980_v20 = vmin.f32 %v1979_v3, %v1400_v8  ;;  %v1402_v13 = vpop.f32.mrb[30].mxu1 }
 0x290   : > { %v1730_v52 = vmax.f32 %v1729_v5, %v1402_v13  ;;  %v1960_v53 = vmin.f32 %v1959_v6, %v1402_v13  ;;  %v1404_v54 = vpop.f32.mrb[31].mxu1 }
 0x291   : > { %v1751_v14 = vmax.f32 %v1750_v9, %v1404_v54  ;;  %v1981_v17 = vmin.f32 %v1980_v20, %v1404_v54 }
 0x295   : > { %v1408_v24 = vpop.f32.mrb[32].mxu1 }
 0x296   : > { %v1731_v25 = vmax.f32 %v1730_v52, %v1408_v24  ;;  %v1961_v26 = vmin.f32 %v1960_v53, %v1408_v24  ;;  %v1410_v27 = vpop.f32.mrb[33].mxu1 }
 0x297   : > { %v1752_v30 = vmax.f32 %v1751_v14, %v1410_v27  ;;  %v1982_v31 = vmin.f32 %v1981_v17, %v1410_v27  ;;  %v1412_v34 = vpop.f32.mrb[34].mxu1 }
 0x298   : > { %v1732_v35 = vmax.f32 %v1731_v25, %v1412_v34  ;;  %v1962_v44 = vmin.f32 %v1961_v26, %v1412_v34  ;;  %v1414_v49 = vpop.f32.mrb[35].mxu1  ;;  %v14423_v26 = vmov 1966171168  }
 0x299   : > { %v1753_v47 = vmax.f32 %v1752_v30, %v1414_v49  ;;  %v1983_v15 = vmin.f32 %v1982_v31, %v1414_v49  ;;  %v1863_v27 = vunpack.c.l.s4 %v14423_v26  ;;  %v1865_v30 = vlaneseq }
 0x29d   : > { %v1418_v29 = vpop.f32.mrb[36].mxu1 }
 0x29e   : > { %v1733_v32 = vmax.f32 %v1732_v35, %v1418_v29  ;;  %v1963_v33 = vmin.f32 %v1962_v44, %v1418_v29  ;;  %v1420_v36 = vpop.f32.mrb[37].mxu1 }
 0x29f   : > { %v1754_v55 = vmax.f32 %v1753_v47, %v1420_v36  ;;  %v1984_v40 = vmin.f32 %v1983_v15, %v1420_v36  ;;  %v1422_v41 = vpop.f32.mrb[38].mxu1 }
 0x2a0   : > { %v1734_v45 = vmax.f32 %v1733_v32, %v1422_v41  ;;  %v1964_v46 = vmin.f32 %v1963_v33, %v1422_v41  ;;  %v1424_v48 = vpop.f32.mrb[39].mxu1  ;;  %v1864_v32 = vunpack.c.0.s8 %v1863_v27  ;;  %v15027_v33 = vshrl.u32 %v1865_v30, 7 }
 0x2a1   : > { %v1755_v43 = vmax.f32 %v1754_v55, %v1424_v48  ;;  %v1985_v57 = vmin.f32 %v1984_v40, %v1424_v48 }
 0x2a2   : > { %20886 = vst [vmem:[#allocation9_spill] sm:$0xff] %v15027_v33 }
 0x2a5   : > { %v1428_v51 = vpop.f32.mrb[40].mxu1 }
 0x2a6   : > { %v1735_v59 = vmax.f32 %v1734_v45, %v1428_v51  ;;  %v1965_v60 = vmin.f32 %v1964_v46, %v1428_v51  ;;  %v1430_v61 = vpop.f32.mrb[41].mxu1 }
 0x2a7   : > { %v1756_v62 = vmax.f32 %v1755_v43, %v1430_v61  ;;  %v1986_v1 = vmin.f32 %v1985_v57, %v1430_v61  ;;  %v1432_v2 = vpop.f32.mrb[42].mxu1 }
 0x2a8   : > { %v1736_v3 = vmax.f32 %v1735_v59, %v1432_v2  ;;  %v1966_v4 = vmin.f32 %v1965_v60, %v1432_v2  ;;  %v1434_v5 = vpop.f32.mrb[43].mxu1 }
 0x2a9   : > { %v1757_v6 = vmax.f32 %v1756_v62, %v1434_v5  ;;  %v1987_v8 = vmin.f32 %v1986_v1, %v1434_v5 }
 0x2ad   : > { %v1438_v9 = vpop.f32.mrb[44].mxu1 }
 0x2ae   : > { %v1737_v20 = vmax.f32 %v1736_v3, %v1438_v9  ;;  %v1967_v13 = vmin.f32 %v1966_v4, %v1438_v9  ;;  %v1440_v52 = vpop.f32.mrb[45].mxu1 }
 0x2af   : > { %v1758_v53 = vmax.f32 %v1757_v6, %v1440_v52  ;;  %v1988_v54 = vmin.f32 %v1987_v8, %v1440_v52  ;;  %v1442_v14 = vpop.f32.mrb[46].mxu1 }
 0x2b0   : > { %v1738_v17 = vmax.f32 %v1737_v20, %v1442_v14  ;;  %v1968_v24 = vmin.f32 %v1967_v13, %v1442_v14  ;;  %v1444_v25 = vpop.f32.mrb[47].mxu1 }
 0x2b1   : > { %v1759_v31 = vmax.f32 %v1758_v53, %v1444_v25  ;;  %v1989_v34 = vmin.f32 %v1988_v54, %v1444_v25 }
 0x2b2   : > { %v1739_v35 = vrot.slane %v1738_v17, 4  ;;  %v1969_v44 = vrot.slane %v1968_v24, 4 }
 0x2b3   : > { %v1760_v49 = vrot.slane %v1759_v31, 4  ;;  %v1990_v47 = vrot.slane %v1989_v34, 4 }
 0x2b4   : > { %v1740_v15 = vmax.f32 %v1738_v17, %v1739_v35  ;;  %v1970_v29 = vmin.f32 %v1968_v24, %v1969_v44 }
 0x2b5   : > { %v1761_v36 = vmax.f32 %v1759_v31, %v1760_v49  ;;  %v1991_v55 = vmin.f32 %v1989_v34, %v1990_v47  ;;  %v1604_v40 = vpop.f32.mrb[48].mxu1 }
 0x2b6   : > { %v1741_v41 = vrot.slane %v1740_v15, 2  ;;  %v1971_v45 = vrot.slane %v1970_v29, 2  ;;  %v1809_v46 = vmax.f32 %v1808_v63, %v1604_v40  ;;  %v2039_v48 = vmin.f32 %v2038_v0, %v1604_v40  ;;  %v1606_v43 = vpop.f32.mrb[49].mxu1 }
 0x2b7   : > { %v1762_v57 = vrot.slane %v1761_v36, 2  ;;  %v1992_v51 = vrot.slane %v1991_v55, 2  ;;  %v1830_v59 = vmax.f32 %v1829_v7, %v1606_v43  ;;  %v2060_v60 = vmin.f32 %v2059_v10, %v1606_v43  ;;  %v1608_v61 = vpop.f32.mrb[50].mxu1 }
 0x2b8   : > { %v1742_v62 = vmax.f32 %v1740_v15, %v1741_v41  ;;  %v1972_v1 = vmin.f32 %v1970_v29, %v1971_v45  ;;  %v1810_v2 = vmax.f32 %v1809_v46, %v1608_v61  ;;  %v2040_v63 = vmin.f32 %v2039_v48, %v1608_v61  ;;  %v1610_v3 = vpop.f32.mrb[51].mxu1 }
 0x2b9   : > { %v1763_v4 = vmax.f32 %v1761_v36, %v1762_v57  ;;  %v1993_v12 = vmin.f32 %v1991_v55, %v1992_v51  ;;  %v1831_v58 = vmax.f32 %v1830_v59, %v1610_v3  ;;  %v2061_v0 = vmin.f32 %v2060_v60, %v1610_v3 }
 0x2ba   : > { %v1743_v5 = vrot.slane %v1742_v62, 1  ;;  %v1973_v6 = vrot.slane %v1972_v1, 1  ;;  %v15042_v7 = vsub.s32 %v1864_v32, %v15027_v33 }
 0x2bb   : > { %v1764_v8 = vrot.slane %v1763_v4, 1  ;;  %v1994_v9 = vrot.slane %v1993_v12, 1 }
 0x2bc   : > { %20887 = vst [vmem:[#allocation10_spill] sm:$0xff] %v15042_v7  ;;  %v1744_v20 = vmax.f32 %v1742_v62, %v1743_v5  ;;  %v1974_v50 = vmin.f32 %v1972_v1, %v1973_v6  ;;  %v15048_v27 = vrot.slane %v1858_v16, %v15042_v7  ;;  %v15054_v30 = vrot.slane %v2088_v28, %v15042_v7 }
 0x2bd   : > { %v1765_v39 = vmax.f32 %v1763_v4, %v1764_v8  ;;  %v1995_v10 = vmin.f32 %v1993_v12, %v1994_v9  ;;  %v1614_v13 = vpop.f32.mrb[52].mxu1 }
 0x2be   : > { %v1811_v52 = vmax.f32 %v1810_v2, %v1614_v13  ;;  %v2041_v53 = vmin.f32 %v2040_v63, %v1614_v13  ;;  %v1616_v54 = vpop.f32.mrb[53].mxu1 }
 0x2bf   : > { %v1859_v14 = vcombine.low %v1744_v20, %v1765_v39  ;;  %v2089_v17 = vcombine.low %v1974_v50, %v1995_v10  ;;  %v1832_v24 = vmax.f32 %v1831_v58, %v1616_v54  ;;  %v2062_v25 = vmin.f32 %v2061_v0, %v1616_v54  ;;  %v1618_v26 = vpop.f32.mrb[54].mxu1 }
 0x2c0   : > { %v1812_v31 = vmax.f32 %v1811_v52, %v1618_v26  ;;  %v2042_v34 = vmin.f32 %v2041_v53, %v1618_v26  ;;  %v1620_v35 = vpop.f32.mrb[55].mxu1 }
 0x2c1   : > { %v15057_v44 = vrot.slane %v1859_v14, %v15042_v7  ;;  %v15060_v49 = vrot.slane %v2089_v17, %v15042_v7  ;;  %v1833_v47 = vmax.f32 %v1832_v24, %v1620_v35  ;;  %v2063_v15 = vmin.f32 %v2062_v25, %v1620_v35 }
 0x2c3   : > { %v1890_v37 = vcombine.low %v15048_v27, %v15057_v44  ;;  %v2120_v42 = vcombine.low %v15054_v30, %v15060_v49 }
 0x2c5   : > { %v1624_v38 = vpop.f32.mrb[56].mxu1  ;;  %v2128_v18 = vrot.slane %v2120_v42, %v15042_v7 }
 0x2c6   : > { %v1813_v56 = vmax.f32 %v1812_v31, %v1624_v38  ;;  %v2043_v16 = vmin.f32 %v2042_v34, %v1624_v38  ;;  %v1626_v28 = vpop.f32.mrb[57].mxu1 }
 0x2c7   : > { %v1834_v29 = vmax.f32 %v1833_v47, %v1626_v28  ;;  %v2064_v32 = vmin.f32 %v2063_v15, %v1626_v28  ;;  %v1628_v36 = vpop.f32.mrb[58].mxu1 }
 0x2c8   : > { %v1814_v55 = vmax.f32 %v1813_v56, %v1628_v36  ;;  %v2044_v40 = vmin.f32 %v2043_v16, %v1628_v36  ;;  %v1630_v41 = vpop.f32.mrb[59].mxu1 }
 0x2c9   : > { %v1835_v45 = vmax.f32 %v1834_v29, %v1630_v41  ;;  %v2065_v46 = vmin.f32 %v2064_v32, %v1630_v41 }
 0x2cd   : > { %v1634_v48 = vpop.f32.mrb[60].mxu1 }
 0x2ce   : > { %v1815_v43 = vmax.f32 %v1814_v55, %v1634_v48  ;;  %v2045_v57 = vmin.f32 %v2044_v40, %v1634_v48  ;;  %v1636_v51 = vpop.f32.mrb[61].mxu1 }
 0x2cf   : > { %v1836_v59 = vmax.f32 %v1835_v45, %v1636_v51  ;;  %v2066_v60 = vmin.f32 %v2065_v46, %v1636_v51  ;;  %v1638_v61 = vpop.f32.mrb[62].mxu1 }
 0x2d0   : > { %v1816_v62 = vmax.f32 %v1815_v43, %v1638_v61  ;;  %v2046_v1 = vmin.f32 %v2045_v57, %v1638_v61  ;;  %v1640_v2 = vpop.f32.mrb[63].mxu1 }
 0x2d1   : > { %v1837_v63 = vmax.f32 %v1836_v59, %v1640_v2  ;;  %v2067_v3 = vmin.f32 %v2066_v60, %v1640_v2 }
 0x2d5   : > { %v1644_v4 = vpop.f32.mrb[64].mxu1 }
 0x2d6   : > { %v1817_v12 = vmax.f32 %v1816_v62, %v1644_v4  ;;  %v2047_v58 = vmin.f32 %v2046_v1, %v1644_v4  ;;  %v1646_v0 = vpop.f32.mrb[65].mxu1 }
 0x2d7   : > { %v1838_v5 = vmax.f32 %v1837_v63, %v1646_v0  ;;  %v2068_v6 = vmin.f32 %v2067_v3, %v1646_v0  ;;  %v1648_v8 = vpop.f32.mrb[66].mxu1 }
 0x2d8   : > { %v1818_v9 = vmax.f32 %v1817_v12, %v1648_v8  ;;  %v2048_v20 = vmin.f32 %v2047_v58, %v1648_v8  ;;  %v1650_v50 = vpop.f32.mrb[67].mxu1 }
 0x2d9   : > { %v1839_v39 = vmax.f32 %v1838_v5, %v1650_v50  ;;  %v2069_v10 = vmin.f32 %v2068_v6, %v1650_v50 }
 0x2dd   : > { %v1654_v13 = vpop.f32.mrb[68].mxu1 }
 0x2de   : > { %v1819_v52 = vmax.f32 %v1818_v9, %v1654_v13  ;;  %v2049_v53 = vmin.f32 %v2048_v20, %v1654_v13  ;;  %v1656_v54 = vpop.f32.mrb[69].mxu1  ;;  %v1882_v13 = vrot.slane %v1860_v22, %v15042_v7  ;;  %v1911_v22 = vld [vmem:[%s1910_s13] ss:$4 sm:$0xff] }
 0x2df   : > { %v1840_v14 = vmax.f32 %v1839_v39, %v1656_v54  ;;  %v2070_v17 = vmin.f32 %v2069_v10, %v1656_v54  ;;  %v1658_v24 = vpop.f32.mrb[70].mxu1 }
 0x2e0   : > { %v1820_v25 = vmax.f32 %v1819_v52, %v1658_v24  ;;  %v2050_v26 = vmin.f32 %v2049_v53, %v1658_v24  ;;  %v1660_v31 = vpop.f32.mrb[71].mxu1  ;;  %v2112_v52 = vrot.slane %v2090_v23, %v15042_v7  ;;  %v1898_v24 = vrot.slane %v1890_v37, %v15042_v7 }
 0x2e1   : > { %v1841_v34 = vmax.f32 %v1840_v14, %v1660_v31  ;;  %v2071_v35 = vmin.f32 %v2070_v17, %v1660_v31 }
 0x2e5   : > { %v1664_v47 = vpop.f32.mrb[72].mxu1 }
 0x2e6   : > { %v1821_v15 = vmax.f32 %v1820_v25, %v1664_v47  ;;  %v2051_v38 = vmin.f32 %v2050_v26, %v1664_v47  ;;  %v1666_v56 = vpop.f32.mrb[73].mxu1 }
 0x2e7   : > { %v1842_v16 = vmax.f32 %v1841_v34, %v1666_v56  ;;  %v2072_v28 = vmin.f32 %v2071_v35, %v1666_v56  ;;  %v1668_v29 = vpop.f32.mrb[74].mxu1 }
 0x2e8   : > { %v1822_v32 = vmax.f32 %v1821_v15, %v1668_v29  ;;  %v2052_v36 = vmin.f32 %v2051_v38, %v1668_v29  ;;  %v1670_v55 = vpop.f32.mrb[75].mxu1 }
 0x2e9   : > { %v1843_v40 = vmax.f32 %v1842_v16, %v1670_v55  ;;  %v2073_v41 = vmin.f32 %v2072_v28, %v1670_v55 }
 0x2ea   : > { %v1823_v45 = vrot.slane %v1822_v32, 4  ;;  %v2053_v46 = vrot.slane %v2052_v36, 4 }
 0x2eb   : > { %v1844_v48 = vrot.slane %v1843_v40, 4  ;;  %v2074_v43 = vrot.slane %v2073_v41, 4 }
 0x2ec   : > { %v1824_v57 = vmax.f32 %v1822_v32, %v1823_v45  ;;  %v2054_v51 = vmin.f32 %v2052_v36, %v2053_v46 }
 0x2ed   : > { %v1845_v59 = vmax.f32 %v1843_v40, %v1844_v48  ;;  %v2075_v60 = vmin.f32 %v2073_v41, %v2074_v43 }
 0x2ee   : > { %v1825_v61 = vrot.slane %v1824_v57, 2  ;;  %v2055_v62 = vrot.slane %v2054_v51, 2 }
 0x2ef   : > { %v1846_v1 = vrot.slane %v1845_v59, 2  ;;  %v2076_v2 = vrot.slane %v2075_v60, 2 }
 0x2f0   : > { %v1826_v63 = vmax.f32 %v1824_v57, %v1825_v61  ;;  %v2056_v3 = vmin.f32 %v2054_v51, %v2055_v62 }
 0x2f1   : > { %v1847_v4 = vmax.f32 %v1845_v59, %v1846_v1  ;;  %v2077_v12 = vmin.f32 %v2075_v60, %v2076_v2 }
 0x2f2   : > { %v1827_v58 = vrot.slane %v1826_v63, 1  ;;  %v2057_v0 = vrot.slane %v2056_v3, 1 }
 0x2f3   : > { %v1848_v5 = vrot.slane %v1847_v4, 1  ;;  %v2078_v6 = vrot.slane %v2077_v12, 1 }
 0x2f4   : > { %v1828_v8 = vmax.f32 %v1826_v63, %v1827_v58  ;;  %v2058_v9 = vmin.f32 %v2056_v3, %v2057_v0 }
 0x2f5   : > { %v1849_v20 = vmax.f32 %v1847_v4, %v1848_v5  ;;  %v2079_v50 = vmin.f32 %v2077_v12, %v2078_v6 }
 0x2f7   : > { %v1861_v39 = vcombine.low %v1828_v8, %v1849_v20  ;;  %v2091_v10 = vcombine.low %v2058_v9, %v2079_v50 }
 0x2f9   : > { %v1889_v53 = vrot.slane %v1861_v39, %v15042_v7  ;;  %v2119_v54 = vrot.slane %v2091_v10, %v15042_v7 }
 0x2fb   : > { %v1891_v14 = vcombine.low %v1882_v13, %v1889_v53  ;;  %v2121_v17 = vcombine.low %v2112_v52, %v2119_v54 }
 0x2fd   : > { %v1905_v21 = vrot.slane %v1891_v14, %v15042_v7  ;;  %v2135_v19 = vrot.slane %v2121_v17, %v15042_v7  ;;  %2141 = sbr.rel (%p14512_p10) target bundleno = 2302 (0x8fe), region = 60 }
 0x2ff   : > { %v1906_v23 = vcombine.low %v1898_v24, %v1905_v21  ;;  %v2136_v25 = vcombine.low %v2128_v18, %v2135_v19 }
 0x301   : > { %v1908_v26 = vmax.f32 %v1681_v11, %v1906_v23  ;;  %v2138_v31 = vmin.f32 %v1911_v22, %v2136_v25 }
 0x303   : > { %1909 = vst [vmem:[%s1680_s28] ss:$4 sm:$0xff] %v1908_v26  ;;  %2139 = vst [vmem:[%s1910_s13] ss:$4 sm:$0xff] %v2138_v31 }
 0x304   : > { %v15093_v27 = vld [vmem:[%s20040_s4] sm:$0xff]  ;;  %v15103_v44 = vld [vmem:[%s20040_s4 + $0x8] sm:$0xff]  ;;  %v20046_v47 = vmov 0.0  }
 0x305   : > { %v15098_v30 = vld [vmem:[%s20040_s4 + $0x20] sm:$0xff]  ;;  %v15112_v37 = vld [vmem:[%s20040_s4 + $0x28] sm:$0xff]  ;;  %2400 = vmatprep.mubr.f32.mxu0 %v20046_v47  ;;  %v15130_v15 = vunpack.c.h.bf16 %v15093_v27  ;;  %3063 = vmatprep.mubr.f32.mxu1 %v20046_v47  ;;  %v15229_v2 = vunpack.c.h.bf16 %v15103_v44 }
 0x306   : > { %v15107_v49 = vcombine.high %v15093_v27, %v15098_v30  ;;  %v15116_v42 = vcombine.low %v15093_v27, %v15098_v30  ;;  %v15121_v34 = vld [vmem:[%s20040_s4 + $0x40] sm:$0xff]  ;;  %v15133_v38 = vunpack.c.h.bf16 %v15098_v30  ;;  %v15138_v56 = vcombine.high %v15103_v44, %v15112_v37  ;;  %v15151_v29 = vld [vmem:[%s20040_s4 + $0x48] sm:$0xff] }
 0x307   : > { %v15126_v35 = vld [vmem:[%s20040_s4 + $0x60] sm:$0xff]  ;;  %20890 = vst [vmem:[#allocation13_spill] sm:$0xff] %v15130_v15  ;;  %v15142_v16 = vcombine.low %v15103_v44, %v15112_v37  ;;  %v15156_v32 = vld [vmem:[%s20040_s4 + $0x68] sm:$0xff]  ;;  %v15193_v43 = vsub.f32 %v15130_v15, %v15130_v15  ;;  %20903 = vst [vmem:[#allocation26_spill] sm:$0xff] %v15229_v2 }
 0x308   : > { %20888 = vst [vmem:[#allocation11_spill] sm:$0xff] %v15107_v49  ;;  %20889 = vst [vmem:[#allocation12_spill] sm:$0xff] %v15116_v42  ;;  %v15146_v28 = vcombine.high %v15121_v34, %v15126_v35  ;;  %v15160_v36 = vcombine.low %v15121_v34, %v15126_v35  ;;  %v15165_v55 = vld [vmem:[%s20040_s4 + $0x80] sm:$0xff]  ;;  %11651 = vmatprep.subr.bf16.mxu0 %v15107_v49  ;;  %v15170_v40 = vcombine.high %v15151_v29, %v15156_v32  ;;  %v15184_v46 = vld [vmem:[%s20040_s4 + $0x88] sm:$0xff] }
 0x309   : > { %20891 = vst [vmem:[#allocation14_spill] sm:$0xff] %v15133_v38  ;;  %20892 = vst [vmem:[#allocation15_spill] sm:$0xff] %v15138_v56  ;;  %v15174_v41 = vcombine.low %v15151_v29, %v15156_v32  ;;  %v15179_v45 = vld [vmem:[%s20040_s4 + $0xa0] sm:$0xff]  ;;  %v15189_v48 = vld [vmem:[%s20040_s4 + $0xa8] sm:$0xff]  ;;  %v15197_v57 = vsub.f32 %v15133_v38, %v15133_v38  ;;  %11843 = vmatprep.subr.bf16.mxu1 %v15138_v56  ;;  %11653 = vmatpush1.bf16.msra.mxu0 %v15116_v42  ;;  %v20045_v5 = vand.u32 4294901760, %v15193_v43 }
 0x30a   : > { %20893 = vst [vmem:[#allocation16_spill] sm:$0xff] %v15142_v16  ;;  %20894 = vst [vmem:[#allocation17_spill] sm:$0xff] %v15146_v28  ;;  %v15203_v51 = vcombine.high %v15165_v55, %v15179_v45  ;;  %v15207_v59 = vcombine.high %v15184_v46, %v15189_v48  ;;  %v15211_v60 = vcombine.low %v15165_v55, %v15179_v45  ;;  %v15216_v61 = vld [vmem:[%s20040_s4 + $0xc0] sm:$0xff]  ;;  %v15226_v1 = vld [vmem:[%s20040_s4 + $0xc8] sm:$0xff]  ;;  %11845 = vmatpush1.bf16.msra.mxu1 %v15142_v16 }
 0x30b   : > { %20895 = vst [vmem:[#allocation18_spill] sm:$0xff] %v15160_v36  ;;  %20896 = vst [vmem:[#allocation19_spill] sm:$0xff] %v15170_v40  ;;  %v15221_v62 = vld [vmem:[%s20040_s4 + $0xe0] sm:$0xff]  ;;  %11655 = vmatprep.subr.bf16.mxu0 %v15146_v28  ;;  %v15235_v63 = vcombine.low %v15184_v46, %v15189_v48  ;;  %v15244_v4 = vld [vmem:[%s20040_s4 + $0xe8] sm:$0xff]  ;;  %11847 = vmatprep.subr.bf16.mxu1 %v15170_v40  ;;  %v2414_v17 = vsub.f32 %v15193_v43, %v20045_v5  ;;  %v20919_v15 = vand.u32 4294901760, %v15197_v57 }
 0x30c   : > { %20897 = vst [vmem:[#allocation20_spill] sm:$0xff] %v15174_v41  ;;  %20898 = vst [vmem:[#allocation21_spill] sm:$0xff] %v15193_v43  ;;  %v15239_v3 = vcombine.high %v15216_v61, %v15221_v62  ;;  %v15248_v12 = vcombine.low %v15216_v61, %v15221_v62  ;;  %v15253_v58 = vld [vmem:[%s20040_s4 + $0x100] sm:$0xff]  ;;  %v15264_v6 = vcombine.high %v15226_v1, %v15244_v4  ;;  %v15277_v20 = vld [vmem:[%s20040_s4 + $0x108] sm:$0xff]  ;;  %v15416_v42 = vunpack.c.h.bf16 %v15112_v37 }
 0x30d   : > { %20899 = vst [vmem:[#allocation22_spill] sm:$0xff] %v15197_v57  ;;  %20900 = vst [vmem:[#allocation23_spill] sm:$0xff] %v15203_v51  ;;  %v15258_v0 = vld [vmem:[%s20040_s4 + $0x120] sm:$0xff]  ;;  %v15268_v8 = vcombine.low %v15226_v1, %v15244_v4  ;;  %v15282_v50 = vld [vmem:[%s20040_s4 + $0x128] sm:$0xff]  ;;  %11657 = vmatpush1.bf16.msra.mxu0 %v15160_v36  ;;  %v2415_v38 = vand.u32 4294901760, %v2414_v17  ;;  %v2424_v7 = vsub.f32 %v15197_v57, %v20919_v15  ;;  %v15426_v57 = vunpack.c.l.bf16 %v15093_v27 }
 0x30e   : > { %20901 = vst [vmem:[#allocation24_spill] sm:$0xff] %v15207_v59  ;;  %20902 = vst [vmem:[#allocation25_spill] sm:$0xff] %v15211_v60  ;;  %v15272_v9 = vcombine.high %v15253_v58, %v15258_v0  ;;  %v15286_v39 = vcombine.low %v15253_v58, %v15258_v0  ;;  %v15291_v10 = vld [vmem:[%s20040_s4 + $0x140] sm:$0xff]  ;;  %v15295_v13 = vcombine.high %v15277_v20, %v15282_v50  ;;  %v15309_v54 = vld [vmem:[%s20040_s4 + $0x148] sm:$0xff]  ;;  %11849 = vmatpush1.bf16.msra.mxu1 %v15174_v41 }
 0x30f   : > { %20904 = vst [vmem:[#allocation27_spill] sm:$0xff] %v15235_v63  ;;  %20905 = vst [vmem:[#allocation28_spill] sm:$0xff] %v15239_v3  ;;  %v15299_v52 = vcombine.low %v15277_v20, %v15282_v50  ;;  %v15304_v53 = vld [vmem:[%s20040_s4 + $0x160] sm:$0xff]  ;;  %v15314_v14 = vld [vmem:[%s20040_s4 + $0x168] sm:$0xff]  ;;  %11659 = vmatprep.subr.bf16.mxu0 %v15203_v51  ;;  %11851 = vmatprep.subr.bf16.mxu1 %v15207_v59  ;;  %v2425_v28 = vand.u32 4294901760, %v2424_v7  ;;  %v15421_v56 = vsub.f32 %v15229_v2, %v15229_v2 }
 0x310   : > { %20906 = vst [vmem:[#allocation29_spill] sm:$0xff] %v15248_v12  ;;  %20907 = vst [vmem:[#allocation30_spill] sm:$0xff] %v15264_v6  ;;  %v15323_v18 = vcombine.high %v15291_v10, %v15304_v53  ;;  %v15327_v21 = vcombine.high %v15309_v54, %v15314_v14  ;;  %v15331_v19 = vcombine.low %v15291_v10, %v15304_v53  ;;  %v15340_v22 = vld [vmem:[%s20040_s4 + $0x180] sm:$0xff]  ;;  %v15350_v25 = vld [vmem:[%s20040_s4 + $0x188] sm:$0xff]  ;;  %v15429_v43 = vunpack.c.l.bf16 %v15098_v30 }
 0x311   : > { %20908 = vst [vmem:[#allocation31_spill] sm:$0xff] %v15268_v8  ;;  %20909 = vst [vmem:[#allocation32_spill] sm:$0xff] %v15272_v9  ;;  %v15335_v11 = vcombine.low %v15309_v54, %v15314_v14  ;;  %v15345_v23 = vld [vmem:[%s20040_s4 + $0x1a0] sm:$0xff]  ;;  %v15361_v31 = vld [vmem:[%s20040_s4 + $0x1a8] sm:$0xff]  ;;  %11661 = vmatpush1.bf16.msra.mxu0 %v15211_v60  ;;  %v15433_v7 = vpack.c.bf16 %v2425_v28, %v2415_v38  ;;  %v15437_v60 = vsub.f32 %v15416_v42, %v15416_v42 }
 0x312   : > { %20910 = vst [vmem:[#allocation33_spill] sm:$0xff] %v15286_v39  ;;  %20911 = vst [vmem:[#allocation34_spill] sm:$0xff] %v15295_v13  ;;  %v15356_v26 = vcombine.high %v15340_v22, %v15345_v23  ;;  %v15365_v5 = vcombine.low %v15340_v22, %v15345_v23  ;;  %v15370_v47 = vld [vmem:[%s20040_s4 + $0x1c0] sm:$0xff]  ;;  %v15383_v33 = vcombine.high %v15350_v25, %v15361_v31  ;;  %v15396_v17 = vld [vmem:[%s20040_s4 + $0x1c8] sm:$0xff]  ;;  %11853 = vmatpush1.bf16.msra.mxu1 %v15235_v63 }
 0x313   : > { %20912 = vst [vmem:[#allocation35_spill] sm:$0xff] %v15299_v52  ;;  %20913 = vst [vmem:[#allocation36_spill] sm:$0xff] %v15323_v18  ;;  %v15375_v24 = vld [vmem:[%s20040_s4 + $0x1e0] sm:$0xff]  ;;  %v15387_v41 = vcombine.low %v15350_v25, %v15361_v31  ;;  %v15401_v15 = vld [vmem:[%s20040_s4 + $0x1e8] sm:$0xff]  ;;  %11663 = vmatprep.subr.bf16.mxu0 %v15239_v3  ;;  %v15440_v2 = vunpack.c.l.bf16 %v15103_v44  ;;  %11855 = vmatprep.subr.bf16.mxu1 %v15264_v6  ;;  %v15452_v38 = vsub.f32 %v15426_v57, %v15426_v57 }
 0x314   : > { %20914 = vst [vmem:[#allocation37_spill] sm:$0xff] %v15327_v21  ;;  %20915 = vst [vmem:[#allocation38_spill] sm:$0xff] %v15331_v19  ;;  %v15391_v51 = vcombine.high %v15370_v47, %v15375_v24  ;;  %v15405_v59 = vcombine.low %v15370_v47, %v15375_v24  ;;  %v2335_v36 = vld [vmem:[#allocation2] sm:$0x1]  ;;  %v15409_v40 = vcombine.high %v15396_v17, %v15401_v15 }
 0x315   : > { %20916 = vst [vmem:[#allocation39_spill] sm:$0xff] %v15335_v11  ;;  %20917 = vst [vmem:[#allocation40_spill] sm:$0xff] %v15356_v26  ;;  %v15413_v16 = vcombine.low %v15396_v17, %v15401_v15  ;;  %v15423_v49 = vand.u32 4294901760, %v2335_v36  ;;  %v15456_v28 = vsub.f32 %v15429_v43, %v15429_v43  ;;  %11665 = vmatpush1.bf16.msra.mxu0 %v15248_v12 }
 0x316   : > { %20918 = vst [vmem:[#allocation41_spill] sm:$0xff] %v15365_v5  ;;  %20920 = vst [vmem:[#allocation42_spill] sm:$0xff] %v15383_v33  ;;  %11857 = vmatpush1.bf16.msra.mxu1 %v15268_v8  ;;  %11667 = vmatprep.subr.bf16.mxu0 %v15272_v9  ;;  %v20941_v8 = vand.u32 4294901760, %v15452_v38 }
 0x317   : > { %20921 = vst [vmem:[#allocation43_spill] sm:$0xff] %v15387_v41  ;;  %20922 = vst [vmem:[#allocation44_spill] sm:$0xff] %v15391_v51  ;;  %v15448_v30 = vsub.f32 %v2335_v36, %v15423_v49  ;;  %v15468_v36 = vunpack.c.h.bf16 %v15121_v34  ;;  %11859 = vmatprep.subr.bf16.mxu1 %v15295_v13  ;;  %v20942_v3 = vand.u32 4294901760, %v15456_v28 }
 0x318   : > { %20923 = vst [vmem:[#allocation45_spill] sm:$0xff] %v15401_v15  ;;  %20924 = vst [vmem:[#allocation46_spill] sm:$0xff] %v15405_v59  ;;  %v15443_v15 = vunpack.c.l.bf16 %v15112_v37  ;;  %v15461_v37 = vsub.f32 %v15440_v2, %v15440_v2  ;;  %v2419_v9 = vsub.f32 %v15452_v38, %v20941_v8 }
 0x319   : > { %20925 = vst [vmem:[#allocation47_spill] sm:$0xff] %v15409_v40  ;;  %20926 = vst [vmem:[#allocation48_spill] sm:$0xff] %v15413_v16  ;;  %11669 = vmatpush1.bf16.msra.mxu0 %v15286_v39 }
 0x31a   : > { %20927 = vst [vmem:[#allocation49_spill] sm:$0xff] %v15416_v42  ;;  %20928 = vst [vmem:[#allocation50_spill] sm:$0xff] %v15423_v49  ;;  %v15465_v27 = vsub.f32 %v15443_v15, %v15443_v15  ;;  %v20937_v42 = vand.u32 4294901760, %v15421_v56  ;;  %v20943_v63 = vand.u32 4294901760, %v15461_v37  ;;  %v2420_v13 = vand.u32 4294901760, %v2419_v9  ;;  %11861 = vmatpush1.bf16.msra.mxu1 %v15299_v52  ;;  %11671 = vmatprep.subr.bf16.mxu0 %v15323_v18 }
 0x31b   : > { %20929 = vst [vmem:[#allocation51_spill] sm:$0xff] %v15426_v57  ;;  %20930 = vst [vmem:[#allocation52_spill] sm:$0xff] %v15429_v43  ;;  %v15475_v57 = vand.u32 4294901760, %v15448_v30  ;;  %11863 = vmatprep.subr.bf16.mxu1 %v15327_v21  ;;  %v15840_v21 = vunpack.c.h.bf16 %v15282_v50  ;;  %v15912_v18 = vunpack.c.h.bf16 %v15304_v53 }
 0x31c   : > { %20931 = vst [vmem:[#allocation53_spill] sm:$0xff] %v15433_v7  ;;  %20932 = vst [vmem:[#allocation54_spill] sm:$0xff] %v15437_v60  ;;  %v3077_v43 = vsub.f32 %v15421_v56, %v20937_v42  ;;  %v15487_v42 = vunpack.c.h.bf16 %v15126_v35  ;;  %v3082_v49 = vsub.f32 %v15461_v37, %v20943_v63 }
 0x31d   : > { %20933 = vst [vmem:[#allocation55_spill] sm:$0xff] %v15440_v2  ;;  %20934 = vst [vmem:[#allocation56_spill] sm:$0xff] %v15443_v15  ;;  %v20939_v15 = vand.u32 4294901760, %v15437_v60  ;;  %v2404_v2 = vsub.f32 %v15448_v30, %v15475_v57  ;;  %11673 = vmatpush1.bf16.msra.mxu0 %v15331_v19  ;;  %v15933_v39 = vsub.f32 %v15912_v18, %v15912_v18 }
 0x31e   : > { %20935 = vst [vmem:[#allocation57_spill] sm:$0xff] %v15448_v30  ;;  %20936 = vst [vmem:[#allocation58_spill] sm:$0xff] %v15468_v36  ;;  %v3078_v44 = vand.u32 4294901760, %v3077_v43  ;;  %11865 = vmatpush1.bf16.msra.mxu1 %v15335_v11  ;;  %11675 = vmatprep.subr.bf16.mxu0 %v15356_v26 }
 0x31f   : > { %20938 = vst [vmem:[#allocation59_spill] sm:$0xff] %v15475_v57  ;;  %v3087_v6 = vsub.f32 %v15437_v60, %v20939_v15  ;;  %20940 = vst [vmem:[#allocation60_spill] sm:$0xff] %v15487_v42  ;;  %v2429_v15 = vsub.f32 %v15456_v28, %v20942_v3  ;;  %v20944_v60 = vand.u32 4294901760, %v15465_v27  ;;  %v15506_v57 = vsub.f32 %v15468_v36, %v15468_v36 }
 0x320   : > { %v15509_v8 = vand.u32 4294901760, %v2404_v2  ;;  %v15513_v3 = vsub.f32 %v15487_v42, %v15487_v42  ;;  %v15528_v42 = vunpack.c.h.bf16 %v15156_v32  ;;  %11867 = vmatprep.subr.bf16.mxu1 %v15383_v33  ;;  %v15605_v33 = vunpack.c.h.bf16 %v15179_v45  ;;  %21004 = vst [vmem:[#allocation111_spill] sm:$0xff] %v15840_v21  ;;  %21015 = vst [vmem:[#allocation122_spill] sm:$0xff] %v15912_v18 }
 0x321   : > { %v3088_v12 = vand.u32 4294901760, %v3087_v6  ;;  %v3092_v43 = vsub.f32 %v15465_v27, %v20944_v60  ;;  %v2430_v30 = vand.u32 4294901760, %v2429_v15  ;;  %v3083_v60 = vand.u32 4294901760, %v3082_v49  ;;  %11677 = vmatpush1.bf16.msra.mxu0 %v15365_v5  ;;  %21019 = vst [vmem:[#allocation125_spill] sm:$0xff] %v15933_v39 }
 0x322   : > { %20945 = vst [vmem:[#allocation61_spill] sm:$0xff] %v15509_v8  ;;  %v20115_v36 = vand.u32 4294901760, %v15506_v57  ;;  %v20114_v9 = vand.u32 4294901760, %v15513_v3  ;;  %v15525_v15 = vunpack.c.h.bf16 %v15151_v29  ;;  %20949 = vst [vmem:[#allocation65_spill] sm:$0xff] %v15528_v42  ;;  %11869 = vmatpush1.bf16.msra.mxu1 %v15387_v41  ;;  %11679 = vmatprep.subr.bf16.mxu0 %v15391_v51  ;;  %v15620_v19 = vsub.f32 %v15605_v33, %v15605_v33 }
 0x323   : > { %v15517_v63 = vpack.c.bf16 %v3088_v12, %v3078_v44  ;;  %v3093_v6 = vand.u32 4294901760, %v3092_v43  ;;  %v15521_v2 = vpack.c.bf16 %v2430_v30, %v2420_v13  ;;  %v15536_v12 = vunpack.c.l.bf16 %v15121_v34  ;;  %20962 = vst [vmem:[#allocation75_spill] sm:$0xff] %v15605_v33  ;;  %11871 = vmatprep.subr.bf16.mxu1 %v15409_v40 }
 0x324   : > { %20948 = vst [vmem:[#allocation64_spill] sm:$0xff] %v15525_v15  ;;  %v2434_v49 = vsub.f32 %v15506_v57, %v20115_v36  ;;  %v15539_v13 = vunpack.c.l.bf16 %v15126_v35  ;;  %v2444_v30 = vsub.f32 %v15513_v3, %v20114_v9  ;;  %v15547_v44 = vsub.f32 %v15525_v15, %v15525_v15  ;;  %20964 = vst [vmem:[#allocation76_spill] sm:$0xff] %v15620_v19 }
 0x325   : > { %20946 = vst [vmem:[#allocation62_spill] sm:$0xff] %v15517_v63  ;;  %20947 = vst [vmem:[#allocation63_spill] sm:$0xff] %v15521_v2  ;;  %v15530_v52 = vpack.c.bf16 %v3093_v6, %v3083_v60  ;;  %v15551_v43 = vsub.f32 %v15528_v42, %v15528_v42  ;;  %v15554_v34 = vunpack.c.l.bf16 %v15151_v29  ;;  %v15560_v60 = vsub.f32 %v15536_v12, %v15536_v12 }
 0x326   : > { %20951 = vst [vmem:[#allocation67_spill] sm:$0xff] %v15536_v12  ;;  %20952 = vst [vmem:[#allocation68_spill] sm:$0xff] %v15539_v13  ;;  %v2435_v35 = vand.u32 4294901760, %v2434_v49  ;;  %v15564_v6 = vsub.f32 %v15539_v13, %v15539_v13  ;;  %v15567_v9 = vunpack.c.l.bf16 %v15156_v32  ;;  %v2445_v29 = vand.u32 4294901760, %v2444_v30  ;;  %11681 = vmatpush1.bf16.msra.mxu0 %v15405_v59  ;;  %11873 = vmatpush1.bf16.msra.mxu1 %v15413_v16 }
 0x327   : > { %20950 = vst [vmem:[#allocation66_spill] sm:$0xff] %v15530_v52  ;;  %20953 = vst [vmem:[#allocation69_spill] sm:$0xff] %v15554_v34  ;;  %v20124_v36 = vand.u32 4294901760, %v15547_v44  ;;  %v15574_v49 = vsub.f32 %v15554_v34, %v15554_v34  ;;  %v15583_v32 = vunpack.c.h.bf16 %v15165_v55  ;;  %v20959_v34 = vand.u32 4294901760, %v15551_v43  ;;  %11683 = vmatprep.subr.bf16.mxu0 %v15433_v7  ;;  %11875 = vmatprep.subr.bf16.mxu1 %v15517_v63 }
 0x328   : > { %20954 = vst [vmem:[#allocation70_spill] sm:$0xff] %v15567_v9  ;;  %v15580_v13 = vsub.f32 %v15567_v9, %v15567_v9  ;;  %v15586_v30 = vpack.c.bf16 %v2445_v29, %v2435_v35  ;;  %v20960_v9 = vand.u32 4294901760, %v15560_v60  ;;  %v20961_v35 = vand.u32 4294901760, %v15564_v6 }
 0x329   : > { %20955 = vst [vmem:[#allocation71_spill] sm:$0xff] %v15574_v49  ;;  %20957 = vst [vmem:[#allocation73_spill] sm:$0xff] %v15583_v32  ;;  %v3097_v42 = vsub.f32 %v15547_v44, %v20124_v36  ;;  %v3107_v15 = vsub.f32 %v15551_v43, %v20959_v34  ;;  %v20963_v41 = vand.u32 4294901760, %v15574_v49  ;;  %v15635_v33 = vunpack.c.h.bf16 %v15189_v48  ;;  %2406 = vmatmul.mubr.f32.vlgmr.msra.gmra.mrb[0].mxu0 %v15509_v8 }
 0x32a   : > { %20956 = vst [vmem:[#allocation72_spill] sm:$0xff] %v15580_v13  ;;  %20958 = vst [vmem:[#allocation74_spill] sm:$0xff] %v15586_v30  ;;  %v2439_v5 = vsub.f32 %v15560_v60, %v20960_v9  ;;  %v2449_v29 = vsub.f32 %v15564_v6, %v20961_v35  ;;  %v20138_v36 = vand.u32 4294901760, %v15580_v13  ;;  %v15613_v9 = vsub.f32 %v15583_v32, %v15583_v32 }
 0x32b   : > { %v3098_v34 = vand.u32 4294901760, %v3097_v42  ;;  %v3108_v12 = vand.u32 4294901760, %v3107_v15  ;;  %v3102_v51 = vsub.f32 %v15574_v49, %v20963_v41  ;;  %v15627_v32 = vunpack.c.h.bf16 %v15184_v46  ;;  %20968 = vst [vmem:[#allocation80_spill] sm:$0xff] %v15635_v33  ;;  %11685 = vmatpush1.bf16.msra.mxu0 %v15521_v2  ;;  %3069 = vmatmul.mubr.f32.vlgmr.msra.gmra.mrb[0].mxu1 %v15509_v8 }
 0x32c   : > { %v2440_v11 = vand.u32 4294901760, %v2439_v5  ;;  %v2450_v26 = vand.u32 4294901760, %v2449_v29  ;;  %v3112_v35 = vsub.f32 %v15580_v13, %v20138_v36  ;;  %v20140_v41 = vand.u32 4294901760, %v15613_v9  ;;  %11877 = vmatpush1.bf16.msra.mxu1 %v15530_v52  ;;  %11687 = vmatprep.subr.bf16.mxu0 %v15586_v30 }
 0x32d   : > { %v15623_v42 = vpack.c.bf16 %v3108_v12, %v3098_v34  ;;  %v3103_v15 = vand.u32 4294901760, %v3102_v51  ;;  %20966 = vst [vmem:[#allocation78_spill] sm:$0xff] %v15627_v32  ;;  %v20142_v36 = vand.u32 4294901760, %v15620_v19  ;;  %v15643_v12 = vsub.f32 %v15627_v32, %v15627_v32 }
 0x32e   : > { %v15631_v5 = vpack.c.bf16 %v2450_v26, %v2440_v11  ;;  %v3113_v29 = vand.u32 4294901760, %v3112_v35  ;;  %v2454_v51 = vsub.f32 %v15613_v9, %v20140_v41  ;;  %v15646_v34 = vunpack.c.l.bf16 %v15165_v55 }
 0x32f   : > { %20965 = vst [vmem:[#allocation77_spill] sm:$0xff] %v15623_v42  ;;  %20969 = vst [vmem:[#allocation81_spill] sm:$0xff] %v15643_v12  ;;  %v15649_v11 = vunpack.c.l.bf16 %v15179_v45  ;;  %v2464_v35 = vsub.f32 %v15620_v19, %v20142_v36  ;;  %v15659_v41 = vsub.f32 %v15635_v33, %v15635_v33  ;;  %v15662_v32 = vunpack.c.l.bf16 %v15184_v46  ;;  %11879 = vmatprep.subr.bf16.mxu1 %v15623_v42 }
 0x330   : > { %20967 = vst [vmem:[#allocation79_spill] sm:$0xff] %v15631_v5  ;;  %20970 = vst [vmem:[#allocation82_spill] sm:$0xff] %v15646_v34  ;;  %v15652_v26 = vpack.c.bf16 %v3113_v29, %v3103_v15  ;;  %v2455_v55 = vand.u32 4294901760, %v2454_v51  ;;  %v20150_v45 = vand.u32 4294901760, %v15643_v12  ;;  %v15669_v15 = vsub.f32 %v15646_v34, %v15646_v34  ;;  %11689 = vmatpush1.bf16.msra.mxu0 %v15631_v5 }
 0x331   : > { %20971 = vst [vmem:[#allocation83_spill] sm:$0xff] %v15649_v11  ;;  %20973 = vst [vmem:[#allocation85_spill] sm:$0xff] %v15659_v41  ;;  %v15673_v29 = vsub.f32 %v15649_v11, %v15649_v11  ;;  %v2465_v46 = vand.u32 4294901760, %v2464_v35  ;;  %v15679_v33 = vunpack.c.l.bf16 %v15189_v48  ;;  %v15683_v51 = vsub.f32 %v15662_v32, %v15662_v32 }
 0x332   : > { %20972 = vst [vmem:[#allocation84_spill] sm:$0xff] %v15652_v26  ;;  %20974 = vst [vmem:[#allocation86_spill] sm:$0xff] %v15662_v32  ;;  %v3117_v11 = vsub.f32 %v15643_v12, %v20150_v45  ;;  %v20154_v34 = vand.u32 4294901760, %v15669_v15  ;;  %v15692_v35 = vunpack.c.h.bf16 %v15216_v61  ;;  %v20980_v36 = vmov 0.0   ;;  %11881 = vmatpush1.bf16.msra.mxu1 %v15652_v26 }
 0x333   : > { %20975 = vst [vmem:[#allocation87_spill] sm:$0xff] %v15669_v15  ;;  %20976 = vst [vmem:[#allocation88_spill] sm:$0xff] %v15673_v29  ;;  %2604 = vmatprep.mubr.f32.mxu0 %v20980_v36  ;;  %v15695_v48 = vpack.c.bf16 %v2465_v46, %v2455_v55  ;;  %v20982_v32 = vand.u32 4294901760, %v15659_v41  ;;  %v15703_v45 = vsub.f32 %v15679_v33, %v15679_v33  ;;  %3267 = vmatprep.mubr.f32.mxu1 %v20980_v36 }
 0x334   : > { %20977 = vst [vmem:[#allocation89_spill] sm:$0xff] %v15679_v33  ;;  %20978 = vst [vmem:[#allocation90_spill] sm:$0xff] %v15683_v51  ;;  %v3118_v52 = vand.u32 4294901760, %v3117_v11  ;;  %v2459_v55 = vsub.f32 %v15669_v15, %v20154_v34  ;;  %v20984_v46 = vand.u32 4294901760, %v15673_v29  ;;  %v20986_v33 = vand.u32 4294901760, %v15683_v51 }
 0x335   : > { %20979 = vst [vmem:[#allocation91_spill] sm:$0xff] %v15692_v35  ;;  %20981 = vst [vmem:[#allocation92_spill] sm:$0xff] %v15695_v48  ;;  %v3127_v30 = vsub.f32 %v15659_v41, %v20982_v32  ;;  %v15714_v32 = vunpack.c.h.bf16 %v15221_v62  ;;  %11691 = vmatprep.subr.bf16.mxu0 %v15695_v48  ;;  %v20163_v5 = vand.u32 4294901760, %v15703_v45  ;;  %v15724_v34 = vsub.f32 %v15692_v35, %v15692_v35 }
 0x336   : > { %20983 = vst [vmem:[#allocation93_spill] sm:$0xff] %v15703_v45  ;;  %v2469_v2 = vsub.f32 %v15673_v29, %v20984_v46  ;;  %v3122_v11 = vsub.f32 %v15683_v51, %v20986_v33  ;;  %v2460_v63 = vand.u32 4294901760, %v2459_v55  ;;  %v15731_v26 = vunpack.c.h.bf16 %v15226_v1 }
 0x337   : > { %20985 = vst [vmem:[#allocation94_spill] sm:$0xff] %v15714_v32  ;;  %v3128_v42 = vand.u32 4294901760, %v3127_v30  ;;  %20987 = vst [vmem:[#allocation95_spill] sm:$0xff] %v15724_v34  ;;  %v15728_v7 = vsub.f32 %v15714_v32, %v15714_v32  ;;  %v3132_v33 = vsub.f32 %v15703_v45, %v20163_v5  ;;  %v20164_v8 = vand.u32 4294901760, %v15724_v34 }
 0x338   : > { %v2470_v46 = vand.u32 4294901760, %v2469_v2  ;;  %20989 = vst [vmem:[#allocation97_spill] sm:$0xff] %v15731_v26  ;;  %v3123_v48 = vand.u32 4294901760, %v3122_v11  ;;  %v15743_v55 = vunpack.c.h.bf16 %v15244_v4  ;;  %v15747_v32 = vsub.f32 %v15731_v26, %v15731_v26 }
 0x339   : > { %20988 = vst [vmem:[#allocation96_spill] sm:$0xff] %v15728_v7  ;;  %v15733_v30 = vpack.c.bf16 %v3128_v42, %v3118_v52  ;;  %v20167_v2 = vand.u32 4294901760, %v15728_v7  ;;  %v3133_v52 = vand.u32 4294901760, %v3132_v33  ;;  %v2474_v42 = vsub.f32 %v15724_v34, %v20164_v8 }
 0x33a   : > { %v15739_v35 = vpack.c.bf16 %v2470_v46, %v2460_v63  ;;  %20992 = vst [vmem:[#allocation100_spill] sm:$0xff] %v15743_v55  ;;  %v15754_v11 = vunpack.c.l.bf16 %v15216_v61  ;;  %v15757_v63 = vunpack.c.l.bf16 %v15221_v62  ;;  %v20171_v5 = vand.u32 4294901760, %v15747_v32 }
 0x33b   : > { %20990 = vst [vmem:[#allocation98_spill] sm:$0xff] %v15733_v30  ;;  %11883 = vmatprep.subr.bf16.mxu1 %v15733_v30  ;;  %v2484_v46 = vsub.f32 %v15728_v7, %v20167_v2  ;;  %v15766_v33 = vsub.f32 %v15743_v55, %v15743_v55  ;;  %v15769_v8 = vunpack.c.l.bf16 %v15226_v1  ;;  %v15771_v61 = vpack.c.bf16 %v3133_v52, %v3123_v48 }
 0x33c   : > { %20991 = vst [vmem:[#allocation99_spill] sm:$0xff] %v15739_v35  ;;  %20993 = vst [vmem:[#allocation101_spill] sm:$0xff] %v15754_v11  ;;  %11693 = vmatpush1.bf16.msra.mxu0 %v15739_v35  ;;  %v2475_v26 = vand.u32 4294901760, %v2474_v42  ;;  %v15775_v62 = vsub.f32 %v15754_v11, %v15754_v11  ;;  %v15779_v35 = vsub.f32 %v15757_v63, %v15757_v63  ;;  %v15786_v1 = vunpack.c.l.bf16 %v15244_v4 }
 0x33d   : > { %20994 = vst [vmem:[#allocation102_spill] sm:$0xff] %v15757_v63  ;;  %20995 = vst [vmem:[#allocation103_spill] sm:$0xff] %v15769_v8  ;;  %v2485_v2 = vand.u32 4294901760, %v2484_v46  ;;  %v3137_v55 = vsub.f32 %v15747_v32, %v20171_v5  ;;  %v20175_v30 = vand.u32 4294901760, %v15766_v33  ;;  %11885 = vmatpush1.bf16.msra.mxu1 %v15771_v61  ;;  %v15793_v42 = vsub.f32 %v15769_v8, %v15769_v8 }
 0x33e   : > { %20996 = vst [vmem:[#allocation104_spill] sm:$0xff] %v15771_v61  ;;  %20997 = vst [vmem:[#allocation105_spill] sm:$0xff] %v15786_v1  ;;  %v20177_v48 = vand.u32 4294901760, %v15775_v62  ;;  %v15796_v46 = vunpack.c.h.bf16 %v15253_v58  ;;  %v15805_v11 = vsub.f32 %v15786_v1, %v15786_v1  ;;  %v21000_v8 = vand.u32 4294901760, %v15779_v35 }
 0x33f   : > { %v15798_v63 = vpack.c.bf16 %v2485_v2, %v2475_v26  ;;  %v3138_v5 = vand.u32 4294901760, %v3137_v55  ;;  %v3147_v4 = vsub.f32 %v15766_v33, %v20175_v30  ;;  %v20188_v26 = vand.u32 4294901760, %v15793_v42 }
 0x340   : > { %20998 = vst [vmem:[#allocation106_spill] sm:$0xff] %v15796_v46  ;;  %v2479_v52 = vsub.f32 %v15775_v62, %v20177_v48  ;;  %v2489_v61 = vsub.f32 %v15779_v35, %v21000_v8  ;;  %v15815_v2 = vunpack.c.h.bf16 %v15258_v0  ;;  %v20190_v30 = vand.u32 4294901760, %v15805_v11 }
 0x341   : > { %20999 = vst [vmem:[#allocation107_spill] sm:$0xff] %v15798_v63  ;;  %11695 = vmatprep.subr.bf16.mxu0 %v15798_v63  ;;  %v3148_v55 = vand.u32 4294901760, %v3147_v4  ;;  %v15821_v1 = vsub.f32 %v15796_v46, %v15796_v46  ;;  %v15824_v48 = vunpack.c.h.bf16 %v15277_v20  ;;  %v3142_v8 = vsub.f32 %v15793_v42, %v20188_v26 }
 0x342   : > { %21001 = vst [vmem:[#allocation108_spill] sm:$0xff] %v15815_v2  ;;  %v2480_v16 = vand.u32 4294901760, %v2479_v52  ;;  %v2490_v59 = vand.u32 4294901760, %v2489_v61  ;;  %v15831_v40 = vsub.f32 %v15815_v2, %v15815_v2  ;;  %v3152_v46 = vsub.f32 %v15805_v11, %v20190_v30 }
 0x343   : > { %21002 = vst [vmem:[#allocation109_spill] sm:$0xff] %v15824_v48  ;;  %v15833_v4 = vpack.c.bf16 %v3148_v55, %v3138_v5  ;;  %v20191_v63 = vand.u32 4294901760, %v15821_v1  ;;  %v3143_v52 = vand.u32 4294901760, %v3142_v8  ;;  %v15847_v2 = vsub.f32 %v15824_v48, %v15824_v48 }
 0x344   : > { %v15842_v61 = vpack.c.bf16 %v2490_v59, %v2480_v16  ;;  %v20196_v26 = vand.u32 4294901760, %v15831_v40  ;;  %v3153_v5 = vand.u32 4294901760, %v3152_v46  ;;  %v15855_v30 = vsub.f32 %v15840_v21, %v15840_v21 }
 0x345   : > { %21003 = vst [vmem:[#allocation110_spill] sm:$0xff] %v15833_v4  ;;  %11887 = vmatprep.subr.bf16.mxu1 %v15833_v4  ;;  %v2494_v55 = vsub.f32 %v15821_v1, %v20191_v63  ;;  %v15858_v16 = vunpack.c.l.bf16 %v15253_v58  ;;  %v20197_v8 = vand.u32 4294901760, %v15847_v2  ;;  %v15866_v46 = vunpack.c.l.bf16 %v15258_v0 }
 0x346   : > { %21005 = vst [vmem:[#allocation112_spill] sm:$0xff] %v15842_v61  ;;  %11697 = vmatpush1.bf16.msra.mxu0 %v15842_v61  ;;  %v2504_v59 = vsub.f32 %v15831_v40, %v20196_v26  ;;  %v15869_v63 = vunpack.c.l.bf16 %v15277_v20  ;;  %v15871_v48 = vpack.c.bf16 %v3153_v5, %v3143_v52  ;;  %v20201_v58 = vand.u32 4294901760, %v15855_v30 }
 0x347   : > { %21006 = vst [vmem:[#allocation113_spill] sm:$0xff] %v15858_v16  ;;  %21007 = vst [vmem:[#allocation114_spill] sm:$0xff] %v15866_v46  ;;  %v2495_v21 = vand.u32 4294901760, %v2494_v55  ;;  %v15876_v61 = vsub.f32 %v15858_v16, %v15858_v16  ;;  %v3157_v26 = vsub.f32 %v15847_v2, %v20197_v8  ;;  %v15883_v0 = vsub.f32 %v15866_v46, %v15866_v46 }
 0x348   : > { %21008 = vst [vmem:[#allocation115_spill] sm:$0xff] %v15869_v63  ;;  %21009 = vst [vmem:[#allocation116_spill] sm:$0xff] %v15871_v48  ;;  %v2505_v4 = vand.u32 4294901760, %v2504_v59  ;;  %v15886_v20 = vunpack.c.l.bf16 %v15282_v50  ;;  %11889 = vmatpush1.bf16.msra.mxu1 %v15871_v48  ;;  %v3167_v52 = vsub.f32 %v15855_v30, %v20201_v58  ;;  %v15895_v55 = vsub.f32 %v15869_v63, %v15869_v63 }
 0x349   : > { %21010 = vst [vmem:[#allocation117_spill] sm:$0xff] %v15876_v61  ;;  %21011 = vst [vmem:[#allocation118_spill] sm:$0xff] %v15883_v0  ;;  %v20205_v5 = vand.u32 4294901760, %v15876_v61  ;;  %v15898_v59 = vunpack.c.h.bf16 %v15291_v10  ;;  %v3158_v46 = vand.u32 4294901760, %v3157_v26  ;;  %v20210_v50 = vand.u32 4294901760, %v15883_v0 }
 0x34a   : > { %21012 = vst [vmem:[#allocation119_spill] sm:$0xff] %v15886_v20  ;;  %v15900_v8 = vpack.c.bf16 %v2505_v4, %v2495_v21  ;;  %v15905_v16 = vsub.f32 %v15886_v20, %v15886_v20  ;;  %v3168_v48 = vand.u32 4294901760, %v3167_v52  ;;  %v15924_v52 = vunpack.c.h.bf16 %v15309_v54 }
 0x34b   : > { %21013 = vst [vmem:[#allocation120_spill] sm:$0xff] %v15898_v59  ;;  %v2499_v58 = vsub.f32 %v15876_v61, %v20205_v5  ;;  %v2509_v21 = vsub.f32 %v15883_v0, %v20210_v50  ;;  %v15921_v4 = vsub.f32 %v15898_v59, %v15898_v59  ;;  %v21018_v20 = vand.u32 4294901760, %v15895_v55 }
 0x34c   : > { %21014 = vst [vmem:[#allocation121_spill] sm:$0xff] %v15900_v8  ;;  %11699 = vmatprep.subr.bf16.mxu0 %v15900_v8  ;;  %v20216_v26 = vand.u32 4294901760, %v15905_v16  ;;  %21016 = vst [vmem:[#allocation123_spill] sm:$0xff] %v15924_v52  ;;  %v15926_v5 = vpack.c.bf16 %v3168_v48, %v3158_v46  ;;  %v15940_v61 = vunpack.c.h.bf16 %v15314_v14  ;;  %v20222_v46 = vand.u32 4294901760, %v15933_v39 }
 0x34d   : > { %v2500_v63 = vand.u32 4294901760, %v2499_v58  ;;  %v3162_v8 = vsub.f32 %v15895_v55, %v21018_v20  ;;  %v2510_v50 = vand.u32 4294901760, %v2509_v21  ;;  %v20220_v0 = vand.u32 4294901760, %v15921_v4 }
 0x34e   : > { %21017 = vst [vmem:[#allocation124_spill] sm:$0xff] %v15926_v5  ;;  %v3172_v59 = vsub.f32 %v15905_v16, %v20216_v26  ;;  %21020 = vst [vmem:[#allocation126_spill] sm:$0xff] %v15940_v61  ;;  %11891 = vmatprep.subr.bf16.mxu1 %v15926_v5  ;;  %v15946_v58 = vsub.f32 %v15924_v52, %v15924_v52  ;;  %v15949_v20 = vunpack.c.l.bf16 %v15291_v10  ;;  %v15965_v10 = vunpack.c.l.bf16 %v15304_v53 }
 0x34f   : > { %v3163_v48 = vand.u32 4294901760, %v3162_v8  ;;  %v15951_v21 = vpack.c.bf16 %v2510_v50, %v2500_v63  ;;  %v2514_v18 = vsub.f32 %v15921_v4, %v20220_v0  ;;  %v15958_v5 = vsub.f32 %v15940_v61, %v15940_v61 }
 0x350   : > { %21021 = vst [vmem:[#allocation127_spill] sm:$0xff] %v15949_v20  ;;  %v3173_v26 = vand.u32 4294901760, %v3172_v59  ;;  %v2524_v8 = vsub.f32 %v15933_v39, %v20222_v46  ;;  %v20226_v52 = vand.u32 4294901760, %v15946_v58  ;;  %21023 = vst [vmem:[#allocation129_spill] sm:$0xff] %v15965_v10  ;;  %v15969_v63 = vsub.f32 %v15949_v20, %v15949_v20 }
 0x351   : > { %21022 = vst [vmem:[#allocation128_spill] sm:$0xff] %v15951_v21  ;;  %11701 = vmatpush1.bf16.msra.mxu0 %v15951_v21  ;;  %v2515_v50 = vand.u32 4294901760, %v2514_v18  ;;  %v20229_v0 = vand.u32 4294901760, %v15958_v5  ;;  %v15976_v61 = vunpack.c.l.bf16 %v15309_v54  ;;  %v15984_v20 = vsub.f32 %v15965_v10, %v15965_v10 }
 0x352   : > { %21024 = vst [vmem:[#allocation130_spill] sm:$0xff] %v15969_v63  ;;  %v15972_v59 = vpack.c.bf16 %v3173_v26, %v3163_v48  ;;  %v2525_v46 = vand.u32 4294901760, %v2524_v8  ;;  %v3177_v53 = vsub.f32 %v15946_v58, %v20226_v52  ;;  %v20232_v39 = vand.u32 4294901760, %v15969_v63 }
 0x353   : > { %21026 = vst [vmem:[#allocation132_spill] sm:$0xff] %v15976_v61  ;;  %21027 = vst [vmem:[#allocation133_spill] sm:$0xff] %v15984_v20  ;;  %v3187_v18 = vsub.f32 %v15958_v5, %v20229_v0  ;;  %v15991_v54 = vunpack.c.l.bf16 %v15314_v14  ;;  %v15995_v26 = vsub.f32 %v15976_v61, %v15976_v61  ;;  %v15998_v48 = vunpack.c.h.bf16 %v15340_v22 }
 0x354   : > { %21025 = vst [vmem:[#allocation131_spill] sm:$0xff] %v15972_v59  ;;  %11893 = vmatpush1.bf16.msra.mxu1 %v15972_v59  ;;  %v16000_v8 = vpack.c.bf16 %v2525_v46, %v2515_v50  ;;  %v3178_v52 = vand.u32 4294901760, %v3177_v53  ;;  %v2519_v10 = vsub.f32 %v15969_v63, %v20232_v39  ;;  %v20235_v59 = vand.u32 4294901760, %v15984_v20 }
 0x355   : > { %21028 = vst [vmem:[#allocation134_spill] sm:$0xff] %v15991_v54  ;;  %21029 = vst [vmem:[#allocation135_spill] sm:$0xff] %v15995_v26  ;;  %v3188_v0 = vand.u32 4294901760, %v3187_v18  ;;  %v20239_v14 = vand.u32 4294901760, %v15995_v26  ;;  %v16009_v21 = vsub.f32 %v15991_v54, %v15991_v54  ;;  %v16012_v61 = vunpack.c.h.bf16 %v15345_v23 }
 0x356   : > { %21030 = vst [vmem:[#allocation136_spill] sm:$0xff] %v15998_v48  ;;  %21031 = vst [vmem:[#allocation137_spill] sm:$0xff] %v16000_v8  ;;  %11703 = vmatprep.subr.bf16.mxu0 %v16000_v8  ;;  %v2520_v46 = vand.u32 4294901760, %v2519_v10  ;;  %v2529_v50 = vsub.f32 %v15984_v20, %v20235_v59  ;;  %v16020_v53 = vsub.f32 %v15998_v48, %v15998_v48  ;;  %v16023_v18 = vunpack.c.h.bf16 %v15350_v25 }
 0x357   : > { %21032 = vst [vmem:[#allocation138_spill] sm:$0xff] %v16012_v61  ;;  %v16025_v39 = vpack.c.bf16 %v3188_v0, %v3178_v52  ;;  %v3182_v54 = vsub.f32 %v15995_v26, %v20239_v14  ;;  %v20247_v8 = vand.u32 4294901760, %v16009_v21  ;;  %v16033_v10 = vsub.f32 %v16012_v61, %v16012_v61 }
 0x358   : > { %21033 = vst [vmem:[#allocation139_spill] sm:$0xff] %v16023_v18  ;;  %v2530_v59 = vand.u32 4294901760, %v2529_v50  ;;  %v16037_v48 = vunpack.c.h.bf16 %v15361_v31  ;;  %v16041_v0 = vsub.f32 %v16023_v18, %v16023_v18  ;;  %v16049_v50 = vunpack.c.l.bf16 %v15340_v22 }
 0x359   : > { %21034 = vst [vmem:[#allocation140_spill] sm:$0xff] %v16025_v39  ;;  %21035 = vst [vmem:[#allocation141_spill] sm:$0xff] %v16033_v10  ;;  %11895 = vmatprep.subr.bf16.mxu1 %v16025_v39  ;;  %v3183_v52 = vand.u32 4294901760, %v3182_v54  ;;  %v3192_v14 = vsub.f32 %v16009_v21, %v20247_v8  ;;  %v20249_v61 = vand.u32 4294901760, %v16033_v10  ;;  %v21039_v26 = vand.u32 4294901760, %v16020_v53 }
 0x35a   : > { %21036 = vst [vmem:[#allocation142_spill] sm:$0xff] %v16037_v48  ;;  %21037 = vst [vmem:[#allocation143_spill] sm:$0xff] %v16049_v50  ;;  %v16051_v20 = vpack.c.bf16 %v2530_v59, %v2520_v46  ;;  %v20254_v18 = vand.u32 4294901760, %v16041_v0  ;;  %v16059_v54 = vsub.f32 %v16037_v48, %v16037_v48  ;;  %v16065_v22 = vunpack.c.l.bf16 %v15345_v23 }
 0x35b   : > { %v2534_v63 = vsub.f32 %v16020_v53, %v21039_v26  ;;  %v3193_v39 = vand.u32 4294901760, %v3192_v14  ;;  %v2544_v8 = vsub.f32 %v16033_v10, %v20249_v61  ;;  %v16069_v59 = vsub.f32 %v16049_v50, %v16049_v50 }
 0x35c   : > { %21038 = vst [vmem:[#allocation144_spill] sm:$0xff] %v16051_v20  ;;  %21040 = vst [vmem:[#allocation145_spill] sm:$0xff] %v16059_v54  ;;  %11705 = vmatpush1.bf16.msra.mxu0 %v16051_v20  ;;  %v3197_v46 = vsub.f32 %v16041_v0, %v20254_v18  ;;  %v20255_v14 = vand.u32 4294901760, %v16059_v54  ;;  %v16077_v48 = vunpack.c.l.bf16 %v15350_v25  ;;  %v16084_v50 = vsub.f32 %v16065_v22, %v16065_v22 }
 0x35d   : > { %21041 = vst [vmem:[#allocation146_spill] sm:$0xff] %v16065_v22  ;;  %21042 = vst [vmem:[#allocation147_spill] sm:$0xff] %v16069_v59  ;;  %v2535_v26 = vand.u32 4294901760, %v2534_v63  ;;  %v16079_v61 = vpack.c.bf16 %v3193_v39, %v3183_v52  ;;  %v2545_v23 = vand.u32 4294901760, %v2544_v8  ;;  %v20258_v10 = vand.u32 4294901760, %v16069_v59 }
 0x35e   : > { %21043 = vst [vmem:[#allocation148_spill] sm:$0xff] %v16077_v48  ;;  %21045 = vst [vmem:[#allocation150_spill] sm:$0xff] %v16084_v50  ;;  %v3198_v20 = vand.u32 4294901760, %v3197_v46  ;;  %v3207_v63 = vsub.f32 %v16059_v54, %v20255_v14  ;;  %v16090_v18 = vunpack.c.l.bf16 %v15361_v31  ;;  %v16094_v25 = vsub.f32 %v16077_v48, %v16077_v48 }
 0x35f   : > { %21044 = vst [vmem:[#allocation149_spill] sm:$0xff] %v16079_v61  ;;  %11897 = vmatpush1.bf16.msra.mxu1 %v16079_v61  ;;  %v16097_v39 = vpack.c.bf16 %v2545_v23, %v2535_v26  ;;  %v2539_v8 = vsub.f32 %v16069_v59, %v20258_v10  ;;  %v20262_v52 = vand.u32 4294901760, %v16084_v50  ;;  %v16104_v46 = vunpack.c.h.bf16 %v15370_v47 }
 0x360   : > { %21046 = vst [vmem:[#allocation151_spill] sm:$0xff] %v16090_v18  ;;  %21047 = vst [vmem:[#allocation152_spill] sm:$0xff] %v16094_v25  ;;  %v3208_v14 = vand.u32 4294901760, %v3207_v63  ;;  %v16109_v22 = vsub.f32 %v16090_v18, %v16090_v18  ;;  %v16112_v48 = vunpack.c.h.bf16 %v15375_v24  ;;  %v16123_v63 = vunpack.c.h.bf16 %v15396_v17 }
 0x361   : > { %21048 = vst [vmem:[#allocation153_spill] sm:$0xff] %v16097_v39  ;;  %21049 = vst [vmem:[#allocation154_spill] sm:$0xff] %v16104_v46  ;;  %11707 = vmatprep.subr.bf16.mxu0 %v16097_v39  ;;  %v2540_v26 = vand.u32 4294901760, %v2539_v8  ;;  %v2549_v23 = vsub.f32 %v16084_v50, %v20262_v52  ;;  %v16120_v10 = vsub.f32 %v16104_v46, %v16104_v46  ;;  %v21053_v18 = vand.u32 4294901760, %v16094_v25  ;;  %v21055_v46 = vld [vmem:[#allocation45_spill] sm:$0xff] }
 0x362   : > { %21050 = vst [vmem:[#allocation155_spill] sm:$0xff] %v16112_v48  ;;  %21051 = vst [vmem:[#allocation156_spill] sm:$0xff] %v16123_v63  ;;  %v16125_v31 = vpack.c.bf16 %v3208_v14, %v3198_v20  ;;  %v20275_v39 = vand.u32 4294901760, %v16109_v22  ;;  %v16133_v8 = vsub.f32 %v16112_v48, %v16112_v48  ;;  %v16137_v59 = vunpack.c.h.bf16 %v21055_v46 }
 0x363   : > { %v3202_v61 = vsub.f32 %v16094_v25, %v21053_v18  ;;  %v2550_v52 = vand.u32 4294901760, %v2549_v23  ;;  %v16141_v20 = vsub.f32 %v16123_v63, %v16123_v63  ;;  %v16149_v23 = vunpack.c.l.bf16 %v15370_v47 }
 0x364   : > { %21052 = vst [vmem:[#allocation157_spill] sm:$0xff] %v16125_v31  ;;  %21054 = vst [vmem:[#allocation158_spill] sm:$0xff] %v16133_v8  ;;  %11899 = vmatprep.subr.bf16.mxu1 %v16125_v31  ;;  %v3212_v18 = vsub.f32 %v16109_v22, %v20275_v39  ;;  %v20277_v48 = vand.u32 4294901760, %v16133_v8  ;;  %v21059_v25 = vand.u32 4294901760, %v16120_v10  ;;  %v16165_v47 = vunpack.c.l.bf16 %v15375_v24 }
 0x365   : > { %21056 = vst [vmem:[#allocation45_spill] sm:$0xff] %v16137_v59  ;;  %v3203_v14 = vand.u32 4294901760, %v3202_v61  ;;  %21057 = vst [vmem:[#allocation159_spill] sm:$0xff] %v16149_v23  ;;  %v16151_v50 = vpack.c.bf16 %v2550_v52, %v2540_v26  ;;  %v20282_v63 = vand.u32 4294901760, %v16141_v20  ;;  %v16159_v61 = vsub.f32 %v16137_v59, %v16137_v59 }
 0x366   : > { %v2554_v54 = vsub.f32 %v16120_v10, %v21059_v25  ;;  %v3213_v31 = vand.u32 4294901760, %v3212_v18  ;;  %v2564_v39 = vsub.f32 %v16133_v8, %v20277_v48  ;;  %21060 = vst [vmem:[#allocation161_spill] sm:$0xff] %v16165_v47  ;;  %v16169_v52 = vsub.f32 %v16149_v23, %v16149_v23 }
 0x367   : > { %21058 = vst [vmem:[#allocation160_spill] sm:$0xff] %v16151_v50  ;;  %11709 = vmatpush1.bf16.msra.mxu0 %v16151_v50  ;;  %v3217_v26 = vsub.f32 %v16141_v20, %v20282_v63  ;;  %v20283_v18 = vand.u32 4294901760, %v16159_v61  ;;  %v16177_v59 = vunpack.c.l.bf16 %v15396_v17  ;;  %v16184_v23 = vsub.f32 %v16165_v47, %v16165_v47 }
 0x368   : > { %21061 = vst [vmem:[#allocation162_spill] sm:$0xff] %v16169_v52  ;;  %v2555_v25 = vand.u32 4294901760, %v2554_v54  ;;  %v16179_v48 = vpack.c.bf16 %v3213_v31, %v3203_v14  ;;  %v2565_v24 = vand.u32 4294901760, %v2564_v39  ;;  %v20285_v8 = vand.u32 4294901760, %v16169_v52 }
 0x369   : > { %21062 = vst [vmem:[#allocation163_spill] sm:$0xff] %v16177_v59  ;;  %v3218_v50 = vand.u32 4294901760, %v3217_v26  ;;  %v3227_v54 = vsub.f32 %v16159_v61, %v20283_v18  ;;  %v16190_v63 = vunpack.c.l.bf16 %v21055_v46  ;;  %v16194_v17 = vsub.f32 %v16177_v59, %v16177_v59 }
 0x36a   : > { %21063 = vst [vmem:[#allocation164_spill] sm:$0xff] %v16179_v48  ;;  %11901 = vmatpush1.bf16.msra.mxu1 %v16179_v48  ;;  %v16197_v39 = vpack.c.bf16 %v2565_v24, %v2555_v25  ;;  %v2559_v31 = vsub.f32 %v16169_v52, %v20285_v8  ;;  %v20293_v14 = vand.u32 4294901760, %v16184_v23 }
 0x36b   : > { %21064 = vst [vmem:[#allocation165_spill] sm:$0xff] %v16190_v63  ;;  %v3228_v26 = vand.u32 4294901760, %v3227_v54  ;;  %v20292_v18 = vand.u32 4294901760, %v16194_v17  ;;  %v16206_v46 = vsub.f32 %v16190_v63, %v16190_v63 }
 0x36c   : > { %21065 = vst [vmem:[#allocation166_spill] sm:$0xff] %v16197_v39  ;;  %11711 = vmatprep.subr.bf16.mxu0 %v16197_v39  ;;  %v2560_v47 = vand.u32 4294901760, %v2559_v31  ;;  %v2569_v25 = vsub.f32 %v16184_v23, %v20293_v14  ;;  %v21067_v39 = vld [vmem:[#allocation21_spill] sm:$0xff]  ;;  %v21068_v31 = vld [vmem:[#allocation22_spill] sm:$0xff] }
 0x36d   : > { %v16212_v24 = vpack.c.bf16 %v3228_v26, %v3218_v50  ;;  %v3222_v8 = vsub.f32 %v16194_v17, %v20292_v18  ;;  %v3231_v54 = vand.u32 4294901760, %v16206_v46  ;;  %v16222_v52 = vpack.c.bf16 %v21068_v31, %v21067_v39 }
 0x36e   : > { %v2570_v59 = vand.u32 4294901760, %v2569_v25  ;;  %v16226_v50 = vpack.c.bf16 %v15659_v41, %v15643_v12  ;;  %v16232_v18 = vpack.c.bf16 %v15673_v29, %v15669_v15  ;;  %v16236_v25 = vpack.c.bf16 %v15703_v45, %v15683_v51  ;;  %v21078_v45 = vld [vmem:[#allocation54_spill] sm:$0xff] }
 0x36f   : > { %21066 = vst [vmem:[#allocation167_spill] sm:$0xff] %v16212_v24  ;;  %11903 = vmatprep.subr.bf16.mxu1 %v16212_v24  ;;  %v3223_v63 = vand.u32 4294901760, %v3222_v8  ;;  %v3232_v48 = vsub.f32 %v16206_v46, %v3231_v54  ;;  %21069 = vst [vmem:[#allocation21_spill] sm:$0xff] %v16222_v52  ;;  %v16240_v8 = vpack.c.bf16 %v15728_v7, %v15724_v34  ;;  %v21083_v29 = vld [vmem:[#allocation50_spill] sm:$0xff]  ;;  %v21095_v41 = vand.u32 4294901760, %v15793_v42 }
 0x370   : > { %21070 = vst [vmem:[#allocation22_spill] sm:$0xff] %v16226_v50  ;;  %v16228_v26 = vpack.c.bf16 %v2570_v59, %v2560_v47  ;;  %21072 = vst [vmem:[#allocation169_spill] sm:$0xff] %v16232_v18  ;;  %v16244_v24 = vpack.c.bf16 %v15766_v33, %v15747_v32  ;;  %v16248_v59 = vpack.c.bf16 %v15779_v35, %v15775_v62 }
 0x371   : > { %21073 = vst [vmem:[#allocation170_spill] sm:$0xff] %v16236_v25  ;;  %21074 = vst [vmem:[#allocation171_spill] sm:$0xff] %v16240_v8  ;;  %v3233_v14 = vand.u32 4294901760, %v3232_v48  ;;  %v16252_v47 = vpack.c.bf16 %v15805_v11, %v15793_v42  ;;  %v16257_v51 = vpack.c.bf16 %v21078_v45, %v15421_v56  ;;  %v16261_v48 = vpack.c.bf16 %v15456_v28, %v15452_v38 }
 0x372   : > { %21071 = vst [vmem:[#allocation168_spill] sm:$0xff] %v16228_v26  ;;  %21075 = vst [vmem:[#allocation172_spill] sm:$0xff] %v16244_v24  ;;  %11713 = vmatpush1.bf16.msra.mxu0 %v16228_v26  ;;  %v16268_v34 = vpack.c.bf16 %v15513_v3, %v15506_v57  ;;  %v16274_v26 = vpack.c.bf16 %v15465_v27, %v15461_v37 }
 0x373   : > { %21076 = vst [vmem:[#allocation173_spill] sm:$0xff] %v16248_v59  ;;  %21077 = vst [vmem:[#allocation174_spill] sm:$0xff] %v16252_v47  ;;  %v16263_v7 = vpack.c.bf16 %v3233_v14, %v3223_v63  ;;  %11715 = vmatprep.subr.bf16.mxu0 %v16222_v52  ;;  %v16280_v63 = vpack.c.bf16 %v15551_v43, %v15547_v44  ;;  %v16284_v14 = vpack.c.bf16 %v15564_v6, %v15560_v60 }
 0x374   : > { %21079 = vst [vmem:[#allocation54_spill] sm:$0xff] %v16257_v51  ;;  %21080 = vst [vmem:[#allocation175_spill] sm:$0xff] %v16261_v48 }
 0x375   : > { %21081 = vst [vmem:[#allocation176_spill] sm:$0xff] %v16263_v7  ;;  %21082 = vst [vmem:[#allocation177_spill] sm:$0xff] %v16268_v34  ;;  %11905 = vmatpush1.bf16.msra.mxu1 %v16263_v7  ;;  %2606 = vmatmul.mubr.f32.vlgmr.msra.gmra.mrb[0].mxu0 %v21083_v29  ;;  %v16289_v7 = vpack.c.bf16 %v15620_v19, %v15613_v9 }
 0x376   : > { %21084 = vst [vmem:[#allocation178_spill] sm:$0xff] %v16274_v26  ;;  %11907 = vmatprep.subr.bf16.mxu1 %v16257_v51  ;;  %11717 = vmatpush1.bf16.msra.mxu0 %v16261_v48  ;;  %21085 = vst [vmem:[#allocation179_spill] sm:$0xff] %v16280_v63  ;;  %v16296_v48 = vpack.c.bf16 %v15580_v13, %v15574_v49  ;;  %v21090_v51 = vand.u32 4294901760, %v15766_v33  ;;  %v21099_v33 = vand.u32 4294901760, %v15831_v40 }
 0x377   : > { %21086 = vst [vmem:[#allocation180_spill] sm:$0xff] %v16284_v14  ;;  %11719 = vmatprep.subr.bf16.mxu0 %v16268_v34  ;;  %21087 = vst [vmem:[#allocation181_spill] sm:$0xff] %v16289_v7  ;;  %2708 = vmatprep.mubr.f32.mxu0 %v20980_v36  ;;  %v21089_v34 = vand.u32 4294901760, %v15747_v32  ;;  %v21098_v32 = vand.u32 4294901760, %v15821_v1 }
 0x378   : > { %3269 = vmatmul.mubr.f32.vlgmr.msra.gmra.mrb[0].mxu1 %v21083_v29  ;;  %21088 = vst [vmem:[#allocation182_spill] sm:$0xff] %v16296_v48  ;;  %v21093_v29 = vand.u32 4294901760, %v15779_v35 }
 0x379   : > { %11909 = vmatpush1.bf16.msra.mxu1 %v16274_v26  ;;  %3371 = vmatprep.mubr.f32.mxu1 %v20980_v36  ;;  %v16305_v52 = vpack.c.bf16 %v21090_v51, %v21089_v34  ;;  %v21092_v26 = vand.u32 4294901760, %v15775_v62  ;;  %v16324_v34 = vpack.c.bf16 %v21099_v33, %v21098_v32  ;;  %v21101_v51 = vand.u32 4294901760, %v15847_v2  ;;  %v21113_v33 = vld [vmem:[#allocation125_spill] sm:$0xff] }
 0x37a   : > { %11911 = vmatprep.subr.bf16.mxu1 %v16280_v63  ;;  %11721 = vmatpush1.bf16.msra.mxu0 %v16284_v14  ;;  %v21096_v63 = vand.u32 4294901760, %v15805_v11  ;;  %v21102_v62 = vand.u32 4294901760, %v15855_v30  ;;  %v21110_v11 = vand.u32 4294901760, %v15905_v16  ;;  %v21112_v32 = vand.u32 4294901760, %v15921_v4 }
 0x37b   : > { %21091 = vst [vmem:[#allocation183_spill] sm:$0xff] %v16305_v52  ;;  %11723 = vmatprep.subr.bf16.mxu0 %v16289_v7  ;;  %v16312_v15 = vpack.c.bf16 %v21093_v29, %v21092_v26  ;;  %21100 = vst [vmem:[#allocation186_spill] sm:$0xff] %v16324_v34  ;;  %v21104_v29 = vld [vmem:[#allocation117_spill] sm:$0xff]  ;;  %v21106_v26 = vld [vmem:[#allocation118_spill] sm:$0xff]  ;;  %v21126_v52 = vand.u32 4294901760, %v16009_v21 }
 0x37c   : > { %v16318_v12 = vpack.c.bf16 %v21096_v63, %v21095_v41  ;;  %v16330_v7 = vpack.c.bf16 %v21102_v62, %v21101_v51  ;;  %v21105_v35 = vand.u32 4294901760, %v21104_v29  ;;  %v21107_v42 = vand.u32 4294901760, %v21106_v26 }
 0x37d   : > { %21094 = vst [vmem:[#allocation184_spill] sm:$0xff] %v16312_v15  ;;  %v21109_v41 = vand.u32 4294901760, %v15895_v55  ;;  %v21116_v51 = vand.u32 4294901760, %v15946_v58  ;;  %v21117_v62 = vand.u32 4294901760, %v15958_v5  ;;  %11913 = vmatpush1.bf16.msra.mxu1 %v16296_v48  ;;  %v21133_v48 = vld [vmem:[#allocation145_spill] sm:$0xff] }
 0x37e   : > { %21097 = vst [vmem:[#allocation185_spill] sm:$0xff] %v16318_v12  ;;  %21103 = vst [vmem:[#allocation187_spill] sm:$0xff] %v16330_v7  ;;  %v16336_v14 = vpack.c.bf16 %v21107_v42, %v21105_v35  ;;  %v21114_v12 = vand.u32 4294901760, %v21113_v33  ;;  %v21119_v35 = vld [vmem:[#allocation130_spill] sm:$0xff]  ;;  %11915 = vmatprep.subr.bf16.mxu1 %v16226_v50  ;;  %11725 = vmatpush1.bf16.msra.mxu0 %v16232_v18  ;;  %v16404_v18 = vpack.c.bf16 %v15831_v40, %v15821_v1 }
 0x37f   : > { %v16342_v63 = vpack.c.bf16 %v21110_v11, %v21109_v41  ;;  %v16354_v7 = vpack.c.bf16 %v21117_v62, %v21116_v51  ;;  %v21120_v42 = vand.u32 4294901760, %v21119_v35  ;;  %v21124_v11 = vld [vmem:[#allocation135_spill] sm:$0xff]  ;;  %v21132_v62 = vand.u32 4294901760, %v16041_v0  ;;  %11727 = vmatprep.subr.bf16.mxu0 %v16240_v8 }
 0x380   : > { %21108 = vst [vmem:[#allocation117_spill] sm:$0xff] %v16336_v14  ;;  %v16348_v34 = vpack.c.bf16 %v21114_v12, %v21112_v32  ;;  %v21121_v14 = vld [vmem:[#allocation133_spill] sm:$0xff]  ;;  %v21128_v32 = vand.u32 4294901760, %v16020_v53  ;;  %v16427_v40 = vpack.c.bf16 %v15855_v30, %v15847_v2  ;;  %v16431_v1 = vpack.c.bf16 %v21106_v26, %v21104_v29  ;;  %v21183_v29 = vld [vmem:[#allocation20_spill] sm:$0xff] }
 0x381   : > { %21111 = vst [vmem:[#allocation118_spill] sm:$0xff] %v16342_v63  ;;  %21118 = vst [vmem:[#allocation188_spill] sm:$0xff] %v16354_v7  ;;  %v21122_v15 = vand.u32 4294901760, %v21121_v14  ;;  %v21125_v63 = vand.u32 4294901760, %v21124_v11  ;;  %v21134_v7 = vand.u32 4294901760, %v21133_v48  ;;  %11917 = vmatpush1.bf16.msra.mxu1 %v16236_v25  ;;  %v16447_v30 = vpack.c.bf16 %v15958_v5, %v15946_v58  ;;  %v21184_v26 = vld [vmem:[#allocation24_spill] sm:$0xff] }
 0x382   : > { %21115 = vst [vmem:[#allocation125_spill] sm:$0xff] %v16348_v34  ;;  %v21129_v34 = vld [vmem:[#allocation141_spill] sm:$0xff]  ;;  %11919 = vmatprep.subr.bf16.mxu1 %v16244_v24  ;;  %11729 = vmatpush1.bf16.msra.mxu0 %v16248_v59  ;;  %21159 = vst [vmem:[#allocation190_spill] sm:$0xff] %v16427_v40  ;;  %v16451_v2 = vpack.c.bf16 %v21121_v14, %v21119_v35  ;;  %v16467_v5 = vpack.c.bf16 %v21133_v48, %v16041_v0  ;;  %v21181_v14 = vld [vmem:[#allocation18_spill] sm:$0xff] }
 0x383   : > { %v16361_v41 = vpack.c.bf16 %v21122_v15, %v21120_v42  ;;  %v16367_v12 = vpack.c.bf16 %v21126_v52, %v21125_v63  ;;  %v21130_v13 = vand.u32 4294901760, %v21129_v34  ;;  %v16379_v49 = vpack.c.bf16 %v21134_v7, %v21132_v62  ;;  %v21136_v15 = vld [vmem:[#allocation147_spill] sm:$0xff]  ;;  %v21138_v52 = vld [vmem:[#allocation150_spill] sm:$0xff]  ;;  %21160 = vst [vmem:[#allocation191_spill] sm:$0xff] %v16431_v1  ;;  %11731 = vmatprep.subr.bf16.mxu0 %v16404_v18  ;;  %v21178_v48 = vld [vmem:[#allocation17_spill] sm:$0xff] }
 0x384   : > { %v21137_v42 = vand.u32 4294901760, %v21136_v15  ;;  %v21139_v63 = vand.u32 4294901760, %v21138_v52  ;;  %v21146_v7 = vld [vmem:[#allocation158_spill] sm:$0xff]  ;;  %21163 = vst [vmem:[#allocation194_spill] sm:$0xff] %v16447_v30  ;;  %21164 = vst [vmem:[#allocation195_spill] sm:$0xff] %v16451_v2  ;;  %v21186_v35 = vld [vmem:[#allocation28_spill] sm:$0xff] }
 0x385   : > { %21123 = vst [vmem:[#allocation130_spill] sm:$0xff] %v16361_v41  ;;  %21127 = vst [vmem:[#allocation133_spill] sm:$0xff] %v16367_v12  ;;  %v16373_v51 = vpack.c.bf16 %v21130_v13, %v21128_v32  ;;  %v21141_v41 = vld [vmem:[#allocation152_spill] sm:$0xff]  ;;  %v21143_v13 = vand.u32 4294901760, %v16109_v22  ;;  %v21147_v62 = vand.u32 4294901760, %v21146_v7  ;;  %11921 = vmatpush1.bf16.msra.mxu1 %v16252_v47  ;;  %v16476_v58 = vpack.c.bf16 %v21146_v7, %v16120_v10  ;;  %v21191_v7 = vld [vmem:[#allocation31_spill] sm:$0xff] }
 0x386   : > { %21135 = vst [vmem:[#allocation141_spill] sm:$0xff] %v16379_v49  ;;  %v16387_v12 = vpack.c.bf16 %v21139_v63, %v21137_v42  ;;  %v21142_v19 = vand.u32 4294901760, %v21141_v41  ;;  %21149 = vst [vmem:[#allocation152_spill] sm:$0xff] %v16404_v18  ;;  %v21150_v42 = vand.u32 4294901760, %v16141_v20  ;;  %v21151_v63 = vand.u32 4294901760, %v16159_v61  ;;  %11923 = vmatprep.subr.bf16.mxu1 %v16427_v40  ;;  %11733 = vmatpush1.bf16.msra.mxu0 %v16431_v1  ;;  %v21218_v59 = vld [vmem:[#allocation48_spill] sm:$0xff] }
 0x387   : > { %21131 = vst [vmem:[#allocation135_spill] sm:$0xff] %v16373_v51  ;;  %v21145_v51 = vand.u32 4294901760, %v16120_v10  ;;  %21167 = vst [vmem:[#allocation198_spill] sm:$0xff] %v16467_v5  ;;  %v16497_v10 = vpack.c.bf16 %v16206_v46, %v16194_v17  ;;  %v21180_v46 = vld [vmem:[#allocation19_spill] sm:$0xff]  ;;  %v21210_v1 = vand.u32 4294901760, %v21078_v45  ;;  %v21212_v47 = vand.u32 4294901760, %v15452_v38 }
 0x388   : > { %21140 = vst [vmem:[#allocation145_spill] sm:$0xff] %v16387_v12  ;;  %v16393_v32 = vpack.c.bf16 %v21143_v13, %v21142_v19  ;;  %v16410_v50 = vpack.c.bf16 %v21151_v63, %v21150_v42  ;;  %v21153_v19 = vld [vmem:[#allocation162_spill] sm:$0xff]  ;;  %21169 = vst [vmem:[#allocation200_spill] sm:$0xff] %v16476_v58  ;;  %v21193_v63 = vld [vmem:[#allocation33_spill] sm:$0xff]  ;;  %v21220_v45 = vand.u32 4294901760, %v15461_v37  ;;  %v21221_v38 = vand.u32 4294901760, %v15465_v27 }
 0x389   : > { %v16399_v49 = vpack.c.bf16 %v21147_v62, %v21145_v51  ;;  %v21154_v13 = vand.u32 4294901760, %v21153_v19  ;;  %v21157_v51 = vand.u32 4294901760, %v16194_v17  ;;  %v16491_v0 = vpack.c.bf16 %v16184_v23, %v21153_v19  ;;  %21173 = vst [vmem:[#allocation204_spill] sm:$0xff] %v16497_v10  ;;  %v21179_v17 = vld [vmem:[#allocation16_spill] sm:$0xff]  ;;  %v21192_v42 = vld [vmem:[#allocation34_spill] sm:$0xff] }
 0x38a   : > { %21144 = vst [vmem:[#allocation147_spill] sm:$0xff] %v16393_v32  ;;  %21152 = vst [vmem:[#allocation158_spill] sm:$0xff] %v16410_v50  ;;  %v21155_v32 = vand.u32 4294901760, %v16184_v23  ;;  %v21176_v23 = vld [vmem:[#allocation15_spill] sm:$0xff]  ;;  %v21194_v19 = vld [vmem:[#allocation36_spill] sm:$0xff]  ;;  %v21229_v27 = vand.u32 4294901760, %v15613_v9 }
 0x38b   : > { %21148 = vst [vmem:[#allocation150_spill] sm:$0xff] %v16399_v49  ;;  %v16420_v62 = vpack.c.bf16 %v3231_v54, %v21157_v51  ;;  %v16436_v54 = vpack.c.bf16 %v21113_v33, %v15921_v4  ;;  %v16456_v4 = vpack.c.bf16 %v21129_v34, %v16020_v53  ;;  %v16487_v53 = vpack.c.bf16 %v16159_v61, %v16141_v20  ;;  %v21175_v20 = vld [vmem:[#allocation57_spill] sm:$0xff]  ;;  %v21177_v61 = vld [vmem:[#allocation12_spill] sm:$0xff]  ;;  %v21182_v34 = vld [vmem:[#allocation23_spill] sm:$0xff] }
 0x38c   : > { %v16416_v12 = vpack.c.bf16 %v21155_v32, %v21154_v13  ;;  %v16441_v32 = vpack.c.bf16 %v15905_v16, %v15895_v55  ;;  %v16461_v16 = vpack.c.bf16 %v16009_v21, %v21124_v11  ;;  %v16471_v55 = vpack.c.bf16 %v21138_v52, %v21136_v15  ;;  %21172 = vst [vmem:[#allocation203_spill] sm:$0xff] %v16491_v0  ;;  %v21185_v33 = vld [vmem:[#allocation25_spill] sm:$0xff]  ;;  %v21188_v11 = vld [vmem:[#allocation30_spill] sm:$0xff]  ;;  %v21190_v52 = vld [vmem:[#allocation32_spill] sm:$0xff] }
 0x38d   : > { %21158 = vst [vmem:[#allocation189_spill] sm:$0xff] %v16420_v62  ;;  %21161 = vst [vmem:[#allocation192_spill] sm:$0xff] %v16436_v54  ;;  %11735 = vmatprep.subr.bf16.mxu0 %v16436_v54  ;;  %v16481_v21 = vpack.c.bf16 %v16109_v22, %v21141_v41  ;;  %v21174_v22 = vld [vmem:[#allocation11_spill] sm:$0xff]  ;;  %v21189_v15 = vld [vmem:[#allocation29_spill] sm:$0xff]  ;;  %v21209_v54 = vand.u32 4294901760, %v15421_v56 }
 0x38e   : > { %21156 = vst [vmem:[#allocation162_spill] sm:$0xff] %v16416_v12  ;;  %21162 = vst [vmem:[#allocation193_spill] sm:$0xff] %v16441_v32  ;;  %11925 = vmatpush1.bf16.msra.mxu1 %v16441_v32  ;;  %11737 = vmatpush1.bf16.msra.mxu0 %v16451_v2  ;;  %v21187_v41 = vld [vmem:[#allocation27_spill] sm:$0xff]  ;;  %v21196_v51 = vld [vmem:[#allocation37_spill] sm:$0xff] }
 0x38f   : > { %21165 = vst [vmem:[#allocation196_spill] sm:$0xff] %v16456_v4  ;;  %21166 = vst [vmem:[#allocation197_spill] sm:$0xff] %v16461_v16  ;;  %11927 = vmatprep.subr.bf16.mxu1 %v16447_v30  ;;  %11739 = vmatprep.subr.bf16.mxu0 %v16456_v4  ;;  %v21195_v13 = vld [vmem:[#allocation35_spill] sm:$0xff]  ;;  %v21208_v32 = vld [vmem:[#allocation46_spill] sm:$0xff]  ;;  %v16547_v40 = vpack.c.bf16 %v21210_v1, %v21209_v54  ;;  %v16568_v1 = vpack.c.bf16 %v21221_v38, %v21220_v45  ;;  %v21227_v54 = vand.u32 4294901760, %v15564_v6 }
 0x390   : > { %21168 = vst [vmem:[#allocation199_spill] sm:$0xff] %v16471_v55  ;;  %21170 = vst [vmem:[#allocation201_spill] sm:$0xff] %v16481_v21  ;;  %v21206_v2 = vld [vmem:[#allocation43_spill] sm:$0xff]  ;;  %v21230_v37 = vld [vmem:[#allocation76_spill] sm:$0xff] }
 0x391   : > { %21171 = vst [vmem:[#allocation202_spill] sm:$0xff] %v16487_v53  ;;  %v21207_v30 = vld [vmem:[#allocation47_spill] sm:$0xff]  ;;  %21211 = vst [vmem:[#allocation206_spill] sm:$0xff] %v16547_v40  ;;  %v21238_v9 = vld [vmem:[#allocation81_spill] sm:$0xff] }
 0x392   : > { %11929 = vmatpush1.bf16.msra.mxu1 %v16461_v16  ;;  %11741 = vmatpush1.bf16.msra.mxu0 %v16471_v55  ;;  %v21202_v55 = vld [vmem:[#allocation44_spill] sm:$0xff]  ;;  %v21204_v16 = vand.u32 4294901760, %v21068_v31  ;;  %v21215_v31 = vand.u32 4294901760, %v15506_v57  ;;  %v21219_v56 = vld [vmem:[#allocation59_spill] sm:$0xff]  ;;  %21222 = vst [vmem:[#allocation209_spill] sm:$0xff] %v16568_v1  ;;  %v21223_v57 = vand.u32 4294901760, %v15547_v44 }
 0x393   : > { %11931 = vmatprep.subr.bf16.mxu1 %v16467_v5  ;;  %11743 = vmatprep.subr.bf16.mxu0 %v16476_v58  ;;  %v21201_v58 = vld [vmem:[#allocation41_spill] sm:$0xff]  ;;  %v21203_v5 = vand.u32 4294901760, %v21067_v39  ;;  %v21213_v39 = vand.u32 4294901760, %v15456_v28  ;;  %v21224_v28 = vand.u32 4294901760, %v15551_v43  ;;  %v21233_v44 = vld [vmem:[#allocation71_spill] sm:$0xff]  ;;  %v21239_v38 = vand.u32 4294901760, %v21238_v9 }
 0x394   : > { %v21234_v43 = vand.u32 4294901760, %v21233_v44  ;;  %v21253_v9 = vld [vmem:[#allocation90_spill] sm:$0xff]  ;;  %v16738_v25 = vld [vmem:[%s20040_s4 + $0xd8] sm:$0xff] }
 0x395   : > { %v16538_v4 = vpack.c.bf16 %v21204_v16, %v21203_v5  ;;  %v16553_v18 = vpack.c.bf16 %v21213_v39, %v21212_v47  ;;  %v21216_v16 = vand.u32 4294901760, %v15513_v3  ;;  %v16576_v3 = vpack.c.bf16 %v21224_v28, %v21223_v57  ;;  %v21240_v57 = vld [vmem:[#allocation85_spill] sm:$0xff]  ;;  %v16733_v24 = vld [vmem:[%s20040_s4 + $0xf0] sm:$0xff] }
 0x396   : > { %11933 = vmatpush1.bf16.msra.mxu1 %v16481_v21  ;;  %11745 = vmatpush1.bf16.msra.mxu0 %v16491_v0  ;;  %v21198_v0 = vld [vmem:[#allocation40_spill] sm:$0xff]  ;;  %v21200_v21 = vld [vmem:[#allocation42_spill] sm:$0xff]  ;;  %v21226_v47 = vand.u32 4294901760, %v15560_v60  ;;  %v21241_v28 = vand.u32 4294901760, %v21240_v57  ;;  %v21254_v57 = vand.u32 4294901760, %v21253_v9  ;;  %v21261_v9 = vld [vmem:[#allocation185_spill] sm:$0xff] }
 0x397   : > { %11935 = vmatprep.subr.bf16.mxu1 %v16487_v53  ;;  %11747 = vmatprep.subr.bf16.mxu0 %v21174_v22  ;;  %v21199_v53 = vld [vmem:[#allocation39_spill] sm:$0xff]  ;;  %21205 = vst [vmem:[#allocation205_spill] sm:$0xff] %v16538_v4  ;;  %21214 = vst [vmem:[#allocation207_spill] sm:$0xff] %v16553_v18  ;;  %v16560_v5 = vpack.c.bf16 %v21216_v16, %v21215_v31  ;;  %v21231_v31 = vand.u32 4294901760, %v21230_v37  ;;  %v21235_v60 = vld [vmem:[#allocation72_spill] sm:$0xff] }
 0x398   : > { %21225 = vst [vmem:[#allocation210_spill] sm:$0xff] %v16576_v3  ;;  %v16582_v39 = vpack.c.bf16 %v21227_v54, %v21226_v47  ;;  %v21236_v6 = vand.u32 4294901760, %v21235_v60  ;;  %v16607_v47 = vpack.c.bf16 %v21241_v28, %v21239_v38  ;;  %v21243_v54 = vld [vmem:[#allocation87_spill] sm:$0xff]  ;;  %v21245_v37 = vld [vmem:[#allocation88_spill] sm:$0xff]  ;;  %v21255_v38 = vld [vmem:[#allocation93_spill] sm:$0xff] }
 0x399   : > { %2711 = vmatmul.mubr.f32.vlgmr.msra.gmra.mrb[0].mxu0 %v21175_v20  ;;  %21217 = vst [vmem:[#allocation208_spill] sm:$0xff] %v16560_v5  ;;  %v16589_v16 = vpack.c.bf16 %v21231_v31, %v21229_v27  ;;  %v21244_v27 = vand.u32 4294901760, %v21243_v54  ;;  %v21246_v31 = vand.u32 4294901760, %v21245_v37  ;;  %v21256_v28 = vand.u32 4294901760, %v21255_v38  ;;  %v21258_v54 = vld [vmem:[#allocation183_spill] sm:$0xff] }
 0x39a   : > { %11937 = vmatpush1.bf16.msra.mxu1 %v16497_v10  ;;  %11749 = vmatpush1.bf16.msra.mxu0 %v21177_v61  ;;  %v21197_v10 = vld [vmem:[#allocation38_spill] sm:$0xff]  ;;  %21228 = vst [vmem:[#allocation211_spill] sm:$0xff] %v16582_v39  ;;  %v16598_v45 = vpack.c.bf16 %v21236_v6, %v21234_v43  ;;  %21242 = vst [vmem:[#allocation72_spill] sm:$0xff] %v16607_v47  ;;  %v21248_v43 = vld [vmem:[#allocation95_spill] sm:$0xff] }
 0x39b   : > { %11939 = vmatprep.subr.bf16.mxu1 %v21176_v23  ;;  %11751 = vmatprep.subr.bf16.mxu0 %v21178_v48  ;;  %21232 = vst [vmem:[#allocation76_spill] sm:$0xff] %v16589_v16  ;;  %v16613_v44 = vpack.c.bf16 %v21246_v31, %v21244_v27  ;;  %v21249_v60 = vand.u32 4294901760, %v21248_v43  ;;  %v21250_v6 = vld [vmem:[#allocation96_spill] sm:$0xff]  ;;  %v21260_v27 = vld [vmem:[#allocation186_spill] sm:$0xff] }
 0x39c   : > { %2781 = vmatprep.mubr.f32.mxu0 %v20980_v36  ;;  %21237 = vst [vmem:[#allocation71_spill] sm:$0xff] %v16598_v45  ;;  %v2144_v37 = vld [vmem:[%s20040_s4 + $0x10] sm:$0xff]  ;;  %v16645_v43 = vld [vmem:[%s20040_s4 + $0x18] sm:$0xff] }
 0x39d   : > { %3374 = vmatmul.mubr.f32.vlgmr.msra.gmra.mrb[0].mxu1 %v21175_v20  ;;  %21247 = vst [vmem:[#allocation81_spill] sm:$0xff] %v16613_v44  ;;  %v2148_v31 = vld [vmem:[%s20040_s4 + $0x30] sm:$0xff]  ;;  %v16666_v38 = vld [vmem:[%s20040_s4 + $0x58] sm:$0xff]  ;;  %v16745_v8 = vunpack.c.h.bf16 %v2144_v37 }
 0x39e   : > { %11941 = vmatpush1.bf16.msra.mxu1 %v21179_v17  ;;  %3444 = vmatprep.mubr.f32.mxu1 %v20980_v36  ;;  %v21276_v20 = vld [vmem:[#allocation188_spill] sm:$0xff] }
 0x39f   : > { %11943 = vmatprep.subr.bf16.mxu1 %v21180_v46  ;;  %11753 = vmatpush1.bf16.msra.mxu0 %v21181_v14  ;;  %21274 = vst [vmem:[#allocation215_spill] sm:$0xff] %v16745_v8 }
 0x3a0   : > { %11755 = vmatprep.subr.bf16.mxu0 %v21182_v34 }
 0x3a2   : > { %11945 = vmatpush1.bf16.msra.mxu1 %v21183_v29 }
 0x3a3   : > { %11947 = vmatprep.subr.bf16.mxu1 %v21184_v26  ;;  %11757 = vmatpush1.bf16.msra.mxu0 %v21185_v33 }
 0x3a4   : > { %11759 = vmatprep.subr.bf16.mxu0 %v21186_v35 }
 0x3a6   : > { %11949 = vmatpush1.bf16.msra.mxu1 %v21187_v41 }
 0x3a7   : > { %11951 = vmatprep.subr.bf16.mxu1 %v21188_v11  ;;  %11761 = vmatpush1.bf16.msra.mxu0 %v21189_v15 }
 0x3a8   : > { %11763 = vmatprep.subr.bf16.mxu0 %v21190_v52 }
 0x3aa   : > { %11953 = vmatpush1.bf16.msra.mxu1 %v21191_v7 }
 0x3ab   : > { %11955 = vmatprep.subr.bf16.mxu1 %v21192_v42  ;;  %11765 = vmatpush1.bf16.msra.mxu0 %v21193_v63 }
 0x3ac   : > { %11767 = vmatprep.subr.bf16.mxu0 %v21194_v19 }
 0x3ae   : > { %11957 = vmatpush1.bf16.msra.mxu1 %v21195_v13 }
 0x3af   : > { %11959 = vmatprep.subr.bf16.mxu1 %v21196_v51  ;;  %11769 = vmatpush1.bf16.msra.mxu0 %v21197_v10 }
 0x3b0   : > { %11771 = vmatprep.subr.bf16.mxu0 %v21198_v0 }
 0x3b2   : > { %11961 = vmatpush1.bf16.msra.mxu1 %v21199_v53 }
 0x3b3   : > { %11963 = vmatprep.subr.bf16.mxu1 %v21200_v21  ;;  %11773 = vmatpush1.bf16.msra.mxu0 %v21201_v58  ;;  %v21315_v21 = vld [vmem:[#allocation147_spill] sm:$0xff] }
 0x3b4   : > { %11775 = vmatprep.subr.bf16.mxu0 %v21202_v55 }
 0x3b6   : > { %11965 = vmatpush1.bf16.msra.mxu1 %v21206_v2 }
 0x3b7   : > { %11967 = vmatprep.subr.bf16.mxu1 %v21207_v30  ;;  %11777 = vmatpush1.bf16.msra.mxu0 %v21208_v32 }
 0x3b8   : > { %11779 = vmatprep.subr.bf16.mxu0 %v16538_v4 }
 0x3ba   : > { %11969 = vmatpush1.bf16.msra.mxu1 %v21218_v59  ;;  %2785 = vmatmul.mubr.f32.vlgmr.msra.gmra.mrb[0].mxu0 %v21219_v56  ;;  %v16792_v59 = vld [vmem:[%s20040_s4 + $0x138] sm:$0xff] }
 0x3bb   : > { %11971 = vmatprep.subr.bf16.mxu1 %v16547_v40  ;;  %11781 = vmatpush1.bf16.msra.mxu0 %v16553_v18  ;;  %v21271_v18 = vld [vmem:[#allocation118_spill] sm:$0xff]  ;;  %21287 = vst [vmem:[#allocation225_spill] sm:$0xff] %v16792_v59 }
 0x3bc   : > { %11783 = vmatprep.subr.bf16.mxu0 %v16560_v5  ;;  %2919 = vmatprep.mubr.f32.mxu0 %v20980_v36  ;;  %v16719_v5 = vld [vmem:[%s20040_s4 + $0xd0] sm:$0xff] }
 0x3bd   : > { %3448 = vmatmul.mubr.f32.vlgmr.msra.gmra.mrb[0].mxu1 %v21219_v56  ;;  %v16747_v56 = vunpack.c.h.bf16 %v2148_v31  ;;  %v16808_v32 = vcombine.low %v16719_v5, %v16733_v24 }
 0x3be   : > { %11973 = vmatpush1.bf16.msra.mxu1 %v16568_v1  ;;  %3582 = vmatprep.mubr.f32.mxu1 %v20980_v36 }
 0x3bf   : > { %11975 = vmatprep.subr.bf16.mxu1 %v16576_v3  ;;  %11785 = vmatpush1.bf16.msra.mxu0 %v16582_v39  ;;  %v21251_v3 = vand.u32 4294901760, %v21250_v6  ;;  %v16627_v39 = vpack.c.bf16 %v21256_v28, %v21254_v57  ;;  %v16655_v6 = vld [vmem:[%s20040_s4 + $0x50] sm:$0xff]  ;;  %v16671_v28 = vld [vmem:[%s20040_s4 + $0x78] sm:$0xff]  ;;  %21275 = vst [vmem:[#allocation216_spill] sm:$0xff] %v16747_v56  ;;  %21292 = vst [vmem:[#allocation230_spill] sm:$0xff] %v16808_v32 }
 0x3c0   : > { %11787 = vmatprep.subr.bf16.mxu0 %v16589_v16  ;;  %v16661_v57 = vld [vmem:[%s20040_s4 + $0x70] sm:$0xff]  ;;  %v16714_v16 = vcombine.high %v16666_v38, %v16671_v28  ;;  %v16728_v4 = vcombine.low %v16666_v38, %v16671_v28 }
 0x3c1   : > { %v16620_v1 = vpack.c.bf16 %v21251_v3, %v21249_v60  ;;  %21257 = vst [vmem:[#allocation87_spill] sm:$0xff] %v16627_v39  ;;  %v21259_v3 = vld [vmem:[#allocation184_spill] sm:$0xff]  ;;  %v16724_v40 = vcombine.low %v16655_v6, %v16661_v57  ;;  %v16831_v32 = vld [vmem:[%s20040_s4 + $0x170] sm:$0xff] }
 0x3c2   : > { %11977 = vmatpush1.bf16.msra.mxu1 %v16598_v45  ;;  %v16650_v60 = vld [vmem:[%s20040_s4 + $0x38] sm:$0xff]  ;;  %v16710_v45 = vcombine.high %v16655_v6, %v16661_v57  ;;  %21270 = vst [vmem:[#allocation212_spill] sm:$0xff] %v16714_v16  ;;  %21273 = vst [vmem:[#allocation214_spill] sm:$0xff] %v16728_v4  ;;  %v21277_v4 = vld [vmem:[#allocation130_spill] sm:$0xff] }
 0x3c3   : > { %21252 = vst [vmem:[#allocation85_spill] sm:$0xff] %v16620_v1  ;;  %11979 = vmatprep.subr.bf16.mxu1 %v16607_v47  ;;  %11789 = vmatpush1.bf16.msra.mxu0 %v16613_v44  ;;  %v16690_v44 = vld [vmem:[%s20040_s4 + $0xb0] sm:$0xff]  ;;  %v16706_v47 = vcombine.low %v16645_v43, %v16650_v60  ;;  %21272 = vst [vmem:[#allocation213_spill] sm:$0xff] %v16724_v40  ;;  %v16888_v2 = vunpack.c.l.bf16 %v16650_v60 }
 0x3c4   : > { %11791 = vmatprep.subr.bf16.mxu0 %v16620_v1  ;;  %v16685_v1 = vcombine.high %v16645_v43, %v16650_v60  ;;  %21269 = vst [vmem:[#allocation93_spill] sm:$0xff] %v16710_v45  ;;  %v16767_v45 = vld [vmem:[%s20040_s4 + $0x130] sm:$0xff]  ;;  %21297 = vst [vmem:[#allocation234_spill] sm:$0xff] %v16831_v32 }
 0x3c5   : > { %21268 = vst [vmem:[#allocation90_spill] sm:$0xff] %v16706_v47  ;;  %v16762_v47 = vld [vmem:[%s20040_s4 + $0x110] sm:$0xff]  ;;  %21281 = vst [vmem:[#allocation220_spill] sm:$0xff] %v16767_v45 }
 0x3c6   : > { %11981 = vmatpush1.bf16.msra.mxu1 %v16627_v39  ;;  %v16681_v39 = vcombine.high %v2144_v37, %v2148_v31  ;;  %21266 = vst [vmem:[#allocation95_spill] sm:$0xff] %v16685_v1  ;;  %21280 = vst [vmem:[#allocation219_spill] sm:$0xff] %v16762_v47  ;;  %v16787_v1 = vld [vmem:[%s20040_s4 + $0x118] sm:$0xff] }
 0x3c7   : > { %11983 = vmatprep.subr.bf16.mxu1 %v21258_v54  ;;  %11793 = vmatpush1.bf16.msra.mxu0 %v21259_v3  ;;  %v21263_v3 = vld [vmem:[#allocation117_spill] sm:$0xff]  ;;  %21310 = vst [vmem:[#allocation245_spill] sm:$0xff] %v16888_v2  ;;  %v16892_v55 = vcombine.low %v16787_v1, %v16792_v59 }
 0x3c8   : > { %11795 = vmatprep.subr.bf16.mxu0 %v21260_v27  ;;  %v21262_v27 = vld [vmem:[#allocation187_spill] sm:$0xff]  ;;  %v21264_v54 = vld [vmem:[#allocation125_spill] sm:$0xff]  ;;  %21265 = vst [vmem:[#allocation88_spill] sm:$0xff] %v16681_v39  ;;  %v16794_v39 = vunpack.c.l.bf16 %v2144_v37 }
 0x3c9   : > { %21311 = vst [vmem:[#allocation246_spill] sm:$0xff] %v16892_v55  ;;  %v21326_v55 = vld [vmem:[#allocation50_spill] sm:$0xff] }
 0x3ca   : > { %11985 = vmatpush1.bf16.msra.mxu1 %v21261_v9  ;;  %v16678_v9 = vld [vmem:[%s20040_s4 + $0x90] sm:$0xff]  ;;  %21288 = vst [vmem:[#allocation226_spill] sm:$0xff] %v16794_v39 }
 0x3cb   : > { %11987 = vmatprep.subr.bf16.mxu1 %v21262_v27  ;;  %11797 = vmatpush1.bf16.msra.mxu0 %v21263_v3  ;;  %v16695_v3 = vld [vmem:[%s20040_s4 + $0x98] sm:$0xff]  ;;  %v16702_v27 = vcombine.low %v2144_v37, %v2148_v31  ;;  %v16753_v40 = vcombine.high %v16678_v9, %v16690_v44  ;;  %v21294_v37 = vld [vmem:[#allocation133_spill] sm:$0xff] }
 0x3cc   : > { %11799 = vmatprep.subr.bf16.mxu0 %v21264_v54  ;;  %v16700_v54 = vld [vmem:[%s20040_s4 + $0xb8] sm:$0xff] }
 0x3cd   : > { %21267 = vst [vmem:[#allocation96_spill] sm:$0xff] %v16702_v27  ;;  %21278 = vst [vmem:[#allocation217_spill] sm:$0xff] %v16753_v40  ;;  %v16757_v16 = vcombine.high %v16695_v3, %v16700_v54  ;;  %v21284_v40 = vld [vmem:[#allocation135_spill] sm:$0xff]  ;;  %v16782_v27 = vcombine.low %v16695_v3, %v16700_v54 }
 0x3ce   : > { %11989 = vmatpush1.bf16.msra.mxu1 %v21271_v18  ;;  %v16743_v18 = vld [vmem:[%s20040_s4 + $0xf8] sm:$0xff] }
 0x3cf   : > { %11991 = vmatprep.subr.bf16.mxu1 %v21276_v20  ;;  %11801 = vmatpush1.bf16.msra.mxu0 %v21277_v4  ;;  %21279 = vst [vmem:[#allocation218_spill] sm:$0xff] %v16757_v16  ;;  %v16770_v4 = vunpack.c.h.bf16 %v16645_v43  ;;  %v16773_v20 = vunpack.c.h.bf16 %v16650_v60  ;;  %v16778_v16 = vcombine.low %v16678_v9, %v16690_v44  ;;  %21286 = vst [vmem:[#allocation224_spill] sm:$0xff] %v16782_v27 }
 0x3d0   : > { %11803 = vmatprep.subr.bf16.mxu0 %v21284_v40  ;;  %v16796_v40 = vunpack.c.l.bf16 %v2148_v31  ;;  %v16804_v27 = vcombine.high %v16738_v25, %v16743_v18  ;;  %v16812_v30 = vcombine.low %v16738_v25, %v16743_v18  ;;  %v16817_v31 = vcombine.high %v16762_v47, %v16767_v45 }
 0x3d1   : > { %21282 = vst [vmem:[#allocation221_spill] sm:$0xff] %v16770_v4  ;;  %21283 = vst [vmem:[#allocation222_spill] sm:$0xff] %v16773_v20 }
 0x3d2   : > { %21285 = vst [vmem:[#allocation223_spill] sm:$0xff] %v16778_v16  ;;  %21289 = vst [vmem:[#allocation227_spill] sm:$0xff] %v16796_v40  ;;  %v16800_v16 = vcombine.high %v16719_v5, %v16733_v24  ;;  %11993 = vmatpush1.bf16.msra.mxu1 %v21294_v37  ;;  %v16835_v37 = vsub.f32 %v16745_v8, %v16745_v8  ;;  %v16855_v8 = vld [vmem:[%s20040_s4 + $0x178] sm:$0xff] }
 0x3d3   : > { %21291 = vst [vmem:[#allocation229_spill] sm:$0xff] %v16804_v27  ;;  %21293 = vst [vmem:[#allocation231_spill] sm:$0xff] %v16812_v30  ;;  %v16826_v27 = vld [vmem:[%s20040_s4 + $0x150] sm:$0xff]  ;;  %v16839_v30 = vsub.f32 %v16747_v56, %v16747_v56  ;;  %v16859_v56 = vsub.f32 %v16770_v4, %v16770_v4  ;;  %v16878_v4 = vsub.f32 %v16794_v39, %v16794_v39  ;;  %v16899_v39 = vunpack.c.h.bf16 %v16655_v6 }
 0x3d4   : > { %21290 = vst [vmem:[#allocation228_spill] sm:$0xff] %v16800_v16  ;;  %21295 = vst [vmem:[#allocation232_spill] sm:$0xff] %v16817_v31  ;;  %v16821_v16 = vcombine.low %v16762_v47, %v16767_v45  ;;  %v21300_v31 = vld [vmem:[#allocation141_spill] sm:$0xff]  ;;  %v16845_v45 = vcombine.high %v16787_v1, %v16792_v59  ;;  %v16850_v47 = vld [vmem:[%s20040_s4 + $0x158] sm:$0xff]  ;;  %v16896_v58 = vcombine.high %v16826_v27, %v16831_v32 }
 0x3d5   : > { %21298 = vst [vmem:[#allocation235_spill] sm:$0xff] %v16835_v37  ;;  %21299 = vst [vmem:[#allocation236_spill] sm:$0xff] %v16839_v30  ;;  %11995 = vmatprep.subr.bf16.mxu1 %v21300_v31  ;;  %v16869_v31 = vld [vmem:[%s20040_s4 + $0x190] sm:$0xff]  ;;  %v16911_v60 = vcombine.low %v16826_v27, %v16831_v32  ;;  %v16919_v59 = vcombine.low %v16850_v47, %v16855_v8 }
 0x3d6   : > { %21296 = vst [vmem:[#allocation233_spill] sm:$0xff] %v16821_v16  ;;  %v21301_v16 = vld [vmem:[#allocation145_spill] sm:$0xff]  ;;  %21302 = vst [vmem:[#allocation237_spill] sm:$0xff] %v16845_v45  ;;  %v16874_v45 = vld [vmem:[%s20040_s4 + $0x1b0] sm:$0xff]  ;;  %11997 = vmatpush1.bf16.msra.mxu1 %v21315_v21 }
 0x3d7   : > { %11805 = vmatpush1.bf16.msra.mxu0 %v21301_v16  ;;  %21303 = vst [vmem:[#allocation238_spill] sm:$0xff] %v16859_v56  ;;  %v16863_v16 = vsub.f32 %v16773_v20, %v16773_v20  ;;  %21305 = vst [vmem:[#allocation240_spill] sm:$0xff] %v16869_v31  ;;  %v16882_v20 = vsub.f32 %v16796_v40, %v16796_v40  ;;  %v16902_v40 = vunpack.c.h.bf16 %v16661_v57  ;;  %11999 = vmatprep.subr.bf16.mxu1 %v16410_v50 }
 0x3d8   : > { %11807 = vmatprep.subr.bf16.mxu0 %v16399_v49  ;;  %21306 = vst [vmem:[#allocation241_spill] sm:$0xff] %v16874_v45  ;;  %21307 = vst [vmem:[#allocation242_spill] sm:$0xff] %v16878_v4  ;;  %v16885_v49 = vunpack.c.l.bf16 %v16645_v43  ;;  %v16907_v43 = vcombine.high %v16850_v47, %v16855_v8  ;;  %v16923_v21 = vcombine.high %v16869_v31, %v16874_v45 }
 0x3d9   : > { %21304 = vst [vmem:[#allocation239_spill] sm:$0xff] %v16863_v16  ;;  %21308 = vst [vmem:[#allocation243_spill] sm:$0xff] %v16882_v20  ;;  %v16950_v32 = vcombine.low %v16869_v31, %v16874_v45  ;;  %v16958_v50 = vsub.f32 %v16902_v40, %v16902_v40  ;;  %v17034_v31 = vld [vmem:[%s20040_s4 + $0x1d8] sm:$0xff] }
 0x3da   : > { %21309 = vst [vmem:[#allocation244_spill] sm:$0xff] %v16885_v49  ;;  %21312 = vst [vmem:[#allocation247_spill] sm:$0xff] %v16896_v58  ;;  %v16933_v58 = vld [vmem:[%s20040_s4 + $0x1b8] sm:$0xff]  ;;  %12001 = vmatpush1.bf16.msra.mxu1 %v16420_v62  ;;  %v16980_v62 = vld [vmem:[%s20040_s4 + $0x1d0] sm:$0xff] }
 0x3db   : > { %21313 = vst [vmem:[#allocation248_spill] sm:$0xff] %v16899_v39  ;;  %21314 = vst [vmem:[#allocation249_spill] sm:$0xff] %v16902_v40  ;;  %11809 = vmatpush1.bf16.msra.mxu0 %v16416_v12  ;;  %v16954_v12 = vsub.f32 %v16899_v39, %v16899_v39  ;;  %12003 = vmatprep.subr.bf16.mxu1 %v21176_v23 }
 0x3dc   : > { %21316 = vst [vmem:[#allocation250_spill] sm:$0xff] %v16907_v43  ;;  %21317 = vst [vmem:[#allocation251_spill] sm:$0xff] %v16911_v60  ;;  %v16928_v60 = vld [vmem:[%s20040_s4 + $0x198] sm:$0xff]  ;;  %11811 = vmatprep.subr.bf16.mxu0 %v21174_v22  ;;  %v16946_v43 = vsub.f32 %v16888_v2, %v16888_v2  ;;  %v21329_v22 = vand.u32 4294901760, %v16839_v30 }
 0x3dd   : > { %21318 = vst [vmem:[#allocation252_spill] sm:$0xff] %v16919_v59  ;;  %21319 = vst [vmem:[#allocation253_spill] sm:$0xff] %v16923_v21  ;;  %v16942_v21 = vsub.f32 %v16885_v49, %v16885_v49  ;;  %v16961_v59 = vunpack.c.h.bf16 %v16666_v38  ;;  %v16967_v2 = vcombine.high %v16928_v60, %v16933_v58  ;;  %v21328_v49 = vand.u32 4294901760, %v16835_v37  ;;  %3584 = vmatmul.mubr.f32.vlgmr.msra.gmra.mrb[0].mxu1 %v21326_v55 }
 0x3de   : > { %21321 = vst [vmem:[#allocation255_spill] sm:$0xff] %v16946_v43  ;;  %21322 = vst [vmem:[#allocation256_spill] sm:$0xff] %v16950_v32  ;;  %2921 = vmatmul.mubr.f32.vlgmr.msra.gmra.mrb[0].mxu0 %v21326_v55  ;;  %v3750_v40 = vsub.f32 %v16839_v30, %v21329_v22  ;;  %v16985_v32 = vld [vmem:[%s20040_s4 + $0x1f0] sm:$0xff]  ;;  %v21331_v22 = vand.u32 4294901760, %v16863_v16  ;;  %v16997_v30 = vunpack.c.l.bf16 %v16655_v6  ;;  %v17012_v6 = vcombine.low %v16928_v60, %v16933_v58 }
 0x3df   : > { %21320 = vst [vmem:[#allocation254_spill] sm:$0xff] %v16942_v21  ;;  %21323 = vst [vmem:[#allocation257_spill] sm:$0xff] %v16954_v12  ;;  %v3740_v39 = vsub.f32 %v16835_v37, %v21328_v49  ;;  %11813 = vmatpush1.bf16.msra.mxu0 %v21177_v61  ;;  %v21330_v49 = vand.u32 4294901760, %v16859_v56  ;;  %v16994_v61 = vunpack.c.h.bf16 %v16671_v28  ;;  %2991 = vmatprep.mubr.f32.mxu0 %v20980_v36 }
 0x3e0   : > { %21324 = vst [vmem:[#allocation258_spill] sm:$0xff] %v16958_v50  ;;  %21325 = vst [vmem:[#allocation259_spill] sm:$0xff] %v16961_v59  ;;  %v4413_v23 = vsub.f32 %v16863_v16, %v21331_v22  ;;  %11815 = vmatprep.subr.bf16.mxu0 %v21178_v48  ;;  %12005 = vmatpush1.bf16.msra.mxu1 %v21179_v17  ;;  %v3751_v22 = vand.u32 4294901760, %v3750_v40  ;;  %v17039_v48 = vld [vmem:[%s20040_s4 + $0x1f8] sm:$0xff]  ;;  %v21342_v17 = vand.u32 4294901760, %v16942_v21 }
 0x3e1   : > { %21327 = vst [vmem:[#allocation260_spill] sm:$0xff] %v16967_v2  ;;  %v4403_v37 = vsub.f32 %v16859_v56, %v21330_v49  ;;  %21332 = vst [vmem:[#allocation261_spill] sm:$0xff] %v16994_v61  ;;  %v21334_v2 = vand.u32 4294901760, %v16878_v4  ;;  %v21335_v49 = vand.u32 4294901760, %v16882_v20  ;;  %3654 = vmatprep.mubr.f32.mxu1 %v20980_v36  ;;  %v3741_v16 = vand.u32 4294901760, %v3740_v39  ;;  %12007 = vmatprep.subr.bf16.mxu1 %v21180_v46 }
 0x3e2   : > { %21333 = vst [vmem:[#allocation262_spill] sm:$0xff] %v16997_v30  ;;  %21336 = vst [vmem:[#allocation263_spill] sm:$0xff] %v17012_v6  ;;  %v4414_v39 = vand.u32 4294901760, %v4413_v23  ;;  %v17043_v40 = vsub.f32 %v16994_v61, %v16994_v61  ;;  %v21343_v6 = vand.u32 4294901760, %v16946_v43 }
 0x3e3   : > { %v3745_v45 = vsub.f32 %v16878_v4, %v21334_v2  ;;  %v3755_v56 = vsub.f32 %v16882_v20, %v21335_v49  ;;  %v17018_v2 = vsub.f32 %v16961_v59, %v16961_v59  ;;  %v17024_v49 = vcombine.high %v16980_v62, %v16985_v32  ;;  %11817 = vmatpush1.bf16.msra.mxu0 %v21181_v14 }
 0x3e4   : > { %v17027_v20 = vunpack.c.l.bf16 %v16661_v57  ;;  %v4404_v59 = vand.u32 4294901760, %v4403_v37  ;;  %21340 = vst [vmem:[#allocation267_spill] sm:$0xff] %v17043_v40  ;;  %v17047_v57 = vsub.f32 %v16997_v30, %v16997_v30  ;;  %11819 = vmatprep.subr.bf16.mxu0 %v21182_v34  ;;  %v4408_v4 = vsub.f32 %v16942_v21, %v21342_v17  ;;  %12009 = vmatpush1.bf16.msra.mxu1 %v21183_v29 }
 0x3e5   : > { %21337 = vst [vmem:[#allocation264_spill] sm:$0xff] %v17018_v2  ;;  %21338 = vst [vmem:[#allocation265_spill] sm:$0xff] %v17024_v49  ;;  %v3746_v14 = vand.u32 4294901760, %v3745_v45  ;;  %v3756_v46 = vand.u32 4294901760, %v3755_v56  ;;  %v4418_v23 = vsub.f32 %v16946_v43, %v21343_v6  ;;  %v21344_v37 = vand.u32 4294901760, %v16954_v12  ;;  %12011 = vmatprep.subr.bf16.mxu1 %v21184_v26 }
 0x3e6   : > { %21339 = vst [vmem:[#allocation266_spill] sm:$0xff] %v17027_v20  ;;  %21341 = vst [vmem:[#allocation268_spill] sm:$0xff] %v17047_v57  ;;  %v21345_v49 = vand.u32 4294901760, %v16958_v50  ;;  %v17064_v56 = vunpack.c.l.bf16 %v16666_v38  ;;  %v17069_v17 = vcombine.high %v17034_v31, %v17039_v48  ;;  %v17073_v45 = vcombine.low %v16980_v62, %v16985_v32 }
 0x3e7   : > { %v3760_v61 = vsub.f32 %v16954_v12, %v21344_v37  ;;  %v17077_v6 = vcombine.low %v17034_v31, %v17039_v48  ;;  %11821 = vmatpush1.bf16.msra.mxu0 %v21185_v33  ;;  %v17085_v38 = vpack.c.bf16 %v3751_v22, %v3741_v16  ;;  %v20460_v37 = vand.u32 4294901760, %v17043_v40 }
 0x3e8   : > { %v3770_v30 = vsub.f32 %v16958_v50, %v21345_v49  ;;  %21346 = vst [vmem:[#allocation269_spill] sm:$0xff] %v17064_v56  ;;  %21347 = vst [vmem:[#allocation270_spill] sm:$0xff] %v17069_v17  ;;  %v17081_v49 = vsub.f32 %v17027_v20, %v17027_v20  ;;  %v17090_v29 = vunpack.c.l.bf16 %v16671_v28  ;;  %11823 = vmatprep.subr.bf16.mxu0 %v21186_v35  ;;  %v4409_v20 = vand.u32 4294901760, %v4408_v4 }
 0x3e9   : > { %21348 = vst [vmem:[#allocation271_spill] sm:$0xff] %v17073_v45  ;;  %21349 = vst [vmem:[#allocation272_spill] sm:$0xff] %v17077_v6  ;;  %v17093_v43 = vpack.c.bf16 %v4414_v39, %v4404_v59  ;;  %v17095_v21 = vpack.c.bf16 %v3756_v46, %v3746_v14  ;;  %v4419_v50 = vand.u32 4294901760, %v4418_v23  ;;  %v3761_v26 = vand.u32 4294901760, %v3760_v61  ;;  %12013 = vmatpush1.bf16.msra.mxu1 %v21187_v41  ;;  %v21408_v41 = vld [vmem:[#allocation88_spill] sm:$0xff] }
 0x3ea   : > { %21350 = vst [vmem:[#allocation273_spill] sm:$0xff] %v17081_v49  ;;  %21351 = vst [vmem:[#allocation274_spill] sm:$0xff] %v17085_v38  ;;  %v3771_v12 = vand.u32 4294901760, %v3770_v30  ;;  %v21355_v16 = vand.u32 4294901760, %v17018_v2  ;;  %v17102_v34 = vsub.f32 %v17064_v56, %v17064_v56  ;;  %v17107_v59 = vunpack.c.h.bf16 %v16678_v9  ;;  %12015 = vmatprep.subr.bf16.mxu1 %v21188_v11 }
 0x3eb   : > { %21352 = vst [vmem:[#allocation275_spill] sm:$0xff] %v17090_v29  ;;  %21353 = vst [vmem:[#allocation276_spill] sm:$0xff] %v17093_v43  ;;  %v17110_v4 = vunpack.c.h.bf16 %v16690_v44  ;;  %v17113_v30 = vunpack.c.h.bf16 %v16695_v3  ;;  %11825 = vmatpush1.bf16.msra.mxu0 %v21189_v15  ;;  %v4433_v61 = vsub.f32 %v17043_v40, %v20460_v37  ;;  %v21360_v46 = vand.u32 4294901760, %v17047_v57 }
 0x3ec   : > { %21354 = vst [vmem:[#allocation277_spill] sm:$0xff] %v17095_v21  ;;  %v4423_v22 = vsub.f32 %v17018_v2, %v21355_v16  ;;  %21356 = vst [vmem:[#allocation278_spill] sm:$0xff] %v17102_v34  ;;  %v17127_v39 = vsub.f32 %v17090_v29, %v17090_v29  ;;  %v17130_v23 = vunpack.c.h.bf16 %v16700_v54  ;;  %11827 = vmatprep.subr.bf16.mxu0 %v21190_v52  ;;  %v17134_v16 = vunpack.c.l.bf16 %v16678_v9 }
 0x3ed   : > { %21357 = vst [vmem:[#allocation279_spill] sm:$0xff] %v17107_v59  ;;  %21358 = vst [vmem:[#allocation280_spill] sm:$0xff] %v17110_v4  ;;  %v17123_v14 = vsub.f32 %v17047_v57, %v21360_v46  ;;  %v17137_v28 = vunpack.c.l.bf16 %v16690_v44  ;;  %v17140_v37 = vunpack.c.l.bf16 %v16695_v3  ;;  %v17143_v46 = vunpack.c.l.bf16 %v16700_v54  ;;  %12017 = vmatpush1.bf16.msra.mxu1 %v21191_v7 }
 0x3ee   : > { %21359 = vst [vmem:[#allocation281_spill] sm:$0xff] %v17113_v30  ;;  %21361 = vst [vmem:[#allocation282_spill] sm:$0xff] %v17127_v39  ;;  %v17145_v56 = vpack.c.bf16 %v4419_v50, %v4409_v20  ;;  %v17147_v29 = vpack.c.bf16 %v3771_v12, %v3761_v26  ;;  %v4424_v15 = vand.u32 4294901760, %v4423_v22  ;;  %v21369_v9 = vand.u32 4294901760, %v17081_v49  ;;  %12019 = vmatprep.subr.bf16.mxu1 %v21192_v42 }
 0x3ef   : > { %21362 = vst [vmem:[#allocation283_spill] sm:$0xff] %v17130_v23  ;;  %21363 = vst [vmem:[#allocation284_spill] sm:$0xff] %v17134_v16  ;;  %v17158_v3 = vsub.f32 %v17107_v59, %v17107_v59  ;;  %v17162_v50 = vsub.f32 %v17110_v4, %v17110_v4  ;;  %v17166_v12 = vsub.f32 %v17113_v30, %v17113_v30  ;;  %11829 = vmatpush1.bf16.msra.mxu0 %v21193_v63 }
 0x3f0   : > { %21364 = vst [vmem:[#allocation285_spill] sm:$0xff] %v17137_v28  ;;  %21365 = vst [vmem:[#allocation286_spill] sm:$0xff] %v17140_v37  ;;  %v17154_v44 = vsub.f32 %v17081_v49, %v21369_v9  ;;  %v4434_v20 = vand.u32 4294901760, %v4433_v61  ;;  %v17174_v22 = vsub.f32 %v17130_v23, %v17130_v23  ;;  %11831 = vmatprep.subr.bf16.mxu0 %v21194_v19  ;;  %v21378_v54 = vand.u32 4294901760, %v17102_v34 }
 0x3f1   : > { %21366 = vst [vmem:[#allocation287_spill] sm:$0xff] %v17143_v46  ;;  %21367 = vst [vmem:[#allocation288_spill] sm:$0xff] %v17145_v56  ;;  %v17179_v9 = vsub.f32 %v17134_v16, %v17134_v16  ;;  %v17183_v11 = vsub.f32 %v17137_v28, %v17137_v28  ;;  %v17187_v61 = vsub.f32 %v17140_v37, %v17140_v37  ;;  %v17199_v4 = vunpack.c.h.bf16 %v16719_v5 }
 0x3f2   : > { %21368 = vst [vmem:[#allocation289_spill] sm:$0xff] %v17147_v29  ;;  %21370 = vst [vmem:[#allocation290_spill] sm:$0xff] %v17158_v3  ;;  %v17191_v26 = vsub.f32 %v17143_v46, %v17143_v46  ;;  %v17196_v23 = vsub.f32 %v17102_v34, %v21378_v54  ;;  %v17202_v30 = vunpack.c.h.bf16 %v16733_v24  ;;  %v17205_v28 = vunpack.c.h.bf16 %v16738_v25  ;;  %12021 = vmatpush1.bf16.msra.mxu1 %v21195_v13 }
 0x3f3   : > { %21371 = vst [vmem:[#allocation291_spill] sm:$0xff] %v17162_v50  ;;  %21372 = vst [vmem:[#allocation292_spill] sm:$0xff] %v17166_v12  ;;  %v3776_v37 = vand.u32 4294901760, %v17154_v44  ;;  %12023 = vmatprep.subr.bf16.mxu1 %v21196_v51  ;;  %11833 = vmatpush1.bf16.msra.mxu0 %v21197_v10  ;;  %v21382_v16 = vand.u32 4294901760, %v17127_v39  ;;  %v17219_v13 = vunpack.c.h.bf16 %v16743_v18  ;;  %v17222_v44 = vunpack.c.l.bf16 %v16719_v5 }
 0x3f4   : > { %21373 = vst [vmem:[#allocation293_spill] sm:$0xff] %v17174_v22  ;;  %21374 = vst [vmem:[#allocation294_spill] sm:$0xff] %v17179_v9  ;;  %11835 = vmatprep.subr.bf16.mxu0 %v21198_v0  ;;  %v17229_v51 = vpack.c.bf16 %v4434_v20, %v4424_v15  ;;  %v17237_v5 = vsub.f32 %v17202_v30, %v17202_v30  ;;  %v17241_v63 = vsub.f32 %v17205_v28, %v17205_v28 }
 0x3f5   : > { %21375 = vst [vmem:[#allocation295_spill] sm:$0xff] %v17183_v11  ;;  %21376 = vst [vmem:[#allocation296_spill] sm:$0xff] %v17187_v61  ;;  %v4438_v19 = vsub.f32 %v17127_v39, %v21382_v16  ;;  %v17233_v16 = vsub.f32 %v17199_v4, %v17199_v4  ;;  %v21389_v46 = vand.u32 4294901760, %v17158_v3  ;;  %v21390_v15 = vand.u32 4294901760, %v17162_v50  ;;  %v21460_v39 = vld [vmem:[#allocation228_spill] sm:$0xff] }
 0x3f6   : > { %21377 = vst [vmem:[#allocation297_spill] sm:$0xff] %v17191_v26  ;;  %21379 = vst [vmem:[#allocation298_spill] sm:$0xff] %v17199_v4  ;;  %12025 = vmatpush1.bf16.msra.mxu1 %v21199_v53  ;;  %v21391_v59 = vand.u32 4294901760, %v17166_v12  ;;  %v21393_v4 = vld [vmem:[#allocation42_spill] sm:$0xff]  ;;  %v4429_v53 = vand.u32 4294901760, %v17196_v23  ;;  %v21395_v0 = vand.u32 4294901760, %v17174_v22  ;;  %v17296_v35 = vunpack.c.l.bf16 %v16738_v25 }
 0x3f7   : > { %21380 = vst [vmem:[#allocation299_spill] sm:$0xff] %v17202_v30  ;;  %21381 = vst [vmem:[#allocation300_spill] sm:$0xff] %v17205_v28  ;;  %v3780_v10 = vsub.f32 %v17158_v3, %v21389_v46  ;;  %v3790_v20 = vsub.f32 %v17162_v50, %v21390_v15  ;;  %v17254_v30 = vunpack.c.l.bf16 %v16733_v24  ;;  %12027 = vmatprep.subr.bf16.mxu1 %v21393_v4  ;;  %v21394_v28 = vld [vmem:[#allocation41_spill] sm:$0xff]  ;;  %v21398_v24 = vld [vmem:[#allocation44_spill] sm:$0xff]  ;;  %v21399_v4 = vand.u32 4294901760, %v17179_v9 }
 0x3f8   : > { %21383 = vst [vmem:[#allocation301_spill] sm:$0xff] %v17219_v13  ;;  %21384 = vst [vmem:[#allocation302_spill] sm:$0xff] %v17222_v44  ;;  %v4443_v54 = vsub.f32 %v17166_v12, %v21391_v59  ;;  %11837 = vmatpush1.bf16.msra.mxu0 %v21394_v28  ;;  %v4453_v46 = vsub.f32 %v17174_v22, %v21395_v0  ;;  %v17264_v15 = vsub.f32 %v17219_v13, %v17219_v13  ;;  %v21453_v22 = vld [vmem:[#allocation218_spill] sm:$0xff] }
 0x3f9   : > { %21385 = vst [vmem:[#allocation303_spill] sm:$0xff] %v17229_v51  ;;  %21386 = vst [vmem:[#allocation304_spill] sm:$0xff] %v17233_v16  ;;  %v17268_v59 = vsub.f32 %v17222_v44, %v17222_v44  ;;  %11839 = vmatprep.subr.bf16.mxu0 %v21398_v24  ;;  %v3785_v28 = vsub.f32 %v17179_v9, %v21399_v4  ;;  %v21400_v23 = vand.u32 4294901760, %v17183_v11  ;;  %v21401_v0 = vand.u32 4294901760, %v17187_v61  ;;  %v21403_v4 = vld [vmem:[#allocation43_spill] sm:$0xff]  ;;  %v21471_v3 = vld [vmem:[#allocation230_spill] sm:$0xff] }
 0x3fa   : > { %21387 = vst [vmem:[#allocation305_spill] sm:$0xff] %v17237_v5  ;;  %21388 = vst [vmem:[#allocation306_spill] sm:$0xff] %v17241_v63  ;;  %v21402_v13 = vand.u32 4294901760, %v17191_v26  ;;  %v4439_v44 = vand.u32 4294901760, %v4438_v19  ;;  %12029 = vmatpush1.bf16.msra.mxu1 %v21403_v4  ;;  %v3781_v33 = vand.u32 4294901760, %v3780_v10  ;;  %v3791_v9 = vand.u32 4294901760, %v3790_v20 }
 0x3fb   : > { %21392 = vst [vmem:[#allocation307_spill] sm:$0xff] %v17254_v30  ;;  %21396 = vst [vmem:[#allocation308_spill] sm:$0xff] %v17264_v15  ;;  %v3795_v42 = vsub.f32 %v17183_v11, %v21400_v23  ;;  %v4448_v7 = vsub.f32 %v17187_v61, %v21401_v0  ;;  %v4444_v23 = vand.u32 4294901760, %v4443_v54  ;;  %v17289_v11 = vsub.f32 %v17254_v30, %v17254_v30  ;;  %v21405_v0 = vld [vmem:[#allocation47_spill] sm:$0xff]  ;;  %v21406_v61 = vld [vmem:[#allocation46_spill] sm:$0xff] }
 0x3fc   : > { %21397 = vst [vmem:[#allocation309_spill] sm:$0xff] %v17268_v59  ;;  %v4458_v52 = vsub.f32 %v17191_v26, %v21402_v13  ;;  %12031 = vmatprep.subr.bf16.mxu1 %v21405_v0  ;;  %11841 = vmatpush1.bf16.msra.mxu0 %v21406_v61  ;;  %v4454_v19 = vand.u32 4294901760, %v4453_v46  ;;  %21407 = vst [vmem:[#allocation311_spill] sm:$0xff] %v17296_v35  ;;  %v3786_v10 = vand.u32 4294901760, %v3785_v28  ;;  %v21409_v30 = vand.u32 4294901760, %v17123_v14  ;;  %v21418_v14 = vld [vmem:[#allocation95_spill] sm:$0xff] }
 0x3fd   : > { %21404 = vst [vmem:[#allocation310_spill] sm:$0xff] %v17289_v11  ;;  %12035 = vmatprep.subr.bf16.mxu0 %v21408_v41  ;;  %v3796_v54 = vand.u32 4294901760, %v3795_v42  ;;  %v4449_v20 = vand.u32 4294901760, %v4448_v7  ;;  %v21411_v61 = vand.u32 4294901760, %v17233_v16  ;;  %v21412_v24 = vand.u32 4294901760, %v17237_v5  ;;  %v21435_v0 = vld [vmem:[#allocation212_spill] sm:$0xff] }
 0x3fe   : > { %v4459_v4 = vand.u32 4294901760, %v4458_v52  ;;  %v17301_v26 = vpack.c.bf16 %v3776_v37, %v21409_v30  ;;  %v21413_v13 = vand.u32 4294901760, %v17241_v63  ;;  %v21414_v52 = vld [vmem:[#allocation48_spill] sm:$0xff]  ;;  %v17320_v7 = vpack.c.bf16 %v4439_v44, %v4429_v53 }
 0x3ff   : > { %v17306_v46 = vsub.f32 %v17233_v16, %v21411_v61  ;;  %v17311_v25 = vsub.f32 %v17237_v5, %v21412_v24  ;;  %12033 = vmatpush1.bf16.msra.mxu1 %v21414_v52  ;;  %2993 = vmatmul.mubr.f32.vlgmr.msra.gmra.mrb[0].mxu0 %v21326_v55  ;;  %v17322_v37 = vpack.c.bf16 %v3791_v9, %v3781_v33  ;;  %v17326_v30 = vunpack.c.l.bf16 %v16743_v18  ;;  %v21419_v61 = vld [vmem:[#allocation96_spill] sm:$0xff]  ;;  %v21423_v18 = vld [vmem:[#allocation93_spill] sm:$0xff] }
 0x400   : > { %21410 = vst [vmem:[#allocation312_spill] sm:$0xff] %v17301_v26  ;;  %v17316_v42 = vsub.f32 %v17241_v63, %v21413_v13  ;;  %21415 = vst [vmem:[#allocation313_spill] sm:$0xff] %v17320_v7  ;;  %12227 = vmatprep.subr.bf16.mxu1 %v21418_v14  ;;  %12037 = vmatpush1.bf16.msra.mxu0 %v21419_v61  ;;  %v21420_v24 = vand.u32 4294901760, %v17264_v15  ;;  %v21421_v52 = vand.u32 4294901760, %v17268_v59  ;;  %v21437_v14 = vld [vmem:[#allocation225_spill] sm:$0xff]  ;;  %v21451_v16 = vld [vmem:[#allocation240_spill] sm:$0xff]  ;;  %v17551_v57 = vunpack.c.h.bf16 %v17034_v31 }
 0x401   : > { %21416 = vst [vmem:[#allocation314_spill] sm:$0xff] %v17322_v37  ;;  %21417 = vst [vmem:[#allocation315_spill] sm:$0xff] %v17326_v30  ;;  %v17342_v33 = vsub.f32 %v17296_v35, %v17296_v35  ;;  %12039 = vmatprep.subr.bf16.mxu0 %v21423_v18  ;;  %3726 = vmatprep.mubr.f32.mxu0 %v20980_v36  ;;  %v17346_v9 = vpack.c.bf16 %v4454_v19, %v4444_v23  ;;  %v21427_v35 = vld [vmem:[#allocation219_spill] sm:$0xff]  ;;  %v21429_v18 = vld [vmem:[#allocation90_spill] sm:$0xff]  ;;  %v21430_v23 = vand.u32 4294901760, %v17289_v11 }
 0x402   : > { %v17333_v13 = vsub.f32 %v17264_v15, %v21420_v24  ;;  %v17338_v53 = vsub.f32 %v17268_v59, %v21421_v52  ;;  %v17348_v44 = vpack.c.bf16 %v3796_v54, %v3786_v10  ;;  %v17350_v28 = vpack.c.bf16 %v4459_v4, %v4449_v20  ;;  %3656 = vmatmul.mubr.f32.vlgmr.msra.gmra.mrb[0].mxu1 %v21326_v55  ;;  %v21432_v10 = vld [vmem:[#allocation220_spill] sm:$0xff]  ;;  %v21436_v52 = vld [vmem:[#allocation213_spill] sm:$0xff] }
 0x403   : > { %21422 = vst [vmem:[#allocation316_spill] sm:$0xff] %v17342_v33  ;;  %21424 = vst [vmem:[#allocation317_spill] sm:$0xff] %v17346_v9  ;;  %v17357_v61 = vunpack.c.h.bf16 %v21427_v35  ;;  %12229 = vmatpush1.bf16.msra.mxu1 %v21429_v18  ;;  %4389 = vmatprep.mubr.f32.mxu1 %v20980_v36  ;;  %v17364_v4 = vsub.f32 %v17289_v11, %v21430_v23  ;;  %v17368_v19 = vsub.f32 %v17326_v30, %v17326_v30  ;;  %v21439_v30 = vld [vmem:[#allocation217_spill] sm:$0xff]  ;;  %v21445_v23 = vld [vmem:[#allocation234_spill] sm:$0xff] }
 0x404   : > { %21425 = vst [vmem:[#allocation318_spill] sm:$0xff] %v17348_v44  ;;  %21426 = vst [vmem:[#allocation319_spill] sm:$0xff] %v17350_v28  ;;  %v17371_v54 = vunpack.c.h.bf16 %v21432_v10  ;;  %v17374_v20 = vunpack.c.h.bf16 %v16787_v1  ;;  %12231 = vmatprep.subr.bf16.mxu1 %v21435_v0  ;;  %12041 = vmatpush1.bf16.msra.mxu0 %v21436_v52  ;;  %v17382_v41 = vunpack.c.h.bf16 %v21437_v14  ;;  %v17386_v11 = vunpack.c.l.bf16 %v21427_v35  ;;  %v21494_v44 = vld [vmem:[#allocation250_spill] sm:$0xff] }
 0x405   : > { %21428 = vst [vmem:[#allocation219_spill] sm:$0xff] %v17357_v61  ;;  %21431 = vst [vmem:[#allocation320_spill] sm:$0xff] %v17368_v19  ;;  %12043 = vmatprep.subr.bf16.mxu0 %v21439_v30  ;;  %v17389_v59 = vunpack.c.l.bf16 %v21432_v10  ;;  %v17392_v0 = vunpack.c.h.bf16 %v16850_v47  ;;  %v17395_v24 = vunpack.c.h.bf16 %v16855_v8  ;;  %v17398_v18 = vunpack.c.l.bf16 %v16826_v27  ;;  %v21449_v10 = vld [vmem:[#allocation214_spill] sm:$0xff] }
 0x406   : > { %21433 = vst [vmem:[#allocation220_spill] sm:$0xff] %v17371_v54  ;;  %21434 = vst [vmem:[#allocation321_spill] sm:$0xff] %v17374_v20  ;;  %v17401_v52 = vunpack.c.l.bf16 %v21445_v23  ;;  %v17404_v30 = vunpack.c.l.bf16 %v16850_v47  ;;  %v17407_v35 = vunpack.c.l.bf16 %v16855_v8  ;;  %v17412_v15 = vsub.f32 %v17357_v61, %v17357_v61  ;;  %v21454_v8 = vld [vmem:[#allocation223_spill] sm:$0xff] }
 0x407   : > { %21438 = vst [vmem:[#allocation225_spill] sm:$0xff] %v17382_v41  ;;  %21440 = vst [vmem:[#allocation322_spill] sm:$0xff] %v17386_v11  ;;  %12233 = vmatpush1.bf16.msra.mxu1 %v21449_v10  ;;  %v17416_v63 = vsub.f32 %v17371_v54, %v17371_v54  ;;  %v17420_v5 = vsub.f32 %v17374_v20, %v17374_v20  ;;  %v17423_v47 = vunpack.c.h.bf16 %v21451_v16  ;;  %v17432_v61 = vunpack.c.l.bf16 %v16787_v1  ;;  %v21457_v54 = vld [vmem:[#allocation241_spill] sm:$0xff] }
 0x408   : > { %21441 = vst [vmem:[#allocation323_spill] sm:$0xff] %v17389_v59  ;;  %21442 = vst [vmem:[#allocation324_spill] sm:$0xff] %v17392_v0  ;;  %12235 = vmatprep.subr.bf16.mxu1 %v21453_v22  ;;  %12045 = vmatpush1.bf16.msra.mxu0 %v21454_v8  ;;  %v17429_v10 = vsub.f32 %v17382_v41, %v17382_v41  ;;  %v17435_v12 = vunpack.c.h.bf16 %v21457_v54  ;;  %v17438_v20 = vunpack.c.h.bf16 %v16928_v60  ;;  %v17485_v50 = vunpack.c.l.bf16 %v21457_v54  ;;  %v21474_v54 = vld [vmem:[#allocation232_spill] sm:$0xff] }
 0x409   : > { %21443 = vst [vmem:[#allocation325_spill] sm:$0xff] %v17395_v24  ;;  %21444 = vst [vmem:[#allocation326_spill] sm:$0xff] %v17398_v18  ;;  %12047 = vmatprep.subr.bf16.mxu0 %v21460_v39  ;;  %v17443_v22 = vsub.f32 %v17386_v11, %v17386_v11  ;;  %v17447_v8 = vsub.f32 %v17389_v59, %v17389_v59  ;;  %v17451_v1 = vsub.f32 %v17392_v0, %v17392_v0  ;;  %v21466_v39 = vld [vmem:[#allocation224_spill] sm:$0xff] }
 0x40a   : > { %21446 = vst [vmem:[#allocation234_spill] sm:$0xff] %v17401_v52  ;;  %21447 = vst [vmem:[#allocation327_spill] sm:$0xff] %v17404_v30  ;;  %v17455_v41 = vsub.f32 %v17395_v24, %v17395_v24  ;;  %v17459_v34 = vsub.f32 %v17398_v18, %v17398_v18  ;;  %v17463_v11 = vsub.f32 %v17401_v52, %v17401_v52  ;;  %v17479_v18 = vunpack.c.h.bf16 %v16933_v58 }
 0x40b   : > { %21448 = vst [vmem:[#allocation328_spill] sm:$0xff] %v17407_v35  ;;  %21450 = vst [vmem:[#allocation329_spill] sm:$0xff] %v17416_v63  ;;  %v17467_v59 = vsub.f32 %v17404_v30, %v17404_v30  ;;  %v17471_v0 = vsub.f32 %v17407_v35, %v17407_v35  ;;  %12237 = vmatpush1.bf16.msra.mxu1 %v21466_v39  ;;  %v17476_v24 = vsub.f32 %v17423_v47, %v17423_v47  ;;  %v21470_v30 = vld [vmem:[#allocation229_spill] sm:$0xff] }
 0x40c   : > { %21452 = vst [vmem:[#allocation240_spill] sm:$0xff] %v17423_v47  ;;  %21455 = vst [vmem:[#allocation330_spill] sm:$0xff] %v17429_v10  ;;  %v17482_v52 = vunpack.c.l.bf16 %v21451_v16  ;;  %12239 = vmatprep.subr.bf16.mxu1 %v21470_v30  ;;  %12049 = vmatpush1.bf16.msra.mxu0 %v21471_v3  ;;  %v17490_v35 = vunpack.c.l.bf16 %v21437_v14  ;;  %v17494_v47 = vsub.f32 %v17435_v12, %v17435_v12  ;;  %v17501_v16 = vunpack.c.l.bf16 %v16928_v60  ;;  %v21480_v60 = vld [vmem:[#allocation233_spill] sm:$0xff] }
 0x40d   : > { %21456 = vst [vmem:[#allocation331_spill] sm:$0xff] %v17432_v61  ;;  %21458 = vst [vmem:[#allocation241_spill] sm:$0xff] %v17435_v12  ;;  %v17498_v39 = vsub.f32 %v17438_v20, %v17438_v20  ;;  %12051 = vmatprep.subr.bf16.mxu0 %v21474_v54  ;;  %v17506_v30 = vsub.f32 %v17432_v61, %v17432_v61  ;;  %v17511_v12 = vunpack.c.l.bf16 %v16933_v58  ;;  %v21477_v54 = vld [vmem:[#allocation231_spill] sm:$0xff]  ;;  %v17554_v61 = vunpack.c.h.bf16 %v17039_v48 }
 0x40e   : > { %21459 = vst [vmem:[#allocation332_spill] sm:$0xff] %v17438_v20  ;;  %21461 = vst [vmem:[#allocation333_spill] sm:$0xff] %v17443_v22  ;;  %v17521_v14 = vsub.f32 %v17479_v18, %v17479_v18  ;;  %v17525_v58 = vsub.f32 %v17482_v52, %v17482_v52  ;;  %v17529_v49 = vsub.f32 %v17485_v50, %v17485_v50  ;;  %v21479_v20 = vld [vmem:[#allocation237_spill] sm:$0xff]  ;;  %v21492_v28 = vand.u32 4294901760, %v17455_v41 }
 0x40f   : > { %21462 = vst [vmem:[#allocation334_spill] sm:$0xff] %v17447_v8  ;;  %21463 = vst [vmem:[#allocation335_spill] sm:$0xff] %v17451_v1  ;;  %12241 = vmatpush1.bf16.msra.mxu1 %v21477_v54  ;;  %v17537_v3 = vsub.f32 %v17501_v16, %v17501_v16  ;;  %v21490_v54 = vld [vmem:[#allocation246_spill] sm:$0xff]  ;;  %v21496_v2 = vand.u32 4294901760, %v17459_v34  ;;  %v21497_v55 = vand.u32 4294901760, %v17463_v11  ;;  %v21499_v9 = vand.u32 4294901760, %v17467_v59 }
 0x410   : > { %21464 = vst [vmem:[#allocation336_spill] sm:$0xff] %v17455_v41  ;;  %21465 = vst [vmem:[#allocation337_spill] sm:$0xff] %v17459_v34  ;;  %12243 = vmatprep.subr.bf16.mxu1 %v21479_v20  ;;  %12053 = vmatpush1.bf16.msra.mxu0 %v21480_v60  ;;  %v17548_v20 = vunpack.c.h.bf16 %v16985_v32  ;;  %v17560_v60 = vunpack.c.l.bf16 %v16985_v32 }
 0x411   : > { %21467 = vst [vmem:[#allocation338_spill] sm:$0xff] %v17479_v18  ;;  %21468 = vst [vmem:[#allocation339_spill] sm:$0xff] %v17482_v52  ;;  %v17540_v18 = vunpack.c.h.bf16 %v16980_v62  ;;  %v21482_v52 = vld [vmem:[#allocation247_spill] sm:$0xff]  ;;  %v17589_v40 = vpack.c.bf16 %v21497_v55, %v21496_v2  ;;  %v17609_v55 = vsub.f32 %v17554_v61, %v17554_v61 }
 0x412   : > { %21469 = vst [vmem:[#allocation340_spill] sm:$0xff] %v17485_v50  ;;  %21472 = vst [vmem:[#allocation341_spill] sm:$0xff] %v17490_v35  ;;  %12055 = vmatprep.subr.bf16.mxu0 %v21482_v52  ;;  %v17545_v50 = vsub.f32 %v17511_v12, %v17511_v12  ;;  %v17563_v52 = vunpack.c.l.bf16 %v17034_v31  ;;  %v21495_v31 = vld [vmem:[#allocation251_spill] sm:$0xff] }
 0x413   : > { %21473 = vst [vmem:[#allocation342_spill] sm:$0xff] %v17501_v16  ;;  %21475 = vst [vmem:[#allocation343_spill] sm:$0xff] %v17506_v30  ;;  %v17557_v16 = vunpack.c.l.bf16 %v16980_v62  ;;  %12245 = vmatpush1.bf16.msra.mxu1 %v21490_v54  ;;  %v21491_v62 = vand.u32 4294901760, %v17451_v1  ;;  %v17583_v54 = vsub.f32 %v17540_v18, %v17540_v18 }
 0x414   : > { %21476 = vst [vmem:[#allocation344_spill] sm:$0xff] %v17511_v12  ;;  %21478 = vst [vmem:[#allocation345_spill] sm:$0xff] %v17529_v49  ;;  %v17566_v12 = vunpack.c.l.bf16 %v17039_v48  ;;  %12247 = vmatprep.subr.bf16.mxu1 %v21494_v44  ;;  %12057 = vmatpush1.bf16.msra.mxu0 %v21495_v31  ;;  %v17605_v31 = vsub.f32 %v17551_v57, %v17551_v57  ;;  %v21515_v44 = vand.u32 4294901760, %v17525_v58 }
 0x415   : > { %21481 = vst [vmem:[#allocation346_spill] sm:$0xff] %v17540_v18  ;;  %21483 = vst [vmem:[#allocation347_spill] sm:$0xff] %v17548_v20  ;;  %v17576_v32 = vpack.c.bf16 %v21492_v28, %v21491_v62  ;;  %v21500_v28 = vand.u32 4294901760, %v17471_v0  ;;  %v17601_v18 = vsub.f32 %v17548_v20, %v17548_v20  ;;  %v17613_v2 = vsub.f32 %v17557_v16, %v17557_v16  ;;  %v21503_v20 = vld [vmem:[#allocation252_spill] sm:$0xff] }
 0x416   : > { %21484 = vst [vmem:[#allocation348_spill] sm:$0xff] %v17551_v57  ;;  %21485 = vst [vmem:[#allocation349_spill] sm:$0xff] %v17554_v61  ;;  %v17625_v48 = vsub.f32 %v17566_v12, %v17566_v12  ;;  %v17629_v61 = vunpack.c.h.bf16 %v16826_v27  ;;  %v17632_v57 = vunpack.c.h.bf16 %v21445_v23  ;;  %v17651_v23 = vsub.f32 %v17490_v35, %v17490_v35 }
 0x417   : > { %21486 = vst [vmem:[#allocation350_spill] sm:$0xff] %v17557_v16  ;;  %21487 = vst [vmem:[#allocation351_spill] sm:$0xff] %v17560_v60  ;;  %v17595_v62 = vpack.c.bf16 %v21500_v28, %v21499_v9  ;;  %v17617_v9 = vsub.f32 %v17560_v60, %v17560_v60  ;;  %v17621_v28 = vsub.f32 %v17563_v52, %v17563_v52  ;;  %12249 = vmatpush1.bf16.msra.mxu1 %v21503_v20  ;;  %v21513_v20 = vld [vmem:[#allocation256_spill] sm:$0xff] }
 0x418   : > { %21488 = vst [vmem:[#allocation352_spill] sm:$0xff] %v17563_v52  ;;  %21489 = vst [vmem:[#allocation353_spill] sm:$0xff] %v17566_v12  ;;  %v21506_v16 = vand.u32 4294901760, %v17476_v24  ;;  %v21507_v60 = vand.u32 4294901760, %v17494_v47  ;;  %v21509_v52 = vand.u32 4294901760, %v17498_v39  ;;  %v20579_v27 = vand.u32 4294901760, %v17583_v54 }
 0x419   : > { %21493 = vst [vmem:[#allocation354_spill] sm:$0xff] %v17576_v32  ;;  %21498 = vst [vmem:[#allocation355_spill] sm:$0xff] %v17589_v40  ;;  %v21502_v32 = vld [vmem:[#allocation253_spill] sm:$0xff]  ;;  %v21510_v40 = vand.u32 4294901760, %v17521_v14  ;;  %v20581_v35 = vand.u32 4294901760, %v17605_v31 }
 0x41a   : > { %21501 = vst [vmem:[#allocation356_spill] sm:$0xff] %v17595_v62  ;;  %12059 = vmatprep.subr.bf16.mxu0 %v21502_v32  ;;  %21504 = vst [vmem:[#allocation357_spill] sm:$0xff] %v17629_v61  ;;  %v17638_v62 = vpack.c.bf16 %v21507_v60, %v21506_v16  ;;  %v21512_v32 = vld [vmem:[#allocation260_spill] sm:$0xff]  ;;  %v21516_v16 = vand.u32 4294901760, %v17529_v49  ;;  %v21524_v49 = vand.u32 4294901760, %v17601_v18 }
 0x41b   : > { %21505 = vst [vmem:[#allocation358_spill] sm:$0xff] %v17632_v57  ;;  %v17644_v12 = vpack.c.bf16 %v21510_v40, %v21509_v52  ;;  %12251 = vmatprep.subr.bf16.mxu1 %v21512_v32  ;;  %12061 = vmatpush1.bf16.msra.mxu0 %v21513_v20  ;;  %21514 = vst [vmem:[#allocation361_spill] sm:$0xff] %v17651_v23  ;;  %v21519_v40 = vand.u32 4294901760, %v17545_v50  ;;  %v17681_v20 = vsub.f32 %v17632_v57, %v17632_v57 }
 0x41c   : > { %21508 = vst [vmem:[#allocation359_spill] sm:$0xff] %v17638_v62  ;;  %v17657_v60 = vpack.c.bf16 %v21516_v16, %v21515_v44  ;;  %v21518_v62 = vand.u32 4294901760, %v17537_v3  ;;  %v17687_v32 = vpack.c.bf16 %v21524_v49, %v20579_v27  ;;  %v3816_v44 = vand.u32 4294901760, %v17364_v4 }
 0x41d   : > { %21511 = vst [vmem:[#allocation360_spill] sm:$0xff] %v17644_v12  ;;  %v21521_v12 = vld [vmem:[#allocation265_spill] sm:$0xff]  ;;  %21523 = vst [vmem:[#allocation364_spill] sm:$0xff] %v17681_v20  ;;  %v21531_v27 = vand.u32 4294901760, %v17621_v28  ;;  %v21535_v4 = vand.u32 4294901760, %v17311_v25  ;;  %v20586_v57 = vand.u32 4294901760, %v17416_v63 }
 0x41e   : > { %21517 = vst [vmem:[#allocation362_spill] sm:$0xff] %v17657_v60  ;;  %v17663_v52 = vpack.c.bf16 %v21519_v40, %v21518_v62  ;;  %12063 = vmatprep.subr.bf16.mxu0 %v21521_v12  ;;  %v21522_v62 = vld [vmem:[#allocation263_spill] sm:$0xff]  ;;  %v17677_v40 = vsub.f32 %v17629_v61, %v17629_v61  ;;  %21525 = vst [vmem:[#allocation365_spill] sm:$0xff] %v17687_v32  ;;  %v21526_v60 = vand.u32 4294901760, %v17609_v55  ;;  %v21528_v61 = vand.u32 4294901760, %v17613_v2 }
 0x41f   : > { %12253 = vmatpush1.bf16.msra.mxu1 %v21522_v62  ;;  %12065 = vmatpush1.bf16.msra.mxu0 %v17073_v45  ;;  %v21532_v32 = vand.u32 4294901760, %v17625_v48  ;;  %v21538_v25 = vand.u32 4294901760, %v17316_v42  ;;  %v21544_v42 = vand.u32 4294901760, %v17368_v19 }
 0x420   : > { %21520 = vst [vmem:[#allocation363_spill] sm:$0xff] %v17663_v52  ;;  %v17693_v16 = vpack.c.bf16 %v21526_v60, %v20581_v35  ;;  %12255 = vmatprep.subr.bf16.mxu1 %v17069_v17  ;;  %v21529_v52 = vand.u32 4294901760, %v17617_v9  ;;  %12067 = vmatprep.subr.bf16.mxu0 %v17085_v38  ;;  %v21534_v35 = vand.u32 4294901760, %v17306_v46  ;;  %v21537_v46 = vld [vmem:[#allocation61_spill] sm:$0xff] }
 0x421   : > { %v17709_v60 = vpack.c.bf16 %v21532_v32, %v21531_v27  ;;  %v21542_v27 = vand.u32 4294901760, %v17338_v53  ;;  %v21546_v32 = vand.u32 4294901760, %v17420_v5 }
 0x422   : > { %21527 = vst [vmem:[#allocation366_spill] sm:$0xff] %v17693_v16  ;;  %v17703_v49 = vpack.c.bf16 %v21529_v52, %v21528_v61  ;;  %v17716_v16 = vpack.c.bf16 %v21535_v4, %v21534_v35  ;;  %3732 = vmatmul.mubr.f32.vlgmr.msra.gmra.mrb[2].mxu0 %v21537_v46  ;;  %v21539_v35 = vand.u32 4294901760, %v17333_v13  ;;  %v21541_v61 = vand.u32 4294901760, %v17342_v33 }
 0x423   : > { %21533 = vst [vmem:[#allocation368_spill] sm:$0xff] %v17709_v60  ;;  %12257 = vmatpush1.bf16.msra.mxu1 %v17077_v6  ;;  %12069 = vmatpush1.bf16.msra.mxu0 %v17095_v21  ;;  %v17742_v45 = vpack.c.bf16 %v3816_v44, %v21542_v27  ;;  %v4478_v13 = vsub.f32 %v17368_v19, %v21544_v42  ;;  %v21547_v44 = vand.u32 4294901760, %v17429_v10  ;;  %v21548_v42 = vand.u32 4294901760, %v17443_v22 }
 0x424   : > { %21530 = vst [vmem:[#allocation367_spill] sm:$0xff] %v17703_v49  ;;  %21536 = vst [vmem:[#allocation369_spill] sm:$0xff] %v17716_v16  ;;  %v17731_v4 = vpack.c.bf16 %v21539_v35, %v21538_v25  ;;  %v4468_v52 = vsub.f32 %v17342_v33, %v21541_v61  ;;  %12259 = vmatprep.subr.bf16.mxu1 %v17093_v43  ;;  %v21545_v25 = vand.u32 4294901760, %v17412_v15  ;;  %12071 = vmatprep.subr.bf16.mxu0 %v17147_v29 }
 0x425   : > { %21543 = vst [vmem:[#allocation370_spill] sm:$0xff] %v17742_v45  ;;  %v3830_v35 = vsub.f32 %v17416_v63, %v20586_v57  ;;  %v4483_v53 = vsub.f32 %v17420_v5, %v21546_v32  ;;  %v4493_v27 = vsub.f32 %v17429_v10, %v21547_v44  ;;  %3930 = vmatprep.mubr.f32.mxu0 %v20980_v36  ;;  %v21549_v49 = vand.u32 4294901760, %v17447_v8 }
 0x426   : > { %21540 = vst [vmem:[#allocation61_spill] sm:$0xff] %v17731_v4  ;;  %v3820_v61 = vsub.f32 %v17412_v15, %v21545_v25  ;;  %4395 = vmatmul.mubr.f32.vlgmr.msra.gmra.mrb[2].mxu1 %v21537_v46  ;;  %v3825_v25 = vsub.f32 %v17443_v22, %v21548_v42  ;;  %v21550_v29 = vand.u32 4294901760, %v17506_v30  ;;  %v21551_v21 = vand.u32 4294901760, %v17651_v23 }
 0x427   : > { %v3835_v57 = vsub.f32 %v17447_v8, %v21549_v49  ;;  %12261 = vmatpush1.bf16.msra.mxu1 %v17145_v56  ;;  %v21552_v46 = vand.u32 4294901760, %v17677_v40  ;;  %v21553_v42 = vand.u32 4294901760, %v17681_v20  ;;  %v21554_v49 = vand.u32 4294901760, %v17451_v1  ;;  %4593 = vmatprep.mubr.f32.mxu1 %v20980_v36 }
 0x428   : > { %v4488_v32 = vsub.f32 %v17506_v30, %v21550_v29  ;;  %v4498_v44 = vsub.f32 %v17651_v23, %v21551_v21  ;;  %12263 = vmatprep.subr.bf16.mxu1 %v17229_v51  ;;  %12073 = vmatpush1.bf16.msra.mxu0 %v17301_v26  ;;  %v4469_v21 = vand.u32 4294901760, %v4468_v52  ;;  %v21555_v29 = vand.u32 4294901760, %v17455_v41 }
 0x429   : > { %v3840_v43 = vsub.f32 %v17677_v40, %v21552_v46  ;;  %v3850_v38 = vsub.f32 %v17681_v20, %v21553_v42  ;;  %v4503_v60 = vsub.f32 %v17451_v1, %v21554_v49  ;;  %v21556_v46 = vand.u32 4294901760, %v17459_v34  ;;  %12075 = vmatprep.subr.bf16.mxu0 %v17322_v37  ;;  %v21559_v20 = vld [vmem:[#allocation318_spill] sm:$0xff] }
 0x42a   : > { %v4513_v56 = vsub.f32 %v17455_v41, %v21555_v29  ;;  %v21557_v42 = vand.u32 4294901760, %v17463_v11  ;;  %v4479_v49 = vand.u32 4294901760, %v4478_v13  ;;  %v3821_v62 = vand.u32 4294901760, %v3820_v61 }
 0x42b   : > { %v3845_v6 = vsub.f32 %v17459_v34, %v21556_v46  ;;  %v3831_v51 = vand.u32 4294901760, %v3830_v35  ;;  %v4484_v12 = vand.u32 4294901760, %v4483_v53  ;;  %v4494_v26 = vand.u32 4294901760, %v4493_v27  ;;  %12265 = vmatpush1.bf16.msra.mxu1 %v17320_v7  ;;  %v21558_v34 = vld [vmem:[#allocation317_spill] sm:$0xff]  ;;  %v21638_v7 = vld [vmem:[#allocation308_spill] sm:$0xff] }
 0x42c   : > { %v3855_v17 = vsub.f32 %v17463_v11, %v21557_v42  ;;  %v3826_v52 = vand.u32 4294901760, %v3825_v25  ;;  %v3836_v1 = vand.u32 4294901760, %v3835_v57  ;;  %v4489_v23 = vand.u32 4294901760, %v4488_v32  ;;  %12267 = vmatprep.subr.bf16.mxu1 %v21558_v34  ;;  %12077 = vmatpush1.bf16.msra.mxu0 %v21559_v20  ;;  %v21634_v20 = vld [vmem:[#allocation296_spill] sm:$0xff] }
 0x42d   : > { %v4499_v29 = vand.u32 4294901760, %v4498_v44  ;;  %v3841_v41 = vand.u32 4294901760, %v3840_v43  ;;  %v3851_v30 = vand.u32 4294901760, %v3850_v38  ;;  %v4504_v46 = vand.u32 4294901760, %v4503_v60  ;;  %12079 = vmatprep.subr.bf16.mxu0 %v17716_v16  ;;  %v21569_v44 = vld [vmem:[#allocation319_spill] sm:$0xff] }
 0x42e   : > { %v4514_v42 = vand.u32 4294901760, %v4513_v56  ;;  %v3846_v37 = vand.u32 4294901760, %v3845_v6  ;;  %v3856_v13 = vand.u32 4294901760, %v3855_v17  ;;  %v21560_v61 = vand.u32 4294901760, %v17467_v59 }
 0x42f   : > { %v17804_v57 = vpack.c.bf16 %v4479_v49, %v4469_v21  ;;  %v17806_v53 = vpack.c.bf16 %v3831_v51, %v3821_v62  ;;  %v21563_v43 = vand.u32 4294901760, %v17476_v24  ;;  %v21564_v60 = vand.u32 4294901760, %v17494_v47  ;;  %12269 = vmatpush1.bf16.msra.mxu1 %v21569_v44  ;;  %v21632_v44 = vld [vmem:[#allocation305_spill] sm:$0xff] }
 0x430   : > { %v4508_v35 = vsub.f32 %v17467_v59, %v21560_v61  ;;  %v17814_v6 = vpack.c.bf16 %v4494_v26, %v4484_v12  ;;  %v21566_v17 = vand.u32 4294901760, %v17471_v0  ;;  %v21567_v25 = vand.u32 4294901760, %v17498_v39  ;;  %v21573_v61 = vld [vmem:[#allocation345_spill] sm:$0xff]  ;;  %12271 = vmatprep.subr.bf16.mxu1 %v17731_v4  ;;  %12081 = vmatpush1.bf16.msra.mxu0 %v17742_v45 }
 0x431   : > { %21561 = vst [vmem:[#allocation371_spill] sm:$0xff] %v17804_v57  ;;  %21562 = vst [vmem:[#allocation372_spill] sm:$0xff] %v17806_v53  ;;  %v3860_v38 = vsub.f32 %v17476_v24, %v21563_v43  ;;  %v3870_v56 = vsub.f32 %v17494_v47, %v21564_v60  ;;  %v21568_v51 = vand.u32 4294901760, %v17521_v14  ;;  %v17826_v21 = vpack.c.bf16 %v3836_v1, %v3826_v52 }
 0x432   : > { %21565 = vst [vmem:[#allocation373_spill] sm:$0xff] %v17814_v6  ;;  %v4518_v27 = vsub.f32 %v17471_v0, %v21566_v17  ;;  %v4523_v32 = vsub.f32 %v17498_v39, %v21567_v25  ;;  %v17828_v49 = vpack.c.bf16 %v4499_v29, %v4489_v23  ;;  %v21572_v12 = vand.u32 4294901760, %v17525_v58  ;;  %12083 = vmatprep.subr.bf16.mxu0 %v17806_v53 }
 0x433   : > { %v4533_v62 = vsub.f32 %v17521_v14, %v21568_v51  ;;  %21570 = vst [vmem:[#allocation374_spill] sm:$0xff] %v17826_v21  ;;  %v21574_v43 = vand.u32 4294901760, %v21573_v61  ;;  %v17838_v17 = vpack.c.bf16 %v3851_v30, %v3841_v41  ;;  %v17840_v25 = vpack.c.bf16 %v4514_v42, %v4504_v46  ;;  %12273 = vmatpush1.bf16.msra.mxu1 %v17804_v57 }
 0x434   : > { %21571 = vst [vmem:[#allocation375_spill] sm:$0xff] %v17828_v49  ;;  %v3865_v26 = vsub.f32 %v17525_v58, %v21572_v12  ;;  %v17842_v1 = vpack.c.bf16 %v3856_v13, %v3846_v37  ;;  %v4509_v23 = vand.u32 4294901760, %v4508_v35  ;;  %v3861_v52 = vand.u32 4294901760, %v3860_v38  ;;  %12275 = vmatprep.subr.bf16.mxu1 %v17814_v6  ;;  %12085 = vmatpush1.bf16.msra.mxu0 %v17826_v21 }
 0x435   : > { %v3875_v60 = vsub.f32 %v21573_v61, %v21574_v43  ;;  %21575 = vst [vmem:[#allocation345_spill] sm:$0xff] %v17838_v17  ;;  %21576 = vst [vmem:[#allocation376_spill] sm:$0xff] %v17840_v25  ;;  %v3871_v29 = vand.u32 4294901760, %v3870_v56  ;;  %v21578_v51 = vand.u32 4294901760, %v17583_v54  ;;  %v21579_v43 = vand.u32 4294901760, %v17601_v18  ;;  %12087 = vmatprep.subr.bf16.mxu0 %v17838_v17 }
 0x436   : > { %21577 = vst [vmem:[#allocation377_spill] sm:$0xff] %v17842_v1  ;;  %v4519_v45 = vand.u32 4294901760, %v4518_v27  ;;  %v4524_v41 = vand.u32 4294901760, %v4523_v32  ;;  %v4534_v30 = vand.u32 4294901760, %v4533_v62  ;;  %v21580_v46 = vand.u32 4294901760, %v17537_v3 }
 0x437   : > { %v3880_v12 = vsub.f32 %v17583_v54, %v21578_v51  ;;  %v3890_v4 = vsub.f32 %v17601_v18, %v21579_v43  ;;  %v3866_v42 = vand.u32 4294901760, %v3865_v26  ;;  %v3876_v13 = vand.u32 4294901760, %v3875_v60  ;;  %12277 = vmatpush1.bf16.msra.mxu1 %v17828_v49 }
 0x438   : > { %v4528_v37 = vsub.f32 %v17537_v3, %v21580_v46  ;;  %v21581_v35 = vand.u32 4294901760, %v17545_v50  ;;  %v21582_v56 = vand.u32 4294901760, %v17605_v31  ;;  %v21583_v27 = vand.u32 4294901760, %v17609_v55  ;;  %12279 = vmatprep.subr.bf16.mxu1 %v17840_v25  ;;  %12089 = vmatpush1.bf16.msra.mxu0 %v17842_v1  ;;  %v21628_v1 = vld [vmem:[#allocation294_spill] sm:$0xff]  ;;  %v21629_v25 = vld [vmem:[#allocation295_spill] sm:$0xff] }
 0x439   : > { %v21584_v62 = vand.u32 4294901760, %v17613_v2  ;;  %v21585_v60 = vand.u32 4294901760, %v17617_v9  ;;  %v17873_v46 = vpack.c.bf16 %v3871_v29, %v3861_v52  ;;  %v17875_v6 = vpack.c.bf16 %v4519_v45, %v4509_v23 }
 0x43a   : > { %v4538_v38 = vsub.f32 %v17545_v50, %v21581_v35  ;;  %v4543_v51 = vsub.f32 %v17605_v31, %v21582_v56  ;;  %v4553_v32 = vsub.f32 %v17609_v55, %v21583_v27  ;;  %v3881_v35 = vand.u32 4294901760, %v3880_v12 }
 0x43b   : > { %v3885_v26 = vsub.f32 %v17613_v2, %v21584_v62  ;;  %v3895_v43 = vsub.f32 %v17617_v9, %v21585_v60  ;;  %21586 = vst [vmem:[#allocation378_spill] sm:$0xff] %v17873_v46  ;;  %v3891_v56 = vand.u32 4294901760, %v3890_v4  ;;  %21587 = vst [vmem:[#allocation379_spill] sm:$0xff] %v17875_v6  ;;  %v17877_v21 = vpack.c.bf16 %v4534_v30, %v4524_v41 }
 0x43c   : > { %v4529_v57 = vand.u32 4294901760, %v4528_v37  ;;  %v17880_v27 = vpack.c.bf16 %v3876_v13, %v3866_v42  ;;  %v4539_v62 = vand.u32 4294901760, %v4538_v38  ;;  %v21590_v53 = vand.u32 4294901760, %v17621_v28  ;;  %12091 = vmatprep.subr.bf16.mxu0 %v17873_v46  ;;  %12281 = vmatpush1.bf16.msra.mxu1 %v17875_v6  ;;  %v21596_v42 = vld [vmem:[#allocation235_spill] sm:$0xff]  ;;  %v21597_v13 = vld [vmem:[#allocation236_spill] sm:$0xff]  ;;  %v21626_v6 = vld [vmem:[#allocation293_spill] sm:$0xff] }
 0x43d   : > { %21588 = vst [vmem:[#allocation380_spill] sm:$0xff] %v17877_v21  ;;  %v21591_v17 = vand.u32 4294901760, %v17625_v48  ;;  %v4544_v45 = vand.u32 4294901760, %v4543_v51  ;;  %v4554_v4 = vand.u32 4294901760, %v4553_v32  ;;  %v3886_v23 = vand.u32 4294901760, %v3885_v26  ;;  %12283 = vmatprep.subr.bf16.mxu1 %v17877_v21  ;;  %v21600_v51 = vld [vmem:[#allocation238_spill] sm:$0xff] }
 0x43e   : > { %21589 = vst [vmem:[#allocation381_spill] sm:$0xff] %v17880_v27  ;;  %v4548_v60 = vsub.f32 %v17621_v28, %v21590_v53  ;;  %v3896_v29 = vand.u32 4294901760, %v3895_v43  ;;  %v17891_v12 = vpack.c.bf16 %v3891_v56, %v3881_v35  ;;  %v17894_v41 = vpack.c.bf16 %v4539_v62, %v4529_v57  ;;  %12093 = vmatpush1.bf16.msra.mxu0 %v17880_v27  ;;  %v21601_v32 = vld [vmem:[#allocation239_spill] sm:$0xff]  ;;  %v21603_v43 = vld [vmem:[#allocation242_spill] sm:$0xff]  ;;  %v21606_v62 = vld [vmem:[#allocation257_spill] sm:$0xff] }
 0x43f   : > { %v4558_v52 = vsub.f32 %v17625_v48, %v21591_v17  ;;  %v17898_v17 = vpack.c.bf16 %v4554_v4, %v4544_v45  ;;  %v17905_v38 = vpack.c.bf16 %v21597_v13, %v21596_v42  ;;  %v17914_v26 = vpack.c.bf16 %v21601_v32, %v21600_v51  ;;  %v21604_v35 = vld [vmem:[#allocation243_spill] sm:$0xff]  ;;  %v21609_v45 = vld [vmem:[#allocation50_spill] sm:$0xff] }
 0x440   : > { %21592 = vst [vmem:[#allocation382_spill] sm:$0xff] %v17891_v12  ;;  %21593 = vst [vmem:[#allocation383_spill] sm:$0xff] %v17894_v41  ;;  %v4549_v53 = vand.u32 4294901760, %v4548_v60  ;;  %v17900_v37 = vpack.c.bf16 %v3896_v29, %v3886_v23  ;;  %12095 = vmatprep.subr.bf16.mxu0 %v17891_v12  ;;  %12285 = vmatpush1.bf16.msra.mxu1 %v17894_v41  ;;  %v17918_v56 = vpack.c.bf16 %v21604_v35, %v21603_v43  ;;  %v21607_v60 = vld [vmem:[#allocation258_spill] sm:$0xff]  ;;  %v21611_v23 = vld [vmem:[#allocation255_spill] sm:$0xff] }
 0x441   : > { %v4559_v30 = vand.u32 4294901760, %v4558_v52  ;;  %21594 = vst [vmem:[#allocation384_spill] sm:$0xff] %v17898_v17  ;;  %21598 = vst [vmem:[#allocation235_spill] sm:$0xff] %v17905_v38  ;;  %12287 = vmatprep.subr.bf16.mxu1 %v17898_v17  ;;  %v17923_v52 = vpack.c.bf16 %v21607_v60, %v21606_v62  ;;  %v21610_v4 = vld [vmem:[#allocation254_spill] sm:$0xff]  ;;  %v21617_v17 = vld [vmem:[#allocation273_spill] sm:$0xff]  ;;  %v17962_v49 = vpack.c.bf16 %v21629_v25, %v21628_v1 }
 0x442   : > { %21595 = vst [vmem:[#allocation385_spill] sm:$0xff] %v17900_v37  ;;  %12097 = vmatpush1.bf16.msra.mxu0 %v17900_v37  ;;  %21602 = vst [vmem:[#allocation238_spill] sm:$0xff] %v17914_v26  ;;  %v17929_v29 = vpack.c.bf16 %v21611_v23, %v21610_v4  ;;  %v21620_v12 = vld [vmem:[#allocation291_spill] sm:$0xff]  ;;  %v21640_v25 = vld [vmem:[#allocation309_spill] sm:$0xff] }
 0x443   : > { %v17908_v57 = vpack.c.bf16 %v4559_v30, %v4549_v53  ;;  %21605 = vst [vmem:[#allocation239_spill] sm:$0xff] %v17918_v56  ;;  %12099 = vmatprep.subr.bf16.mxu0 %v17905_v38  ;;  %21608 = vst [vmem:[#allocation242_spill] sm:$0xff] %v17923_v52  ;;  %v21613_v53 = vld [vmem:[#allocation264_spill] sm:$0xff]  ;;  %v21614_v30 = vld [vmem:[#allocation267_spill] sm:$0xff] }
 0x444   : > { %21612 = vst [vmem:[#allocation243_spill] sm:$0xff] %v17929_v29  ;;  %v17935_v37 = vpack.c.bf16 %v21614_v30, %v21613_v53  ;;  %v21616_v38 = vld [vmem:[#allocation268_spill] sm:$0xff]  ;;  %21630 = vst [vmem:[#allocation267_spill] sm:$0xff] %v17962_v49 }
 0x445   : > { %21599 = vst [vmem:[#allocation236_spill] sm:$0xff] %v17908_v57  ;;  %12289 = vmatpush1.bf16.msra.mxu1 %v17908_v57  ;;  %3932 = vmatmul.mubr.f32.vlgmr.msra.gmra.mrb[2].mxu0 %v21609_v45  ;;  %v17939_v41 = vpack.c.bf16 %v21617_v17, %v21616_v38  ;;  %v21619_v57 = vld [vmem:[#allocation290_spill] sm:$0xff] }
 0x446   : > { %12291 = vmatprep.subr.bf16.mxu1 %v17914_v26  ;;  %12101 = vmatpush1.bf16.msra.mxu0 %v17918_v56  ;;  %21615 = vst [vmem:[#allocation257_spill] sm:$0xff] %v17935_v37  ;;  %v17944_v27 = vpack.c.bf16 %v21620_v12, %v21619_v57  ;;  %v21622_v56 = vld [vmem:[#allocation278_spill] sm:$0xff] }
 0x447   : > { %21618 = vst [vmem:[#allocation258_spill] sm:$0xff] %v17939_v41  ;;  %12103 = vmatprep.subr.bf16.mxu0 %v17923_v52  ;;  %4034 = vmatprep.mubr.f32.mxu0 %v20980_v36  ;;  %v21623_v26 = vld [vmem:[#allocation282_spill] sm:$0xff]  ;;  %v21625_v52 = vld [vmem:[#allocation292_spill] sm:$0xff] }
 0x448   : > { %21621 = vst [vmem:[#allocation254_spill] sm:$0xff] %v17944_v27  ;;  %4595 = vmatmul.mubr.f32.vlgmr.msra.gmra.mrb[2].mxu1 %v21609_v45  ;;  %v17951_v21 = vpack.c.bf16 %v21623_v26, %v21622_v56  ;;  %v17958_v46 = vpack.c.bf16 %v21626_v6, %v21625_v52 }
 0x449   : > { %12293 = vmatpush1.bf16.msra.mxu1 %v17929_v29  ;;  %4697 = vmatprep.mubr.f32.mxu1 %v20980_v36  ;;  %v21631_v29 = vld [vmem:[#allocation304_spill] sm:$0xff] }
 0x44a   : > { %21624 = vst [vmem:[#allocation255_spill] sm:$0xff] %v17951_v21  ;;  %12295 = vmatprep.subr.bf16.mxu1 %v17935_v37  ;;  %12105 = vmatpush1.bf16.msra.mxu0 %v17939_v41  ;;  %21627 = vst [vmem:[#allocation264_spill] sm:$0xff] %v17958_v46  ;;  %v17967_v16 = vpack.c.bf16 %v21632_v44, %v21631_v29  ;;  %v21635_v37 = vld [vmem:[#allocation297_spill] sm:$0xff]  ;;  %v21637_v41 = vld [vmem:[#allocation306_spill] sm:$0xff] }
 0x44b   : > { %12107 = vmatprep.subr.bf16.mxu0 %v17944_v27  ;;  %v17972_v34 = vpack.c.bf16 %v21635_v37, %v21634_v20  ;;  %v17978_v45 = vpack.c.bf16 %v21638_v7, %v21637_v41  ;;  %v21641_v27 = vld [vmem:[#allocation310_spill] sm:$0xff] }
 0x44c   : > { %21633 = vst [vmem:[#allocation268_spill] sm:$0xff] %v17967_v16  ;;  %v17982_v1 = vpack.c.bf16 %v21641_v27, %v21640_v25 }
 0x44d   : > { %12297 = vmatpush1.bf16.msra.mxu1 %v17951_v21  ;;  %21636 = vst [vmem:[#allocation273_spill] sm:$0xff] %v17972_v34  ;;  %21639 = vst [vmem:[#allocation290_spill] sm:$0xff] %v17978_v45  ;;  %v17987_v21 = vpack.c.bf16 %v17416_v63, %v17412_v15 }
 0x44e   : > { %12299 = vmatprep.subr.bf16.mxu1 %v17958_v46  ;;  %12109 = vmatpush1.bf16.msra.mxu0 %v17962_v49  ;;  %21642 = vst [vmem:[#allocation291_spill] sm:$0xff] %v17982_v1  ;;  %v17992_v46 = vpack.c.bf16 %v17368_v19, %v17342_v33  ;;  %v17998_v49 = vpack.c.bf16 %v17429_v10, %v17420_v5  ;;  %v21649_v19 = vld [vmem:[#allocation343_spill] sm:$0xff]  ;;  %v21653_v10 = vld [vmem:[#allocation336_spill] sm:$0xff] }
 0x44f   : > { %12111 = vmatprep.subr.bf16.mxu0 %v17967_v16  ;;  %21643 = vst [vmem:[#allocation278_spill] sm:$0xff] %v17987_v21  ;;  %v18002_v16 = vpack.c.bf16 %v17447_v8, %v17443_v22  ;;  %v21655_v22 = vld [vmem:[#allocation337_spill] sm:$0xff] }
 0x450   : > { %21644 = vst [vmem:[#allocation282_spill] sm:$0xff] %v17992_v46  ;;  %21645 = vst [vmem:[#allocation292_spill] sm:$0xff] %v17998_v49 }
 0x451   : > { %12301 = vmatpush1.bf16.msra.mxu1 %v17972_v34  ;;  %21646 = vst [vmem:[#allocation293_spill] sm:$0xff] %v18002_v16  ;;  %v21647_v34 = vld [vmem:[#allocation364_spill] sm:$0xff] }
 0x452   : > { %12303 = vmatprep.subr.bf16.mxu1 %v17978_v45  ;;  %12113 = vmatpush1.bf16.msra.mxu0 %v17982_v1  ;;  %v18007_v63 = vpack.c.bf16 %v21647_v34, %v17677_v40  ;;  %v21650_v45 = vld [vmem:[#allocation361_spill] sm:$0xff]  ;;  %v21652_v1 = vld [vmem:[#allocation335_spill] sm:$0xff] }
 0x453   : > { %12115 = vmatprep.subr.bf16.mxu0 %v17987_v21  ;;  %v18012_v33 = vpack.c.bf16 %v21650_v45, %v21649_v19  ;;  %v18018_v8 = vpack.c.bf16 %v21653_v10, %v21652_v1  ;;  %v18022_v21 = vpack.c.bf16 %v17463_v11, %v21655_v22  ;;  %v18038_v11 = vpack.c.bf16 %v17521_v14, %v17498_v39  ;;  %v21668_v10 = vld [vmem:[#allocation95_spill] sm:$0xff]  ;;  %v21671_v14 = vld [vmem:[#allocation90_spill] sm:$0xff]  ;;  %v21680_v1 = vld [vmem:[#allocation229_spill] sm:$0xff] }
 0x454   : > { %21648 = vst [vmem:[#allocation304_spill] sm:$0xff] %v18007_v63  ;;  %v18042_v22 = vpack.c.bf16 %v21573_v61, %v17525_v58  ;;  %v18058_v39 = vpack.c.bf16 %v17609_v55, %v17605_v31  ;;  %v21672_v58 = vld [vmem:[#allocation212_spill] sm:$0xff]  ;;  %v21673_v31 = vld [vmem:[#allocation213_spill] sm:$0xff]  ;;  %v21675_v55 = vld [vmem:[#allocation214_spill] sm:$0xff] }
 0x455   : > { %12305 = vmatpush1.bf16.msra.mxu1 %v17992_v46  ;;  %21651 = vst [vmem:[#allocation305_spill] sm:$0xff] %v18012_v33  ;;  %21654 = vst [vmem:[#allocation296_spill] sm:$0xff] %v18018_v8  ;;  %v18027_v46 = vpack.c.bf16 %v17494_v47, %v17476_v24  ;;  %v18047_v24 = vpack.c.bf16 %v17601_v18, %v17583_v54  ;;  %v21667_v18 = vld [vmem:[#allocation57_spill] sm:$0xff]  ;;  %v21669_v47 = vld [vmem:[#allocation96_spill] sm:$0xff] }
 0x456   : > { %12307 = vmatprep.subr.bf16.mxu1 %v17998_v49  ;;  %12117 = vmatpush1.bf16.msra.mxu0 %v18002_v16  ;;  %21656 = vst [vmem:[#allocation297_spill] sm:$0xff] %v18022_v21  ;;  %v18032_v49 = vpack.c.bf16 %v17471_v0, %v17467_v59  ;;  %21659 = vst [vmem:[#allocation309_spill] sm:$0xff] %v18038_v11  ;;  %v18052_v59 = vpack.c.bf16 %v17545_v50, %v17537_v3  ;;  %v21666_v50 = vld [vmem:[#allocation88_spill] sm:$0xff]  ;;  %v21670_v54 = vld [vmem:[#allocation93_spill] sm:$0xff]  ;;  %v21695_v16 = vand.u32 4294901760, %v21596_v42 }
 0x457   : > { %12119 = vmatprep.subr.bf16.mxu0 %v18007_v63  ;;  %21657 = vst [vmem:[#allocation306_spill] sm:$0xff] %v18027_v46  ;;  %21660 = vst [vmem:[#allocation310_spill] sm:$0xff] %v18042_v22  ;;  %v18062_v0 = vpack.c.bf16 %v17617_v9, %v17613_v2  ;;  %v18068_v3 = vpack.c.bf16 %v17625_v48, %v17621_v28  ;;  %v21674_v48 = vld [vmem:[#allocation217_spill] sm:$0xff]  ;;  %v21676_v2 = vld [vmem:[#allocation218_spill] sm:$0xff]  ;;  %v21705_v42 = vand.u32 4294901760, %v21604_v35 }
 0x458   : > { %21658 = vst [vmem:[#allocation308_spill] sm:$0xff] %v18032_v49  ;;  %21661 = vst [vmem:[#allocation364_spill] sm:$0xff] %v18047_v24  ;;  %v21677_v9 = vld [vmem:[#allocation223_spill] sm:$0xff]  ;;  %v21678_v28 = vld [vmem:[#allocation228_spill] sm:$0xff] }
 0x459   : > { %12309 = vmatpush1.bf16.msra.mxu1 %v18012_v33  ;;  %21662 = vst [vmem:[#allocation343_spill] sm:$0xff] %v18052_v59  ;;  %21663 = vst [vmem:[#allocation361_spill] sm:$0xff] %v18058_v39  ;;  %v21679_v61 = vld [vmem:[#allocation224_spill] sm:$0xff]  ;;  %v21694_v63 = vld [vmem:[#allocation265_spill] sm:$0xff] }
 0x45a   : > { %12311 = vmatprep.subr.bf16.mxu1 %v18018_v8  ;;  %12121 = vmatpush1.bf16.msra.mxu0 %v18022_v21  ;;  %21664 = vst [vmem:[#allocation335_spill] sm:$0xff] %v18062_v0  ;;  %21665 = vst [vmem:[#allocation336_spill] sm:$0xff] %v18068_v3  ;;  %v21691_v21 = vld [vmem:[#allocation252_spill] sm:$0xff] }
 0x45b   : > { %12123 = vmatprep.subr.bf16.mxu0 %v18027_v46  ;;  %v21690_v46 = vld [vmem:[#allocation253_spill] sm:$0xff]  ;;  %v21692_v8 = vld [vmem:[#allocation260_spill] sm:$0xff] }
 0x45c   : > { %v21693_v33 = vld [vmem:[#allocation256_spill] sm:$0xff] }
 0x45d   : > { %12313 = vmatpush1.bf16.msra.mxu1 %v18032_v49  ;;  %v21689_v49 = vld [vmem:[#allocation251_spill] sm:$0xff] }
 0x45e   : > { %12315 = vmatprep.subr.bf16.mxu1 %v18038_v11  ;;  %12125 = vmatpush1.bf16.msra.mxu0 %v18042_v22  ;;  %v21687_v22 = vld [vmem:[#allocation246_spill] sm:$0xff] }
 0x45f   : > { %12127 = vmatprep.subr.bf16.mxu0 %v18047_v24  ;;  %v21686_v24 = vld [vmem:[#allocation247_spill] sm:$0xff]  ;;  %v21688_v11 = vld [vmem:[#allocation250_spill] sm:$0xff] }
 0x461   : > { %12317 = vmatpush1.bf16.msra.mxu1 %v18052_v59  ;;  %v21685_v59 = vld [vmem:[#allocation233_spill] sm:$0xff] }
 0x462   : > { %12319 = vmatprep.subr.bf16.mxu1 %v18058_v39  ;;  %12129 = vmatpush1.bf16.msra.mxu0 %v18062_v0  ;;  %v21683_v0 = vld [vmem:[#allocation231_spill] sm:$0xff]  ;;  %v21684_v39 = vld [vmem:[#allocation237_spill] sm:$0xff] }
 0x463   : > { %12131 = vmatprep.subr.bf16.mxu0 %v21666_v50 }
 0x465   : > { %12321 = vmatpush1.bf16.msra.mxu1 %v18068_v3  ;;  %4037 = vmatmul.mubr.f32.vlgmr.msra.gmra.mrb[2].mxu0 %v21667_v18  ;;  %v21682_v3 = vld [vmem:[#allocation232_spill] sm:$0xff] }
 0x466   : > { %12323 = vmatprep.subr.bf16.mxu1 %v21668_v10  ;;  %12133 = vmatpush1.bf16.msra.mxu0 %v21669_v47 }
 0x467   : > { %12135 = vmatprep.subr.bf16.mxu0 %v21670_v54  ;;  %4107 = vmatprep.mubr.f32.mxu0 %v20980_v36 }
 0x468   : > { %4700 = vmatmul.mubr.f32.vlgmr.msra.gmra.mrb[2].mxu1 %v21667_v18  ;;  %v21681_v18 = vld [vmem:[#allocation230_spill] sm:$0xff] }
 0x469   : > { %12325 = vmatpush1.bf16.msra.mxu1 %v21671_v14  ;;  %4770 = vmatprep.mubr.f32.mxu1 %v20980_v36 }
 0x46a   : > { %12327 = vmatprep.subr.bf16.mxu1 %v21672_v58  ;;  %12137 = vmatpush1.bf16.msra.mxu0 %v21673_v31 }
 0x46b   : > { %12139 = vmatprep.subr.bf16.mxu0 %v21674_v48 }
 0x46d   : > { %12329 = vmatpush1.bf16.msra.mxu1 %v21675_v55 }
 0x46e   : > { %12331 = vmatprep.subr.bf16.mxu1 %v21676_v2  ;;  %12141 = vmatpush1.bf16.msra.mxu0 %v21677_v9 }
 0x46f   : > { %12143 = vmatprep.subr.bf16.mxu0 %v21678_v28 }
 0x471   : > { %12333 = vmatpush1.bf16.msra.mxu1 %v21679_v61 }
 0x472   : > { %12335 = vmatprep.subr.bf16.mxu1 %v21680_v1  ;;  %12145 = vmatpush1.bf16.msra.mxu0 %v21681_v18 }
 0x473   : > { %12147 = vmatprep.subr.bf16.mxu0 %v21682_v3 }
 0x475   : > { %12337 = vmatpush1.bf16.msra.mxu1 %v21683_v0 }
 0x476   : > { %12339 = vmatprep.subr.bf16.mxu1 %v21684_v39  ;;  %12149 = vmatpush1.bf16.msra.mxu0 %v21685_v59 }
 0x477   : > { %12151 = vmatprep.subr.bf16.mxu0 %v21686_v24  ;;  %v21696_v24 = vand.u32 4294901760, %v21597_v13  ;;  %v21708_v13 = vand.u32 4294901760, %v21607_v60  ;;  %v21719_v60 = vand.u32 4294901760, %v21617_v17  ;;  %v21725_v17 = vand.u32 4294901760, %v21623_v26 }
 0x478   : > { %v21735_v26 = vand.u32 4294901760, %v21631_v29  ;;  %v21742_v29 = vand.u32 4294901760, %v21638_v7 }
 0x479   : > { %12341 = vmatpush1.bf16.msra.mxu1 %v21687_v22  ;;  %v18109_v59 = vpack.c.bf16 %v21696_v24, %v21695_v16  ;;  %v21698_v22 = vld [vmem:[#allocation263_spill] sm:$0xff]  ;;  %v21707_v16 = vand.u32 4294901760, %v21606_v62  ;;  %v21718_v62 = vand.u32 4294901760, %v21616_v38  ;;  %v21724_v38 = vand.u32 4294901760, %v21622_v56 }
 0x47a   : > { %12343 = vmatprep.subr.bf16.mxu1 %v21688_v11  ;;  %12153 = vmatpush1.bf16.msra.mxu0 %v21689_v49  ;;  %v21699_v11 = vld [vmem:[#allocation270_spill] sm:$0xff]  ;;  %v21700_v49 = vld [vmem:[#allocation271_spill] sm:$0xff] }
 0x47b   : > { %12155 = vmatprep.subr.bf16.mxu0 %v21690_v46  ;;  %21697 = vst [vmem:[#allocation337_spill] sm:$0xff] %v18109_v59  ;;  %v18131_v24 = vpack.c.bf16 %v21708_v13, %v21707_v16  ;;  %v21730_v13 = vld [vmem:[#allocation294_spill] sm:$0xff] }
 0x47d   : > { %12345 = vmatpush1.bf16.msra.mxu1 %v21691_v21  ;;  %v21701_v21 = vand.u32 4294901760, %v21600_v51  ;;  %21709 = vst [vmem:[#allocation387_spill] sm:$0xff] %v18131_v24  ;;  %v21711_v51 = vld [vmem:[#allocation59_spill] sm:$0xff] }
 0x47e   : > { %12347 = vmatprep.subr.bf16.mxu1 %v21692_v8  ;;  %12157 = vmatpush1.bf16.msra.mxu0 %v21693_v33  ;;  %v21702_v8 = vand.u32 4294901760, %v21601_v32 }
 0x47f   : > { %12159 = vmatprep.subr.bf16.mxu0 %v21694_v63  ;;  %v21704_v63 = vand.u32 4294901760, %v21603_v43  ;;  %v21716_v43 = vand.u32 4294901760, %v21614_v30 }
 0x480   : > { %v18118_v46 = vpack.c.bf16 %v21702_v8, %v21701_v21  ;;  %v21712_v8 = vand.u32 4294901760, %v21610_v4  ;;  %v21713_v21 = vand.u32 4294901760, %v21611_v23  ;;  %v21721_v4 = vand.u32 4294901760, %v21619_v57 }
 0x481   : > { %12349 = vmatpush1.bf16.msra.mxu1 %v21698_v22  ;;  %v18124_v33 = vpack.c.bf16 %v21705_v42, %v21704_v63  ;;  %v21715_v63 = vand.u32 4294901760, %v21613_v53  ;;  %v18153_v42 = vpack.c.bf16 %v21719_v60, %v21718_v62  ;;  %v21722_v23 = vand.u32 4294901760, %v21620_v12 }
 0x482   : > { %12351 = vmatprep.subr.bf16.mxu1 %v21699_v11  ;;  %12161 = vmatpush1.bf16.msra.mxu0 %v21700_v49  ;;  %21703 = vst [vmem:[#allocation57_spill] sm:$0xff] %v18118_v46  ;;  %v21710_v49 = vld [vmem:[#allocation272_spill] sm:$0xff]  ;;  %v18139_v32 = vpack.c.bf16 %v21713_v21, %v21712_v8  ;;  %v18169_v53 = vpack.c.bf16 %v21725_v17, %v21724_v38  ;;  %v21727_v12 = vand.u32 4294901760, %v21625_v52  ;;  %v21728_v57 = vand.u32 4294901760, %v21626_v6  ;;  %v21732_v8 = vld [vmem:[#allocation295_spill] sm:$0xff] }
 0x483   : > { %21706 = vst [vmem:[#allocation386_spill] sm:$0xff] %v18124_v33  ;;  %12163 = vmatprep.subr.bf16.mxu0 %v18109_v59  ;;  %v18147_v35 = vpack.c.bf16 %v21716_v43, %v21715_v63  ;;  %21720 = vst [vmem:[#allocation389_spill] sm:$0xff] %v18153_v42  ;;  %v18160_v16 = vpack.c.bf16 %v21722_v23, %v21721_v4  ;;  %v21733_v56 = vand.u32 4294901760, %v21732_v8  ;;  %v21736_v63 = vand.u32 4294901760, %v21632_v44 }
 0x484   : > { %21714 = vst [vmem:[#allocation59_spill] sm:$0xff] %v18139_v32  ;;  %21726 = vst [vmem:[#allocation391_spill] sm:$0xff] %v18169_v53  ;;  %v18178_v30 = vpack.c.bf16 %v21728_v57, %v21727_v12  ;;  %v21738_v6 = vand.u32 4294901760, %v21634_v20  ;;  %v21739_v52 = vand.u32 4294901760, %v21635_v37  ;;  %v21741_v60 = vand.u32 4294901760, %v21637_v41  ;;  %v21748_v37 = vld [vmem:[#allocation329_spill] sm:$0xff] }
 0x485   : > { %12353 = vmatpush1.bf16.msra.mxu1 %v21710_v49  ;;  %4111 = vmatmul.mubr.f32.vlgmr.msra.gmra.mrb[2].mxu0 %v21711_v51  ;;  %21717 = vst [vmem:[#allocation388_spill] sm:$0xff] %v18147_v35  ;;  %21723 = vst [vmem:[#allocation390_spill] sm:$0xff] %v18160_v16  ;;  %v18191_v43 = vpack.c.bf16 %v21736_v63, %v21735_v26  ;;  %v21744_v44 = vand.u32 4294901760, %v21640_v25  ;;  %v21745_v23 = vand.u32 4294901760, %v21641_v27  ;;  %v21747_v20 = vand.u32 4294901760, %v17412_v15  ;;  %v21751_v41 = vld [vmem:[#allocation316_spill] sm:$0xff] }
 0x486   : > { %12355 = vmatprep.subr.bf16.mxu1 %v18118_v46  ;;  %12165 = vmatpush1.bf16.msra.mxu0 %v18124_v33  ;;  %21729 = vst [vmem:[#allocation392_spill] sm:$0xff] %v18178_v30  ;;  %v18198_v62 = vpack.c.bf16 %v21739_v52, %v21738_v6  ;;  %v18206_v4 = vpack.c.bf16 %v21742_v29, %v21741_v60  ;;  %v21749_v17 = vand.u32 4294901760, %v21748_v37  ;;  %v21752_v7 = vand.u32 4294901760, %v21751_v41  ;;  %v21753_v57 = vld [vmem:[#allocation320_spill] sm:$0xff]  ;;  %v21757_v27 = vld [vmem:[#allocation330_spill] sm:$0xff]  ;;  %v21773_v37 = vld [vmem:[#allocation359_spill] sm:$0xff] }
 0x487   : > { %12167 = vmatprep.subr.bf16.mxu0 %v18131_v24  ;;  %4245 = vmatprep.mubr.f32.mxu0 %v20980_v36  ;;  %21737 = vst [vmem:[#allocation295_spill] sm:$0xff] %v18191_v43  ;;  %v18212_v38 = vpack.c.bf16 %v21745_v23, %v21744_v44  ;;  %v21756_v25 = vand.u32 4294901760, %v17420_v5  ;;  %v21758_v15 = vand.u32 4294901760, %v21757_v27  ;;  %v21762_v63 = vld [vmem:[#allocation334_spill] sm:$0xff]  ;;  %v21765_v60 = vand.u32 4294901760, %v17677_v40  ;;  %v21777_v41 = vld [vmem:[#allocation365_spill] sm:$0xff] }
 0x488   : > { %4774 = vmatmul.mubr.f32.vlgmr.msra.gmra.mrb[2].mxu1 %v21711_v51  ;;  %v21731_v51 = vand.u32 4294901760, %v21730_v13  ;;  %21740 = vst [vmem:[#allocation393_spill] sm:$0xff] %v18198_v62  ;;  %21743 = vst [vmem:[#allocation394_spill] sm:$0xff] %v18206_v4  ;;  %v18219_v12 = vpack.c.bf16 %v21749_v17, %v21747_v20  ;;  %v21754_v13 = vand.u32 4294901760, %v21753_v57  ;;  %v21763_v6 = vand.u32 4294901760, %v21762_v63  ;;  %v21771_v40 = vld [vmem:[#allocation354_spill] sm:$0xff] }
 0x489   : > { %12357 = vmatpush1.bf16.msra.mxu1 %v18139_v32  ;;  %4908 = vmatprep.mubr.f32.mxu1 %v20980_v36  ;;  %21746 = vst [vmem:[#allocation395_spill] sm:$0xff] %v18212_v38  ;;  %v18234_v8 = vpack.c.bf16 %v21758_v15, %v21756_v25  ;;  %v21766_v29 = vand.u32 4294901760, %v21647_v34  ;;  %v21768_v5 = vand.u32 4294901760, %v21649_v19  ;;  %v21769_v23 = vand.u32 4294901760, %v21650_v45  ;;  %v21772_v34 = vld [vmem:[#allocation355_spill] sm:$0xff]  ;;  %v21774_v17 = vld [vmem:[#allocation356_spill] sm:$0xff] }
 0x48a   : > { %12359 = vmatprep.subr.bf16.mxu1 %v18147_v35  ;;  %12169 = vmatpush1.bf16.msra.mxu0 %v18153_v42  ;;  %v18184_v21 = vpack.c.bf16 %v21733_v56, %v21731_v51  ;;  %21750 = vst [vmem:[#allocation329_spill] sm:$0xff] %v18219_v12  ;;  %v18226_v51 = vpack.c.bf16 %v21754_v13, %v21752_v7  ;;  %v21760_v56 = vld [vmem:[#allocation333_spill] sm:$0xff]  ;;  %v21775_v19 = vld [vmem:[#allocation360_spill] sm:$0xff]  ;;  %v21776_v45 = vld [vmem:[#allocation362_spill] sm:$0xff] }
 0x48b   : > { %12171 = vmatprep.subr.bf16.mxu0 %v18160_v16  ;;  %21759 = vst [vmem:[#allocation320_spill] sm:$0xff] %v18234_v8  ;;  %v21761_v26 = vand.u32 4294901760, %v21760_v56  ;;  %v18247_v44 = vpack.c.bf16 %v21766_v29, %v21765_v60  ;;  %v18254_v20 = vpack.c.bf16 %v21769_v23, %v21768_v5  ;;  %v21778_v7 = vld [vmem:[#allocation363_spill] sm:$0xff]  ;;  %v21779_v57 = vld [vmem:[#allocation366_spill] sm:$0xff]  ;;  %v21781_v25 = vld [vmem:[#allocation368_spill] sm:$0xff] }
 0x48c   : > { %21734 = vst [vmem:[#allocation294_spill] sm:$0xff] %v18184_v21  ;;  %21755 = vst [vmem:[#allocation316_spill] sm:$0xff] %v18226_v51  ;;  %v21780_v13 = vld [vmem:[#allocation367_spill] sm:$0xff]  ;;  %v21782_v27 = vld [vmem:[#allocation50_spill] sm:$0xff] }
 0x48d   : > { %12361 = vmatpush1.bf16.msra.mxu1 %v18169_v53  ;;  %v18240_v52 = vpack.c.bf16 %v21763_v6, %v21761_v26  ;;  %21767 = vst [vmem:[#allocation333_spill] sm:$0xff] %v18247_v44  ;;  %21770 = vst [vmem:[#allocation334_spill] sm:$0xff] %v18254_v20  ;;  %v21783_v15 = vld [vmem:[#allocation233_spill] sm:$0xff]  ;;  %v21784_v56 = vld [vmem:[#allocation247_spill] sm:$0xff] }
 0x48e   : > { %12363 = vmatprep.subr.bf16.mxu1 %v18178_v30  ;;  %12173 = vmatpush1.bf16.msra.mxu0 %v18184_v21  ;;  %v21785_v26 = vld [vmem:[#allocation246_spill] sm:$0xff]  ;;  %v21787_v6 = vld [vmem:[#allocation251_spill] sm:$0xff]  ;;  %v21788_v60 = vld [vmem:[#allocation253_spill] sm:$0xff] }
 0x48f   : > { %12175 = vmatprep.subr.bf16.mxu0 %v18191_v43  ;;  %21764 = vst [vmem:[#allocation330_spill] sm:$0xff] %v18240_v52  ;;  %v21786_v63 = vld [vmem:[#allocation250_spill] sm:$0xff]  ;;  %v21789_v29 = vld [vmem:[#allocation252_spill] sm:$0xff]  ;;  %v21810_v43 = vld [vmem:[#allocation9_spill] sm:$0xff] }
 0x490   : > { %v21790_v5 = vld [vmem:[#allocation260_spill] sm:$0xff]  ;;  %v18330_v21 = vsub.s32 0, %v21810_v43  ;;  %v18338_v53 = vsub.s32 1, %v21810_v43  ;;  %v21814_v16 = vld [vmem:[#allocation31_spill] sm:$0xff]  ;;  %v21816_v32 = vld [vmem:[#allocation34_spill] sm:$0xff]  ;;  %v18349_v33 = vsub.s32 2, %v21810_v43 }
 0x491   : > { %12365 = vmatpush1.bf16.msra.mxu1 %v18198_v62  ;;  %v21791_v23 = vld [vmem:[#allocation256_spill] sm:$0xff]  ;;  %v21817_v24 = vld [vmem:[#allocation33_spill] sm:$0xff]  ;;  %v18354_v59 = vsub.s32 3, %v21810_v43  ;;  %v21889_v43 = vld [vmem:[#allocation131_spill] sm:$0xff] }
 0x492   : > { %12367 = vmatprep.subr.bf16.mxu1 %v18206_v4  ;;  %12177 = vmatpush1.bf16.msra.mxu0 %v18212_v38  ;;  %v21808_v38 = vld [vmem:[#allocation29_spill] sm:$0xff]  ;;  %v4997_v4 = vld [vmem:[#allocation3 + $0x8] sm:$0xff]  ;;  %v21809_v62 = vld [vmem:[#allocation32_spill] sm:$0xff]  ;;  %21811 = vst [vmem:[#allocation50_spill] sm:$0xff] %v18330_v21 }
 0x493   : > { %12179 = vmatprep.subr.bf16.mxu0 %v18219_v12  ;;  %v21807_v12 = vld [vmem:[#allocation30_spill] sm:$0xff]  ;;  %v18335_v30 = vld [vmem:[%s20041_s5] sm:$0xff]  ;;  %v18344_v35 = vand.u32 4294901760, %v4997_v4 }
 0x494   : > { %v10912_v46 = vrot.slane %v18335_v30, %v18330_v21  ;;  %v10920_v21 = vrot.slane %v18335_v30, %v18349_v33 }
 0x495   : > { %12369 = vmatpush1.bf16.msra.mxu1 %v18226_v51 }
 0x496   : > { %12371 = vmatprep.subr.bf16.mxu1 %v18234_v8  ;;  %12181 = vmatpush1.bf16.msra.mxu0 %v18240_v52  ;;  %v4996_v52 = vld [vmem:[#allocation3] sm:$0xff]  ;;  %v21805_v8 = vld [vmem:[#allocation28_spill] sm:$0xff] }
 0x497   : > { %12183 = vmatprep.subr.bf16.mxu0 %v18247_v44  ;;  %v21804_v44 = vld [vmem:[#allocation25_spill] sm:$0xff]  ;;  %v18324_v51 = vand.u32 4294901760, %v4996_v52 }
 0x499   : > { %12373 = vmatpush1.bf16.msra.mxu1 %v18254_v20  ;;  %v21803_v20 = vld [vmem:[#allocation24_spill] sm:$0xff]  ;;  %v18342_v42 = vsub.f32 %v4996_v52, %v18324_v51 }
 0x49a   : > { %12375 = vmatprep.subr.bf16.mxu1 %v21771_v40  ;;  %12185 = vmatpush1.bf16.msra.mxu0 %v21772_v34  ;;  %v21801_v34 = vld [vmem:[#allocation23_spill] sm:$0xff]  ;;  %v21802_v40 = vld [vmem:[#allocation20_spill] sm:$0xff] }
 0x49b   : > { %12187 = vmatprep.subr.bf16.mxu0 %v21773_v37  ;;  %v21800_v37 = vld [vmem:[#allocation18_spill] sm:$0xff] }
 0x49d   : > { %12377 = vmatpush1.bf16.msra.mxu1 %v21774_v17  ;;  %v21799_v17 = vld [vmem:[#allocation19_spill] sm:$0xff] }
 0x49e   : > { %12379 = vmatprep.subr.bf16.mxu1 %v21775_v19  ;;  %12189 = vmatpush1.bf16.msra.mxu0 %v21776_v45  ;;  %v21797_v45 = vld [vmem:[#allocation17_spill] sm:$0xff]  ;;  %v21798_v19 = vld [vmem:[#allocation16_spill] sm:$0xff] }
 0x49f   : > { %12191 = vmatprep.subr.bf16.mxu0 %v21777_v41  ;;  %v21796_v41 = vld [vmem:[#allocation12_spill] sm:$0xff]  ;;  %21818 = vst [vmem:[#allocation17_spill] sm:$0xff] %v18349_v33  ;;  %21819 = vst [vmem:[#allocation16_spill] sm:$0xff] %v18354_v59 }
 0x4a0   : > { %21815 = vst [vmem:[#allocation12_spill] sm:$0xff] %v18342_v42 }
 0x4a1   : > { %12381 = vmatpush1.bf16.msra.mxu1 %v21778_v7  ;;  %v21795_v7 = vld [vmem:[#allocation15_spill] sm:$0xff] }
 0x4a2   : > { %12383 = vmatprep.subr.bf16.mxu1 %v21779_v57  ;;  %12193 = vmatpush1.bf16.msra.mxu0 %v21780_v13  ;;  %v21793_v13 = vld [vmem:[#allocation271_spill] sm:$0xff]  ;;  %21813 = vst [vmem:[#allocation15_spill] sm:$0xff] %v18338_v53 }
 0x4a3   : > { %12195 = vmatprep.subr.bf16.mxu0 %v21666_v50  ;;  %v21794_v57 = vld [vmem:[#allocation11_spill] sm:$0xff] }
 0x4a4   : > { %21812 = vst [vmem:[#allocation11_spill] sm:$0xff] %v18335_v30  ;;  %v21854_v50 = vld [vmem:[#allocation63_spill] sm:$0xff] }
 0x4a5   : > { %12385 = vmatpush1.bf16.msra.mxu1 %v21781_v25  ;;  %4247 = vmatmul.mubr.f32.vlgmr.msra.gmra.mrb[2].mxu0 %v21782_v27  ;;  %v21792_v25 = vld [vmem:[#allocation265_spill] sm:$0xff] }
 0x4a6   : > { %12387 = vmatprep.subr.bf16.mxu1 %v21668_v10  ;;  %12197 = vmatpush1.bf16.msra.mxu0 %v21669_v47  ;;  %v21851_v47 = vld [vmem:[#allocation62_spill] sm:$0xff] }
 0x4a7   : > { %12199 = vmatprep.subr.bf16.mxu0 %v21670_v54  ;;  %4317 = vmatprep.mubr.f32.mxu0 %v20980_v36  ;;  %v21849_v54 = vld [vmem:[#allocation48_spill] sm:$0xff] }
 0x4a8   : > { %4910 = vmatmul.mubr.f32.vlgmr.msra.gmra.mrb[2].mxu1 %v21782_v27 }
 0x4a9   : > { %12389 = vmatpush1.bf16.msra.mxu1 %v21671_v14  ;;  %4980 = vmatprep.mubr.f32.mxu1 %v20980_v36  ;;  %v21848_v14 = vld [vmem:[#allocation53_spill] sm:$0xff] }
 0x4aa   : > { %12391 = vmatprep.subr.bf16.mxu1 %v21672_v58  ;;  %12201 = vmatpush1.bf16.msra.mxu0 %v21673_v31  ;;  %v21847_v31 = vld [vmem:[#allocation46_spill] sm:$0xff] }
 0x4ab   : > { %12203 = vmatprep.subr.bf16.mxu0 %v21674_v48  ;;  %v21841_v48 = vld [vmem:[#allocation43_spill] sm:$0xff]  ;;  %v5001_v58 = vld [vmem:[#allocation3 + $0x28] sm:$0xff] }
 0x4ad   : > { %12393 = vmatpush1.bf16.msra.mxu1 %v21675_v55  ;;  %v21838_v55 = vld [vmem:[#allocation44_spill] sm:$0xff] }
 0x4ae   : > { %12395 = vmatprep.subr.bf16.mxu1 %v21676_v2  ;;  %12205 = vmatpush1.bf16.msra.mxu0 %v21677_v9  ;;  %v21837_v2 = vld [vmem:[#allocation41_spill] sm:$0xff] }
 0x4af   : > { %12207 = vmatprep.subr.bf16.mxu0 %v21678_v28  ;;  %v21832_v28 = vld [vmem:[#allocation42_spill] sm:$0xff] }
 0x4b1   : > { %12397 = vmatpush1.bf16.msra.mxu1 %v21679_v61 }
 0x4b2   : > { %12399 = vmatprep.subr.bf16.mxu1 %v21680_v1  ;;  %12209 = vmatpush1.bf16.msra.mxu0 %v21681_v18  ;;  %v21829_v18 = vld [vmem:[#allocation39_spill] sm:$0xff] }
 0x4b3   : > { %12211 = vmatprep.subr.bf16.mxu0 %v21682_v3 }
 0x4b5   : > { %12401 = vmatpush1.bf16.msra.mxu1 %v21683_v0 }
 0x4b6   : > { %12403 = vmatprep.subr.bf16.mxu1 %v21684_v39  ;;  %12213 = vmatpush1.bf16.msra.mxu0 %v21783_v15  ;;  %v21827_v15 = vld [vmem:[#allocation40_spill] sm:$0xff] }
 0x4b7   : > { %12215 = vmatprep.subr.bf16.mxu0 %v21784_v56  ;;  %v10924_v56 = vrot.slane %v18335_v30, %v18354_v59 }
 0x4b9   : > { %12405 = vmatpush1.bf16.msra.mxu1 %v21785_v26 }
 0x4ba   : > { %12407 = vmatprep.subr.bf16.mxu1 %v21786_v63  ;;  %12217 = vmatpush1.bf16.msra.mxu0 %v21787_v6  ;;  %v21824_v6 = vld [vmem:[#allocation37_spill] sm:$0xff]  ;;  %v21825_v63 = vld [vmem:[#allocation38_spill] sm:$0xff] }
 0x4bb   : > { %12219 = vmatprep.subr.bf16.mxu0 %v21788_v60 }
 0x4bd   : > { %12409 = vmatpush1.bf16.msra.mxu1 %v21789_v29  ;;  %v18364_v29 = vsub.f32 %v4997_v4, %v18344_v35  ;;  %v4999_v4 = vld [vmem:[#allocation3 + $0x18] sm:$0xff] }
 0x4be   : > { %12411 = vmatprep.subr.bf16.mxu1 %v21790_v5  ;;  %12221 = vmatpush1.bf16.msra.mxu0 %v21791_v23  ;;  %v18361_v5 = vand.u32 4294901760, %v18342_v42 }
 0x4bf   : > { %12223 = vmatprep.subr.bf16.mxu0 %v21792_v25  ;;  %21823 = vst [vmem:[#allocation18_spill] sm:$0xff] %v18364_v29 }
 0x4c0   : > { %21822 = vst [vmem:[#allocation19_spill] sm:$0xff] %v18361_v5  ;;  %v5080_v1 = vsub.f32 %v18342_v42, %v18361_v5  ;;  %v21871_v5 = vld [vmem:[#allocation107_spill] sm:$0xff] }
 0x4c1   : > { %12413 = vmatpush1.bf16.msra.mxu1 %v21698_v22  ;;  %v21821_v22 = vld [vmem:[#allocation35_spill] sm:$0xff] }
 0x4c2   : > { %12415 = vmatprep.subr.bf16.mxu1 %v21699_v11  ;;  %12225 = vmatpush1.bf16.msra.mxu0 %v21793_v13  ;;  %v4998_v13 = vld [vmem:[#allocation3 + $0x10] sm:$0xff]  ;;  %v10916_v11 = vrot.slane %v18335_v30, %v18338_v53  ;;  %v21886_v30 = vld [vmem:[#allocation128_spill] sm:$0xff] }
 0x4c3   : > { %12419 = vmatprep.subr.bf16.mxu0 %v21794_v57  ;;  %v18370_v26 = vand.u32 4294901760, %v4998_v13 }
 0x4c5   : > { %12417 = vmatpush1.bf16.msra.mxu1 %v21710_v49  ;;  %4319 = vmatmul.mubr.f32.vlgmr.msra.gmra.mrb[2].mxu0 %v21782_v27  ;;  %v21820_v49 = vld [vmem:[#allocation36_spill] sm:$0xff] }
 0x4c6   : > { %12611 = vmatprep.subr.bf16.mxu1 %v21795_v7  ;;  %12421 = vmatpush1.bf16.msra.mxu0 %v21796_v41 }
 0x4c7   : > { %12423 = vmatprep.subr.bf16.mxu0 %v21797_v45  ;;  %5076 = vmatprep.mubr.f32.mxu0 %v20980_v36 }
 0x4c8   : > { %4982 = vmatmul.mubr.f32.vlgmr.msra.gmra.mrb[2].mxu1 %v21782_v27  ;;  %v21806_v27 = vld [vmem:[#allocation27_spill] sm:$0xff] }
 0x4c9   : > { %12613 = vmatpush1.bf16.msra.mxu1 %v21798_v19  ;;  %6474 = vmatprep.mubr.f32.mxu1 %v20980_v36 }
 0x4ca   : > { %12615 = vmatprep.subr.bf16.mxu1 %v21799_v17  ;;  %12425 = vmatpush1.bf16.msra.mxu0 %v21800_v37 }
 0x4cb   : > { %12427 = vmatprep.subr.bf16.mxu0 %v21801_v34 }
 0x4cd   : > { %12617 = vmatpush1.bf16.msra.mxu1 %v21802_v40 }
 0x4ce   : > { %12619 = vmatprep.subr.bf16.mxu1 %v21803_v20  ;;  %12429 = vmatpush1.bf16.msra.mxu0 %v21804_v44 }
 0x4cf   : > { %12431 = vmatprep.subr.bf16.mxu0 %v21805_v8 }
 0x4d1   : > { %12621 = vmatpush1.bf16.msra.mxu1 %v21806_v27 }
 0x4d2   : > { %12623 = vmatprep.subr.bf16.mxu1 %v21807_v12  ;;  %12433 = vmatpush1.bf16.msra.mxu0 %v21808_v38  ;;  %v2994_v52 = vpop.f32.mrb[0].mxu0 }
 0x4d3   : > { %12435 = vmatprep.subr.bf16.mxu0 %v21809_v62  ;;  %v4988_v25 = vmul.f32 0.00048828125, %v2994_v52  ;;  %v2996_v23 = vpop.f32.mrb[1].mxu0 }
 0x4d4   : > { %v4989_v60 = vmul.f32 0.00048828125, %v2996_v23 }
 0x4d5   : > { %12625 = vmatpush1.bf16.msra.mxu1 %v21814_v16  ;;  %v18372_v53 = vadd.f32 %v10912_v46, %v4988_v25  ;;  %v3657_v52 = vpop.f32.mrb[0].mxu1  ;;  %v18383_v46 = vand.u32 4294901760, %v18364_v29 }
 0x4d6   : > { %12627 = vmatprep.subr.bf16.mxu1 %v21816_v32  ;;  %12437 = vmatpush1.bf16.msra.mxu0 %v21817_v24  ;;  %v4990_v39 = vmul.f32 0.00048828125, %v3657_v52  ;;  %v18377_v0 = vadd.f32 %v10916_v11, %v4989_v60  ;;  %v10966_v33 = vcombine.low %v4988_v25, %v4989_v60  ;;  %v3659_v23 = vpop.f32.mrb[1].mxu1  ;;  %v18391_v11 = vsub.f32 %v4998_v13, %v18370_v26  ;;  %v21834_v60 = vld [vmem:[#allocation10_spill] sm:$0xff] }
 0x4d7   : > { %12439 = vmatprep.subr.bf16.mxu0 %v21820_v49  ;;  %21826 = vst [vmem:[#allocation23_spill] sm:$0xff] %v18372_v53  ;;  %v4991_v3 = vmul.f32 0.00048828125, %v3659_v23  ;;  %21830 = vst [vmem:[#allocation24_spill] sm:$0xff] %v18383_v46  ;;  %v18393_v25 = vand.u32 4294901760, %v4999_v4 }
 0x4d8   : > { %21828 = vst [vmem:[#allocation20_spill] sm:$0xff] %v18377_v0  ;;  %v18385_v61 = vadd.f32 %v10920_v21, %v4990_v39  ;;  %v11225_v59 = vcombine.low %v18372_v53, %v18377_v0  ;;  %21833 = vst [vmem:[#allocation28_spill] sm:$0xff] %v18391_v11  ;;  %v18396_v52 = vrot.slane %v10966_v33, %v21834_v60  ;;  %v5000_v21 = vld [vmem:[#allocation3 + $0x20] sm:$0xff] }
 0x4d9   : > { %12629 = vmatpush1.bf16.msra.mxu1 %v21821_v22  ;;  %v18398_v23 = vadd.f32 %v10924_v56, %v4991_v3  ;;  %v10967_v9 = vcombine.low %v4990_v39, %v4991_v3  ;;  %v5091_v33 = vsub.f32 %v18364_v29, %v18383_v46  ;;  %v21842_v39 = vld [vmem:[#allocation47_spill] sm:$0xff]  ;;  %v18414_v3 = vand.u32 4294901760, %v5080_v1  ;;  %v21859_v46 = vld [vmem:[#allocation77_spill] sm:$0xff] }
 0x4da   : > { %12631 = vmatprep.subr.bf16.mxu1 %v21824_v6  ;;  %12441 = vmatpush1.bf16.msra.mxu0 %v21825_v63  ;;  %21831 = vst [vmem:[#allocation25_spill] sm:$0xff] %v18385_v61  ;;  %21835 = vst [vmem:[#allocation27_spill] sm:$0xff] %v18396_v52  ;;  %v18403_v0 = vrot.slane %v11225_v59, %v21834_v60  ;;  %v18417_v56 = vand.u32 4294901760, %v18391_v11  ;;  %v18420_v59 = vsub.f32 %v4999_v4, %v18393_v25  ;;  %v5002_v1 = vld [vmem:[#allocation3 + $0x30] sm:$0xff]  ;;  %v5005_v52 = vld [vmem:[#allocation3 + $0x48] sm:$0xff] }
 0x4db   : > { %12443 = vmatprep.subr.bf16.mxu0 %v21827_v15  ;;  %21836 = vst [vmem:[#allocation30_spill] sm:$0xff] %v18398_v23  ;;  %v18406_v53 = vrot.slane %v10967_v9, %v21834_v60  ;;  %v11226_v13 = vcombine.low %v18385_v61, %v18398_v23  ;;  %21843 = vst [vmem:[#allocation31_spill] sm:$0xff] %v18414_v3  ;;  %v18422_v9 = vand.u32 4294901760, %v5000_v21  ;;  %v18434_v4 = vand.u32 4294901760, %v5091_v33  ;;  %v21855_v33 = vld [vmem:[#allocation74_spill] sm:$0xff] }
 0x4dc   : > { %21839 = vst [vmem:[#allocation29_spill] sm:$0xff] %v18403_v0  ;;  %21844 = vst [vmem:[#allocation34_spill] sm:$0xff] %v18417_v56  ;;  %v18441_v23 = vand.u32 4294901760, %v18420_v59 }
 0x4dd   : > { %12633 = vmatpush1.bf16.msra.mxu1 %v21829_v18  ;;  %21840 = vst [vmem:[#allocation32_spill] sm:$0xff] %v18406_v53  ;;  %21845 = vst [vmem:[#allocation33_spill] sm:$0xff] %v18420_v59  ;;  %v18427_v61 = vrot.slane %v11226_v13, %v21834_v60  ;;  %v5102_v13 = vsub.f32 %v18391_v11, %v18417_v56  ;;  %v18444_v10 = vsub.f32 %v5000_v21, %v18422_v9  ;;  %v21879_v60 = vld [vmem:[#allocation121_spill] sm:$0xff] }
 0x4de   : > { %12635 = vmatprep.subr.bf16.mxu1 %v21832_v28  ;;  %12445 = vmatpush1.bf16.msra.mxu0 %v21837_v2  ;;  %21850 = vst [vmem:[#allocation35_spill] sm:$0xff] %v18434_v4  ;;  %21852 = vst [vmem:[#allocation37_spill] sm:$0xff] %v18441_v23  ;;  %v18454_v56 = vand.u32 4294901760, %v5002_v1 }
 0x4df   : > { %12447 = vmatprep.subr.bf16.mxu0 %v21838_v55  ;;  %21846 = vst [vmem:[#allocation36_spill] sm:$0xff] %v18427_v61  ;;  %21853 = vst [vmem:[#allocation38_spill] sm:$0xff] %v18444_v10  ;;  %v18457_v21 = vand.u32 4294901760, %v5102_v13  ;;  %v18463_v61 = vand.u32 4294901760, %v18444_v10  ;;  %v21863_v13 = vld [vmem:[#allocation92_spill] sm:$0xff] }
 0x4e0   : > { %21857 = vst [vmem:[#allocation40_spill] sm:$0xff] %v18454_v56 }
 0x4e1   : > { %12637 = vmatpush1.bf16.msra.mxu1 %v21841_v48  ;;  %21858 = vst [vmem:[#allocation39_spill] sm:$0xff] %v18457_v21  ;;  %21860 = vst [vmem:[#allocation42_spill] sm:$0xff] %v18463_v61  ;;  %v5124_v0 = vsub.f32 %v18444_v10, %v18463_v61  ;;  %v5010_v48 = vld [vmem:[#allocation3 + $0x70] sm:$0xff] }
 0x4e2   : > { %12639 = vmatprep.subr.bf16.mxu1 %v21842_v39  ;;  %12449 = vmatpush1.bf16.msra.mxu0 %v21847_v31 }
 0x4e3   : > { %12451 = vmatprep.subr.bf16.mxu0 %v21848_v14  ;;  %v18446_v14 = vand.u32 4294901760, %v5001_v58  ;;  %v18498_v61 = vand.u32 4294901760, %v5124_v0 }
 0x4e5   : > { %12641 = vmatpush1.bf16.msra.mxu1 %v21849_v54  ;;  %5082 = vmatmul.mubr.f32.vlgmr.msra.gmra.mrb[4].mxu0 %v18414_v3  ;;  %v5007_v54 = vld [vmem:[#allocation3 + $0x58] sm:$0xff] }
 0x4e6   : > { %12643 = vmatprep.subr.bf16.mxu1 %v21851_v47  ;;  %12453 = vmatpush1.bf16.msra.mxu0 %v21854_v50  ;;  %v21856_v47 = vld [vmem:[#allocation66_spill] sm:$0xff]  ;;  %v5113_v50 = vsub.f32 %v18420_v59, %v18441_v23  ;;  %v18475_v23 = vsub.f32 %v5002_v1, %v18454_v56  ;;  %v5004_v1 = vld [vmem:[#allocation3 + $0x40] sm:$0xff]  ;;  %v18554_v31 = vand.u32 4294901760, %v5007_v54 }
 0x4e7   : > { %5087 = vmatprep.mubr.f32.mxu0 %v20980_v36  ;;  %12455 = vmatprep.subr.bf16.mxu0 %v21855_v33  ;;  %v18466_v33 = vsub.f32 %v5001_v58, %v18446_v14  ;;  %21874 = vst [vmem:[#allocation66_spill] sm:$0xff] %v18498_v61 }
 0x4e8   : > { %6480 = vmatmul.mubr.f32.vlgmr.msra.gmra.mrb[4].mxu1 %v18414_v3  ;;  %v5003_v3 = vld [vmem:[#allocation3 + $0x38] sm:$0xff]  ;;  %21865 = vst [vmem:[#allocation44_spill] sm:$0xff] %v18475_v23  ;;  %v18478_v58 = vand.u32 4294901760, %v5113_v50  ;;  %21897 = vst [vmem:[#allocation121_spill] sm:$0xff] %v18554_v31 }
 0x4e9   : > { %12645 = vmatpush1.bf16.msra.mxu1 %v21856_v47  ;;  %6485 = vmatprep.mubr.f32.mxu1 %v20980_v36  ;;  %21861 = vst [vmem:[#allocation41_spill] sm:$0xff] %v18466_v33  ;;  %v21862_v47 = vld [vmem:[#allocation79_spill] sm:$0xff]  ;;  %v21872_v50 = vld [vmem:[#allocation104_spill] sm:$0xff] }
 0x4ea   : > { %5093 = vmatmul.mubr.f32.gmra.mrb[6].mxu0 %v18434_v4  ;;  %12647 = vmatprep.subr.bf16.mxu1 %v21859_v46  ;;  %v21864_v46 = vld [vmem:[#allocation84_spill] sm:$0xff]  ;;  %21866 = vst [vmem:[#allocation53_spill] sm:$0xff] %v18478_v58 }
 0x4eb   : > { %5098 = vmatprep.mubr.f32.mxu0 %v20980_v36  ;;  %12457 = vmatpush1.bf16.msra.mxu0 %v21862_v47  ;;  %v21867_v47 = vld [vmem:[#allocation98_spill] sm:$0xff] }
 0x4ec   : > { %6491 = vmatmul.mubr.f32.gmra.mrb[6].mxu1 %v18434_v4  ;;  %12459 = vmatprep.subr.bf16.mxu0 %v21863_v13  ;;  %v18484_v4 = vand.u32 4294901760, %v18466_v33  ;;  %v18486_v13 = vand.u32 4294901760, %v5003_v3 }
 0x4ed   : > { %6496 = vmatprep.mubr.f32.mxu1 %v20980_v36  ;;  %12649 = vmatpush1.bf16.msra.mxu1 %v21864_v46  ;;  %v21870_v46 = vld [vmem:[#allocation99_spill] sm:$0xff] }
 0x4ee   : > { %5104 = vmatmul.mubr.f32.gmra.mrb[8].mxu0 %v18457_v21  ;;  %12651 = vmatprep.subr.bf16.mxu1 %v21867_v47  ;;  %21868 = vst [vmem:[#allocation62_spill] sm:$0xff] %v18484_v4  ;;  %21869 = vst [vmem:[#allocation63_spill] sm:$0xff] %v18486_v13  ;;  %v18495_v47 = vand.u32 4294901760, %v18475_v23  ;;  %v5135_v53 = vsub.f32 %v18466_v33, %v18484_v4 }
 0x4ef   : > { %5109 = vmatprep.mubr.f32.mxu0 %v20980_v36  ;;  %12461 = vmatpush1.bf16.msra.mxu0 %v21870_v46  ;;  %v21875_v46 = vld [vmem:[#allocation110_spill] sm:$0xff] }
 0x4f0   : > { %6502 = vmatmul.mubr.f32.gmra.mrb[8].mxu1 %v18457_v21  ;;  %12463 = vmatprep.subr.bf16.mxu0 %v21871_v5  ;;  %21873 = vst [vmem:[#allocation74_spill] sm:$0xff] %v18495_v47  ;;  %v18504_v21 = vsub.f32 %v5003_v3, %v18486_v13  ;;  %v18506_v5 = vand.u32 4294901760, %v5004_v1  ;;  %v5146_v0 = vsub.f32 %v18475_v23, %v18495_v47  ;;  %v18517_v3 = vand.u32 4294901760, %v5135_v53  ;;  %v5006_v47 = vld [vmem:[#allocation3 + $0x50] sm:$0xff] }
 0x4f1   : > { %6507 = vmatprep.mubr.f32.mxu1 %v20980_v36  ;;  %12653 = vmatpush1.bf16.msra.mxu1 %v21872_v50  ;;  %v21878_v50 = vld [vmem:[#allocation112_spill] sm:$0xff] }
 0x4f2   : > { %5115 = vmatmul.mubr.f32.gmra.mrb[10].mxu0 %v18478_v58  ;;  %12655 = vmatprep.subr.bf16.mxu1 %v21875_v46  ;;  %21876 = vst [vmem:[#allocation77_spill] sm:$0xff] %v18504_v21  ;;  %21877 = vst [vmem:[#allocation79_spill] sm:$0xff] %v18506_v5  ;;  %v21880_v46 = vld [vmem:[#allocation116_spill] sm:$0xff]  ;;  %v18520_v4 = vand.u32 4294901760, %v18504_v21  ;;  %v18533_v53 = vand.u32 4294901760, %v5146_v0 }
 0x4f3   : > { %5120 = vmatprep.mubr.f32.mxu0 %v20980_v36  ;;  %12465 = vmatpush1.bf16.msra.mxu0 %v21878_v50  ;;  %21881 = vst [vmem:[#allocation92_spill] sm:$0xff] %v18517_v3  ;;  %v18523_v50 = vsub.f32 %v5004_v1, %v18506_v5  ;;  %v21894_v0 = vld [vmem:[#allocation144_spill] sm:$0xff] }
 0x4f4   : > { %6513 = vmatmul.mubr.f32.gmra.mrb[10].mxu1 %v18478_v58  ;;  %12467 = vmatprep.subr.bf16.mxu0 %v21879_v60  ;;  %21882 = vst [vmem:[#allocation84_spill] sm:$0xff] %v18520_v4  ;;  %v21884_v58 = vld [vmem:[#allocation124_spill] sm:$0xff]  ;;  %v18526_v60 = vand.u32 4294901760, %v5005_v52  ;;  %21888 = vst [vmem:[#allocation107_spill] sm:$0xff] %v18533_v53 }
 0x4f5   : > { %6518 = vmatprep.mubr.f32.mxu1 %v20980_v36  ;;  %12657 = vmatpush1.bf16.msra.mxu1 %v21880_v46  ;;  %21883 = vst [vmem:[#allocation98_spill] sm:$0xff] %v18523_v50  ;;  %v21887_v46 = vld [vmem:[#allocation137_spill] sm:$0xff]  ;;  %v18540_v1 = vand.u32 4294901760, %v18523_v50 }
 0x4f6   : > { %5126 = vmatmul.mubr.f32.gmra.mrb[12].mxu0 %v18498_v61  ;;  %12659 = vmatprep.subr.bf16.mxu1 %v21884_v58  ;;  %21885 = vst [vmem:[#allocation99_spill] sm:$0xff] %v18526_v60  ;;  %v5157_v58 = vsub.f32 %v18504_v21, %v18520_v4  ;;  %v21896_v4 = vld [vmem:[#allocation149_spill] sm:$0xff]  ;;  %v21910_v21 = vld [vmem:[#allocation168_spill] sm:$0xff] }
 0x4f7   : > { %5131 = vmatprep.mubr.f32.mxu0 %v20980_v36  ;;  %12469 = vmatpush1.bf16.msra.mxu0 %v21886_v30  ;;  %21890 = vst [vmem:[#allocation104_spill] sm:$0xff] %v18540_v1  ;;  %v18543_v30 = vsub.f32 %v5005_v52, %v18526_v60 }
 0x4f8   : > { %6524 = vmatmul.mubr.f32.gmra.mrb[12].mxu1 %v18498_v61  ;;  %12471 = vmatprep.subr.bf16.mxu0 %v21887_v46  ;;  %v18545_v61 = vand.u32 4294901760, %v5006_v47  ;;  %v21893_v46 = vld [vmem:[#allocation140_spill] sm:$0xff]  ;;  %v18557_v52 = vand.u32 4294901760, %v5157_v58  ;;  %v21903_v58 = vld [vmem:[#allocation166_spill] sm:$0xff] }
 0x4f9   : > { %6529 = vmatprep.mubr.f32.mxu1 %v20980_v36  ;;  %12661 = vmatpush1.bf16.msra.mxu1 %v21889_v43  ;;  %21891 = vst [vmem:[#allocation110_spill] sm:$0xff] %v18543_v30  ;;  %v21895_v43 = vld [vmem:[#allocation153_spill] sm:$0xff]  ;;  %v18562_v39 = vand.u32 4294901760, %v18543_v30 }
 0x4fa   : > { %5137 = vmatmul.mubr.f32.gmra.mrb[14].mxu0 %v18517_v3  ;;  %21892 = vst [vmem:[#allocation112_spill] sm:$0xff] %v18545_v61  ;;  %12663 = vmatprep.subr.bf16.mxu1 %v21893_v46  ;;  %21898 = vst [vmem:[#allocation116_spill] sm:$0xff] %v18557_v52  ;;  %v5168_v46 = vsub.f32 %v18523_v50, %v18540_v1  ;;  %v18574_v1 = vsub.f32 %v5007_v54, %v18554_v31  ;;  %v21905_v50 = vld [vmem:[#allocation164_spill] sm:$0xff]  ;;  %v5009_v54 = vld [vmem:[#allocation3 + $0x68] sm:$0xff] }
 0x4fb   : > { %5142 = vmatprep.mubr.f32.mxu0 %v20980_v36  ;;  %12473 = vmatpush1.bf16.msra.mxu0 %v21894_v0  ;;  %21899 = vst [vmem:[#allocation124_spill] sm:$0xff] %v18562_v39  ;;  %v18565_v0 = vsub.f32 %v5006_v47, %v18545_v61 }
 0x4fc   : > { %6535 = vmatmul.mubr.f32.gmra.mrb[14].mxu1 %v18517_v3  ;;  %12475 = vmatprep.subr.bf16.mxu0 %v21895_v43  ;;  %v21901_v43 = vld [vmem:[#allocation157_spill] sm:$0xff]  ;;  %v21902_v3 = vld [vmem:[#allocation160_spill] sm:$0xff]  ;;  %21904 = vst [vmem:[#allocation137_spill] sm:$0xff] %v18574_v1  ;;  %v18578_v47 = vand.u32 4294901760, %v5168_v46  ;;  %v18594_v46 = vand.u32 4294901760, %v18574_v1 }
 0x4fd   : > { %6540 = vmatprep.mubr.f32.mxu1 %v20980_v36  ;;  %12665 = vmatpush1.bf16.msra.mxu1 %v21896_v4  ;;  %21900 = vst [vmem:[#allocation128_spill] sm:$0xff] %v18565_v0  ;;  %v5008_v4 = vld [vmem:[#allocation3 + $0x60] sm:$0xff] }
 0x4fe   : > { %5148 = vmatmul.mubr.f32.gmra.mrb[16].mxu0 %v18533_v53  ;;  %12667 = vmatprep.subr.bf16.mxu1 %v21901_v43  ;;  %21906 = vst [vmem:[#allocation131_spill] sm:$0xff] %v18578_v47  ;;  %v5179_v43 = vsub.f32 %v18543_v30, %v18562_v39  ;;  %21912 = vst [vmem:[#allocation153_spill] sm:$0xff] %v18594_v46  ;;  %v21913_v39 = vld [vmem:[#allocation176_spill] sm:$0xff] }
 0x4ff   : > { %5153 = vmatprep.mubr.f32.mxu0 %v20980_v36  ;;  %12477 = vmatpush1.bf16.msra.mxu0 %v21902_v3  ;;  %v18583_v3 = vand.u32 4294901760, %v18565_v0 }
 0x500   : > { %6546 = vmatmul.mubr.f32.gmra.mrb[16].mxu1 %v18533_v53  ;;  %12479 = vmatprep.subr.bf16.mxu0 %v21903_v58  ;;  %v18585_v53 = vand.u32 4294901760, %v5008_v4  ;;  %v21909_v58 = vld [vmem:[#allocation167_spill] sm:$0xff]  ;;  %v18598_v30 = vand.u32 4294901760, %v5179_v43 }
 0x501   : > { %6551 = vmatprep.mubr.f32.mxu1 %v20980_v36  ;;  %12669 = vmatpush1.bf16.msra.mxu1 %v21905_v50  ;;  %21907 = vst [vmem:[#allocation140_spill] sm:$0xff] %v18583_v3  ;;  %v21911_v50 = vld [vmem:[#allocation21_spill] sm:$0xff] }
 0x502   : > { %5159 = vmatmul.mubr.f32.gmra.mrb[18].mxu0 %v18557_v52  ;;  %21908 = vst [vmem:[#allocation144_spill] sm:$0xff] %v18585_v53  ;;  %12671 = vmatprep.subr.bf16.mxu1 %v21909_v58  ;;  %21914 = vst [vmem:[#allocation149_spill] sm:$0xff] %v18598_v30  ;;  %v5190_v58 = vsub.f32 %v18565_v0, %v18583_v3 }
 0x503   : > { %5164 = vmatprep.mubr.f32.mxu0 %v20980_v36  ;;  %12481 = vmatpush1.bf16.msra.mxu0 %v21910_v21  ;;  %v18603_v21 = vsub.f32 %v5008_v4, %v18585_v53 }
 0x504   : > { %6557 = vmatmul.mubr.f32.gmra.mrb[18].mxu1 %v18557_v52  ;;  %12483 = vmatprep.subr.bf16.mxu0 %v21911_v50  ;;  %v18605_v52 = vand.u32 4294901760, %v5009_v54  ;;  %v21917_v50 = vld [vmem:[#allocation54_spill] sm:$0xff]  ;;  %v18614_v43 = vand.u32 4294901760, %v5190_v58 }
 0x505   : > { %6562 = vmatprep.mubr.f32.mxu1 %v20980_v36  ;;  %12673 = vmatpush1.bf16.msra.mxu1 %v21913_v39  ;;  %21915 = vst [vmem:[#allocation157_spill] sm:$0xff] %v18603_v21  ;;  %v5201_v39 = vsub.f32 %v18574_v1, %v18594_v46  ;;  %v18617_v4 = vand.u32 4294901760, %v18603_v21 }
 0x506   : > { %5170 = vmatmul.mubr.f32.gmra.mrb[20].mxu0 %v18578_v47  ;;  %21916 = vst [vmem:[#allocation160_spill] sm:$0xff] %v18605_v52  ;;  %12675 = vmatprep.subr.bf16.mxu1 %v21917_v50  ;;  %21918 = vst [vmem:[#allocation166_spill] sm:$0xff] %v18614_v43  ;;  %v18620_v3 = vsub.f32 %v5009_v54, %v18605_v52  ;;  %v18622_v50 = vand.u32 4294901760, %v5010_v48 }
 0x507   : > { %5175 = vmatprep.mubr.f32.mxu0 %v20980_v36  ;;  %21919 = vst [vmem:[#allocation164_spill] sm:$0xff] %v18617_v4  ;;  %v18627_v46 = vand.u32 4294901760, %v5201_v39  ;;  %v5212_v58 = vsub.f32 %v18603_v21, %v18617_v4 }
 0x508   : > { %6568 = vmatmul.mubr.f32.gmra.mrb[20].mxu1 %v18578_v47  ;;  %21920 = vst [vmem:[#allocation167_spill] sm:$0xff] %v18622_v50  ;;  %v5011_v47 = vld [vmem:[#allocation3 + $0x78] sm:$0xff]  ;;  %v18633_v1 = vand.u32 4294901760, %v18620_v3  ;;  %v18636_v54 = vsub.f32 %v5010_v48, %v18622_v50 }
 0x509   : > { %6573 = vmatprep.mubr.f32.mxu1 %v20980_v36  ;;  %21921 = vst [vmem:[#allocation168_spill] sm:$0xff] %v18627_v46  ;;  %v18638_v0 = vand.u32 4294901760, %v5011_v47  ;;  %v18644_v39 = vand.u32 4294901760, %v5212_v58 }
 0x50a   : > { %5181 = vmatmul.mubr.f32.gmra.mrb[22].mxu0 %v18598_v30  ;;  %21922 = vst [vmem:[#allocation21_spill] sm:$0xff] %v18633_v1  ;;  %v18649_v4 = vand.u32 4294901760, %v18636_v54 }
 0x50b   : > { %5186 = vmatprep.mubr.f32.mxu0 %v20980_v36  ;;  %21923 = vst [vmem:[#allocation176_spill] sm:$0xff] %v18638_v0  ;;  %21924 = vst [vmem:[#allocation54_spill] sm:$0xff] %v18644_v39  ;;  %v18652_v48 = vsub.f32 %v5011_v47, %v18638_v0 }
 0x50c   : > { %6579 = vmatmul.mubr.f32.gmra.mrb[22].mxu1 %v18598_v30  ;;  %v5223_v30 = vsub.f32 %v18620_v3, %v18633_v1  ;;  %21925 = vst [vmem:[#allocation396_spill] sm:$0xff] %v18649_v4  ;;  %v5234_v58 = vsub.f32 %v18636_v54, %v18649_v4 }
 0x50d   : > { %6584 = vmatprep.mubr.f32.mxu1 %v20980_v36  ;;  %v18663_v1 = vand.u32 4294901760, %v18652_v48 }
 0x50e   : > { %5192 = vmatmul.mubr.f32.gmra.mrb[24].mxu0 %v18614_v43  ;;  %v18669_v47 = vand.u32 4294901760, %v5234_v58  ;;  %v21930_v58 = vld [vmem:[#allocation175_spill] sm:$0xff] }
 0x50f   : > { %5197 = vmatprep.mubr.f32.mxu0 %v20980_v36  ;;  %21927 = vst [vmem:[#allocation398_spill] sm:$0xff] %v18663_v1 }
 0x510   : > { %6590 = vmatmul.mubr.f32.gmra.mrb[24].mxu1 %v18614_v43  ;;  %v18658_v43 = vand.u32 4294901760, %v5223_v30  ;;  %21928 = vst [vmem:[#allocation399_spill] sm:$0xff] %v18669_v47  ;;  %v5245_v30 = vsub.f32 %v18652_v48, %v18663_v1 }
 0x511   : > { %6595 = vmatprep.mubr.f32.mxu1 %v20980_v36 }
 0x512   : > { %5203 = vmatmul.mubr.f32.gmra.mrb[26].mxu0 %v18627_v46  ;;  %21926 = vst [vmem:[#allocation397_spill] sm:$0xff] %v18658_v43 }
 0x513   : > { %5208 = vmatprep.mubr.f32.mxu0 %v20980_v36 }
 0x514   : > { %6601 = vmatmul.mubr.f32.gmra.mrb[26].mxu1 %v18627_v46  ;;  %v18677_v46 = vand.u32 4294901760, %v5245_v30  ;;  %v21931_v30 = vld [vmem:[#allocation177_spill] sm:$0xff] }
 0x515   : > { %6606 = vmatprep.mubr.f32.mxu1 %v20980_v36 }
 0x516   : > { %5214 = vmatmul.mubr.f32.gmra.mrb[28].mxu0 %v18644_v39  ;;  %21929 = vst [vmem:[#allocation400_spill] sm:$0xff] %v18677_v46 }
 0x517   : > { %5219 = vmatprep.mubr.f32.mxu0 %v20980_v36 }
 0x518   : > { %6612 = vmatmul.mubr.f32.gmra.mrb[28].mxu1 %v18644_v39  ;;  %v21936_v39 = vld [vmem:[#allocation182_spill] sm:$0xff] }
 0x519   : > { %6617 = vmatprep.mubr.f32.mxu1 %v20980_v36 }
 0x51a   : > { %5225 = vmatmul.mubr.f32.gmra.mrb[30].mxu0 %v18658_v43 }
 0x51b   : > { %5230 = vmatprep.mubr.f32.mxu0 %v20980_v36 }
 0x51c   : > { %6623 = vmatmul.mubr.f32.gmra.mrb[30].mxu1 %v18658_v43  ;;  %v21933_v43 = vld [vmem:[#allocation179_spill] sm:$0xff] }
 0x51d   : > { %6628 = vmatprep.mubr.f32.mxu1 %v20980_v36 }
 0x51e   : > { %5236 = vmatmul.mubr.f32.gmra.mrb[32].mxu0 %v18669_v47 }
 0x51f   : > { %5241 = vmatprep.mubr.f32.mxu0 %v20980_v36 }
 0x520   : > { %6634 = vmatmul.mubr.f32.gmra.mrb[32].mxu1 %v18669_v47  ;;  %v21932_v47 = vld [vmem:[#allocation178_spill] sm:$0xff] }
 0x521   : > { %6639 = vmatprep.mubr.f32.mxu1 %v20980_v36 }
 0x522   : > { %5247 = vmatmul.mubr.f32.gmra.mrb[34].mxu0 %v18677_v46 }
 0x523   : > { %5445 = vmatprep.mubr.f32.mxu0 %v20980_v36 }
 0x524   : > { %6645 = vmatmul.mubr.f32.gmra.mrb[34].mxu1 %v18677_v46  ;;  %v21934_v46 = vld [vmem:[#allocation180_spill] sm:$0xff] }
 0x525   : > { %6843 = vmatprep.mubr.f32.mxu1 %v20980_v36 }
 0x526   : > { %5447 = vmatmul.mubr.f32.vlgmr.msra.gmra.mrb[4].mxu0 %v18324_v51 }
 0x527   : > { %12485 = vmatpush1.bf16.msra.mxu0 %v21930_v58  ;;  %5452 = vmatprep.mubr.f32.mxu0 %v20980_v36  ;;  %v21935_v58 = vld [vmem:[#allocation181_spill] sm:$0xff] }
 0x528   : > { %6845 = vmatmul.mubr.f32.vlgmr.msra.gmra.mrb[4].mxu1 %v18324_v51  ;;  %12487 = vmatprep.subr.bf16.mxu0 %v21931_v30  ;;  %v21938_v30 = vld [vmem:[#allocation169_spill] sm:$0xff] }
 0x529   : > { %12677 = vmatpush1.bf16.msra.mxu1 %v21932_v47  ;;  %6850 = vmatprep.mubr.f32.mxu1 %v20980_v36  ;;  %v21937_v47 = vld [vmem:[#allocation22_spill] sm:$0xff] }
 0x52a   : > { %5454 = vmatmul.mubr.f32.gmra.mrb[6].mxu0 %v18344_v35  ;;  %12679 = vmatprep.subr.bf16.mxu1 %v21933_v43  ;;  %v21939_v43 = vld [vmem:[#allocation171_spill] sm:$0xff] }
 0x52b   : > { %5459 = vmatprep.mubr.f32.mxu0 %v20980_v36  ;;  %12489 = vmatpush1.bf16.msra.mxu0 %v21934_v46  ;;  %v21940_v46 = vld [vmem:[#allocation170_spill] sm:$0xff] }
 0x52c   : > { %6852 = vmatmul.mubr.f32.gmra.mrb[6].mxu1 %v18344_v35  ;;  %12491 = vmatprep.subr.bf16.mxu0 %v21935_v58  ;;  %v21941_v58 = vld [vmem:[#allocation172_spill] sm:$0xff] }
 0x52d   : > { %6857 = vmatprep.mubr.f32.mxu1 %v20980_v36  ;;  %12681 = vmatpush1.bf16.msra.mxu1 %v21936_v39  ;;  %v21942_v39 = vld [vmem:[#allocation173_spill] sm:$0xff] }
 0x52e   : > { %5461 = vmatmul.mubr.f32.gmra.mrb[8].mxu0 %v18370_v26  ;;  %12683 = vmatprep.subr.bf16.mxu1 %v21937_v47  ;;  %v21943_v47 = vld [vmem:[#allocation152_spill] sm:$0xff] }
 0x52f   : > { %5466 = vmatprep.mubr.f32.mxu0 %v20980_v36  ;;  %12493 = vmatpush1.bf16.msra.mxu0 %v21938_v30  ;;  %v21944_v30 = vld [vmem:[#allocation174_spill] sm:$0xff] }
 0x530   : > { %6859 = vmatmul.mubr.f32.gmra.mrb[8].mxu1 %v18370_v26  ;;  %12495 = vmatprep.subr.bf16.mxu0 %v21939_v43  ;;  %v21945_v43 = vld [vmem:[#allocation190_spill] sm:$0xff] }
 0x531   : > { %6864 = vmatprep.mubr.f32.mxu1 %v20980_v36  ;;  %12685 = vmatpush1.bf16.msra.mxu1 %v21940_v46  ;;  %v21946_v46 = vld [vmem:[#allocation191_spill] sm:$0xff] }
 0x532   : > { %5468 = vmatmul.mubr.f32.gmra.mrb[10].mxu0 %v18393_v25  ;;  %12687 = vmatprep.subr.bf16.mxu1 %v21941_v58  ;;  %v21947_v58 = vld [vmem:[#allocation192_spill] sm:$0xff] }
 0x533   : > { %5473 = vmatprep.mubr.f32.mxu0 %v20980_v36  ;;  %12497 = vmatpush1.bf16.msra.mxu0 %v21942_v39  ;;  %v21948_v39 = vld [vmem:[#allocation193_spill] sm:$0xff] }
 0x534   : > { %6866 = vmatmul.mubr.f32.gmra.mrb[10].mxu1 %v18393_v25  ;;  %12499 = vmatprep.subr.bf16.mxu0 %v21943_v47  ;;  %v21949_v47 = vld [vmem:[#allocation194_spill] sm:$0xff] }
 0x535   : > { %6871 = vmatprep.mubr.f32.mxu1 %v20980_v36  ;;  %12689 = vmatpush1.bf16.msra.mxu1 %v21944_v30  ;;  %v21950_v30 = vld [vmem:[#allocation195_spill] sm:$0xff] }
 0x536   : > { %5475 = vmatmul.mubr.f32.gmra.mrb[12].mxu0 %v18422_v9  ;;  %12691 = vmatprep.subr.bf16.mxu1 %v21945_v43  ;;  %v21951_v43 = vld [vmem:[#allocation196_spill] sm:$0xff] }
 0x537   : > { %5480 = vmatprep.mubr.f32.mxu0 %v20980_v36  ;;  %12501 = vmatpush1.bf16.msra.mxu0 %v21946_v46  ;;  %v21952_v46 = vld [vmem:[#allocation197_spill] sm:$0xff] }
 0x538   : > { %6873 = vmatmul.mubr.f32.gmra.mrb[12].mxu1 %v18422_v9  ;;  %12503 = vmatprep.subr.bf16.mxu0 %v21947_v58  ;;  %v21953_v58 = vld [vmem:[#allocation198_spill] sm:$0xff] }
 0x539   : > { %6878 = vmatprep.mubr.f32.mxu1 %v20980_v36  ;;  %12693 = vmatpush1.bf16.msra.mxu1 %v21948_v39  ;;  %v21954_v39 = vld [vmem:[#allocation199_spill] sm:$0xff] }
 0x53a   : > { %5482 = vmatmul.mubr.f32.gmra.mrb[14].mxu0 %v18446_v14  ;;  %12695 = vmatprep.subr.bf16.mxu1 %v21949_v47  ;;  %v21955_v47 = vld [vmem:[#allocation200_spill] sm:$0xff] }
 0x53b   : > { %5487 = vmatprep.mubr.f32.mxu0 %v20980_v36  ;;  %12505 = vmatpush1.bf16.msra.mxu0 %v21950_v30  ;;  %v21956_v30 = vld [vmem:[#allocation201_spill] sm:$0xff] }
 0x53c   : > { %6880 = vmatmul.mubr.f32.gmra.mrb[14].mxu1 %v18446_v14  ;;  %12507 = vmatprep.subr.bf16.mxu0 %v21951_v43  ;;  %v21957_v43 = vld [vmem:[#allocation202_spill] sm:$0xff] }
 0x53d   : > { %6885 = vmatprep.mubr.f32.mxu1 %v20980_v36  ;;  %12697 = vmatpush1.bf16.msra.mxu1 %v21952_v46  ;;  %v21958_v46 = vld [vmem:[#allocation203_spill] sm:$0xff] }
 0x53e   : > { %5489 = vmatmul.mubr.f32.gmra.mrb[16].mxu0 %v18454_v56  ;;  %12699 = vmatprep.subr.bf16.mxu1 %v21953_v58  ;;  %v21959_v58 = vld [vmem:[#allocation204_spill] sm:$0xff] }
 0x53f   : > { %5494 = vmatprep.mubr.f32.mxu0 %v20980_v36  ;;  %12509 = vmatpush1.bf16.msra.mxu0 %v21954_v39  ;;  %v21960_v39 = vld [vmem:[#allocation43_spill] sm:$0xff] }
 0x540   : > { %6887 = vmatmul.mubr.f32.gmra.mrb[16].mxu1 %v18454_v56  ;;  %12511 = vmatprep.subr.bf16.mxu0 %v21955_v47  ;;  %v21961_v47 = vld [vmem:[#allocation77_spill] sm:$0xff] }
 0x541   : > { %6892 = vmatprep.mubr.f32.mxu1 %v20980_v36  ;;  %12701 = vmatpush1.bf16.msra.mxu1 %v21956_v30  ;;  %v21962_v30 = vld [vmem:[#allocation47_spill] sm:$0xff] }
 0x542   : > { %5496 = vmatmul.mubr.f32.gmra.mrb[18].mxu0 %v18486_v13  ;;  %12703 = vmatprep.subr.bf16.mxu1 %v21957_v43  ;;  %v21963_v43 = vld [vmem:[#allocation46_spill] sm:$0xff] }
 0x543   : > { %5501 = vmatprep.mubr.f32.mxu0 %v20980_v36  ;;  %12513 = vmatpush1.bf16.msra.mxu0 %v21958_v46  ;;  %v21964_v46 = vld [vmem:[#allocation205_spill] sm:$0xff] }
 0x544   : > { %6894 = vmatmul.mubr.f32.gmra.mrb[18].mxu1 %v18486_v13  ;;  %12515 = vmatprep.subr.bf16.mxu0 %v21794_v57 }
 0x545   : > { %6899 = vmatprep.mubr.f32.mxu1 %v20980_v36  ;;  %12705 = vmatpush1.bf16.msra.mxu1 %v21959_v58  ;;  %v21965_v58 = vld [vmem:[#allocation48_spill] sm:$0xff] }
 0x546   : > { %5503 = vmatmul.mubr.f32.gmra.mrb[20].mxu0 %v18506_v5  ;;  %12707 = vmatprep.subr.bf16.mxu1 %v21795_v7 }
 0x547   : > { %5508 = vmatprep.mubr.f32.mxu0 %v20980_v36 }
 0x548   : > { %6901 = vmatmul.mubr.f32.gmra.mrb[20].mxu1 %v18506_v5 }
 0x549   : > { %6906 = vmatprep.mubr.f32.mxu1 %v20980_v36 }
 0x54a   : > { %5510 = vmatmul.mubr.f32.gmra.mrb[22].mxu0 %v18526_v60 }
 0x54b   : > { %5515 = vmatprep.mubr.f32.mxu0 %v20980_v36 }
 0x54c   : > { %6908 = vmatmul.mubr.f32.gmra.mrb[22].mxu1 %v18526_v60 }
 0x54d   : > { %6913 = vmatprep.mubr.f32.mxu1 %v20980_v36 }
 0x54e   : > { %5517 = vmatmul.mubr.f32.gmra.mrb[24].mxu0 %v18545_v61 }
 0x54f   : > { %5522 = vmatprep.mubr.f32.mxu0 %v20980_v36 }
 0x550   : > { %6915 = vmatmul.mubr.f32.gmra.mrb[24].mxu1 %v18545_v61 }
 0x551   : > { %6920 = vmatprep.mubr.f32.mxu1 %v20980_v36 }
 0x552   : > { %5524 = vmatmul.mubr.f32.gmra.mrb[26].mxu0 %v18554_v31 }
 0x553   : > { %5529 = vmatprep.mubr.f32.mxu0 %v20980_v36 }
 0x554   : > { %6922 = vmatmul.mubr.f32.gmra.mrb[26].mxu1 %v18554_v31 }
 0x555   : > { %6927 = vmatprep.mubr.f32.mxu1 %v20980_v36 }
 0x556   : > { %5531 = vmatmul.mubr.f32.gmra.mrb[28].mxu0 %v18585_v53 }
 0x557   : > { %5536 = vmatprep.mubr.f32.mxu0 %v20980_v36 }
 0x558   : > { %6929 = vmatmul.mubr.f32.gmra.mrb[28].mxu1 %v18585_v53 }
 0x559   : > { %6934 = vmatprep.mubr.f32.mxu1 %v20980_v36 }
 0x55a   : > { %5538 = vmatmul.mubr.f32.gmra.mrb[30].mxu0 %v18605_v52 }
 0x55b   : > { %5543 = vmatprep.mubr.f32.mxu0 %v20980_v36 }
 0x55c   : > { %6936 = vmatmul.mubr.f32.gmra.mrb[30].mxu1 %v18605_v52 }
 0x55d   : > { %6941 = vmatprep.mubr.f32.mxu1 %v20980_v36 }
 0x55e   : > { %5545 = vmatmul.mubr.f32.gmra.mrb[32].mxu0 %v18622_v50 }
 0x55f   : > { %5550 = vmatprep.mubr.f32.mxu0 %v20980_v36 }
 0x560   : > { %6943 = vmatmul.mubr.f32.gmra.mrb[32].mxu1 %v18622_v50 }
 0x561   : > { %6948 = vmatprep.mubr.f32.mxu1 %v20980_v36 }
 0x562   : > { %5552 = vmatmul.mubr.f32.gmra.mrb[34].mxu0 %v18638_v0 }
 0x563   : > { %5654 = vmatprep.mubr.f32.mxu0 %v20980_v36 }
 0x564   : > { %6950 = vmatmul.mubr.f32.gmra.mrb[34].mxu1 %v18638_v0 }
 0x565   : > { %7052 = vmatprep.mubr.f32.mxu1 %v20980_v36 }
 0x566   : > { %5657 = vmatmul.mubr.f32.vlgmr.msra.gmra.mrb[4].mxu0 %v18342_v42 }
 0x567   : > { %12517 = vmatpush1.bf16.msra.mxu0 %v21796_v41  ;;  %5662 = vmatprep.mubr.f32.mxu0 %v20980_v36 }
 0x568   : > { %7055 = vmatmul.mubr.f32.vlgmr.msra.gmra.mrb[4].mxu1 %v18342_v42  ;;  %12519 = vmatprep.subr.bf16.mxu0 %v21797_v45 }
 0x569   : > { %12709 = vmatpush1.bf16.msra.mxu1 %v21798_v19  ;;  %7060 = vmatprep.mubr.f32.mxu1 %v20980_v36 }
 0x56a   : > { %5665 = vmatmul.mubr.f32.gmra.mrb[6].mxu0 %v18364_v29  ;;  %12711 = vmatprep.subr.bf16.mxu1 %v21799_v17 }
 0x56b   : > { %5670 = vmatprep.mubr.f32.mxu0 %v20980_v36  ;;  %12521 = vmatpush1.bf16.msra.mxu0 %v21800_v37 }
 0x56c   : > { %7063 = vmatmul.mubr.f32.gmra.mrb[6].mxu1 %v18364_v29  ;;  %12523 = vmatprep.subr.bf16.mxu0 %v21801_v34 }
 0x56d   : > { %7068 = vmatprep.mubr.f32.mxu1 %v20980_v36  ;;  %12713 = vmatpush1.bf16.msra.mxu1 %v21802_v40 }
 0x56e   : > { %5673 = vmatmul.mubr.f32.gmra.mrb[8].mxu0 %v18391_v11  ;;  %12715 = vmatprep.subr.bf16.mxu1 %v21803_v20 }
 0x56f   : > { %5678 = vmatprep.mubr.f32.mxu0 %v20980_v36  ;;  %12525 = vmatpush1.bf16.msra.mxu0 %v21804_v44 }
 0x570   : > { %7071 = vmatmul.mubr.f32.gmra.mrb[8].mxu1 %v18391_v11  ;;  %12527 = vmatprep.subr.bf16.mxu0 %v21805_v8 }
 0x571   : > { %7076 = vmatprep.mubr.f32.mxu1 %v20980_v36  ;;  %12717 = vmatpush1.bf16.msra.mxu1 %v21806_v27 }
 0x572   : > { %5681 = vmatmul.mubr.f32.gmra.mrb[10].mxu0 %v18420_v59  ;;  %12719 = vmatprep.subr.bf16.mxu1 %v21807_v12 }
 0x573   : > { %5686 = vmatprep.mubr.f32.mxu0 %v20980_v36  ;;  %12529 = vmatpush1.bf16.msra.mxu0 %v21808_v38 }
 0x574   : > { %7079 = vmatmul.mubr.f32.gmra.mrb[10].mxu1 %v18420_v59  ;;  %12531 = vmatprep.subr.bf16.mxu0 %v21809_v62  ;;  %v21975_v59 = vld [vmem:[#allocation11_spill] sm:$0xff] }
 0x575   : > { %7084 = vmatprep.mubr.f32.mxu1 %v20980_v36  ;;  %12721 = vmatpush1.bf16.msra.mxu1 %v21814_v16 }
 0x576   : > { %5689 = vmatmul.mubr.f32.gmra.mrb[12].mxu0 %v18444_v10  ;;  %12723 = vmatprep.subr.bf16.mxu1 %v21816_v32 }
 0x577   : > { %5694 = vmatprep.mubr.f32.mxu0 %v20980_v36  ;;  %12533 = vmatpush1.bf16.msra.mxu0 %v21817_v24 }
 0x578   : > { %7087 = vmatmul.mubr.f32.gmra.mrb[12].mxu1 %v18444_v10  ;;  %12535 = vmatprep.subr.bf16.mxu0 %v21820_v49  ;;  %v21968_v10 = vld [vmem:[#allocation110_spill] sm:$0xff] }
 0x579   : > { %7092 = vmatprep.mubr.f32.mxu1 %v20980_v36  ;;  %12725 = vmatpush1.bf16.msra.mxu1 %v21821_v22 }
 0x57a   : > { %5697 = vmatmul.mubr.f32.gmra.mrb[14].mxu0 %v18466_v33  ;;  %12727 = vmatprep.subr.bf16.mxu1 %v21824_v6 }
 0x57b   : > { %5702 = vmatprep.mubr.f32.mxu0 %v20980_v36  ;;  %12537 = vmatpush1.bf16.msra.mxu0 %v21825_v63 }
 0x57c   : > { %7095 = vmatmul.mubr.f32.gmra.mrb[14].mxu1 %v18466_v33  ;;  %12539 = vmatprep.subr.bf16.mxu0 %v21827_v15  ;;  %v21967_v33 = vld [vmem:[#allocation206_spill] sm:$0xff] }
 0x57d   : > { %7100 = vmatprep.mubr.f32.mxu1 %v20980_v36  ;;  %12729 = vmatpush1.bf16.msra.mxu1 %v21829_v18 }
 0x57e   : > { %5705 = vmatmul.mubr.f32.gmra.mrb[16].mxu0 %v18475_v23  ;;  %12731 = vmatprep.subr.bf16.mxu1 %v21832_v28 }
 0x57f   : > { %5710 = vmatprep.mubr.f32.mxu0 %v20980_v36  ;;  %12541 = vmatpush1.bf16.msra.mxu0 %v21837_v2 }
 0x580   : > { %7103 = vmatmul.mubr.f32.gmra.mrb[16].mxu1 %v18475_v23  ;;  %12543 = vmatprep.subr.bf16.mxu0 %v21838_v55  ;;  %v21966_v23 = vld [vmem:[#allocation98_spill] sm:$0xff] }
 0x581   : > { %7108 = vmatprep.mubr.f32.mxu1 %v20980_v36  ;;  %12733 = vmatpush1.bf16.msra.mxu1 %v21960_v39 }
 0x582   : > { %5713 = vmatmul.mubr.f32.gmra.mrb[18].mxu0 %v21961_v47  ;;  %12735 = vmatprep.subr.bf16.mxu1 %v21962_v30 }
 0x583   : > { %5718 = vmatprep.mubr.f32.mxu0 %v20980_v36  ;;  %12545 = vmatpush1.bf16.msra.mxu0 %v21963_v43 }
 0x584   : > { %7111 = vmatmul.mubr.f32.gmra.mrb[18].mxu1 %v21961_v47  ;;  %12547 = vmatprep.subr.bf16.mxu0 %v21964_v46  ;;  %v21969_v46 = vld [vmem:[#allocation128_spill] sm:$0xff] }
 0x585   : > { %7116 = vmatprep.mubr.f32.mxu1 %v20980_v36  ;;  %12737 = vmatpush1.bf16.msra.mxu1 %v21965_v58 }
 0x586   : > { %5721 = vmatmul.mubr.f32.gmra.mrb[20].mxu0 %v21966_v23  ;;  %12739 = vmatprep.subr.bf16.mxu1 %v21967_v33  ;;  %v21970_v33 = vld [vmem:[#allocation137_spill] sm:$0xff] }
 0x587   : > { %5726 = vmatprep.mubr.f32.mxu0 %v20980_v36 }
 0x588   : > { %7119 = vmatmul.mubr.f32.gmra.mrb[20].mxu1 %v21966_v23  ;;  %v21971_v23 = vld [vmem:[#allocation9_spill] sm:$0xff] }
 0x589   : > { %7124 = vmatprep.mubr.f32.mxu1 %v20980_v36  ;;  %v18861_v47 = vsub.s32 4, %v21971_v23  ;;  %v18876_v29 = vsub.s32 7, %v21971_v23 }
 0x58a   : > { %5729 = vmatmul.mubr.f32.gmra.mrb[22].mxu0 %v21968_v10 }
 0x58b   : > { %5734 = vmatprep.mubr.f32.mxu0 %v20980_v36  ;;  %21972 = vst [vmem:[#allocation175_spill] sm:$0xff] %v18861_v47  ;;  %v10928_v11 = vrot.slane %v21975_v59, %v18861_v47  ;;  %21976 = vst [vmem:[#allocation179_spill] sm:$0xff] %v18876_v29 }
 0x58c   : > { %7127 = vmatmul.mubr.f32.gmra.mrb[22].mxu1 %v21968_v10  ;;  %v18865_v10 = vsub.s32 5, %v21971_v23 }
 0x58d   : > { %7132 = vmatprep.mubr.f32.mxu1 %v20980_v36 }
 0x58e   : > { %5737 = vmatmul.mubr.f32.gmra.mrb[24].mxu0 %v21969_v46  ;;  %21973 = vst [vmem:[#allocation177_spill] sm:$0xff] %v18865_v10  ;;  %v10932_v42 = vrot.slane %v21975_v59, %v18865_v10 }
 0x58f   : > { %5742 = vmatprep.mubr.f32.mxu0 %v20980_v36 }
 0x590   : > { %7135 = vmatmul.mubr.f32.gmra.mrb[24].mxu1 %v21969_v46  ;;  %v18870_v46 = vsub.s32 6, %v21971_v23 }
 0x591   : > { %7140 = vmatprep.mubr.f32.mxu1 %v20980_v36 }
 0x592   : > { %5745 = vmatmul.mubr.f32.gmra.mrb[26].mxu0 %v21970_v33  ;;  %21974 = vst [vmem:[#allocation178_spill] sm:$0xff] %v18870_v46  ;;  %v10936_v52 = vrot.slane %v21975_v59, %v18870_v46 }
 0x593   : > { %5750 = vmatprep.mubr.f32.mxu0 %v20980_v36 }
 0x594   : > { %7143 = vmatmul.mubr.f32.gmra.mrb[26].mxu1 %v21970_v33 }
 0x595   : > { %7148 = vmatprep.mubr.f32.mxu1 %v20980_v36 }
 0x596   : > { %5753 = vmatmul.mubr.f32.gmra.mrb[28].mxu0 %v18603_v21 }
 0x597   : > { %5758 = vmatprep.mubr.f32.mxu0 %v20980_v36 }
 0x598   : > { %7151 = vmatmul.mubr.f32.gmra.mrb[28].mxu1 %v18603_v21  ;;  %v4320_v33 = vpop.f32.mrb[2].mxu0  ;;  %v10940_v21 = vrot.slane %v21975_v59, %v18876_v29  ;;  %v21980_v59 = vld [vmem:[#allocation10_spill] sm:$0xff] }
 0x599   : > { %v4992_v0 = vmul.f32 0.00048828125, %v4320_v33  ;;  %7156 = vmatprep.mubr.f32.mxu1 %v20980_v36  ;;  %v4322_v50 = vpop.f32.mrb[3].mxu0 }
 0x59a   : > { %v4993_v53 = vmul.f32 0.00048828125, %v4322_v50  ;;  %5761 = vmatmul.mubr.f32.gmra.mrb[30].mxu0 %v18620_v3 }
 0x59b   : > { %v18885_v47 = vadd.f32 %v10928_v11, %v4992_v0  ;;  %v4983_v23 = vpop.f32.mrb[2].mxu1  ;;  %5766 = vmatprep.mubr.f32.mxu0 %v20980_v36 }
 0x59c   : > { %v4994_v31 = vmul.f32 0.00048828125, %v4983_v23  ;;  %v18890_v10 = vadd.f32 %v10932_v42, %v4993_v53  ;;  %v10968_v33 = vcombine.low %v4992_v0, %v4993_v53  ;;  %v4985_v61 = vpop.f32.mrb[3].mxu1  ;;  %7159 = vmatmul.mubr.f32.gmra.mrb[30].mxu1 %v18620_v3 }
 0x59d   : > { %21977 = vst [vmem:[#allocation180_spill] sm:$0xff] %v18885_v47  ;;  %v4995_v60 = vmul.f32 0.00048828125, %v4985_v61  ;;  %7164 = vmatprep.mubr.f32.mxu1 %v20980_v36 }
 0x59e   : > { %21978 = vst [vmem:[#allocation181_spill] sm:$0xff] %v18890_v10  ;;  %v18894_v50 = vadd.f32 %v10936_v52, %v4994_v31  ;;  %v11227_v11 = vcombine.low %v18885_v47, %v18890_v10  ;;  %5769 = vmatmul.mubr.f32.gmra.mrb[32].mxu0 %v18636_v54  ;;  %v10990_v29 = vrot.slane %v10968_v33, %v21980_v59  ;;  %v22012_v10 = vld [vmem:[#allocation187_spill] sm:$0xff]  ;;  %v22027_v47 = vld [vmem:[#allocation158_spill] sm:$0xff] }
 0x59f   : > { %v18900_v46 = vadd.f32 %v10940_v21, %v4995_v60  ;;  %v10969_v42 = vcombine.low %v4994_v31, %v4995_v60  ;;  %5774 = vmatprep.mubr.f32.mxu0 %v20980_v36  ;;  %v21982_v31 = vld [vmem:[#allocation27_spill] sm:$0xff]  ;;  %v21983_v60 = vld [vmem:[#allocation32_spill] sm:$0xff] }
 0x5a0   : > { %21979 = vst [vmem:[#allocation182_spill] sm:$0xff] %v18894_v50  ;;  %7167 = vmatmul.mubr.f32.gmra.mrb[32].mxu1 %v18636_v54  ;;  %v11249_v61 = vrot.slane %v11227_v11, %v21980_v59  ;;  %v21984_v23 = vcombine.low %v21982_v31, %v21983_v60  ;;  %v21993_v60 = vld [vmem:[#allocation207_spill] sm:$0xff] }
 0x5a1   : > { %21981 = vst [vmem:[#allocation22_spill] sm:$0xff] %v18900_v46  ;;  %v10997_v53 = vrot.slane %v10969_v42, %v21980_v59  ;;  %v11228_v52 = vcombine.low %v18894_v50, %v18900_v46  ;;  %7172 = vmatprep.mubr.f32.mxu1 %v20980_v36  ;;  %v21987_v46 = vld [vmem:[#allocation19_spill] sm:$0xff] }
 0x5a2   : > { %5777 = vmatmul.mubr.f32.gmra.mrb[34].mxu0 %v18652_v48  ;;  %v18917_v33 = vrot.slane %v21984_v23, %v21980_v59  ;;  %v21996_v23 = vld [vmem:[#allocation24_spill] sm:$0xff] }
 0x5a3   : > { %v10999_v0 = vcombine.low %v10990_v29, %v10997_v53  ;;  %v11256_v21 = vrot.slane %v11228_v52, %v21980_v59  ;;  %5847 = vmatprep.mubr.f32.mxu0 %v20980_v36  ;;  %v21988_v29 = vld [vmem:[#allocation29_spill] sm:$0xff]  ;;  %v21989_v53 = vld [vmem:[#allocation36_spill] sm:$0xff] }
 0x5a4   : > { %7175 = vmatmul.mubr.f32.gmra.mrb[34].mxu1 %v18652_v48  ;;  %21985 = vst [vmem:[#allocation169_spill] sm:$0xff] %v18917_v33  ;;  %v21990_v52 = vcombine.low %v21988_v29, %v21989_v53  ;;  %v21997_v29 = vld [vmem:[#allocation210_spill] sm:$0xff]  ;;  %v21999_v53 = vld [vmem:[#allocation76_spill] sm:$0xff]  ;;  %v22081_v33 = vld [vmem:[#allocation35_spill] sm:$0xff] }
 0x5a5   : > { %v18920_v11 = vrot.slane %v10999_v0, %v21980_v59  ;;  %v11258_v42 = vcombine.low %v11249_v61, %v11256_v21  ;;  %7245 = vmatprep.mubr.f32.mxu1 %v20980_v36  ;;  %v21994_v61 = vld [vmem:[#allocation208_spill] sm:$0xff]  ;;  %v21995_v21 = vld [vmem:[#allocation209_spill] sm:$0xff]  ;;  %v22007_v0 = vld [vmem:[#allocation183_spill] sm:$0xff] }
 0x5a6   : > { %5851 = vmatmul.mubr.f32.vlgmr.msra.gmra.mrb[4].mxu0 %v21987_v46  ;;  %v18928_v50 = vrot.slane %v21990_v52, %v21980_v59  ;;  %v22000_v52 = vld [vmem:[#allocation71_spill] sm:$0xff] }
 0x5a7   : > { %21986 = vst [vmem:[#allocation171_spill] sm:$0xff] %v18920_v11  ;;  %v18933_v31 = vrot.slane %v11258_v42, %v21980_v59  ;;  %12549 = vmatpush1.bf16.msra.mxu0 %v21993_v60  ;;  %5856 = vmatprep.mubr.f32.mxu0 %v20980_v36  ;;  %v21998_v42 = vld [vmem:[#allocation211_spill] sm:$0xff]  ;;  %v22001_v60 = vld [vmem:[#allocation34_spill] sm:$0xff]  ;;  %v22069_v59 = vld [vmem:[#allocation256_spill] sm:$0xff] }
 0x5a8   : > { %21991 = vst [vmem:[#allocation170_spill] sm:$0xff] %v18928_v50  ;;  %7249 = vmatmul.mubr.f32.vlgmr.msra.gmra.mrb[4].mxu1 %v21987_v46  ;;  %12551 = vmatprep.subr.bf16.mxu0 %v21994_v61  ;;  %v22002_v61 = vld [vmem:[#allocation72_spill] sm:$0xff]  ;;  %v22022_v50 = vld [vmem:[#allocation141_spill] sm:$0xff] }
 0x5a9   : > { %21992 = vst [vmem:[#allocation172_spill] sm:$0xff] %v18933_v31  ;;  %12741 = vmatpush1.bf16.msra.mxu1 %v21995_v21  ;;  %7254 = vmatprep.mubr.f32.mxu1 %v20980_v36  ;;  %v22003_v21 = vld [vmem:[#allocation81_spill] sm:$0xff]  ;;  %v22017_v31 = vld [vmem:[#allocation188_spill] sm:$0xff] }
 0x5aa   : > { %5860 = vmatmul.mubr.f32.gmra.mrb[6].mxu0 %v21996_v23  ;;  %12743 = vmatprep.subr.bf16.mxu1 %v21997_v29  ;;  %v22004_v29 = vld [vmem:[#allocation85_spill] sm:$0xff]  ;;  %v22080_v11 = vld [vmem:[#allocation288_spill] sm:$0xff] }
 0x5ab   : > { %5865 = vmatprep.mubr.f32.mxu0 %v20980_v36  ;;  %12553 = vmatpush1.bf16.msra.mxu0 %v21998_v42  ;;  %v22005_v42 = vld [vmem:[#allocation87_spill] sm:$0xff] }
 0x5ac   : > { %7258 = vmatmul.mubr.f32.gmra.mrb[6].mxu1 %v21996_v23  ;;  %12555 = vmatprep.subr.bf16.mxu0 %v21999_v53  ;;  %v22006_v53 = vld [vmem:[#allocation37_spill] sm:$0xff] }
 0x5ad   : > { %7263 = vmatprep.mubr.f32.mxu1 %v20980_v36  ;;  %12745 = vmatpush1.bf16.msra.mxu1 %v22000_v52  ;;  %v22008_v52 = vld [vmem:[#allocation184_spill] sm:$0xff] }
 0x5ae   : > { %5869 = vmatmul.mubr.f32.gmra.mrb[8].mxu0 %v22001_v60  ;;  %12747 = vmatprep.subr.bf16.mxu1 %v22002_v61  ;;  %v22009_v61 = vld [vmem:[#allocation186_spill] sm:$0xff] }
 0x5af   : > { %5874 = vmatprep.mubr.f32.mxu0 %v20980_v36  ;;  %12557 = vmatpush1.bf16.msra.mxu0 %v22003_v21  ;;  %v22010_v21 = vld [vmem:[#allocation185_spill] sm:$0xff] }
 0x5b0   : > { %7267 = vmatmul.mubr.f32.gmra.mrb[8].mxu1 %v22001_v60  ;;  %12559 = vmatprep.subr.bf16.mxu0 %v22004_v29  ;;  %v22011_v29 = vld [vmem:[#allocation42_spill] sm:$0xff] }
 0x5b1   : > { %7272 = vmatprep.mubr.f32.mxu1 %v20980_v36  ;;  %12749 = vmatpush1.bf16.msra.mxu1 %v22005_v42  ;;  %v22013_v42 = vld [vmem:[#allocation117_spill] sm:$0xff] }
 0x5b2   : > { %5878 = vmatmul.mubr.f32.gmra.mrb[10].mxu0 %v22006_v53  ;;  %12751 = vmatprep.subr.bf16.mxu1 %v22007_v0  ;;  %v22014_v0 = vld [vmem:[#allocation125_spill] sm:$0xff] }
 0x5b3   : > { %5883 = vmatprep.mubr.f32.mxu0 %v20980_v36  ;;  %12561 = vmatpush1.bf16.msra.mxu0 %v22008_v52  ;;  %v22015_v52 = vld [vmem:[#allocation118_spill] sm:$0xff] }
 0x5b4   : > { %7276 = vmatmul.mubr.f32.gmra.mrb[10].mxu1 %v22006_v53  ;;  %12563 = vmatprep.subr.bf16.mxu0 %v22009_v61  ;;  %v22016_v61 = vld [vmem:[#allocation62_spill] sm:$0xff] }
 0x5b5   : > { %7281 = vmatprep.mubr.f32.mxu1 %v20980_v36  ;;  %12753 = vmatpush1.bf16.msra.mxu1 %v22010_v21  ;;  %v22018_v21 = vld [vmem:[#allocation130_spill] sm:$0xff] }
 0x5b6   : > { %5887 = vmatmul.mubr.f32.gmra.mrb[12].mxu0 %v22011_v29  ;;  %12755 = vmatprep.subr.bf16.mxu1 %v22012_v10  ;;  %v22019_v10 = vld [vmem:[#allocation135_spill] sm:$0xff] }
 0x5b7   : > { %5892 = vmatprep.mubr.f32.mxu0 %v20980_v36  ;;  %12565 = vmatpush1.bf16.msra.mxu0 %v22013_v42  ;;  %v22020_v42 = vld [vmem:[#allocation133_spill] sm:$0xff] }
 0x5b8   : > { %7285 = vmatmul.mubr.f32.gmra.mrb[12].mxu1 %v22011_v29  ;;  %12567 = vmatprep.subr.bf16.mxu0 %v22014_v0  ;;  %v22021_v0 = vld [vmem:[#allocation74_spill] sm:$0xff] }
 0x5b9   : > { %7290 = vmatprep.mubr.f32.mxu1 %v20980_v36  ;;  %12757 = vmatpush1.bf16.msra.mxu1 %v22015_v52  ;;  %v22023_v52 = vld [vmem:[#allocation145_spill] sm:$0xff]  ;;  %v22088_v29 = vld [vmem:[#allocation318_spill] sm:$0xff] }
 0x5ba   : > { %5896 = vmatmul.mubr.f32.gmra.mrb[14].mxu0 %v22016_v61  ;;  %12759 = vmatprep.subr.bf16.mxu1 %v22017_v31  ;;  %v22024_v31 = vld [vmem:[#allocation150_spill] sm:$0xff] }
 0x5bb   : > { %5901 = vmatprep.mubr.f32.mxu0 %v20980_v36  ;;  %12569 = vmatpush1.bf16.msra.mxu0 %v22018_v21  ;;  %v22025_v21 = vld [vmem:[#allocation147_spill] sm:$0xff] }
 0x5bc   : > { %7294 = vmatmul.mubr.f32.gmra.mrb[14].mxu1 %v22016_v61  ;;  %12571 = vmatprep.subr.bf16.mxu0 %v22019_v10  ;;  %v22026_v10 = vld [vmem:[#allocation84_spill] sm:$0xff] }
 0x5bd   : > { %7299 = vmatprep.mubr.f32.mxu1 %v20980_v36  ;;  %12761 = vmatpush1.bf16.msra.mxu1 %v22020_v42  ;;  %v22028_v42 = vld [vmem:[#allocation162_spill] sm:$0xff]  ;;  %v22083_v61 = vld [vmem:[#allocation312_spill] sm:$0xff] }
 0x5be   : > { %5905 = vmatmul.mubr.f32.gmra.mrb[16].mxu0 %v22021_v0  ;;  %12763 = vmatprep.subr.bf16.mxu1 %v22022_v50  ;;  %v22029_v50 = vld [vmem:[#allocation189_spill] sm:$0xff] }
 0x5bf   : > { %5910 = vmatprep.mubr.f32.mxu0 %v20980_v36  ;;  %12573 = vmatpush1.bf16.msra.mxu0 %v22023_v52  ;;  %v22030_v52 = vld [vmem:[#allocation104_spill] sm:$0xff] }
 0x5c0   : > { %7303 = vmatmul.mubr.f32.gmra.mrb[16].mxu1 %v22021_v0  ;;  %12575 = vmatprep.subr.bf16.mxu0 %v22024_v31  ;;  %v22034_v31 = vld [vmem:[#allocation164_spill] sm:$0xff]  ;;  %v22082_v0 = vld [vmem:[#allocation303_spill] sm:$0xff] }
 0x5c1   : > { %7308 = vmatprep.mubr.f32.mxu1 %v20980_v36  ;;  %12765 = vmatpush1.bf16.msra.mxu1 %v22025_v21  ;;  %v22035_v21 = vld [vmem:[#allocation21_spill] sm:$0xff] }
 0x5c2   : > { %5914 = vmatmul.mubr.f32.gmra.mrb[18].mxu0 %v22026_v10  ;;  %12767 = vmatprep.subr.bf16.mxu1 %v22027_v47  ;;  %v22031_v47 = vld [vmem:[#allocation124_spill] sm:$0xff] }
 0x5c3   : > { %5919 = vmatprep.mubr.f32.mxu0 %v20980_v36  ;;  %12577 = vmatpush1.bf16.msra.mxu0 %v22028_v42  ;;  %v22066_v42 = vld [vmem:[#allocation253_spill] sm:$0xff] }
 0x5c4   : > { %7312 = vmatmul.mubr.f32.gmra.mrb[18].mxu1 %v22026_v10  ;;  %12579 = vmatprep.subr.bf16.mxu0 %v21794_v57  ;;  %v22032_v57 = vld [vmem:[#allocation140_spill] sm:$0xff]  ;;  %v22079_v10 = vld [vmem:[#allocation289_spill] sm:$0xff] }
 0x5c5   : > { %7317 = vmatprep.mubr.f32.mxu1 %v20980_v36  ;;  %12769 = vmatpush1.bf16.msra.mxu1 %v22029_v50  ;;  %v22067_v50 = vld [vmem:[#allocation252_spill] sm:$0xff] }
 0x5c6   : > { %5923 = vmatmul.mubr.f32.gmra.mrb[20].mxu0 %v22030_v52  ;;  %12771 = vmatprep.subr.bf16.mxu1 %v21795_v7  ;;  %v22033_v7 = vld [vmem:[#allocation153_spill] sm:$0xff] }
 0x5c7   : > { %5928 = vmatprep.mubr.f32.mxu0 %v20980_v36 }
 0x5c8   : > { %7321 = vmatmul.mubr.f32.gmra.mrb[20].mxu1 %v22030_v52  ;;  %v22076_v52 = vld [vmem:[#allocation276_spill] sm:$0xff] }
 0x5c9   : > { %7326 = vmatprep.mubr.f32.mxu1 %v20980_v36 }
 0x5ca   : > { %5932 = vmatmul.mubr.f32.gmra.mrb[22].mxu0 %v22031_v47 }
 0x5cb   : > { %5937 = vmatprep.mubr.f32.mxu0 %v20980_v36 }
 0x5cc   : > { %7330 = vmatmul.mubr.f32.gmra.mrb[22].mxu1 %v22031_v47  ;;  %v22075_v47 = vld [vmem:[#allocation272_spill] sm:$0xff] }
 0x5cd   : > { %7335 = vmatprep.mubr.f32.mxu1 %v20980_v36 }
 0x5ce   : > { %5941 = vmatmul.mubr.f32.gmra.mrb[24].mxu0 %v22032_v57 }
 0x5cf   : > { %5946 = vmatprep.mubr.f32.mxu0 %v20980_v36 }
 0x5d0   : > { %7339 = vmatmul.mubr.f32.gmra.mrb[24].mxu1 %v22032_v57  ;;  %v22074_v57 = vld [vmem:[#allocation274_spill] sm:$0xff] }
 0x5d1   : > { %7344 = vmatprep.mubr.f32.mxu1 %v20980_v36 }
 0x5d2   : > { %5950 = vmatmul.mubr.f32.gmra.mrb[26].mxu0 %v22033_v7 }
 0x5d3   : > { %5955 = vmatprep.mubr.f32.mxu0 %v20980_v36 }
 0x5d4   : > { %7348 = vmatmul.mubr.f32.gmra.mrb[26].mxu1 %v22033_v7  ;;  %v22073_v7 = vld [vmem:[#allocation271_spill] sm:$0xff] }
 0x5d5   : > { %7353 = vmatprep.mubr.f32.mxu1 %v20980_v36 }
 0x5d6   : > { %5959 = vmatmul.mubr.f32.gmra.mrb[28].mxu0 %v22034_v31 }
 0x5d7   : > { %5964 = vmatprep.mubr.f32.mxu0 %v20980_v36 }
 0x5d8   : > { %7357 = vmatmul.mubr.f32.gmra.mrb[28].mxu1 %v22034_v31  ;;  %v22072_v31 = vld [vmem:[#allocation270_spill] sm:$0xff] }
 0x5d9   : > { %7362 = vmatprep.mubr.f32.mxu1 %v20980_v36 }
 0x5da   : > { %5968 = vmatmul.mubr.f32.gmra.mrb[30].mxu0 %v22035_v21 }
 0x5db   : > { %5973 = vmatprep.mubr.f32.mxu0 %v20980_v36 }
 0x5dc   : > { %7366 = vmatmul.mubr.f32.gmra.mrb[30].mxu1 %v22035_v21  ;;  %v22071_v21 = vld [vmem:[#allocation263_spill] sm:$0xff] }
 0x5dd   : > { %7371 = vmatprep.mubr.f32.mxu1 %v20980_v36 }
 0x5de   : > { %5977 = vmatmul.mubr.f32.gmra.mrb[32].mxu0 %v18649_v4 }
 0x5df   : > { %5982 = vmatprep.mubr.f32.mxu0 %v20980_v36 }
 0x5e0   : > { %7375 = vmatmul.mubr.f32.gmra.mrb[32].mxu1 %v18649_v4  ;;  %v22070_v4 = vld [vmem:[#allocation265_spill] sm:$0xff] }
 0x5e1   : > { %7380 = vmatprep.mubr.f32.mxu1 %v20980_v36 }
 0x5e2   : > { %5986 = vmatmul.mubr.f32.gmra.mrb[34].mxu0 %v18663_v1 }
 0x5e3   : > { %6120 = vmatprep.mubr.f32.mxu0 %v20980_v36 }
 0x5e4   : > { %7384 = vmatmul.mubr.f32.gmra.mrb[34].mxu1 %v18663_v1  ;;  %v22068_v1 = vld [vmem:[#allocation260_spill] sm:$0xff] }
 0x5e5   : > { %7518 = vmatprep.mubr.f32.mxu1 %v20980_v36 }
 0x5e6   : > { %6122 = vmatmul.mubr.f32.vlgmr.msra.gmra.mrb[4].mxu0 %v18324_v51 }
 0x5e7   : > { %12581 = vmatpush1.bf16.msra.mxu0 %v21796_v41  ;;  %6127 = vmatprep.mubr.f32.mxu0 %v20980_v36  ;;  %v22057_v41 = vld [vmem:[#allocation230_spill] sm:$0xff] }
 0x5e8   : > { %7520 = vmatmul.mubr.f32.vlgmr.msra.gmra.mrb[4].mxu1 %v18324_v51  ;;  %12583 = vmatprep.subr.bf16.mxu0 %v21797_v45  ;;  %v22056_v45 = vld [vmem:[#allocation229_spill] sm:$0xff] }
 0x5e9   : > { %12773 = vmatpush1.bf16.msra.mxu1 %v21798_v19  ;;  %7525 = vmatprep.mubr.f32.mxu1 %v20980_v36  ;;  %v22055_v19 = vld [vmem:[#allocation224_spill] sm:$0xff] }
 0x5ea   : > { %6129 = vmatmul.mubr.f32.gmra.mrb[6].mxu0 %v18344_v35  ;;  %12775 = vmatprep.subr.bf16.mxu1 %v21799_v17  ;;  %v22054_v17 = vld [vmem:[#allocation228_spill] sm:$0xff] }
 0x5eb   : > { %6134 = vmatprep.mubr.f32.mxu0 %v20980_v36  ;;  %12585 = vmatpush1.bf16.msra.mxu0 %v21800_v37  ;;  %v22053_v37 = vld [vmem:[#allocation223_spill] sm:$0xff] }
 0x5ec   : > { %7527 = vmatmul.mubr.f32.gmra.mrb[6].mxu1 %v18344_v35  ;;  %12587 = vmatprep.subr.bf16.mxu0 %v21801_v34  ;;  %v22052_v34 = vld [vmem:[#allocation218_spill] sm:$0xff] }
 0x5ed   : > { %7532 = vmatprep.mubr.f32.mxu1 %v20980_v36  ;;  %12777 = vmatpush1.bf16.msra.mxu1 %v21802_v40  ;;  %v22051_v40 = vld [vmem:[#allocation214_spill] sm:$0xff] }
 0x5ee   : > { %6136 = vmatmul.mubr.f32.gmra.mrb[8].mxu0 %v18370_v26  ;;  %12779 = vmatprep.subr.bf16.mxu1 %v21803_v20  ;;  %v22050_v20 = vld [vmem:[#allocation217_spill] sm:$0xff] }
 0x5ef   : > { %6141 = vmatprep.mubr.f32.mxu0 %v20980_v36  ;;  %12589 = vmatpush1.bf16.msra.mxu0 %v21804_v44  ;;  %v22049_v44 = vld [vmem:[#allocation213_spill] sm:$0xff] }
 0x5f0   : > { %7534 = vmatmul.mubr.f32.gmra.mrb[8].mxu1 %v18370_v26  ;;  %12591 = vmatprep.subr.bf16.mxu0 %v21805_v8  ;;  %v22048_v8 = vld [vmem:[#allocation212_spill] sm:$0xff] }
 0x5f1   : > { %7539 = vmatprep.mubr.f32.mxu1 %v20980_v36  ;;  %12781 = vmatpush1.bf16.msra.mxu1 %v21806_v27  ;;  %v22061_v27 = vld [vmem:[#allocation233_spill] sm:$0xff] }
 0x5f2   : > { %6143 = vmatmul.mubr.f32.gmra.mrb[10].mxu0 %v18393_v25  ;;  %12783 = vmatprep.subr.bf16.mxu1 %v21807_v12  ;;  %v22047_v12 = vld [vmem:[#allocation90_spill] sm:$0xff] }
 0x5f3   : > { %6148 = vmatprep.mubr.f32.mxu0 %v20980_v36  ;;  %12593 = vmatpush1.bf16.msra.mxu0 %v21808_v38  ;;  %v22046_v38 = vld [vmem:[#allocation93_spill] sm:$0xff] }
 0x5f4   : > { %7541 = vmatmul.mubr.f32.gmra.mrb[10].mxu1 %v18393_v25  ;;  %12595 = vmatprep.subr.bf16.mxu0 %v21809_v62  ;;  %v22045_v62 = vld [vmem:[#allocation96_spill] sm:$0xff] }
 0x5f5   : > { %7546 = vmatprep.mubr.f32.mxu1 %v20980_v36  ;;  %12785 = vmatpush1.bf16.msra.mxu1 %v21814_v16  ;;  %v22044_v16 = vld [vmem:[#allocation176_spill] sm:$0xff] }
 0x5f6   : > { %6150 = vmatmul.mubr.f32.gmra.mrb[12].mxu0 %v18422_v9  ;;  %12787 = vmatprep.subr.bf16.mxu1 %v21816_v32  ;;  %v22043_v32 = vld [vmem:[#allocation167_spill] sm:$0xff] }
 0x5f7   : > { %6155 = vmatprep.mubr.f32.mxu0 %v20980_v36  ;;  %12597 = vmatpush1.bf16.msra.mxu0 %v21817_v24  ;;  %v22042_v24 = vld [vmem:[#allocation160_spill] sm:$0xff] }
 0x5f8   : > { %7548 = vmatmul.mubr.f32.gmra.mrb[12].mxu1 %v18422_v9  ;;  %12599 = vmatprep.subr.bf16.mxu0 %v21820_v49  ;;  %v22036_v49 = vld [vmem:[#allocation88_spill] sm:$0xff] }
 0x5f9   : > { %7553 = vmatprep.mubr.f32.mxu1 %v20980_v36  ;;  %12789 = vmatpush1.bf16.msra.mxu1 %v21821_v22  ;;  %v22037_v22 = vld [vmem:[#allocation95_spill] sm:$0xff] }
 0x5fa   : > { %6157 = vmatmul.mubr.f32.gmra.mrb[14].mxu0 %v18446_v14  ;;  %12791 = vmatprep.subr.bf16.mxu1 %v21824_v6  ;;  %v22060_v6 = vld [vmem:[#allocation237_spill] sm:$0xff] }
 0x5fb   : > { %6162 = vmatprep.mubr.f32.mxu0 %v20980_v36  ;;  %12601 = vmatpush1.bf16.msra.mxu0 %v21825_v63  ;;  %v22059_v63 = vld [vmem:[#allocation231_spill] sm:$0xff] }
 0x5fc   : > { %7555 = vmatmul.mubr.f32.gmra.mrb[14].mxu1 %v18446_v14  ;;  %12603 = vmatprep.subr.bf16.mxu0 %v21827_v15  ;;  %v22058_v15 = vld [vmem:[#allocation232_spill] sm:$0xff] }
 0x5fd   : > { %7560 = vmatprep.mubr.f32.mxu1 %v20980_v36  ;;  %12793 = vmatpush1.bf16.msra.mxu1 %v21829_v18  ;;  %v22041_v18 = vld [vmem:[#allocation144_spill] sm:$0xff] }
 0x5fe   : > { %6164 = vmatmul.mubr.f32.gmra.mrb[16].mxu0 %v18454_v56  ;;  %12795 = vmatprep.subr.bf16.mxu1 %v21832_v28  ;;  %v22040_v28 = vld [vmem:[#allocation121_spill] sm:$0xff] }
 0x5ff   : > { %6169 = vmatprep.mubr.f32.mxu0 %v20980_v36  ;;  %12605 = vmatpush1.bf16.msra.mxu0 %v21837_v2  ;;  %v22039_v2 = vld [vmem:[#allocation112_spill] sm:$0xff] }
 0x600   : > { %7562 = vmatmul.mubr.f32.gmra.mrb[16].mxu1 %v18454_v56  ;;  %12607 = vmatprep.subr.bf16.mxu0 %v21838_v55  ;;  %v22038_v55 = vld [vmem:[#allocation99_spill] sm:$0xff] }
 0x601   : > { %7567 = vmatprep.mubr.f32.mxu1 %v20980_v36  ;;  %12797 = vmatpush1.bf16.msra.mxu1 %v21960_v39  ;;  %v22062_v39 = vld [vmem:[#allocation247_spill] sm:$0xff] }
 0x602   : > { %6171 = vmatmul.mubr.f32.gmra.mrb[18].mxu0 %v18486_v13  ;;  %12799 = vmatprep.subr.bf16.mxu1 %v21962_v30  ;;  %v22063_v30 = vld [vmem:[#allocation246_spill] sm:$0xff] }
 0x603   : > { %6176 = vmatprep.mubr.f32.mxu0 %v20980_v36  ;;  %12609 = vmatpush1.bf16.msra.mxu0 %v21963_v43  ;;  %v22064_v43 = vld [vmem:[#allocation250_spill] sm:$0xff] }
 0x604   : > { %7569 = vmatmul.mubr.f32.gmra.mrb[18].mxu1 %v18486_v13  ;;  %12803 = vmatprep.subr.bf16.mxu0 %v22036_v49 }
 0x605   : > { %7574 = vmatprep.mubr.f32.mxu1 %v20980_v36  ;;  %12801 = vmatpush1.bf16.msra.mxu1 %v21965_v58  ;;  %v22065_v58 = vld [vmem:[#allocation251_spill] sm:$0xff] }
 0x606   : > { %6178 = vmatmul.mubr.f32.gmra.mrb[20].mxu0 %v18506_v5  ;;  %12995 = vmatprep.subr.bf16.mxu1 %v22037_v22 }
 0x607   : > { %6183 = vmatprep.mubr.f32.mxu0 %v20980_v36 }
 0x608   : > { %7576 = vmatmul.mubr.f32.gmra.mrb[20].mxu1 %v18506_v5 }
 0x609   : > { %7581 = vmatprep.mubr.f32.mxu1 %v20980_v36 }
 0x60a   : > { %6185 = vmatmul.mubr.f32.gmra.mrb[22].mxu0 %v22038_v55 }
 0x60b   : > { %6190 = vmatprep.mubr.f32.mxu0 %v20980_v36 }
 0x60c   : > { %7583 = vmatmul.mubr.f32.gmra.mrb[22].mxu1 %v22038_v55 }
 0x60d   : > { %7588 = vmatprep.mubr.f32.mxu1 %v20980_v36 }
 0x60e   : > { %6192 = vmatmul.mubr.f32.gmra.mrb[24].mxu0 %v22039_v2 }
 0x60f   : > { %6197 = vmatprep.mubr.f32.mxu0 %v20980_v36 }
 0x610   : > { %7590 = vmatmul.mubr.f32.gmra.mrb[24].mxu1 %v22039_v2 }
 0x611   : > { %7595 = vmatprep.mubr.f32.mxu1 %v20980_v36 }
 0x612   : > { %6199 = vmatmul.mubr.f32.gmra.mrb[26].mxu0 %v22040_v28 }
 0x613   : > { %6204 = vmatprep.mubr.f32.mxu0 %v20980_v36 }
 0x614   : > { %7597 = vmatmul.mubr.f32.gmra.mrb[26].mxu1 %v22040_v28 }
 0x615   : > { %7602 = vmatprep.mubr.f32.mxu1 %v20980_v36 }
 0x616   : > { %6206 = vmatmul.mubr.f32.gmra.mrb[28].mxu0 %v22041_v18 }
 0x617   : > { %6211 = vmatprep.mubr.f32.mxu0 %v20980_v36 }
 0x618   : > { %7604 = vmatmul.mubr.f32.gmra.mrb[28].mxu1 %v22041_v18 }
 0x619   : > { %7609 = vmatprep.mubr.f32.mxu1 %v20980_v36 }
 0x61a   : > { %6213 = vmatmul.mubr.f32.gmra.mrb[30].mxu0 %v22042_v24 }
 0x61b   : > { %6218 = vmatprep.mubr.f32.mxu0 %v20980_v36 }
 0x61c   : > { %7611 = vmatmul.mubr.f32.gmra.mrb[30].mxu1 %v22042_v24 }
 0x61d   : > { %7616 = vmatprep.mubr.f32.mxu1 %v20980_v36 }
 0x61e   : > { %6220 = vmatmul.mubr.f32.gmra.mrb[32].mxu0 %v22043_v32 }
 0x61f   : > { %6225 = vmatprep.mubr.f32.mxu0 %v20980_v36 }
 0x620   : > { %7618 = vmatmul.mubr.f32.gmra.mrb[32].mxu1 %v22043_v32 }
 0x621   : > { %7623 = vmatprep.mubr.f32.mxu1 %v20980_v36 }
 0x622   : > { %6227 = vmatmul.mubr.f32.gmra.mrb[34].mxu0 %v22044_v16 }
 0x623   : > { %6297 = vmatprep.mubr.f32.mxu0 %v20980_v36 }
 0x624   : > { %7625 = vmatmul.mubr.f32.gmra.mrb[34].mxu1 %v22044_v16 }
 0x625   : > { %7695 = vmatprep.mubr.f32.mxu1 %v20980_v36 }
 0x626   : > { %6299 = vmatmul.mubr.f32.vlgmr.msra.gmra.mrb[4].mxu0 %v18324_v51 }
 0x627   : > { %12805 = vmatpush1.bf16.msra.mxu0 %v22045_v62  ;;  %6304 = vmatprep.mubr.f32.mxu0 %v20980_v36 }
 0x628   : > { %7697 = vmatmul.mubr.f32.vlgmr.msra.gmra.mrb[4].mxu1 %v18324_v51  ;;  %12807 = vmatprep.subr.bf16.mxu0 %v22046_v38 }
 0x629   : > { %12997 = vmatpush1.bf16.msra.mxu1 %v22047_v12  ;;  %7702 = vmatprep.mubr.f32.mxu1 %v20980_v36 }
 0x62a   : > { %6306 = vmatmul.mubr.f32.gmra.mrb[6].mxu0 %v18344_v35  ;;  %12999 = vmatprep.subr.bf16.mxu1 %v22048_v8 }
 0x62b   : > { %6311 = vmatprep.mubr.f32.mxu0 %v20980_v36  ;;  %12809 = vmatpush1.bf16.msra.mxu0 %v22049_v44 }
 0x62c   : > { %7704 = vmatmul.mubr.f32.gmra.mrb[6].mxu1 %v18344_v35  ;;  %12811 = vmatprep.subr.bf16.mxu0 %v22050_v20 }
 0x62d   : > { %7709 = vmatprep.mubr.f32.mxu1 %v20980_v36  ;;  %13001 = vmatpush1.bf16.msra.mxu1 %v22051_v40 }
 0x62e   : > { %6313 = vmatmul.mubr.f32.gmra.mrb[8].mxu0 %v18370_v26  ;;  %13003 = vmatprep.subr.bf16.mxu1 %v22052_v34 }
 0x62f   : > { %6318 = vmatprep.mubr.f32.mxu0 %v20980_v36  ;;  %12813 = vmatpush1.bf16.msra.mxu0 %v22053_v37 }
 0x630   : > { %7711 = vmatmul.mubr.f32.gmra.mrb[8].mxu1 %v18370_v26  ;;  %12815 = vmatprep.subr.bf16.mxu0 %v22054_v17 }
 0x631   : > { %7716 = vmatprep.mubr.f32.mxu1 %v20980_v36  ;;  %13005 = vmatpush1.bf16.msra.mxu1 %v22055_v19 }
 0x632   : > { %6320 = vmatmul.mubr.f32.gmra.mrb[10].mxu0 %v18393_v25  ;;  %13007 = vmatprep.subr.bf16.mxu1 %v22056_v45 }
 0x633   : > { %6325 = vmatprep.mubr.f32.mxu0 %v20980_v36  ;;  %12817 = vmatpush1.bf16.msra.mxu0 %v22057_v41 }
 0x634   : > { %7718 = vmatmul.mubr.f32.gmra.mrb[10].mxu1 %v18393_v25  ;;  %12819 = vmatprep.subr.bf16.mxu0 %v22058_v15 }
 0x635   : > { %7723 = vmatprep.mubr.f32.mxu1 %v20980_v36  ;;  %13009 = vmatpush1.bf16.msra.mxu1 %v22059_v63 }
 0x636   : > { %6327 = vmatmul.mubr.f32.gmra.mrb[12].mxu0 %v18422_v9  ;;  %13011 = vmatprep.subr.bf16.mxu1 %v22060_v6 }
 0x637   : > { %6332 = vmatprep.mubr.f32.mxu0 %v20980_v36  ;;  %12821 = vmatpush1.bf16.msra.mxu0 %v22061_v27 }
 0x638   : > { %7725 = vmatmul.mubr.f32.gmra.mrb[12].mxu1 %v18422_v9  ;;  %12823 = vmatprep.subr.bf16.mxu0 %v22062_v39 }
 0x639   : > { %7730 = vmatprep.mubr.f32.mxu1 %v20980_v36  ;;  %13013 = vmatpush1.bf16.msra.mxu1 %v22063_v30 }
 0x63a   : > { %6334 = vmatmul.mubr.f32.gmra.mrb[14].mxu0 %v18446_v14  ;;  %13015 = vmatprep.subr.bf16.mxu1 %v22064_v43 }
 0x63b   : > { %6339 = vmatprep.mubr.f32.mxu0 %v20980_v36  ;;  %12825 = vmatpush1.bf16.msra.mxu0 %v22065_v58 }
 0x63c   : > { %7732 = vmatmul.mubr.f32.gmra.mrb[14].mxu1 %v18446_v14  ;;  %12827 = vmatprep.subr.bf16.mxu0 %v22066_v42 }
 0x63d   : > { %7737 = vmatprep.mubr.f32.mxu1 %v20980_v36  ;;  %13017 = vmatpush1.bf16.msra.mxu1 %v22067_v50 }
 0x63e   : > { %6341 = vmatmul.mubr.f32.gmra.mrb[16].mxu0 %v18454_v56  ;;  %13019 = vmatprep.subr.bf16.mxu1 %v22068_v1 }
 0x63f   : > { %6346 = vmatprep.mubr.f32.mxu0 %v20980_v36  ;;  %12829 = vmatpush1.bf16.msra.mxu0 %v22069_v59 }
 0x640   : > { %7739 = vmatmul.mubr.f32.gmra.mrb[16].mxu1 %v18454_v56  ;;  %12831 = vmatprep.subr.bf16.mxu0 %v22070_v4 }
 0x641   : > { %7744 = vmatprep.mubr.f32.mxu1 %v20980_v36  ;;  %13021 = vmatpush1.bf16.msra.mxu1 %v22071_v21 }
 0x642   : > { %6348 = vmatmul.mubr.f32.gmra.mrb[18].mxu0 %v18486_v13  ;;  %13023 = vmatprep.subr.bf16.mxu1 %v22072_v31 }
 0x643   : > { %6353 = vmatprep.mubr.f32.mxu0 %v20980_v36  ;;  %12833 = vmatpush1.bf16.msra.mxu0 %v22073_v7 }
 0x644   : > { %7746 = vmatmul.mubr.f32.gmra.mrb[18].mxu1 %v18486_v13  ;;  %12835 = vmatprep.subr.bf16.mxu0 %v22074_v57  ;;  %v22078_v57 = vld [vmem:[#allocation277_spill] sm:$0xff] }
 0x645   : > { %7751 = vmatprep.mubr.f32.mxu1 %v20980_v36  ;;  %13025 = vmatpush1.bf16.msra.mxu1 %v22075_v47 }
 0x646   : > { %6355 = vmatmul.mubr.f32.gmra.mrb[20].mxu0 %v18506_v5  ;;  %13027 = vmatprep.subr.bf16.mxu1 %v22076_v52  ;;  %v22077_v52 = vld [vmem:[#allocation31_spill] sm:$0xff] }
 0x647   : > { %6360 = vmatprep.mubr.f32.mxu0 %v20980_v36 }
 0x648   : > { %7753 = vmatmul.mubr.f32.gmra.mrb[20].mxu1 %v18506_v5 }
 0x649   : > { %7758 = vmatprep.mubr.f32.mxu1 %v20980_v36 }
 0x64a   : > { %6362 = vmatmul.mubr.f32.gmra.mrb[22].mxu0 %v22038_v55 }
 0x64b   : > { %6367 = vmatprep.mubr.f32.mxu0 %v20980_v36 }
 0x64c   : > { %7760 = vmatmul.mubr.f32.gmra.mrb[22].mxu1 %v22038_v55 }
 0x64d   : > { %7765 = vmatprep.mubr.f32.mxu1 %v20980_v36 }
 0x64e   : > { %6369 = vmatmul.mubr.f32.gmra.mrb[24].mxu0 %v22039_v2 }
 0x64f   : > { %6374 = vmatprep.mubr.f32.mxu0 %v20980_v36 }
 0x650   : > { %7767 = vmatmul.mubr.f32.gmra.mrb[24].mxu1 %v22039_v2 }
 0x651   : > { %7772 = vmatprep.mubr.f32.mxu1 %v20980_v36 }
 0x652   : > { %6376 = vmatmul.mubr.f32.gmra.mrb[26].mxu0 %v22040_v28 }
 0x653   : > { %6381 = vmatprep.mubr.f32.mxu0 %v20980_v36 }
 0x654   : > { %7774 = vmatmul.mubr.f32.gmra.mrb[26].mxu1 %v22040_v28 }
 0x655   : > { %7779 = vmatprep.mubr.f32.mxu1 %v20980_v36 }
 0x656   : > { %6383 = vmatmul.mubr.f32.gmra.mrb[28].mxu0 %v22041_v18 }
 0x657   : > { %6388 = vmatprep.mubr.f32.mxu0 %v20980_v36 }
 0x658   : > { %7781 = vmatmul.mubr.f32.gmra.mrb[28].mxu1 %v22041_v18 }
 0x659   : > { %7786 = vmatprep.mubr.f32.mxu1 %v20980_v36 }
 0x65a   : > { %6390 = vmatmul.mubr.f32.gmra.mrb[30].mxu0 %v22042_v24 }
 0x65b   : > { %6395 = vmatprep.mubr.f32.mxu0 %v20980_v36 }
 0x65c   : > { %7788 = vmatmul.mubr.f32.gmra.mrb[30].mxu1 %v22042_v24 }
 0x65d   : > { %7793 = vmatprep.mubr.f32.mxu1 %v20980_v36 }
 0x65e   : > { %6397 = vmatmul.mubr.f32.gmra.mrb[32].mxu0 %v22043_v32 }
 0x65f   : > { %6402 = vmatprep.mubr.f32.mxu0 %v20980_v36 }
 0x660   : > { %7795 = vmatmul.mubr.f32.gmra.mrb[32].mxu1 %v22043_v32 }
 0x661   : > { %7800 = vmatprep.mubr.f32.mxu1 %v20980_v36 }
 0x662   : > { %6404 = vmatmul.mubr.f32.gmra.mrb[34].mxu0 %v22044_v16 }
 0x663   : > { %7872 = vmatprep.mubr.f32.mxu0 %v20980_v36 }
 0x664   : > { %7802 = vmatmul.mubr.f32.gmra.mrb[34].mxu1 %v22044_v16 }
 0x665   : > { %9270 = vmatprep.mubr.f32.mxu1 %v20980_v36 }
 0x666   : > { %7878 = vmatmul.mubr.f32.vlgmr.msra.gmra.mrb[36].mxu0 %v22077_v52 }
 0x667   : > { %12837 = vmatpush1.bf16.msra.mxu0 %v22078_v57  ;;  %7883 = vmatprep.mubr.f32.mxu0 %v20980_v36  ;;  %v22084_v57 = vld [vmem:[#allocation314_spill] sm:$0xff] }
 0x668   : > { %9276 = vmatmul.mubr.f32.vlgmr.msra.gmra.mrb[36].mxu1 %v22077_v52  ;;  %12839 = vmatprep.subr.bf16.mxu0 %v22079_v10  ;;  %v22085_v52 = vld [vmem:[#allocation313_spill] sm:$0xff]  ;;  %v22086_v10 = vld [vmem:[#allocation39_spill] sm:$0xff] }
 0x669   : > { %13029 = vmatpush1.bf16.msra.mxu1 %v22080_v11  ;;  %9281 = vmatprep.mubr.f32.mxu1 %v20980_v36  ;;  %v22087_v11 = vld [vmem:[#allocation317_spill] sm:$0xff] }
 0x66a   : > { %7889 = vmatmul.mubr.f32.gmra.mrb[38].mxu0 %v22081_v33  ;;  %13031 = vmatprep.subr.bf16.mxu1 %v22082_v0  ;;  %v22089_v0 = vld [vmem:[#allocation369_spill] sm:$0xff] }
 0x66b   : > { %7894 = vmatprep.mubr.f32.mxu0 %v20980_v36  ;;  %12841 = vmatpush1.bf16.msra.mxu0 %v22083_v61  ;;  %v22091_v61 = vld [vmem:[#allocation53_spill] sm:$0xff] }
 0x66c   : > { %9287 = vmatmul.mubr.f32.gmra.mrb[38].mxu1 %v22081_v33  ;;  %12843 = vmatprep.subr.bf16.mxu0 %v22084_v57  ;;  %v22090_v33 = vld [vmem:[#allocation319_spill] sm:$0xff]  ;;  %v22092_v57 = vld [vmem:[#allocation61_spill] sm:$0xff] }
 0x66d   : > { %9292 = vmatprep.mubr.f32.mxu1 %v20980_v36  ;;  %13033 = vmatpush1.bf16.msra.mxu1 %v22085_v52  ;;  %v22093_v52 = vld [vmem:[#allocation370_spill] sm:$0xff] }
 0x66e   : > { %7900 = vmatmul.mubr.f32.gmra.mrb[40].mxu0 %v22086_v10  ;;  %13035 = vmatprep.subr.bf16.mxu1 %v22087_v11  ;;  %v22094_v11 = vld [vmem:[#allocation372_spill] sm:$0xff] }
 0x66f   : > { %7905 = vmatprep.mubr.f32.mxu0 %v20980_v36  ;;  %12845 = vmatpush1.bf16.msra.mxu0 %v22088_v29  ;;  %v22095_v29 = vld [vmem:[#allocation371_spill] sm:$0xff] }
 0x670   : > { %9298 = vmatmul.mubr.f32.gmra.mrb[40].mxu1 %v22086_v10  ;;  %12847 = vmatprep.subr.bf16.mxu0 %v22089_v0  ;;  %v22096_v10 = vld [vmem:[#allocation66_spill] sm:$0xff]  ;;  %v22097_v0 = vld [vmem:[#allocation373_spill] sm:$0xff] }
 0x671   : > { %9303 = vmatprep.mubr.f32.mxu1 %v20980_v36  ;;  %13037 = vmatpush1.bf16.msra.mxu1 %v22090_v33  ;;  %v22098_v33 = vld [vmem:[#allocation374_spill] sm:$0xff] }
 0x672   : > { %7911 = vmatmul.mubr.f32.gmra.mrb[42].mxu0 %v22091_v61  ;;  %13039 = vmatprep.subr.bf16.mxu1 %v22092_v57  ;;  %v22099_v57 = vld [vmem:[#allocation345_spill] sm:$0xff] }
 0x673   : > { %7916 = vmatprep.mubr.f32.mxu0 %v20980_v36  ;;  %12849 = vmatpush1.bf16.msra.mxu0 %v22093_v52  ;;  %v22101_v52 = vld [vmem:[#allocation92_spill] sm:$0xff] }
 0x674   : > { %9309 = vmatmul.mubr.f32.gmra.mrb[42].mxu1 %v22091_v61  ;;  %12851 = vmatprep.subr.bf16.mxu0 %v22094_v11  ;;  %v22100_v61 = vld [vmem:[#allocation375_spill] sm:$0xff]  ;;  %v22102_v11 = vld [vmem:[#allocation376_spill] sm:$0xff] }
 0x675   : > { %9314 = vmatprep.mubr.f32.mxu1 %v20980_v36  ;;  %13041 = vmatpush1.bf16.msra.mxu1 %v22095_v29  ;;  %v22103_v29 = vld [vmem:[#allocation377_spill] sm:$0xff] }
 0x676   : > { %7922 = vmatmul.mubr.f32.gmra.mrb[44].mxu0 %v22096_v10  ;;  %13043 = vmatprep.subr.bf16.mxu1 %v22097_v0  ;;  %v22104_v0 = vld [vmem:[#allocation378_spill] sm:$0xff] }
 0x677   : > { %7927 = vmatprep.mubr.f32.mxu0 %v20980_v36  ;;  %12853 = vmatpush1.bf16.msra.mxu0 %v22098_v33  ;;  %v22106_v33 = vld [vmem:[#allocation107_spill] sm:$0xff] }
 0x678   : > { %9320 = vmatmul.mubr.f32.gmra.mrb[44].mxu1 %v22096_v10  ;;  %12855 = vmatprep.subr.bf16.mxu0 %v22099_v57  ;;  %v22105_v10 = vld [vmem:[#allocation379_spill] sm:$0xff]  ;;  %v22107_v57 = vld [vmem:[#allocation380_spill] sm:$0xff] }
 0x679   : > { %9325 = vmatprep.mubr.f32.mxu1 %v20980_v36  ;;  %13045 = vmatpush1.bf16.msra.mxu1 %v22100_v61  ;;  %v22108_v61 = vld [vmem:[#allocation381_spill] sm:$0xff] }
 0x67a   : > { %7933 = vmatmul.mubr.f32.gmra.mrb[46].mxu0 %v22101_v52  ;;  %13047 = vmatprep.subr.bf16.mxu1 %v22102_v11  ;;  %v22109_v11 = vld [vmem:[#allocation382_spill] sm:$0xff] }
 0x67b   : > { %7938 = vmatprep.mubr.f32.mxu0 %v20980_v36  ;;  %12857 = vmatpush1.bf16.msra.mxu0 %v22103_v29  ;;  %v22111_v29 = vld [vmem:[#allocation116_spill] sm:$0xff] }
 0x67c   : > { %9331 = vmatmul.mubr.f32.gmra.mrb[46].mxu1 %v22101_v52  ;;  %12859 = vmatprep.subr.bf16.mxu0 %v22104_v0  ;;  %v22110_v52 = vld [vmem:[#allocation383_spill] sm:$0xff]  ;;  %v22112_v0 = vld [vmem:[#allocation384_spill] sm:$0xff] }
 0x67d   : > { %9336 = vmatprep.mubr.f32.mxu1 %v20980_v36  ;;  %13049 = vmatpush1.bf16.msra.mxu1 %v22105_v10  ;;  %v22113_v10 = vld [vmem:[#allocation385_spill] sm:$0xff] }
 0x67e   : > { %7944 = vmatmul.mubr.f32.gmra.mrb[48].mxu0 %v22106_v33  ;;  %13051 = vmatprep.subr.bf16.mxu1 %v22107_v57  ;;  %v22114_v57 = vld [vmem:[#allocation235_spill] sm:$0xff] }
 0x67f   : > { %7949 = vmatprep.mubr.f32.mxu0 %v20980_v36  ;;  %12861 = vmatpush1.bf16.msra.mxu0 %v22108_v61  ;;  %v22116_v61 = vld [vmem:[#allocation131_spill] sm:$0xff] }
 0x680   : > { %9342 = vmatmul.mubr.f32.gmra.mrb[48].mxu1 %v22106_v33  ;;  %12863 = vmatprep.subr.bf16.mxu0 %v22109_v11  ;;  %v22115_v33 = vld [vmem:[#allocation236_spill] sm:$0xff]  ;;  %v22117_v11 = vld [vmem:[#allocation238_spill] sm:$0xff] }
 0x681   : > { %9347 = vmatprep.mubr.f32.mxu1 %v20980_v36  ;;  %13053 = vmatpush1.bf16.msra.mxu1 %v22110_v52  ;;  %v22118_v52 = vld [vmem:[#allocation149_spill] sm:$0xff] }
 0x682   : > { %7955 = vmatmul.mubr.f32.gmra.mrb[50].mxu0 %v22111_v29  ;;  %13055 = vmatprep.subr.bf16.mxu1 %v22112_v0  ;;  %v22120_v0 = vld [vmem:[#allocation168_spill] sm:$0xff] }
 0x683   : > { %7960 = vmatprep.mubr.f32.mxu0 %v20980_v36  ;;  %12865 = vmatpush1.bf16.msra.mxu0 %v22113_v10  ;;  %v22121_v10 = vld [vmem:[#allocation54_spill] sm:$0xff] }
 0x684   : > { %9353 = vmatmul.mubr.f32.gmra.mrb[50].mxu1 %v22111_v29  ;;  %12867 = vmatprep.subr.bf16.mxu0 %v22114_v57  ;;  %v22119_v29 = vld [vmem:[#allocation166_spill] sm:$0xff]  ;;  %v22122_v57 = vld [vmem:[#allocation397_spill] sm:$0xff] }
 0x685   : > { %9358 = vmatprep.mubr.f32.mxu1 %v20980_v36  ;;  %13057 = vmatpush1.bf16.msra.mxu1 %v22115_v33  ;;  %v22123_v33 = vld [vmem:[#allocation399_spill] sm:$0xff] }
 0x686   : > { %7966 = vmatmul.mubr.f32.gmra.mrb[52].mxu0 %v22116_v61  ;;  %13059 = vmatprep.subr.bf16.mxu1 %v22117_v11  ;;  %v22125_v11 = vld [vmem:[#allocation239_spill] sm:$0xff] }
 0x687   : > { %7971 = vmatprep.mubr.f32.mxu0 %v20980_v36 }
 0x688   : > { %9364 = vmatmul.mubr.f32.gmra.mrb[52].mxu1 %v22116_v61  ;;  %v22124_v61 = vld [vmem:[#allocation400_spill] sm:$0xff] }
 0x689   : > { %9369 = vmatprep.mubr.f32.mxu1 %v20980_v36 }
 0x68a   : > { %7977 = vmatmul.mubr.f32.gmra.mrb[54].mxu0 %v22118_v52 }
 0x68b   : > { %7982 = vmatprep.mubr.f32.mxu0 %v20980_v36 }
 0x68c   : > { %9375 = vmatmul.mubr.f32.gmra.mrb[54].mxu1 %v22118_v52  ;;  %v22126_v52 = vld [vmem:[#allocation242_spill] sm:$0xff] }
 0x68d   : > { %9380 = vmatprep.mubr.f32.mxu1 %v20980_v36 }
 0x68e   : > { %7988 = vmatmul.mubr.f32.gmra.mrb[56].mxu0 %v22119_v29 }
 0x68f   : > { %7993 = vmatprep.mubr.f32.mxu0 %v20980_v36 }
 0x690   : > { %9386 = vmatmul.mubr.f32.gmra.mrb[56].mxu1 %v22119_v29  ;;  %v22127_v29 = vld [vmem:[#allocation243_spill] sm:$0xff] }
 0x691   : > { %9391 = vmatprep.mubr.f32.mxu1 %v20980_v36 }
 0x692   : > { %7999 = vmatmul.mubr.f32.gmra.mrb[58].mxu0 %v22120_v0 }
 0x693   : > { %8004 = vmatprep.mubr.f32.mxu0 %v20980_v36 }
 0x694   : > { %9397 = vmatmul.mubr.f32.gmra.mrb[58].mxu1 %v22120_v0  ;;  %v22128_v0 = vld [vmem:[#allocation257_spill] sm:$0xff] }
 0x695   : > { %9402 = vmatprep.mubr.f32.mxu1 %v20980_v36 }
 0x696   : > { %8010 = vmatmul.mubr.f32.gmra.mrb[60].mxu0 %v22121_v10 }
 0x697   : > { %8015 = vmatprep.mubr.f32.mxu0 %v20980_v36 }
 0x698   : > { %9408 = vmatmul.mubr.f32.gmra.mrb[60].mxu1 %v22121_v10  ;;  %v22129_v10 = vld [vmem:[#allocation258_spill] sm:$0xff] }
 0x699   : > { %9413 = vmatprep.mubr.f32.mxu1 %v20980_v36 }
 0x69a   : > { %8021 = vmatmul.mubr.f32.gmra.mrb[62].mxu0 %v22122_v57 }
 0x69b   : > { %8026 = vmatprep.mubr.f32.mxu0 %v20980_v36 }
 0x69c   : > { %9419 = vmatmul.mubr.f32.gmra.mrb[62].mxu1 %v22122_v57  ;;  %v22130_v57 = vld [vmem:[#allocation254_spill] sm:$0xff] }
 0x69d   : > { %9424 = vmatprep.mubr.f32.mxu1 %v20980_v36 }
 0x69e   : > { %8032 = vmatmul.mubr.f32.gmra.mrb[64].mxu0 %v22123_v33 }
 0x69f   : > { %8037 = vmatprep.mubr.f32.mxu0 %v20980_v36 }
 0x6a0   : > { %9430 = vmatmul.mubr.f32.gmra.mrb[64].mxu1 %v22123_v33  ;;  %v22131_v33 = vld [vmem:[#allocation255_spill] sm:$0xff] }
 0x6a1   : > { %9435 = vmatprep.mubr.f32.mxu1 %v20980_v36 }
 0x6a2   : > { %8043 = vmatmul.mubr.f32.gmra.mrb[66].mxu0 %v22124_v61 }
 0x6a3   : > { %8241 = vmatprep.mubr.f32.mxu0 %v20980_v36 }
 0x6a4   : > { %9441 = vmatmul.mubr.f32.gmra.mrb[66].mxu1 %v22124_v61  ;;  %v22132_v61 = vld [vmem:[#allocation264_spill] sm:$0xff] }
 0x6a5   : > { %9639 = vmatprep.mubr.f32.mxu1 %v20980_v36 }
 0x6a6   : > { %8243 = vmatmul.mubr.f32.vlgmr.msra.gmra.mrb[36].mxu0 %v18324_v51 }
 0x6a7   : > { %12869 = vmatpush1.bf16.msra.mxu0 %v22125_v11  ;;  %8248 = vmatprep.mubr.f32.mxu0 %v20980_v36  ;;  %v22133_v11 = vld [vmem:[#allocation267_spill] sm:$0xff] }
 0x6a8   : > { %9641 = vmatmul.mubr.f32.vlgmr.msra.gmra.mrb[36].mxu1 %v18324_v51  ;;  %12871 = vmatprep.subr.bf16.mxu0 %v22126_v52  ;;  %v22134_v52 = vld [vmem:[#allocation268_spill] sm:$0xff] }
 0x6a9   : > { %13061 = vmatpush1.bf16.msra.mxu1 %v22127_v29  ;;  %9646 = vmatprep.mubr.f32.mxu1 %v20980_v36  ;;  %v22135_v29 = vld [vmem:[#allocation273_spill] sm:$0xff] }
 0x6aa   : > { %8250 = vmatmul.mubr.f32.gmra.mrb[38].mxu0 %v18344_v35  ;;  %13063 = vmatprep.subr.bf16.mxu1 %v22128_v0  ;;  %v22136_v0 = vld [vmem:[#allocation290_spill] sm:$0xff] }
 0x6ab   : > { %8255 = vmatprep.mubr.f32.mxu0 %v20980_v36  ;;  %12873 = vmatpush1.bf16.msra.mxu0 %v22129_v10  ;;  %v22137_v10 = vld [vmem:[#allocation291_spill] sm:$0xff] }
 0x6ac   : > { %9648 = vmatmul.mubr.f32.gmra.mrb[38].mxu1 %v18344_v35  ;;  %12875 = vmatprep.subr.bf16.mxu0 %v22130_v57  ;;  %v22138_v57 = vld [vmem:[#allocation278_spill] sm:$0xff] }
 0x6ad   : > { %9653 = vmatprep.mubr.f32.mxu1 %v20980_v36  ;;  %13065 = vmatpush1.bf16.msra.mxu1 %v22131_v33  ;;  %v22139_v33 = vld [vmem:[#allocation282_spill] sm:$0xff] }
 0x6ae   : > { %8257 = vmatmul.mubr.f32.gmra.mrb[40].mxu0 %v18370_v26  ;;  %13067 = vmatprep.subr.bf16.mxu1 %v22132_v61  ;;  %v22140_v61 = vld [vmem:[#allocation292_spill] sm:$0xff] }
 0x6af   : > { %8262 = vmatprep.mubr.f32.mxu0 %v20980_v36  ;;  %12877 = vmatpush1.bf16.msra.mxu0 %v22133_v11  ;;  %v22141_v11 = vld [vmem:[#allocation293_spill] sm:$0xff] }
 0x6b0   : > { %9655 = vmatmul.mubr.f32.gmra.mrb[40].mxu1 %v18370_v26  ;;  %12879 = vmatprep.subr.bf16.mxu0 %v22134_v52  ;;  %v22142_v52 = vld [vmem:[#allocation304_spill] sm:$0xff] }
 0x6b1   : > { %9660 = vmatprep.mubr.f32.mxu1 %v20980_v36  ;;  %13069 = vmatpush1.bf16.msra.mxu1 %v22135_v29  ;;  %v22143_v29 = vld [vmem:[#allocation305_spill] sm:$0xff] }
 0x6b2   : > { %8264 = vmatmul.mubr.f32.gmra.mrb[42].mxu0 %v18393_v25  ;;  %13071 = vmatprep.subr.bf16.mxu1 %v22136_v0  ;;  %v22144_v0 = vld [vmem:[#allocation296_spill] sm:$0xff] }
 0x6b3   : > { %8269 = vmatprep.mubr.f32.mxu0 %v20980_v36  ;;  %12881 = vmatpush1.bf16.msra.mxu0 %v22137_v10  ;;  %v22145_v10 = vld [vmem:[#allocation297_spill] sm:$0xff] }
 0x6b4   : > { %9662 = vmatmul.mubr.f32.gmra.mrb[42].mxu1 %v18393_v25  ;;  %12883 = vmatprep.subr.bf16.mxu0 %v22138_v57  ;;  %v22146_v57 = vld [vmem:[#allocation306_spill] sm:$0xff] }
 0x6b5   : > { %9667 = vmatprep.mubr.f32.mxu1 %v20980_v36  ;;  %13073 = vmatpush1.bf16.msra.mxu1 %v22139_v33  ;;  %v22147_v33 = vld [vmem:[#allocation308_spill] sm:$0xff] }
 0x6b6   : > { %8271 = vmatmul.mubr.f32.gmra.mrb[44].mxu0 %v18422_v9  ;;  %13075 = vmatprep.subr.bf16.mxu1 %v22140_v61  ;;  %v22148_v61 = vld [vmem:[#allocation309_spill] sm:$0xff] }
 0x6b7   : > { %8276 = vmatprep.mubr.f32.mxu0 %v20980_v36  ;;  %12885 = vmatpush1.bf16.msra.mxu0 %v22141_v11  ;;  %v22149_v11 = vld [vmem:[#allocation310_spill] sm:$0xff] }
 0x6b8   : > { %9669 = vmatmul.mubr.f32.gmra.mrb[44].mxu1 %v18422_v9  ;;  %12887 = vmatprep.subr.bf16.mxu0 %v22142_v52  ;;  %v22150_v52 = vld [vmem:[#allocation364_spill] sm:$0xff] }
 0x6b9   : > { %9674 = vmatprep.mubr.f32.mxu1 %v20980_v36  ;;  %13077 = vmatpush1.bf16.msra.mxu1 %v22143_v29  ;;  %v22151_v29 = vld [vmem:[#allocation343_spill] sm:$0xff] }
 0x6ba   : > { %8278 = vmatmul.mubr.f32.gmra.mrb[46].mxu0 %v18446_v14  ;;  %13079 = vmatprep.subr.bf16.mxu1 %v22144_v0  ;;  %v22152_v0 = vld [vmem:[#allocation361_spill] sm:$0xff] }
 0x6bb   : > { %8283 = vmatprep.mubr.f32.mxu0 %v20980_v36  ;;  %12889 = vmatpush1.bf16.msra.mxu0 %v22145_v10  ;;  %v22153_v10 = vld [vmem:[#allocation335_spill] sm:$0xff] }
 0x6bc   : > { %9676 = vmatmul.mubr.f32.gmra.mrb[46].mxu1 %v18446_v14  ;;  %12891 = vmatprep.subr.bf16.mxu0 %v22146_v57  ;;  %v22154_v57 = vld [vmem:[#allocation336_spill] sm:$0xff] }
 0x6bd   : > { %9681 = vmatprep.mubr.f32.mxu1 %v20980_v36  ;;  %13081 = vmatpush1.bf16.msra.mxu1 %v22147_v33  ;;  %v22155_v33 = vld [vmem:[#allocation12_spill] sm:$0xff] }
 0x6be   : > { %8285 = vmatmul.mubr.f32.gmra.mrb[48].mxu0 %v18454_v56  ;;  %13083 = vmatprep.subr.bf16.mxu1 %v22148_v61  ;;  %v22156_v61 = vld [vmem:[#allocation18_spill] sm:$0xff] }
 0x6bf   : > { %8290 = vmatprep.mubr.f32.mxu0 %v20980_v36  ;;  %12893 = vmatpush1.bf16.msra.mxu0 %v22149_v11  ;;  %v22157_v11 = vld [vmem:[#allocation28_spill] sm:$0xff] }
 0x6c0   : > { %9683 = vmatmul.mubr.f32.gmra.mrb[48].mxu1 %v18454_v56  ;;  %12895 = vmatprep.subr.bf16.mxu0 %v22150_v52  ;;  %v22158_v52 = vld [vmem:[#allocation33_spill] sm:$0xff] }
 0x6c1   : > { %9688 = vmatprep.mubr.f32.mxu1 %v20980_v36  ;;  %13085 = vmatpush1.bf16.msra.mxu1 %v22151_v29  ;;  %v22159_v29 = vld [vmem:[#allocation38_spill] sm:$0xff] }
 0x6c2   : > { %8292 = vmatmul.mubr.f32.gmra.mrb[50].mxu0 %v18486_v13  ;;  %13087 = vmatprep.subr.bf16.mxu1 %v22152_v0 }
 0x6c3   : > { %8297 = vmatprep.mubr.f32.mxu0 %v20980_v36  ;;  %12897 = vmatpush1.bf16.msra.mxu0 %v22153_v10 }
 0x6c4   : > { %9690 = vmatmul.mubr.f32.gmra.mrb[50].mxu1 %v18486_v13  ;;  %12899 = vmatprep.subr.bf16.mxu0 %v22036_v49  ;;  %v22166_v13 = vld [vmem:[#allocation55_spill] sm:$0xff] }
 0x6c5   : > { %9695 = vmatprep.mubr.f32.mxu1 %v20980_v36  ;;  %13089 = vmatpush1.bf16.msra.mxu1 %v22154_v57  ;;  %v22160_v57 = vld [vmem:[#allocation41_spill] sm:$0xff] }
 0x6c6   : > { %8299 = vmatmul.mubr.f32.gmra.mrb[52].mxu0 %v18506_v5  ;;  %13091 = vmatprep.subr.bf16.mxu1 %v22037_v22 }
 0x6c7   : > { %8304 = vmatprep.mubr.f32.mxu0 %v20980_v36 }
 0x6c8   : > { %9697 = vmatmul.mubr.f32.gmra.mrb[52].mxu1 %v18506_v5 }
 0x6c9   : > { %9702 = vmatprep.mubr.f32.mxu1 %v20980_v36 }
 0x6ca   : > { %8306 = vmatmul.mubr.f32.gmra.mrb[54].mxu0 %v22038_v55 }
 0x6cb   : > { %8311 = vmatprep.mubr.f32.mxu0 %v20980_v36 }
 0x6cc   : > { %9704 = vmatmul.mubr.f32.gmra.mrb[54].mxu1 %v22038_v55 }
 0x6cd   : > { %9709 = vmatprep.mubr.f32.mxu1 %v20980_v36 }
 0x6ce   : > { %8313 = vmatmul.mubr.f32.gmra.mrb[56].mxu0 %v22039_v2 }
 0x6cf   : > { %8318 = vmatprep.mubr.f32.mxu0 %v20980_v36 }
 0x6d0   : > { %9711 = vmatmul.mubr.f32.gmra.mrb[56].mxu1 %v22039_v2 }
 0x6d1   : > { %9716 = vmatprep.mubr.f32.mxu1 %v20980_v36 }
 0x6d2   : > { %8320 = vmatmul.mubr.f32.gmra.mrb[58].mxu0 %v22040_v28 }
 0x6d3   : > { %8325 = vmatprep.mubr.f32.mxu0 %v20980_v36 }
 0x6d4   : > { %9718 = vmatmul.mubr.f32.gmra.mrb[58].mxu1 %v22040_v28  ;;  %v22164_v28 = vld [vmem:[#allocation13_spill] sm:$0xff] }
 0x6d5   : > { %9723 = vmatprep.mubr.f32.mxu1 %v20980_v36 }
 0x6d6   : > { %8327 = vmatmul.mubr.f32.gmra.mrb[60].mxu0 %v22041_v18 }
 0x6d7   : > { %8332 = vmatprep.mubr.f32.mxu0 %v20980_v36 }
 0x6d8   : > { %9725 = vmatmul.mubr.f32.gmra.mrb[60].mxu1 %v22041_v18  ;;  %v22163_v18 = vld [vmem:[#allocation44_spill] sm:$0xff] }
 0x6d9   : > { %9730 = vmatprep.mubr.f32.mxu1 %v20980_v36 }
 0x6da   : > { %8334 = vmatmul.mubr.f32.gmra.mrb[62].mxu0 %v22042_v24 }
 0x6db   : > { %8339 = vmatprep.mubr.f32.mxu0 %v20980_v36 }
 0x6dc   : > { %9732 = vmatmul.mubr.f32.gmra.mrb[62].mxu1 %v22042_v24 }
 0x6dd   : > { %9737 = vmatprep.mubr.f32.mxu1 %v20980_v36 }
 0x6de   : > { %8341 = vmatmul.mubr.f32.gmra.mrb[64].mxu0 %v22043_v32 }
 0x6df   : > { %8346 = vmatprep.mubr.f32.mxu0 %v20980_v36 }
 0x6e0   : > { %9739 = vmatmul.mubr.f32.gmra.mrb[64].mxu1 %v22043_v32 }
 0x6e1   : > { %9744 = vmatprep.mubr.f32.mxu1 %v20980_v36 }
 0x6e2   : > { %8348 = vmatmul.mubr.f32.gmra.mrb[66].mxu0 %v22044_v16 }
 0x6e3   : > { %8450 = vmatprep.mubr.f32.mxu0 %v20980_v36 }
 0x6e4   : > { %9746 = vmatmul.mubr.f32.gmra.mrb[66].mxu1 %v22044_v16  ;;  %v22162_v16 = vld [vmem:[#allocation52_spill] sm:$0xff] }
 0x6e5   : > { %9848 = vmatprep.mubr.f32.mxu1 %v20980_v36 }
 0x6e6   : > { %8453 = vmatmul.mubr.f32.vlgmr.msra.gmra.mrb[36].mxu0 %v22155_v33 }
 0x6e7   : > { %12901 = vmatpush1.bf16.msra.mxu0 %v22045_v62  ;;  %8458 = vmatprep.mubr.f32.mxu0 %v20980_v36 }
 0x6e8   : > { %9851 = vmatmul.mubr.f32.vlgmr.msra.gmra.mrb[36].mxu1 %v22155_v33  ;;  %12903 = vmatprep.subr.bf16.mxu0 %v22046_v38 }
 0x6e9   : > { %13093 = vmatpush1.bf16.msra.mxu1 %v22047_v12  ;;  %9856 = vmatprep.mubr.f32.mxu1 %v20980_v36 }
 0x6ea   : > { %8461 = vmatmul.mubr.f32.gmra.mrb[38].mxu0 %v22156_v61  ;;  %13095 = vmatprep.subr.bf16.mxu1 %v22048_v8 }
 0x6eb   : > { %8466 = vmatprep.mubr.f32.mxu0 %v20980_v36  ;;  %12905 = vmatpush1.bf16.msra.mxu0 %v22049_v44 }
 0x6ec   : > { %9859 = vmatmul.mubr.f32.gmra.mrb[38].mxu1 %v22156_v61  ;;  %12907 = vmatprep.subr.bf16.mxu0 %v22050_v20 }
 0x6ed   : > { %9864 = vmatprep.mubr.f32.mxu1 %v20980_v36  ;;  %13097 = vmatpush1.bf16.msra.mxu1 %v22051_v40 }
 0x6ee   : > { %8469 = vmatmul.mubr.f32.gmra.mrb[40].mxu0 %v22157_v11  ;;  %13099 = vmatprep.subr.bf16.mxu1 %v22052_v34 }
 0x6ef   : > { %8474 = vmatprep.mubr.f32.mxu0 %v20980_v36  ;;  %12909 = vmatpush1.bf16.msra.mxu0 %v22053_v37 }
 0x6f0   : > { %9867 = vmatmul.mubr.f32.gmra.mrb[40].mxu1 %v22157_v11  ;;  %12911 = vmatprep.subr.bf16.mxu0 %v22054_v17 }
 0x6f1   : > { %9872 = vmatprep.mubr.f32.mxu1 %v20980_v36  ;;  %13101 = vmatpush1.bf16.msra.mxu1 %v22055_v19 }
 0x6f2   : > { %8477 = vmatmul.mubr.f32.gmra.mrb[42].mxu0 %v22158_v52  ;;  %13103 = vmatprep.subr.bf16.mxu1 %v22056_v45 }
 0x6f3   : > { %8482 = vmatprep.mubr.f32.mxu0 %v20980_v36  ;;  %12913 = vmatpush1.bf16.msra.mxu0 %v22057_v41 }
 0x6f4   : > { %9875 = vmatmul.mubr.f32.gmra.mrb[42].mxu1 %v22158_v52  ;;  %12915 = vmatprep.subr.bf16.mxu0 %v22058_v15  ;;  %v22161_v52 = vld [vmem:[#allocation51_spill] sm:$0xff] }
 0x6f5   : > { %9880 = vmatprep.mubr.f32.mxu1 %v20980_v36  ;;  %13105 = vmatpush1.bf16.msra.mxu1 %v22059_v63 }
 0x6f6   : > { %8485 = vmatmul.mubr.f32.gmra.mrb[44].mxu0 %v22159_v29  ;;  %13107 = vmatprep.subr.bf16.mxu1 %v22060_v6 }
 0x6f7   : > { %8490 = vmatprep.mubr.f32.mxu0 %v20980_v36  ;;  %12917 = vmatpush1.bf16.msra.mxu0 %v22061_v27 }
 0x6f8   : > { %9883 = vmatmul.mubr.f32.gmra.mrb[44].mxu1 %v22159_v29  ;;  %12919 = vmatprep.subr.bf16.mxu0 %v22062_v39 }
 0x6f9   : > { %v6300_v0 = vpop.f32.mrb[4].mxu0  ;;  %9888 = vmatprep.mubr.f32.mxu1 %v20980_v36  ;;  %13109 = vmatpush1.bf16.msra.mxu1 %v22063_v30 }
 0x6fa   : > { %v6302_v10 = vpop.f32.mrb[5].mxu0  ;;  %8493 = vmatmul.mubr.f32.gmra.mrb[46].mxu0 %v22160_v57  ;;  %13111 = vmatprep.subr.bf16.mxu1 %v22064_v43  ;;  %v10604_v29 = vmul.f32 %v6300_v0, %v22161_v52  ;;  %v22167_v0 = vld [vmem:[#allocation56_spill] sm:$0xff] }
 0x6fb   : > { %v7698_v33 = vpop.f32.mrb[4].mxu1  ;;  %8498 = vmatprep.mubr.f32.mxu0 %v20980_v36  ;;  %12921 = vmatpush1.bf16.msra.mxu0 %v22065_v58  ;;  %v10605_v2 = vmul.f32 %v6302_v10, %v22164_v28  ;;  %v22169_v10 = vld [vmem:[#allocation49_spill] sm:$0xff] }
 0x6fc   : > { %v7700_v61 = vpop.f32.mrb[5].mxu1  ;;  %9891 = vmatmul.mubr.f32.gmra.mrb[46].mxu1 %v22160_v57  ;;  %12923 = vmatprep.subr.bf16.mxu0 %v22066_v42  ;;  %v22165_v57 = vld [vmem:[#allocation14_spill] sm:$0xff]  ;;  %v10606_v56 = vmul.f32 %v7698_v33, %v22166_v13  ;;  %v22170_v13 = vld [vmem:[#allocation67_spill] sm:$0xff] }
 0x6fd   : > { %v6307_v11 = vpop.f32.mrb[6].mxu0  ;;  %9896 = vmatprep.mubr.f32.mxu1 %v20980_v36  ;;  %13113 = vmatpush1.bf16.msra.mxu1 %v22067_v50 }
 0x6fe   : > { %v10612_v32 = vmul.f32 %v6307_v11, %v22162_v16  ;;  %v6309_v24 = vpop.f32.mrb[7].mxu0  ;;  %8501 = vmatmul.mubr.f32.gmra.mrb[48].mxu0 %v22163_v18  ;;  %13115 = vmatprep.subr.bf16.mxu1 %v22068_v1  ;;  %v22168_v11 = vld [vmem:[#allocation26_spill] sm:$0xff] }
 0x6ff   : > { %v7705_v55 = vpop.f32.mrb[6].mxu1  ;;  %v10613_v5 = vmul.f32 %v6309_v24, %v22165_v57  ;;  %8506 = vmatprep.mubr.f32.mxu0 %v20980_v36  ;;  %12925 = vmatpush1.bf16.msra.mxu0 %v22069_v59  ;;  %v10607_v1 = vmul.f32 %v7700_v61, %v22168_v11 }
 0x700   : > { %v10732_v50 = vadd.f32 %v10612_v32, %v10604_v29  ;;  %v10614_v52 = vmul.f32 %v7705_v55, %v22167_v0  ;;  %v7707_v16 = vpop.f32.mrb[7].mxu1  ;;  %9899 = vmatmul.mubr.f32.gmra.mrb[48].mxu1 %v22163_v18  ;;  %12927 = vmatprep.subr.bf16.mxu0 %v22070_v4  ;;  %v22171_v55 = vld [vmem:[#allocation77_spill] sm:$0xff]  ;;  %v22172_v0 = vld [vmem:[#allocation58_spill] sm:$0xff] }
 0x701   : > { %v10753_v28 = vadd.f32 %v10613_v5, %v10605_v2  ;;  %v10615_v42 = vmul.f32 %v7707_v16, %v22169_v10  ;;  %v6314_v24 = vpop.f32.mrb[8].mxu0  ;;  %9904 = vmatprep.mubr.f32.mxu1 %v20980_v36  ;;  %13117 = vmatpush1.bf16.msra.mxu1 %v22071_v21  ;;  %v22173_v2 = vld [vmem:[#allocation69_spill] sm:$0xff]  ;;  %v22175_v10 = vld [vmem:[#allocation64_spill] sm:$0xff] }
 0x702   : > { %v10774_v57 = vadd.f32 %v10614_v52, %v10606_v56  ;;  %v10620_v32 = vmul.f32 %v6314_v24, %v22170_v13  ;;  %v6316_v33 = vpop.f32.mrb[9].mxu0  ;;  %8509 = vmatmul.mubr.f32.gmra.mrb[50].mxu0 %v22171_v55  ;;  %13119 = vmatprep.subr.bf16.mxu1 %v22072_v31  ;;  %v22174_v56 = vld [vmem:[#allocation337_spill] sm:$0xff] }
 0x703   : > { %v10795_v18 = vadd.f32 %v10615_v42, %v10607_v1  ;;  %v7712_v29 = vpop.f32.mrb[8].mxu1  ;;  %v10621_v61 = vmul.f32 %v6316_v33, %v22172_v0  ;;  %8514 = vmatprep.mubr.f32.mxu0 %v20980_v36  ;;  %12929 = vmatpush1.bf16.msra.mxu0 %v22073_v7  ;;  %v22176_v42 = vld [vmem:[#allocation68_spill] sm:$0xff]  ;;  %v22183_v7 = vld [vmem:[#allocation110_spill] sm:$0xff] }
 0x704   : > { %v10733_v5 = vadd.f32 %v10732_v50, %v10620_v32  ;;  %v10622_v16 = vmul.f32 %v7712_v29, %v22173_v2  ;;  %v7714_v11 = vpop.f32.mrb[9].mxu1  ;;  %9907 = vmatmul.mubr.f32.gmra.mrb[50].mxu1 %v22171_v55  ;;  %12931 = vmatprep.subr.bf16.mxu0 %v22174_v56  ;;  %v22177_v50 = vld [vmem:[#allocation98_spill] sm:$0xff]  ;;  %v22178_v32 = vld [vmem:[#allocation57_spill] sm:$0xff]  ;;  %v22179_v2 = vld [vmem:[#allocation60_spill] sm:$0xff] }
 0x705   : > { %v10754_v52 = vadd.f32 %v10753_v28, %v10621_v61  ;;  %v10623_v24 = vmul.f32 %v7714_v11, %v22175_v10  ;;  %v6321_v13 = vpop.f32.mrb[10].mxu0  ;;  %9912 = vmatprep.mubr.f32.mxu1 %v20980_v36  ;;  %13121 = vmatpush1.bf16.msra.mxu1 %v22075_v47  ;;  %v22180_v61 = vld [vmem:[#allocation70_spill] sm:$0xff] }
 0x706   : > { %v10775_v1 = vadd.f32 %v10774_v57, %v10622_v16  ;;  %v10628_v33 = vmul.f32 %v6321_v13, %v22176_v42  ;;  %v6323_v0 = vpop.f32.mrb[11].mxu0  ;;  %8517 = vmatmul.mubr.f32.gmra.mrb[52].mxu0 %v22177_v50  ;;  %13123 = vmatprep.subr.bf16.mxu1 %v22178_v32  ;;  %v22181_v16 = vld [vmem:[#allocation65_spill] sm:$0xff]  ;;  %v22182_v32 = vld [vmem:[#allocation82_spill] sm:$0xff] }
 0x707   : > { %v10796_v29 = vadd.f32 %v10795_v18, %v10623_v24  ;;  %v7719_v55 = vpop.f32.mrb[10].mxu1  ;;  %v10629_v56 = vmul.f32 %v6323_v0, %v22179_v2  ;;  %8522 = vmatprep.mubr.f32.mxu0 %v20980_v36 }
 0x708   : > { %v10734_v28 = vadd.f32 %v10733_v5, %v10628_v33  ;;  %v10630_v11 = vmul.f32 %v7719_v55, %v22180_v61  ;;  %v7721_v10 = vpop.f32.mrb[11].mxu1  ;;  %9915 = vmatmul.mubr.f32.gmra.mrb[52].mxu1 %v22177_v50  ;;  %v22184_v5 = vld [vmem:[#allocation73_spill] sm:$0xff]  ;;  %v22185_v50 = vld [vmem:[#allocation86_spill] sm:$0xff] }
 0x709   : > { %v10755_v57 = vadd.f32 %v10754_v52, %v10629_v56  ;;  %v10631_v13 = vmul.f32 %v7721_v10, %v22181_v16  ;;  %v6328_v42 = vpop.f32.mrb[12].mxu0  ;;  %9920 = vmatprep.mubr.f32.mxu1 %v20980_v36  ;;  %v22186_v10 = vld [vmem:[#allocation78_spill] sm:$0xff] }
 0x70a   : > { %v10776_v47 = vadd.f32 %v10775_v1, %v10630_v11  ;;  %v10636_v18 = vmul.f32 %v6328_v42, %v22182_v32  ;;  %v6330_v24 = vpop.f32.mrb[13].mxu0  ;;  %8525 = vmatmul.mubr.f32.gmra.mrb[54].mxu0 %v22183_v7  ;;  %v22187_v42 = vld [vmem:[#allocation83_spill] sm:$0xff]  ;;  %v22188_v32 = vld [vmem:[#allocation128_spill] sm:$0xff] }
 0x70b   : > { %v10797_v0 = vadd.f32 %v10796_v29, %v10631_v13  ;;  %v7726_v2 = vpop.f32.mrb[12].mxu1  ;;  %v10637_v33 = vmul.f32 %v6330_v24, %v22184_v5  ;;  %8530 = vmatprep.mubr.f32.mxu0 %v20980_v36 }
 0x70c   : > { %v10735_v55 = vadd.f32 %v10734_v28, %v10636_v18  ;;  %v10638_v52 = vmul.f32 %v7726_v2, %v22185_v50  ;;  %v7728_v56 = vpop.f32.mrb[13].mxu1  ;;  %9923 = vmatmul.mubr.f32.gmra.mrb[54].mxu1 %v22183_v7  ;;  %v22189_v28 = vld [vmem:[#allocation75_spill] sm:$0xff]  ;;  %v22190_v7 = vld [vmem:[#allocation89_spill] sm:$0xff] }
 0x70d   : > { %v10756_v61 = vadd.f32 %v10755_v57, %v10637_v33  ;;  %v10639_v1 = vmul.f32 %v7728_v56, %v22186_v10  ;;  %v6335_v11 = vpop.f32.mrb[14].mxu0  ;;  %9928 = vmatprep.mubr.f32.mxu1 %v20980_v36  ;;  %v22191_v56 = vld [vmem:[#allocation80_spill] sm:$0xff] }
 0x70e   : > { %v10777_v16 = vadd.f32 %v10776_v47, %v10638_v52  ;;  %v10644_v29 = vmul.f32 %v6335_v11, %v22187_v42  ;;  %v6337_v13 = vpop.f32.mrb[15].mxu0  ;;  %8533 = vmatmul.mubr.f32.gmra.mrb[56].mxu0 %v22188_v32  ;;  %v22192_v11 = vld [vmem:[#allocation101_spill] sm:$0xff] }
 0x70f   : > { %v10798_v24 = vadd.f32 %v10797_v0, %v10639_v1  ;;  %v7733_v5 = vpop.f32.mrb[14].mxu1  ;;  %v10645_v18 = vmul.f32 %v6337_v13, %v22189_v28  ;;  %8538 = vmatprep.mubr.f32.mxu0 %v20980_v36  ;;  %v22193_v42 = vld [vmem:[#allocation137_spill] sm:$0xff] }
 0x710   : > { %v10736_v2 = vadd.f32 %v10735_v55, %v10644_v29  ;;  %v10646_v57 = vmul.f32 %v7733_v5, %v22190_v7  ;;  %v7735_v33 = vpop.f32.mrb[15].mxu1  ;;  %9931 = vmatmul.mubr.f32.gmra.mrb[56].mxu1 %v22188_v32  ;;  %v22194_v55 = vld [vmem:[#allocation91_spill] sm:$0xff] }
 0x711   : > { %v10757_v50 = vadd.f32 %v10756_v61, %v10645_v18  ;;  %v10647_v47 = vmul.f32 %v7735_v33, %v22191_v56  ;;  %v6342_v52 = vpop.f32.mrb[16].mxu0  ;;  %9936 = vmatprep.mubr.f32.mxu1 %v20980_v36  ;;  %v22195_v32 = vld [vmem:[#allocation103_spill] sm:$0xff]  ;;  %v22196_v33 = vld [vmem:[#allocation97_spill] sm:$0xff] }
 0x712   : > { %v10778_v10 = vadd.f32 %v10777_v16, %v10646_v57  ;;  %v10652_v0 = vmul.f32 %v6342_v52, %v22192_v11  ;;  %v6344_v1 = vpop.f32.mrb[17].mxu0  ;;  %8541 = vmatmul.mubr.f32.gmra.mrb[58].mxu0 %v22193_v42  ;;  %v22197_v52 = vld [vmem:[#allocation102_spill] sm:$0xff]  ;;  %v22198_v11 = vld [vmem:[#allocation157_spill] sm:$0xff] }
 0x713   : > { %v10799_v13 = vadd.f32 %v10798_v24, %v10647_v47  ;;  %v7740_v28 = vpop.f32.mrb[16].mxu1  ;;  %v10653_v29 = vmul.f32 %v6344_v1, %v22194_v55  ;;  %8546 = vmatprep.mubr.f32.mxu0 %v20980_v36 }
 0x714   : > { %v10737_v5 = vadd.f32 %v10736_v2, %v10652_v0  ;;  %v10654_v61 = vmul.f32 %v7740_v28, %v22195_v32  ;;  %v7742_v18 = vpop.f32.mrb[17].mxu1  ;;  %9939 = vmatmul.mubr.f32.gmra.mrb[58].mxu1 %v22193_v42  ;;  %v22199_v2 = vld [vmem:[#allocation94_spill] sm:$0xff]  ;;  %v22200_v42 = vld [vmem:[#allocation105_spill] sm:$0xff] }
 0x715   : > { %v10758_v7 = vadd.f32 %v10757_v50, %v10653_v29  ;;  %v10655_v16 = vmul.f32 %v7742_v18, %v22196_v33  ;;  %v6349_v57 = vpop.f32.mrb[18].mxu0  ;;  %9944 = vmatprep.mubr.f32.mxu1 %v20980_v36  ;;  %v22201_v18 = vld [vmem:[#allocation100_spill] sm:$0xff] }
 0x716   : > { %v10779_v56 = vadd.f32 %v10778_v10, %v10654_v61  ;;  %v10660_v24 = vmul.f32 %v6349_v57, %v22197_v52  ;;  %v6351_v47 = vpop.f32.mrb[19].mxu0  ;;  %8549 = vmatmul.mubr.f32.gmra.mrb[60].mxu0 %v22198_v11  ;;  %v22202_v57 = vld [vmem:[#allocation113_spill] sm:$0xff] }
 0x717   : > { %v10800_v1 = vadd.f32 %v10799_v13, %v10655_v16  ;;  %v7747_v55 = vpop.f32.mrb[18].mxu1  ;;  %v10661_v0 = vmul.f32 %v6351_v47, %v22199_v2  ;;  %8554 = vmatprep.mubr.f32.mxu0 %v20980_v36 }
 0x718   : > { %v10738_v28 = vadd.f32 %v10737_v5, %v10660_v24  ;;  %v10662_v50 = vmul.f32 %v7747_v55, %v22200_v42  ;;  %v7749_v29 = vpop.f32.mrb[19].mxu1  ;;  %9947 = vmatmul.mubr.f32.gmra.mrb[60].mxu1 %v22198_v11  ;;  %v22203_v5 = vld [vmem:[#allocation106_spill] sm:$0xff]  ;;  %v22204_v11 = vld [vmem:[#allocation115_spill] sm:$0xff]  ;;  %v22205_v42 = vld [vmem:[#allocation109_spill] sm:$0xff] }
 0x719   : > { %v10759_v32 = vadd.f32 %v10758_v7, %v10661_v0  ;;  %v10663_v10 = vmul.f32 %v7749_v29, %v22201_v18  ;;  %v6356_v61 = vpop.f32.mrb[20].mxu0  ;;  %9952 = vmatprep.mubr.f32.mxu1 %v20980_v36  ;;  %v22206_v18 = vld [vmem:[#allocation114_spill] sm:$0xff] }
 0x71a   : > { %v10780_v33 = vadd.f32 %v10779_v56, %v10662_v50  ;;  %v10668_v13 = vmul.f32 %v6356_v61, %v22202_v57  ;;  %v6358_v16 = vpop.f32.mrb[21].mxu0  ;;  %8557 = vmatmul.mubr.f32.gmra.mrb[62].mxu0 %v18620_v3 }
 0x71b   : > { %v10801_v52 = vadd.f32 %v10800_v1, %v10663_v10  ;;  %v7754_v47 = vpop.f32.mrb[20].mxu1  ;;  %v10669_v24 = vmul.f32 %v6358_v16, %v22203_v5  ;;  %8562 = vmatprep.mubr.f32.mxu0 %v20980_v36 }
 0x71c   : > { %v10739_v55 = vadd.f32 %v10738_v28, %v10668_v13  ;;  %v10670_v7 = vmul.f32 %v7754_v47, %v22204_v11  ;;  %v7756_v2 = vpop.f32.mrb[21].mxu1  ;;  %9955 = vmatmul.mubr.f32.gmra.mrb[62].mxu1 %v18620_v3  ;;  %v22207_v28 = vld [vmem:[#allocation108_spill] sm:$0xff]  ;;  %v22208_v3 = vld [vmem:[#allocation119_spill] sm:$0xff] }
 0x71d   : > { %v10760_v0 = vadd.f32 %v10759_v32, %v10669_v24  ;;  %v10671_v56 = vmul.f32 %v7756_v2, %v22205_v42  ;;  %v6363_v50 = vpop.f32.mrb[22].mxu0  ;;  %9960 = vmatprep.mubr.f32.mxu1 %v20980_v36  ;;  %v22209_v24 = vld [vmem:[#allocation111_spill] sm:$0xff] }
 0x71e   : > { %v10781_v29 = vadd.f32 %v10780_v33, %v10670_v7  ;;  %v10676_v1 = vmul.f32 %v6363_v50, %v22206_v18  ;;  %v6365_v10 = vpop.f32.mrb[23].mxu0  ;;  %8565 = vmatmul.mubr.f32.gmra.mrb[64].mxu0 %v18636_v54  ;;  %v22210_v2 = vld [vmem:[#allocation127_spill] sm:$0xff] }
 0x71f   : > { %v10802_v61 = vadd.f32 %v10801_v52, %v10671_v56  ;;  %v7761_v57 = vpop.f32.mrb[22].mxu1  ;;  %v10677_v13 = vmul.f32 %v6365_v10, %v22207_v28  ;;  %8570 = vmatprep.mubr.f32.mxu0 %v20980_v36  ;;  %v22213_v28 = vld [vmem:[#allocation123_spill] sm:$0xff] }
 0x720   : > { %v10740_v16 = vadd.f32 %v10739_v55, %v10676_v1  ;;  %v10678_v32 = vmul.f32 %v7761_v57, %v22208_v3  ;;  %v7763_v47 = vpop.f32.mrb[23].mxu1  ;;  %9963 = vmatmul.mubr.f32.gmra.mrb[64].mxu1 %v18636_v54  ;;  %v22211_v55 = vld [vmem:[#allocation120_spill] sm:$0xff] }
 0x721   : > { %v10761_v5 = vadd.f32 %v10760_v0, %v10677_v13  ;;  %v10679_v33 = vmul.f32 %v7763_v47, %v22209_v24  ;;  %v6370_v11 = vpop.f32.mrb[24].mxu0  ;;  %9968 = vmatprep.mubr.f32.mxu1 %v20980_v36  ;;  %v22212_v54 = vld [vmem:[#allocation132_spill] sm:$0xff] }
 0x722   : > { %v10782_v7 = vadd.f32 %v10781_v29, %v10678_v32  ;;  %v10684_v52 = vmul.f32 %v6370_v11, %v22210_v2  ;;  %v6372_v42 = vpop.f32.mrb[25].mxu0  ;;  %8573 = vmatmul.mubr.f32.gmra.mrb[66].mxu0 %v18652_v48  ;;  %v22214_v32 = vld [vmem:[#allocation129_spill] sm:$0xff]  ;;  %v22216_v2 = vld [vmem:[#allocation386_spill] sm:$0xff] }
 0x723   : > { %v10803_v56 = vadd.f32 %v10802_v61, %v10679_v33  ;;  %v7768_v50 = vpop.f32.mrb[24].mxu1  ;;  %v10685_v18 = vmul.f32 %v6372_v42, %v22211_v55  ;;  %8643 = vmatprep.mubr.f32.mxu0 %v20980_v36  ;;  %v22219_v55 = vld [vmem:[#allocation126_spill] sm:$0xff] }
 0x724   : > { %v10741_v1 = vadd.f32 %v10740_v16, %v10684_v52  ;;  %v10686_v0 = vmul.f32 %v7768_v50, %v22212_v54  ;;  %v7770_v10 = vpop.f32.mrb[25].mxu1  ;;  %9971 = vmatmul.mubr.f32.gmra.mrb[66].mxu1 %v18652_v48  ;;  %v22215_v16 = vld [vmem:[#allocation122_spill] sm:$0xff]  ;;  %v22220_v54 = vld [vmem:[#allocation59_spill] sm:$0xff] }
 0x725   : > { %v10762_v57 = vadd.f32 %v10761_v5, %v10685_v18  ;;  %v10687_v29 = vmul.f32 %v7770_v10, %v22213_v28  ;;  %v6377_v13 = vpop.f32.mrb[26].mxu0  ;;  %10041 = vmatprep.mubr.f32.mxu1 %v20980_v36  ;;  %v22217_v5 = vld [vmem:[#allocation134_spill] sm:$0xff]  ;;  %v22221_v10 = vld [vmem:[#allocation143_spill] sm:$0xff] }
 0x726   : > { %v10783_v3 = vadd.f32 %v10782_v7, %v10686_v0  ;;  %v10692_v61 = vmul.f32 %v6377_v13, %v22214_v32  ;;  %v6379_v47 = vpop.f32.mrb[27].mxu0  ;;  %8647 = vmatmul.mubr.f32.vlgmr.msra.gmra.mrb[36].mxu0 %v21987_v46  ;;  %v22218_v7 = vld [vmem:[#allocation387_spill] sm:$0xff]  ;;  %v22223_v32 = vld [vmem:[#allocation136_spill] sm:$0xff] }
 0x727   : > { %v10804_v24 = vadd.f32 %v10803_v56, %v10687_v29  ;;  %v7775_v33 = vpop.f32.mrb[26].mxu1  ;;  %v10693_v11 = vmul.f32 %v6379_v47, %v22215_v16  ;;  %12933 = vmatpush1.bf16.msra.mxu0 %v22216_v2  ;;  %8652 = vmatprep.mubr.f32.mxu0 %v20980_v36 }
 0x728   : > { %v10742_v48 = vadd.f32 %v10741_v1, %v10692_v61  ;;  %v10694_v52 = vmul.f32 %v7775_v33, %v22217_v5  ;;  %v7777_v42 = vpop.f32.mrb[27].mxu1  ;;  %10045 = vmatmul.mubr.f32.vlgmr.msra.gmra.mrb[36].mxu1 %v21987_v46  ;;  %12935 = vmatprep.subr.bf16.mxu0 %v22218_v7  ;;  %v22222_v1 = vld [vmem:[#allocation388_spill] sm:$0xff]  ;;  %v22227_v5 = vld [vmem:[#allocation139_spill] sm:$0xff] }
 0x729   : > { %v10763_v50 = vadd.f32 %v10762_v57, %v10693_v11  ;;  %v10695_v18 = vmul.f32 %v7777_v42, %v22219_v55  ;;  %13125 = vmatpush1.bf16.msra.mxu1 %v22220_v54  ;;  %v6384_v56 = vpop.f32.mrb[28].mxu0  ;;  %10050 = vmatprep.mubr.f32.mxu1 %v20980_v36  ;;  %v22224_v57 = vld [vmem:[#allocation389_spill] sm:$0xff]  ;;  %v22225_v33 = vld [vmem:[#allocation148_spill] sm:$0xff]  ;;  %v22229_v55 = vld [vmem:[#allocation146_spill] sm:$0xff] }
 0x72a   : > { %v10784_v0 = vadd.f32 %v10783_v3, %v10694_v52  ;;  %v10700_v28 = vmul.f32 %v6384_v56, %v22221_v10  ;;  %v6386_v29 = vpop.f32.mrb[29].mxu0  ;;  %8656 = vmatmul.mubr.f32.gmra.mrb[38].mxu0 %v21996_v23  ;;  %13127 = vmatprep.subr.bf16.mxu1 %v22222_v1  ;;  %v22226_v3 = vld [vmem:[#allocation390_spill] sm:$0xff]  ;;  %v22233_v1 = vld [vmem:[#allocation151_spill] sm:$0xff] }
 0x72b   : > { %v10805_v13 = vadd.f32 %v10804_v24, %v10695_v18  ;;  %v7782_v46 = vpop.f32.mrb[28].mxu1  ;;  %v10701_v61 = vmul.f32 %v6386_v29, %v22223_v32  ;;  %8661 = vmatprep.mubr.f32.mxu0 %v20980_v36  ;;  %12937 = vmatpush1.bf16.msra.mxu0 %v22224_v57  ;;  %v22228_v24 = vld [vmem:[#allocation391_spill] sm:$0xff]  ;;  %v22231_v10 = vld [vmem:[#allocation138_spill] sm:$0xff] }
 0x72c   : > { %v10743_v47 = vadd.f32 %v10742_v48, %v10700_v28  ;;  %v10702_v16 = vmul.f32 %v7782_v46, %v22225_v33  ;;  %v7784_v11 = vpop.f32.mrb[29].mxu1  ;;  %10054 = vmatmul.mubr.f32.gmra.mrb[38].mxu1 %v21996_v23  ;;  %12939 = vmatprep.subr.bf16.mxu0 %v22226_v3  ;;  %v22230_v48 = vld [vmem:[#allocation392_spill] sm:$0xff]  ;;  %v22235_v57 = vld [vmem:[#allocation142_spill] sm:$0xff]  ;;  %v22237_v3 = vld [vmem:[#allocation159_spill] sm:$0xff] }
 0x72d   : > { %v10764_v2 = vadd.f32 %v10763_v50, %v10701_v61  ;;  %v10703_v52 = vmul.f32 %v7784_v11, %v22227_v5  ;;  %v6391_v42 = vpop.f32.mrb[30].mxu0  ;;  %10059 = vmatprep.mubr.f32.mxu1 %v20980_v36  ;;  %13129 = vmatpush1.bf16.msra.mxu1 %v22228_v24  ;;  %v22232_v50 = vld [vmem:[#allocation294_spill] sm:$0xff] }
 0x72e   : > { %v10785_v7 = vadd.f32 %v10784_v0, %v10702_v16  ;;  %v10708_v18 = vmul.f32 %v6391_v42, %v22229_v55  ;;  %v6393_v54 = vpop.f32.mrb[31].mxu0  ;;  %8665 = vmatmul.mubr.f32.gmra.mrb[40].mxu0 %v22001_v60  ;;  %13131 = vmatprep.subr.bf16.mxu1 %v22230_v48  ;;  %v22234_v0 = vld [vmem:[#allocation295_spill] sm:$0xff]  ;;  %v22239_v24 = vld [vmem:[#allocation154_spill] sm:$0xff] }
 0x72f   : > { %v10806_v56 = vadd.f32 %v10805_v13, %v10703_v52  ;;  %v7789_v23 = vpop.f32.mrb[30].mxu1  ;;  %v10709_v28 = vmul.f32 %v6393_v54, %v22231_v10  ;;  %8670 = vmatprep.mubr.f32.mxu0 %v20980_v36  ;;  %12941 = vmatpush1.bf16.msra.mxu0 %v22232_v50  ;;  %v22236_v13 = vld [vmem:[#allocation393_spill] sm:$0xff]  ;;  %v22241_v54 = vld [vmem:[#allocation163_spill] sm:$0xff] }
 0x730   : > { %v10744_v29 = vadd.f32 %v10743_v47, %v10708_v18  ;;  %v10710_v46 = vmul.f32 %v7789_v23, %v22233_v1  ;;  %v7791_v32 = vpop.f32.mrb[31].mxu1  ;;  %10063 = vmatmul.mubr.f32.gmra.mrb[40].mxu1 %v22001_v60  ;;  %12943 = vmatprep.subr.bf16.mxu0 %v22234_v0  ;;  %v22238_v47 = vld [vmem:[#allocation394_spill] sm:$0xff] }
 0x731   : > { %v10765_v61 = vadd.f32 %v10764_v2, %v10709_v28  ;;  %v10711_v33 = vmul.f32 %v7791_v32, %v22235_v57  ;;  %v6398_v16 = vpop.f32.mrb[32].mxu0  ;;  %10068 = vmatprep.mubr.f32.mxu1 %v20980_v36  ;;  %13133 = vmatpush1.bf16.msra.mxu1 %v22236_v13  ;;  %v22240_v2 = vld [vmem:[#allocation395_spill] sm:$0xff]  ;;  %v22243_v28 = vld [vmem:[#allocation156_spill] sm:$0xff]  ;;  %v22245_v32 = vld [vmem:[#allocation161_spill] sm:$0xff] }
 0x732   : > { %v10786_v11 = vadd.f32 %v10785_v7, %v10710_v46  ;;  %v10716_v5 = vmul.f32 %v6398_v16, %v22237_v3  ;;  %v6400_v52 = vpop.f32.mrb[33].mxu0  ;;  %8674 = vmatmul.mubr.f32.gmra.mrb[42].mxu0 %v22006_v53  ;;  %13135 = vmatprep.subr.bf16.mxu1 %v22238_v47  ;;  %v22242_v7 = vld [vmem:[#allocation329_spill] sm:$0xff]  ;;  %v22248_v13 = vld [vmem:[#allocation155_spill] sm:$0xff] }
 0x733   : > { %v10807_v42 = vadd.f32 %v10806_v56, %v10711_v33  ;;  %v7796_v60 = vpop.f32.mrb[32].mxu1  ;;  %v10717_v55 = vmul.f32 %v6400_v52, %v22239_v24  ;;  %8679 = vmatprep.mubr.f32.mxu0 %v20980_v36  ;;  %12945 = vmatpush1.bf16.msra.mxu0 %v22240_v2  ;;  %v22244_v56 = vld [vmem:[#allocation316_spill] sm:$0xff]  ;;  %v22250_v52 = vld [vmem:[#allocation165_spill] sm:$0xff] }
 0x734   : > { %v10745_v18 = vadd.f32 %v10744_v29, %v10716_v5  ;;  %v10718_v48 = vmul.f32 %v7796_v60, %v22241_v54  ;;  %v7798_v23 = vpop.f32.mrb[33].mxu1  ;;  %10072 = vmatmul.mubr.f32.gmra.mrb[42].mxu1 %v22006_v53  ;;  %12947 = vmatprep.subr.bf16.mxu0 %v22242_v7  ;;  %v22246_v29 = vld [vmem:[#allocation42_spill] sm:$0xff]  ;;  %v22247_v33 = vld [vmem:[#allocation320_spill] sm:$0xff] }
 0x735   : > { %v10766_v10 = vadd.f32 %v10765_v61, %v10717_v55  ;;  %v10719_v50 = vmul.f32 %v7798_v23, %v22243_v28  ;;  %v6405_v1 = vpop.f32.mrb[34].mxu0  ;;  %10077 = vmatprep.mubr.f32.mxu1 %v20980_v36  ;;  %13137 = vmatpush1.bf16.msra.mxu1 %v22244_v56  ;;  %v22249_v61 = vld [vmem:[#allocation330_spill] sm:$0xff]  ;;  %v22252_v55 = vld [vmem:[#allocation45_spill] sm:$0xff]  ;;  %v22257_v56 = vld [vmem:[#allocation359_spill] sm:$0xff] }
 0x736   : > { %v10787_v46 = vadd.f32 %v10786_v11, %v10718_v48  ;;  %v10724_v0 = vmul.f32 %v6405_v1, %v22245_v32  ;;  %v6407_v57 = vpop.f32.mrb[35].mxu0  ;;  %8683 = vmatmul.mubr.f32.gmra.mrb[44].mxu0 %v22246_v29  ;;  %13139 = vmatprep.subr.bf16.mxu1 %v22247_v33  ;;  %v22251_v11 = vld [vmem:[#allocation333_spill] sm:$0xff]  ;;  %v22254_v23 = vld [vmem:[#allocation62_spill] sm:$0xff] }
 0x737   : > { %v10808_v16 = vadd.f32 %v10807_v42, %v10719_v50  ;;  %v7803_v53 = vpop.f32.mrb[34].mxu1  ;;  %v10725_v3 = vmul.f32 %v6407_v57, %v22248_v13  ;;  %8688 = vmatprep.mubr.f32.mxu0 %v20980_v36  ;;  %12949 = vmatpush1.bf16.msra.mxu0 %v22249_v61  ;;  %v22253_v42 = vld [vmem:[#allocation334_spill] sm:$0xff]  ;;  %v22256_v50 = vld [vmem:[#allocation355_spill] sm:$0xff]  ;;  %v14347_v57 = vld [vmem:[%s20041_s5] sm:$0xff] }
 0x738   : > { %v10746_v5 = vadd.f32 %v10745_v18, %v10724_v0  ;;  %v10726_v47 = vmul.f32 %v7803_v53, %v22250_v52  ;;  %v7805_v60 = vpop.f32.mrb[35].mxu1  ;;  %10081 = vmatmul.mubr.f32.gmra.mrb[44].mxu1 %v22246_v29  ;;  %12951 = vmatprep.subr.bf16.mxu0 %v22251_v11  ;;  %v22255_v7 = vld [vmem:[#allocation354_spill] sm:$0xff]  ;;  %v10957_v29 = vmul.f32 2.0, %v14347_v57  ;;  %v22260_v13 = vld [vmem:[#allocation360_spill] sm:$0xff] }
 0x739   : > { %v10767_v24 = vadd.f32 %v10766_v10, %v10725_v3  ;;  %v10727_v2 = vmul.f32 %v7805_v60, %v22252_v55  ;;  %10086 = vmatprep.mubr.f32.mxu1 %v20980_v36  ;;  %13141 = vmatpush1.bf16.msra.mxu1 %v22253_v42  ;;  %v22259_v53 = vld [vmem:[#allocation74_spill] sm:$0xff]  ;;  %v22262_v60 = vld [vmem:[#allocation365_spill] sm:$0xff]  ;;  %v22263_v55 = vld [vmem:[#allocation363_spill] sm:$0xff] }
 0x73a   : > { %v10747_v54 = vrot.slane %v10746_v5, 4  ;;  %v10788_v48 = vadd.f32 %v10787_v46, %v10726_v47  ;;  %8692 = vmatmul.mubr.f32.gmra.mrb[46].mxu0 %v22254_v23  ;;  %13143 = vmatprep.subr.bf16.mxu1 %v22255_v7  ;;  %v22258_v46 = vld [vmem:[#allocation356_spill] sm:$0xff]  ;;  %v22265_v42 = vld [vmem:[#allocation171_spill] sm:$0xff]  ;;  %v19639_v7 = vmul.f32 %v14347_v57, %v14347_v57 }
 0x73b   : > { %v10768_v18 = vrot.slane %v10767_v24, 4  ;;  %v10809_v28 = vadd.f32 %v10808_v16, %v10727_v2  ;;  %8697 = vmatprep.mubr.f32.mxu0 %v20980_v36  ;;  %12953 = vmatpush1.bf16.msra.mxu0 %v22256_v50  ;;  %v22264_v2 = vld [vmem:[#allocation169_spill] sm:$0xff]  ;;  %v22268_v50 = vld [vmem:[#allocation366_spill] sm:$0xff] }
 0x73c   : > { %v10748_v1 = vadd.f32 %v10747_v54, %v10746_v5  ;;  %v10789_v10 = vrot.slane %v10788_v48, 4  ;;  %10090 = vmatmul.mubr.f32.gmra.mrb[46].mxu1 %v22254_v23  ;;  %12955 = vmatprep.subr.bf16.mxu0 %v22257_v56  ;;  %v22261_v5 = vld [vmem:[#allocation362_spill] sm:$0xff]  ;;  %v22266_v54 = vcombine.low %v22264_v2, %v22265_v42  ;;  %v22269_v56 = vld [vmem:[#allocation367_spill] sm:$0xff] }
 0x73d   : > { %v10769_v32 = vadd.f32 %v10768_v18, %v10767_v24  ;;  %v10810_v0 = vrot.slane %v10809_v28, 4  ;;  %10095 = vmatprep.mubr.f32.mxu1 %v20980_v36  ;;  %13145 = vmatpush1.bf16.msra.mxu1 %v22258_v46 }
 0x73e   : > { %v10749_v33 = vrot.slane %v10748_v1, 2  ;;  %v10790_v16 = vadd.f32 %v10789_v10, %v10788_v48  ;;  %8701 = vmatmul.mubr.f32.gmra.mrb[48].mxu0 %v22259_v53  ;;  %13147 = vmatprep.subr.bf16.mxu1 %v22260_v13  ;;  %v19637_v48 = vmul.f32 %v22266_v54, %v10957_v29  ;;  %v22270_v29 = vld [vmem:[#allocation368_spill] sm:$0xff] }
 0x73f   : > { %v10770_v3 = vrot.slane %v10769_v32, 2  ;;  %v10811_v61 = vadd.f32 %v10810_v0, %v10809_v28  ;;  %8706 = vmatprep.mubr.f32.mxu0 %v20980_v36  ;;  %12957 = vmatpush1.bf16.msra.mxu0 %v22261_v5  ;;  %v22267_v28 = vld [vmem:[#allocation84_spill] sm:$0xff] }
 0x740   : > { %v10750_v52 = vadd.f32 %v10749_v33, %v10748_v1  ;;  %v10791_v47 = vrot.slane %v10790_v16, 2  ;;  %10099 = vmatmul.mubr.f32.gmra.mrb[48].mxu1 %v22259_v53  ;;  %12959 = vmatprep.subr.bf16.mxu0 %v22262_v60 }
 0x741   : > { %v10771_v11 = vadd.f32 %v10770_v3, %v10769_v32  ;;  %v10812_v24 = vrot.slane %v10811_v61, 2  ;;  %10104 = vmatprep.mubr.f32.mxu1 %v20980_v36  ;;  %13149 = vmatpush1.bf16.msra.mxu1 %v22263_v55  ;;  %v22274_v55 = vld [vmem:[#allocation17_spill] sm:$0xff] }
 0x742   : > { %v10751_v23 = vrot.slane %v10750_v52, 1  ;;  %v10792_v18 = vadd.f32 %v10791_v47, %v10790_v16  ;;  %8710 = vmatmul.mubr.f32.gmra.mrb[50].mxu0 %v22267_v28  ;;  %13151 = vmatprep.subr.bf16.mxu1 %v22268_v50  ;;  %v22271_v16 = vld [vmem:[#allocation50_spill] sm:$0xff]  ;;  %v11029_v2 = vrot.slane %v19637_v48, %v22274_v55  ;;  %v11079_v42 = vrot.slane %v19639_v7, %v22274_v55  ;;  %v22276_v50 = vld [vmem:[#allocation23_spill] sm:$0xff] }
 0x743   : > { %v10772_v1 = vrot.slane %v10771_v11, 1  ;;  %v10813_v10 = vadd.f32 %v10812_v24, %v10811_v61  ;;  %8715 = vmatprep.mubr.f32.mxu0 %v20980_v36  ;;  %12961 = vmatpush1.bf16.msra.mxu0 %v22269_v56  ;;  %v11021_v53 = vrot.slane %v19637_v48, %v22271_v16  ;;  %v11071_v13 = vrot.slane %v19639_v7, %v22271_v16  ;;  %v22272_v61 = vld [vmem:[#allocation104_spill] sm:$0xff] }
 0x744   : > { %v10752_v32 = vadd.f32 %v10751_v23, %v10750_v52  ;;  %v10793_v0 = vrot.slane %v10792_v18, 1  ;;  %10108 = vmatmul.mubr.f32.gmra.mrb[50].mxu1 %v22267_v28  ;;  %12963 = vmatprep.subr.bf16.mxu0 %v22036_v49  ;;  %v22273_v49 = vld [vmem:[#allocation15_spill] sm:$0xff]  ;;  %v22275_v23 = vld [vmem:[#allocation16_spill] sm:$0xff] }
 0x745   : > { %v10773_v46 = vadd.f32 %v10772_v1, %v10771_v11  ;;  %v10814_v57 = vrot.slane %v10813_v10, 1  ;;  %10113 = vmatprep.mubr.f32.mxu1 %v20980_v36  ;;  %13153 = vmatpush1.bf16.msra.mxu1 %v22270_v29  ;;  %v11025_v52 = vrot.slane %v19637_v48, %v22273_v49  ;;  %v11075_v47 = vrot.slane %v19639_v7, %v22273_v49 }
 0x746   : > { %v10900_v33 = vmul.f32 0.00048828125, %v10752_v32  ;;  %v10794_v3 = vadd.f32 %v10793_v0, %v10792_v18  ;;  %8719 = vmatmul.mubr.f32.gmra.mrb[52].mxu0 %v22272_v61  ;;  %13155 = vmatprep.subr.bf16.mxu1 %v22037_v22  ;;  %v11033_v18 = vrot.slane %v19637_v48, %v22275_v23  ;;  %v11083_v28 = vrot.slane %v19639_v7, %v22275_v23  ;;  %v22277_v32 = vld [vmem:[#allocation124_spill] sm:$0xff] }
 0x747   : > { %v10901_v5 = vmul.f32 0.00048828125, %v10773_v46  ;;  %v10815_v60 = vadd.f32 %v10814_v57, %v10813_v10  ;;  %8724 = vmatprep.mubr.f32.mxu0 %v20980_v36  ;;  %v11116_v1 = vmul.f32 %v22276_v50, %v22276_v50  ;;  %v22278_v0 = vld [vmem:[#allocation20_spill] sm:$0xff] }
 0x748   : > { %v11058_v11 = vadd.f32 %v11021_v53, %v10900_v33  ;;  %v10902_v24 = vmul.f32 0.00048828125, %v10794_v3  ;;  %10117 = vmatmul.mubr.f32.gmra.mrb[52].mxu1 %v22272_v61  ;;  %v11117_v46 = vmul.f32 %v22278_v0, %v22278_v0  ;;  %v22279_v33 = vld [vmem:[#allocation25_spill] sm:$0xff] }
 0x749   : > { %v11059_v22 = vadd.f32 %v11025_v52, %v10901_v5  ;;  %v10903_v54 = vmul.f32 0.00048828125, %v10815_v60  ;;  %10122 = vmatprep.mubr.f32.mxu1 %v20980_v36  ;;  %v11118_v53 = vmul.f32 %v22279_v33, %v22279_v33  ;;  %v22280_v5 = vld [vmem:[#allocation30_spill] sm:$0xff]  ;;  %v22285_v33 = vld [vmem:[#allocation396_spill] sm:$0xff] }
 0x74a   : > { %v11108_v10 = vadd.f32 %v11071_v13, %v11058_v11  ;;  %v11060_v56 = vadd.f32 %v11029_v2, %v10902_v24  ;;  %8728 = vmatmul.mubr.f32.gmra.mrb[54].mxu0 %v22277_v32  ;;  %v11119_v13 = vmul.f32 %v22280_v5, %v22280_v5 }
 0x74b   : > { %v11109_v57 = vadd.f32 %v11075_v47, %v11059_v22  ;;  %v11061_v29 = vadd.f32 %v11033_v18, %v10903_v54  ;;  %8733 = vmatprep.mubr.f32.mxu0 %v20980_v36  ;;  %v22281_v47 = vld [vmem:[#allocation140_spill] sm:$0xff] }
 0x74c   : > { %v11124_v3 = vsub.f32 %v11108_v10, %v11116_v1  ;;  %v11110_v61 = vadd.f32 %v11079_v42, %v11060_v56  ;;  %10126 = vmatmul.mubr.f32.gmra.mrb[54].mxu1 %v22277_v32  ;;  %v22282_v1 = vld [vmem:[#allocation153_spill] sm:$0xff]  ;;  %v22283_v56 = vld [vmem:[#allocation164_spill] sm:$0xff] }
 0x74d   : > { %v11125_v52 = vsub.f32 %v11109_v57, %v11117_v46  ;;  %v11111_v60 = vadd.f32 %v11083_v28, %v11061_v29  ;;  %10131 = vmatprep.mubr.f32.mxu1 %v20980_v36  ;;  %v22284_v32 = vld [vmem:[#allocation21_spill] sm:$0xff] }
 0x74e   : > { %v11132_v11 = vmax.f32 %v11124_v3, 0.0  ;;  %v11126_v24 = vsub.f32 %v11110_v61, %v11118_v53  ;;  %8737 = vmatmul.mubr.f32.gmra.mrb[56].mxu0 %v22281_v47  ;;  %v22286_v3 = vld [vmem:[#allocation10_spill] sm:$0xff] }
 0x74f   : > { %v11133_v2 = vmax.f32 %v11125_v52, 0.0  ;;  %v11127_v22 = vsub.f32 %v11111_v60, %v11119_v13  ;;  %8742 = vmatprep.mubr.f32.mxu0 %v20980_v36  ;;  %v22287_v52 = vld [vmem:[#allocation398_spill] sm:$0xff] }
 0x750   : > { %v11141_v54 = vadd.f32 1e-05, %v11132_v11  ;;  %v11134_v18 = vmax.f32 %v11126_v24, 0.0  ;;  %10135 = vmatmul.mubr.f32.gmra.mrb[56].mxu1 %v22281_v47  ;;  %v22308_v24 = vld [vmem:[#allocation245_spill] sm:$0xff] }
 0x751   : > { %v11142_v42 = vadd.f32 1e-05, %v11133_v2  ;;  %v11135_v50 = vmax.f32 %v11127_v22, 0.0  ;;  %10140 = vmatprep.mubr.f32.mxu1 %v20980_v36  ;;  %v22309_v22 = vld [vmem:[#allocation221_spill] sm:$0xff] }
 0x752   : > { %14331 = vrsqrt.f32 %v11141_v54  ;;  %v11143_v28 = vadd.f32 1e-05, %v11134_v18  ;;  %8746 = vmatmul.mubr.f32.gmra.mrb[58].mxu0 %v22282_v1 }
 0x753   : > { %14333 = vrsqrt.f32 %v11142_v42  ;;  %v11144_v10 = vadd.f32 1e-05, %v11135_v50  ;;  %8751 = vmatprep.mubr.f32.mxu0 %v20980_v36  ;;  %v22310_v42 = vld [vmem:[#allocation222_spill] sm:$0xff] }
 0x754   : > { %14335 = vrsqrt.f32 %v11143_v28  ;;  %10144 = vmatmul.mubr.f32.gmra.mrb[58].mxu1 %v22282_v1 }
 0x755   : > { %14337 = vrsqrt.f32 %v11144_v10  ;;  %10149 = vmatprep.mubr.f32.mxu1 %v20980_v36  ;;  %v22311_v10 = vld [vmem:[#allocation262_spill] sm:$0xff] }
 0x756   : > { %8755 = vmatmul.mubr.f32.gmra.mrb[60].mxu0 %v22283_v56 }
 0x757   : > { %8760 = vmatprep.mubr.f32.mxu0 %v20980_v36 }
 0x758   : > { %10153 = vmatmul.mubr.f32.gmra.mrb[60].mxu1 %v22283_v56 }
 0x759   : > { %10158 = vmatprep.mubr.f32.mxu1 %v20980_v36 }
 0x75a   : > { %8764 = vmatmul.mubr.f32.gmra.mrb[62].mxu0 %v22284_v32 }
 0x75b   : > { %8769 = vmatprep.mubr.f32.mxu0 %v20980_v36 }
 0x75c   : > { %v14332_v0 = vpop.eup %14331  ;;  %10162 = vmatmul.mubr.f32.gmra.mrb[62].mxu1 %v22284_v32 }
 0x75d   : > { %v14334_v46 = vpop.eup %14333  ;;  %10167 = vmatprep.mubr.f32.mxu1 %v20980_v36 }
 0x75e   : > { %v14336_v57 = vpop.eup %14335  ;;  %v11165_v29 = vcombine.low %v14332_v0, %v14334_v46  ;;  %8773 = vmatmul.mubr.f32.gmra.mrb[64].mxu0 %v22285_v33 }
 0x75f   : > { %v14338_v53 = vpop.eup %14337  ;;  %8778 = vmatprep.mubr.f32.mxu0 %v20980_v36 }
 0x760   : > { %v19701_v61 = vrot.slane %v11165_v29, %v22286_v3  ;;  %v11166_v5 = vcombine.low %v14336_v57, %v14338_v53  ;;  %10171 = vmatmul.mubr.f32.gmra.mrb[64].mxu1 %v22285_v33  ;;  %v22312_v57 = vld [vmem:[#allocation248_spill] sm:$0xff]  ;;  %v22313_v53 = vld [vmem:[#allocation269_spill] sm:$0xff] }
 0x761   : > { %10176 = vmatprep.mubr.f32.mxu1 %v20980_v36 }
 0x762   : > { %v19706_v13 = vrot.slane %v11166_v5, %v22286_v3  ;;  %8782 = vmatmul.mubr.f32.gmra.mrb[66].mxu0 %v22287_v52 }
 0x763   : > { %8916 = vmatprep.mubr.f32.mxu0 %v20980_v36 }
 0x764   : > { %v11197_v60 = vcombine.low %v19701_v61, %v19706_v13  ;;  %10180 = vmatmul.mubr.f32.gmra.mrb[66].mxu1 %v22287_v52  ;;  %v11216_v61 = vld [vmem:[%s20043_s7] sm:$0xff] }
 0x765   : > { %10314 = vmatprep.mubr.f32.mxu1 %v20980_v36 }
 0x766   : > { %8918 = vmatmul.mubr.f32.vlgmr.msra.gmra.mrb[36].mxu0 %v18324_v51 }
 0x767   : > { %12965 = vmatpush1.bf16.msra.mxu0 %v22045_v62  ;;  %8923 = vmatprep.mubr.f32.mxu0 %v20980_v36  ;;  %v22288_v62 = vld [vmem:[#allocation253_spill] sm:$0xff] }
 0x768   : > { %10316 = vmatmul.mubr.f32.vlgmr.msra.gmra.mrb[36].mxu1 %v18324_v51  ;;  %12967 = vmatprep.subr.bf16.mxu0 %v22046_v38  ;;  %v22289_v38 = vld [vmem:[#allocation252_spill] sm:$0xff] }
 0x769   : > { %13157 = vmatpush1.bf16.msra.mxu1 %v22047_v12  ;;  %10321 = vmatprep.mubr.f32.mxu1 %v20980_v36  ;;  %v22290_v12 = vld [vmem:[#allocation40_spill] sm:$0xff] }
 0x76a   : > { %8925 = vmatmul.mubr.f32.gmra.mrb[38].mxu0 %v18344_v35  ;;  %13159 = vmatprep.subr.bf16.mxu1 %v22048_v8  ;;  %v22291_v8 = vld [vmem:[#allocation260_spill] sm:$0xff] }
 0x76b   : > { %8930 = vmatprep.mubr.f32.mxu0 %v20980_v36  ;;  %12969 = vmatpush1.bf16.msra.mxu0 %v22049_v44  ;;  %v22292_v44 = vld [vmem:[#allocation63_spill] sm:$0xff] }
 0x76c   : > { %10323 = vmatmul.mubr.f32.gmra.mrb[38].mxu1 %v18344_v35  ;;  %12971 = vmatprep.subr.bf16.mxu0 %v22050_v20  ;;  %v22293_v20 = vld [vmem:[#allocation271_spill] sm:$0xff] }
 0x76d   : > { %10328 = vmatprep.mubr.f32.mxu1 %v20980_v36  ;;  %13161 = vmatpush1.bf16.msra.mxu1 %v22051_v40  ;;  %v22295_v40 = vld [vmem:[#allocation79_spill] sm:$0xff] }
 0x76e   : > { %8932 = vmatmul.mubr.f32.gmra.mrb[40].mxu0 %v18370_v26  ;;  %13163 = vmatprep.subr.bf16.mxu1 %v22052_v34  ;;  %v22299_v34 = vld [vmem:[#allocation144_spill] sm:$0xff] }
 0x76f   : > { %8937 = vmatprep.mubr.f32.mxu0 %v20980_v36  ;;  %12973 = vmatpush1.bf16.msra.mxu0 %v22053_v37  ;;  %v22300_v37 = vld [vmem:[#allocation160_spill] sm:$0xff] }
 0x770   : > { %10330 = vmatmul.mubr.f32.gmra.mrb[40].mxu1 %v18370_v26  ;;  %12975 = vmatprep.subr.bf16.mxu0 %v22054_v17  ;;  %v22301_v17 = vld [vmem:[#allocation167_spill] sm:$0xff] }
 0x771   : > { %10335 = vmatprep.mubr.f32.mxu1 %v20980_v36  ;;  %13165 = vmatpush1.bf16.msra.mxu1 %v22055_v19  ;;  %v22302_v19 = vld [vmem:[#allocation176_spill] sm:$0xff] }
 0x772   : > { %8939 = vmatmul.mubr.f32.gmra.mrb[42].mxu0 %v18393_v25  ;;  %13167 = vmatprep.subr.bf16.mxu1 %v22056_v45 }
 0x773   : > { %8944 = vmatprep.mubr.f32.mxu0 %v20980_v36  ;;  %12977 = vmatpush1.bf16.msra.mxu0 %v22057_v41  ;;  %v22304_v41 = vld [vmem:[#allocation227_spill] sm:$0xff] }
 0x774   : > { %10337 = vmatmul.mubr.f32.gmra.mrb[42].mxu1 %v18393_v25  ;;  %12979 = vmatprep.subr.bf16.mxu0 %v22058_v15 }
 0x775   : > { %10342 = vmatprep.mubr.f32.mxu1 %v20980_v36  ;;  %13169 = vmatpush1.bf16.msra.mxu1 %v22059_v63 }
 0x776   : > { %8946 = vmatmul.mubr.f32.gmra.mrb[44].mxu0 %v18422_v9  ;;  %13171 = vmatprep.subr.bf16.mxu1 %v22060_v6  ;;  %v22305_v6 = vld [vmem:[#allocation215_spill] sm:$0xff] }
 0x777   : > { %8951 = vmatprep.mubr.f32.mxu0 %v20980_v36  ;;  %12981 = vmatpush1.bf16.msra.mxu0 %v22061_v27 }
 0x778   : > { %10344 = vmatmul.mubr.f32.gmra.mrb[44].mxu1 %v18422_v9  ;;  %12983 = vmatprep.subr.bf16.mxu0 %v22062_v39 }
 0x779   : > { %10349 = vmatprep.mubr.f32.mxu1 %v20980_v36  ;;  %13173 = vmatpush1.bf16.msra.mxu1 %v22063_v30  ;;  %v22306_v30 = vld [vmem:[#allocation216_spill] sm:$0xff] }
 0x77a   : > { %8953 = vmatmul.mubr.f32.gmra.mrb[46].mxu0 %v18446_v14  ;;  %13175 = vmatprep.subr.bf16.mxu1 %v22064_v43 }
 0x77b   : > { %8958 = vmatprep.mubr.f32.mxu0 %v20980_v36  ;;  %12985 = vmatpush1.bf16.msra.mxu0 %v22065_v58 }
 0x77c   : > { %10351 = vmatmul.mubr.f32.gmra.mrb[46].mxu1 %v18446_v14  ;;  %12987 = vmatprep.subr.bf16.mxu0 %v22288_v62 }
 0x77d   : > { %10356 = vmatprep.mubr.f32.mxu1 %v20980_v36  ;;  %13177 = vmatpush1.bf16.msra.mxu1 %v22289_v38  ;;  %v22314_v38 = vld [vmem:[#allocation259_spill] sm:$0xff] }
 0x77e   : > { %8960 = vmatmul.mubr.f32.gmra.mrb[48].mxu0 %v22290_v12  ;;  %13179 = vmatprep.subr.bf16.mxu1 %v22291_v8 }
 0x77f   : > { %8965 = vmatprep.mubr.f32.mxu0 %v20980_v36  ;;  %12989 = vmatpush1.bf16.msra.mxu0 %v22069_v59  ;;  %v22294_v59 = vld [vmem:[#allocation272_spill] sm:$0xff] }
 0x780   : > { %10358 = vmatmul.mubr.f32.gmra.mrb[48].mxu1 %v22290_v12  ;;  %12991 = vmatprep.subr.bf16.mxu0 %v22070_v4  ;;  %v22296_v4 = vld [vmem:[#allocation99_spill] sm:$0xff] }
 0x781   : > { %10363 = vmatprep.mubr.f32.mxu1 %v20980_v36  ;;  %13181 = vmatpush1.bf16.msra.mxu1 %v22071_v21  ;;  %v22298_v21 = vld [vmem:[#allocation121_spill] sm:$0xff] }
 0x782   : > { %8967 = vmatmul.mubr.f32.gmra.mrb[50].mxu0 %v22292_v44  ;;  %13183 = vmatprep.subr.bf16.mxu1 %v22072_v31  ;;  %v22297_v31 = vld [vmem:[#allocation112_spill] sm:$0xff] }
 0x783   : > { %8972 = vmatprep.mubr.f32.mxu0 %v20980_v36  ;;  %12993 = vmatpush1.bf16.msra.mxu0 %v22293_v20  ;;  %v22315_v20 = vld [vmem:[#allocation266_spill] sm:$0xff] }
 0x784   : > { %10365 = vmatmul.mubr.f32.gmra.mrb[50].mxu1 %v22292_v44 }
 0x785   : > { %10370 = vmatprep.mubr.f32.mxu1 %v20980_v36  ;;  %13185 = vmatpush1.bf16.msra.mxu1 %v22294_v59 }
 0x786   : > { %8974 = vmatmul.mubr.f32.gmra.mrb[52].mxu0 %v22295_v40 }
 0x787   : > { %8979 = vmatprep.mubr.f32.mxu0 %v20980_v36 }
 0x788   : > { %10372 = vmatmul.mubr.f32.gmra.mrb[52].mxu1 %v22295_v40 }
 0x789   : > { %10377 = vmatprep.mubr.f32.mxu1 %v20980_v36 }
 0x78a   : > { %8981 = vmatmul.mubr.f32.gmra.mrb[54].mxu0 %v22296_v4 }
 0x78b   : > { %8986 = vmatprep.mubr.f32.mxu0 %v20980_v36 }
 0x78c   : > { %10379 = vmatmul.mubr.f32.gmra.mrb[54].mxu1 %v22296_v4 }
 0x78d   : > { %10384 = vmatprep.mubr.f32.mxu1 %v20980_v36 }
 0x78e   : > { %8988 = vmatmul.mubr.f32.gmra.mrb[56].mxu0 %v22297_v31 }
 0x78f   : > { %8993 = vmatprep.mubr.f32.mxu0 %v20980_v36 }
 0x790   : > { %10386 = vmatmul.mubr.f32.gmra.mrb[56].mxu1 %v22297_v31 }
 0x791   : > { %10391 = vmatprep.mubr.f32.mxu1 %v20980_v36 }
 0x792   : > { %8995 = vmatmul.mubr.f32.gmra.mrb[58].mxu0 %v22298_v21 }
 0x793   : > { %9000 = vmatprep.mubr.f32.mxu0 %v20980_v36 }
 0x794   : > { %10393 = vmatmul.mubr.f32.gmra.mrb[58].mxu1 %v22298_v21 }
 0x795   : > { %10398 = vmatprep.mubr.f32.mxu1 %v20980_v36 }
 0x796   : > { %9002 = vmatmul.mubr.f32.gmra.mrb[60].mxu0 %v22299_v34 }
 0x797   : > { %9007 = vmatprep.mubr.f32.mxu0 %v20980_v36 }
 0x798   : > { %10400 = vmatmul.mubr.f32.gmra.mrb[60].mxu1 %v22299_v34 }
 0x799   : > { %10405 = vmatprep.mubr.f32.mxu1 %v20980_v36 }
 0x79a   : > { %9009 = vmatmul.mubr.f32.gmra.mrb[62].mxu0 %v22300_v37 }
 0x79b   : > { %9014 = vmatprep.mubr.f32.mxu0 %v20980_v36 }
 0x79c   : > { %10407 = vmatmul.mubr.f32.gmra.mrb[62].mxu1 %v22300_v37 }
 0x79d   : > { %10412 = vmatprep.mubr.f32.mxu1 %v20980_v36 }
 0x79e   : > { %9016 = vmatmul.mubr.f32.gmra.mrb[64].mxu0 %v22301_v17 }
 0x79f   : > { %9021 = vmatprep.mubr.f32.mxu0 %v20980_v36 }
 0x7a0   : > { %10414 = vmatmul.mubr.f32.gmra.mrb[64].mxu1 %v22301_v17 }
 0x7a1   : > { %10419 = vmatprep.mubr.f32.mxu1 %v20980_v36 }
 0x7a2   : > { %9023 = vmatmul.mubr.f32.gmra.mrb[66].mxu0 %v22302_v19 }
 0x7a3   : > { %9093 = vmatprep.mubr.f32.mxu0 %v20980_v36 }
 0x7a4   : > { %10421 = vmatmul.mubr.f32.gmra.mrb[66].mxu1 %v22302_v19 }
 0x7a5   : > { %10491 = vmatprep.mubr.f32.mxu1 %v20980_v36 }
 0x7a6   : > { %9095 = vmatmul.mubr.f32.vlgmr.msra.gmra.mrb[36].mxu0 %v18324_v51 }
 0x7a7   : > { %9100 = vmatprep.mubr.f32.mxu0 %v20980_v36 }
 0x7a8   : > { %10493 = vmatmul.mubr.f32.vlgmr.msra.gmra.mrb[36].mxu1 %v18324_v51 }
 0x7a9   : > { %10498 = vmatprep.mubr.f32.mxu1 %v20980_v36 }
 0x7aa   : > { %9102 = vmatmul.mubr.f32.gmra.mrb[38].mxu0 %v18344_v35 }
 0x7ab   : > { %9107 = vmatprep.mubr.f32.mxu0 %v20980_v36 }
 0x7ac   : > { %10500 = vmatmul.mubr.f32.gmra.mrb[38].mxu1 %v18344_v35 }
 0x7ad   : > { %10505 = vmatprep.mubr.f32.mxu1 %v20980_v36 }
 0x7ae   : > { %9109 = vmatmul.mubr.f32.gmra.mrb[40].mxu0 %v18370_v26 }
 0x7af   : > { %9114 = vmatprep.mubr.f32.mxu0 %v20980_v36 }
 0x7b0   : > { %10507 = vmatmul.mubr.f32.gmra.mrb[40].mxu1 %v18370_v26 }
 0x7b1   : > { %10512 = vmatprep.mubr.f32.mxu1 %v20980_v36 }
 0x7b2   : > { %9116 = vmatmul.mubr.f32.gmra.mrb[42].mxu0 %v18393_v25 }
 0x7b3   : > { %9121 = vmatprep.mubr.f32.mxu0 %v20980_v36 }
 0x7b4   : > { %10514 = vmatmul.mubr.f32.gmra.mrb[42].mxu1 %v18393_v25 }
 0x7b5   : > { %10519 = vmatprep.mubr.f32.mxu1 %v20980_v36 }
 0x7b6   : > { %9123 = vmatmul.mubr.f32.gmra.mrb[44].mxu0 %v18422_v9 }
 0x7b7   : > { %9128 = vmatprep.mubr.f32.mxu0 %v20980_v36 }
 0x7b8   : > { %10521 = vmatmul.mubr.f32.gmra.mrb[44].mxu1 %v18422_v9 }
 0x7b9   : > { %10526 = vmatprep.mubr.f32.mxu1 %v20980_v36 }
 0x7ba   : > { %9130 = vmatmul.mubr.f32.gmra.mrb[46].mxu0 %v18446_v14 }
 0x7bb   : > { %9135 = vmatprep.mubr.f32.mxu0 %v20980_v36 }
 0x7bc   : > { %10528 = vmatmul.mubr.f32.gmra.mrb[46].mxu1 %v18446_v14  ;;  %v22303_v14 = vld [vmem:[#allocation226_spill] sm:$0xff] }
 0x7bd   : > { %10533 = vmatprep.mubr.f32.mxu1 %v20980_v36 }
 0x7be   : > { %9137 = vmatmul.mubr.f32.gmra.mrb[48].mxu0 %v22290_v12 }
 0x7bf   : > { %9142 = vmatprep.mubr.f32.mxu0 %v20980_v36 }
 0x7c0   : > { %10535 = vmatmul.mubr.f32.gmra.mrb[48].mxu1 %v22290_v12 }
 0x7c1   : > { %10540 = vmatprep.mubr.f32.mxu1 %v20980_v36 }
 0x7c2   : > { %9144 = vmatmul.mubr.f32.gmra.mrb[50].mxu0 %v22292_v44 }
 0x7c3   : > { %9149 = vmatprep.mubr.f32.mxu0 %v20980_v36 }
 0x7c4   : > { %10542 = vmatmul.mubr.f32.gmra.mrb[50].mxu1 %v22292_v44 }
 0x7c5   : > { %10547 = vmatprep.mubr.f32.mxu1 %v20980_v36 }
 0x7c6   : > { %9151 = vmatmul.mubr.f32.gmra.mrb[52].mxu0 %v22295_v40 }
 0x7c7   : > { %9156 = vmatprep.mubr.f32.mxu0 %v20980_v36 }
 0x7c8   : > { %10549 = vmatmul.mubr.f32.gmra.mrb[52].mxu1 %v22295_v40 }
 0x7c9   : > { %10554 = vmatprep.mubr.f32.mxu1 %v20980_v36 }
 0x7ca   : > { %9158 = vmatmul.mubr.f32.gmra.mrb[54].mxu0 %v22296_v4 }
 0x7cb   : > { %9163 = vmatprep.mubr.f32.mxu0 %v20980_v36 }
 0x7cc   : > { %10556 = vmatmul.mubr.f32.gmra.mrb[54].mxu1 %v22296_v4 }
 0x7cd   : > { %10561 = vmatprep.mubr.f32.mxu1 %v20980_v36 }
 0x7ce   : > { %9165 = vmatmul.mubr.f32.gmra.mrb[56].mxu0 %v22297_v31 }
 0x7cf   : > { %9170 = vmatprep.mubr.f32.mxu0 %v20980_v36 }
 0x7d0   : > { %10563 = vmatmul.mubr.f32.gmra.mrb[56].mxu1 %v22297_v31 }
 0x7d1   : > { %10568 = vmatprep.mubr.f32.mxu1 %v20980_v36 }
 0x7d2   : > { %9172 = vmatmul.mubr.f32.gmra.mrb[58].mxu0 %v22298_v21 }
 0x7d3   : > { %9177 = vmatprep.mubr.f32.mxu0 %v20980_v36 }
 0x7d4   : > { %10570 = vmatmul.mubr.f32.gmra.mrb[58].mxu1 %v22298_v21  ;;  %v22316_v21 = vld [vmem:[#allocation249_spill] sm:$0xff] }
 0x7d5   : > { %10575 = vmatprep.mubr.f32.mxu1 %v20980_v36 }
 0x7d6   : > { %9179 = vmatmul.mubr.f32.gmra.mrb[60].mxu0 %v22299_v34 }
 0x7d7   : > { %9184 = vmatprep.mubr.f32.mxu0 %v20980_v36 }
 0x7d8   : > { %10577 = vmatmul.mubr.f32.gmra.mrb[60].mxu1 %v22299_v34 }
 0x7d9   : > { %10582 = vmatprep.mubr.f32.mxu1 %v20980_v36 }
 0x7da   : > { %9186 = vmatmul.mubr.f32.gmra.mrb[62].mxu0 %v22300_v37 }
 0x7db   : > { %9191 = vmatprep.mubr.f32.mxu0 %v20980_v36 }
 0x7dc   : > { %10584 = vmatmul.mubr.f32.gmra.mrb[62].mxu1 %v22300_v37 }
 0x7dd   : > { %10589 = vmatprep.mubr.f32.mxu1 %v20980_v36 }
 0x7de   : > { %9193 = vmatmul.mubr.f32.gmra.mrb[64].mxu0 %v22301_v17 }
 0x7df   : > { %9198 = vmatprep.mubr.f32.mxu0 %v20980_v36 }
 0x7e0   : > { %10591 = vmatmul.mubr.f32.gmra.mrb[64].mxu1 %v22301_v17  ;;  %v22317_v17 = vld [vmem:[#allocation275_spill] sm:$0xff] }
 0x7e1   : > { %10596 = vmatprep.mubr.f32.mxu1 %v20980_v36  ;;  %v22307_v36 = vld [vmem:[#allocation244_spill] sm:$0xff] }
 0x7e2   : > { %9200 = vmatmul.mubr.f32.gmra.mrb[66].mxu0 %v22302_v19 }
 0x7e4   : > { %10598 = vmatmul.mubr.f32.gmra.mrb[66].mxu1 %v22302_v19 }
 0x879   : > { %v9096_v35 = vpop.f32.mrb[36].mxu0 }
 0x87a   : > { %v9098_v51 = vpop.f32.mrb[37].mxu0  ;;  %v10608_v45 = vmul.f32 %v9096_v35, %v22303_v14 }
 0x87b   : > { %v10494_v26 = vpop.f32.mrb[36].mxu1  ;;  %v10609_v27 = vmul.f32 %v9098_v51, %v22305_v6 }
 0x87c   : > { %v10496_v25 = vpop.f32.mrb[37].mxu1  ;;  %v10610_v58 = vmul.f32 %v10494_v26, %v22307_v36  ;;  %v22318_v26 = vld [vmem:[#allocation261_spill] sm:$0xff] }
 0x87d   : > { %v9103_v9 = vpop.f32.mrb[38].mxu0  ;;  %v10611_v54 = vmul.f32 %v10496_v25, %v22309_v22 }
 0x87e   : > { %v10616_v15 = vmul.f32 %v9103_v9, %v22304_v41  ;;  %v9105_v63 = vpop.f32.mrb[39].mxu0 }
 0x87f   : > { %v10501_v39 = vpop.f32.mrb[38].mxu1  ;;  %v10617_v43 = vmul.f32 %v9105_v63, %v22306_v30 }
 0x880   : > { %v10816_v11 = vadd.f32 %v10616_v15, %v10608_v45  ;;  %v10618_v47 = vmul.f32 %v10501_v39, %v22308_v24  ;;  %v10503_v2 = vpop.f32.mrb[39].mxu1  ;;  %v22319_v45 = vld [vmem:[#allocation284_spill] sm:$0xff]  ;;  %v22322_v24 = vld [vmem:[#allocation281_spill] sm:$0xff] }
 0x881   : > { %v10837_v18 = vadd.f32 %v10617_v43, %v10609_v27  ;;  %v10619_v50 = vmul.f32 %v10503_v2, %v22310_v42  ;;  %v9110_v28 = vpop.f32.mrb[40].mxu0  ;;  %v22320_v27 = vld [vmem:[#allocation279_spill] sm:$0xff]  ;;  %v22321_v43 = vld [vmem:[#allocation286_spill] sm:$0xff] }
 0x882   : > { %v10858_v1 = vadd.f32 %v10618_v47, %v10610_v58  ;;  %v10624_v56 = vmul.f32 %v9110_v28, %v22311_v10  ;;  %v9112_v32 = vpop.f32.mrb[41].mxu0 }
 0x883   : > { %v10879_v0 = vadd.f32 %v10619_v50, %v10611_v54  ;;  %v10508_v46 = vpop.f32.mrb[40].mxu1  ;;  %v10625_v29 = vmul.f32 %v9112_v32, %v22312_v57  ;;  %v22323_v54 = vld [vmem:[#allocation285_spill] sm:$0xff]  ;;  %v22325_v32 = vld [vmem:[#allocation287_spill] sm:$0xff] }
 0x884   : > { %v10817_v33 = vadd.f32 %v10816_v11, %v10624_v56  ;;  %v10626_v5 = vmul.f32 %v10508_v46, %v22313_v53  ;;  %v10510_v52 = vpop.f32.mrb[41].mxu1 }
 0x885   : > { %v10838_v62 = vadd.f32 %v10837_v18, %v10625_v29  ;;  %v10627_v12 = vmul.f32 %v10510_v52, %v22314_v38  ;;  %v9117_v8 = vpop.f32.mrb[42].mxu0  ;;  %v22326_v29 = vld [vmem:[#allocation283_spill] sm:$0xff]  ;;  %v22327_v52 = vld [vmem:[#allocation302_spill] sm:$0xff] }
 0x886   : > { %v10859_v44 = vadd.f32 %v10858_v1, %v10626_v5  ;;  %v10632_v59 = vmul.f32 %v9117_v8, %v22315_v20  ;;  %v9119_v40 = vpop.f32.mrb[43].mxu0  ;;  %v22324_v1 = vld [vmem:[#allocation280_spill] sm:$0xff] }
 0x887   : > { %v10880_v4 = vadd.f32 %v10879_v0, %v10627_v12  ;;  %v10515_v31 = vpop.f32.mrb[42].mxu1  ;;  %v10633_v34 = vmul.f32 %v9119_v40, %v22316_v21  ;;  %v22329_v40 = vld [vmem:[#allocation311_spill] sm:$0xff] }
 0x888   : > { %v10818_v37 = vadd.f32 %v10817_v33, %v10632_v59  ;;  %v10634_v19 = vmul.f32 %v10515_v31, %v22317_v17  ;;  %v10517_v35 = vpop.f32.mrb[43].mxu1 }
 0x889   : > { %v10839_v51 = vadd.f32 %v10838_v62, %v10633_v34  ;;  %v10635_v25 = vmul.f32 %v10517_v35, %v22318_v26  ;;  %v9124_v9 = vpop.f32.mrb[44].mxu0  ;;  %v22330_v34 = vld [vmem:[#allocation300_spill] sm:$0xff]  ;;  %v22331_v35 = vld [vmem:[#allocation307_spill] sm:$0xff] }
 0x88a   : > { %v10860_v14 = vadd.f32 %v10859_v44, %v10634_v19  ;;  %v10640_v41 = vmul.f32 %v9124_v9, %v22319_v45  ;;  %v9126_v15 = vpop.f32.mrb[45].mxu0  ;;  %v22328_v44 = vld [vmem:[#allocation298_spill] sm:$0xff] }
 0x88b   : > { %v10881_v63 = vadd.f32 %v10880_v4, %v10635_v25  ;;  %v10522_v6 = vpop.f32.mrb[44].mxu1  ;;  %v10641_v39 = vmul.f32 %v9126_v15, %v22320_v27  ;;  %v22333_v15 = vld [vmem:[#allocation315_spill] sm:$0xff] }
 0x88c   : > { %v10819_v30 = vadd.f32 %v10818_v37, %v10640_v41  ;;  %v10642_v36 = vmul.f32 %v10522_v6, %v22321_v43  ;;  %v10524_v58 = vpop.f32.mrb[45].mxu1 }
 0x88d   : > { %v10840_v11 = vadd.f32 %v10839_v51, %v10641_v39  ;;  %v10643_v47 = vmul.f32 %v10524_v58, %v22322_v24  ;;  %v9131_v2 = vpop.f32.mrb[46].mxu0  ;;  %v22334_v39 = vld [vmem:[#allocation301_spill] sm:$0xff]  ;;  %v22335_v58 = vld [vmem:[#allocation322_spill] sm:$0xff] }
 0x88e   : > { %v10861_v22 = vadd.f32 %v10860_v14, %v10642_v36  ;;  %v10648_v18 = vmul.f32 %v9131_v2, %v22323_v54  ;;  %v9133_v42 = vpop.f32.mrb[47].mxu0  ;;  %v22332_v14 = vld [vmem:[#allocation299_spill] sm:$0xff] }
 0x88f   : > { %v10882_v50 = vadd.f32 %v10881_v63, %v10643_v47  ;;  %v10529_v28 = vpop.f32.mrb[46].mxu1  ;;  %v10649_v10 = vmul.f32 %v9133_v42, %v22324_v1  ;;  %v22337_v42 = vld [vmem:[#allocation331_spill] sm:$0xff] }
 0x890   : > { %v10820_v56 = vadd.f32 %v10819_v30, %v10648_v18  ;;  %v10650_v0 = vmul.f32 %v10529_v28, %v22325_v32  ;;  %v10531_v46 = vpop.f32.mrb[47].mxu1 }
 0x891   : > { %v10841_v57 = vadd.f32 %v10840_v11, %v10649_v10  ;;  %v10651_v33 = vmul.f32 %v10531_v46, %v22326_v29  ;;  %v9138_v53 = vpop.f32.mrb[48].mxu0  ;;  %v22338_v10 = vld [vmem:[#allocation321_spill] sm:$0xff]  ;;  %v22339_v46 = vld [vmem:[#allocation323_spill] sm:$0xff] }
 0x892   : > { %v10862_v5 = vadd.f32 %v10861_v22, %v10650_v0  ;;  %v10656_v62 = vmul.f32 %v9138_v53, %v22327_v52  ;;  %v9140_v38 = vpop.f32.mrb[49].mxu0  ;;  %v22336_v22 = vld [vmem:[#allocation219_spill] sm:$0xff] }
 0x893   : > { %v10883_v12 = vadd.f32 %v10882_v50, %v10651_v33  ;;  %v10536_v8 = vpop.f32.mrb[48].mxu1  ;;  %v10657_v20 = vmul.f32 %v9140_v38, %v22328_v44  ;;  %v22341_v38 = vld [vmem:[#allocation341_spill] sm:$0xff] }
 0x894   : > { %v10821_v59 = vadd.f32 %v10820_v56, %v10656_v62  ;;  %v10658_v4 = vmul.f32 %v10536_v8, %v22329_v40  ;;  %v10538_v31 = vpop.f32.mrb[49].mxu1 }
 0x895   : > { %v10842_v21 = vadd.f32 %v10841_v57, %v10657_v20  ;;  %v10659_v37 = vmul.f32 %v10538_v31, %v22330_v34  ;;  %v9145_v17 = vpop.f32.mrb[50].mxu0  ;;  %v22342_v20 = vld [vmem:[#allocation225_spill] sm:$0xff]  ;;  %v22343_v31 = vld [vmem:[#allocation326_spill] sm:$0xff] }
 0x896   : > { %v10863_v19 = vadd.f32 %v10862_v5, %v10658_v4  ;;  %v10664_v51 = vmul.f32 %v9145_v17, %v22331_v35  ;;  %v9147_v26 = vpop.f32.mrb[51].mxu0  ;;  %v22340_v5 = vld [vmem:[#allocation220_spill] sm:$0xff] }
 0x897   : > { %v10884_v25 = vadd.f32 %v10883_v12, %v10659_v37  ;;  %v10543_v9 = vpop.f32.mrb[50].mxu1  ;;  %v10665_v45 = vmul.f32 %v9147_v26, %v22332_v14  ;;  %v22345_v26 = vld [vmem:[#allocation327_spill] sm:$0xff] }
 0x898   : > { %v10822_v41 = vadd.f32 %v10821_v59, %v10664_v51  ;;  %v10666_v63 = vmul.f32 %v10543_v9, %v22333_v15  ;;  %v10545_v6 = vpop.f32.mrb[51].mxu1 }
 0x899   : > { %v10843_v27 = vadd.f32 %v10842_v21, %v10665_v45  ;;  %v10667_v30 = vmul.f32 %v10545_v6, %v22334_v39  ;;  %v9152_v43 = vpop.f32.mrb[52].mxu0  ;;  %v22346_v45 = vld [vmem:[#allocation324_spill] sm:$0xff]  ;;  %v22347_v6 = vld [vmem:[#allocation234_spill] sm:$0xff] }
 0x89a   : > { %v10864_v36 = vadd.f32 %v10863_v19, %v10666_v63  ;;  %v10672_v11 = vmul.f32 %v9152_v43, %v22335_v58  ;;  %v9154_v24 = vpop.f32.mrb[53].mxu0  ;;  %v22344_v19 = vld [vmem:[#allocation357_spill] sm:$0xff] }
 0x89b   : > { %v10885_v47 = vadd.f32 %v10884_v25, %v10667_v30  ;;  %v10550_v2 = vpop.f32.mrb[52].mxu1  ;;  %v10673_v54 = vmul.f32 %v9154_v24, %v22336_v22  ;;  %v22349_v24 = vld [vmem:[#allocation328_spill] sm:$0xff] }
 0x89c   : > { %v10823_v18 = vadd.f32 %v10822_v41, %v10672_v11  ;;  %v10674_v50 = vmul.f32 %v10550_v2, %v22337_v42  ;;  %v10552_v28 = vpop.f32.mrb[53].mxu1 }
 0x89d   : > { %v10844_v1 = vadd.f32 %v10843_v27, %v10673_v54  ;;  %v10675_v56 = vmul.f32 %v10552_v28, %v22338_v10  ;;  %v9159_v32 = vpop.f32.mrb[54].mxu0  ;;  %v22350_v54 = vld [vmem:[#allocation325_spill] sm:$0xff]  ;;  %v22351_v28 = vld [vmem:[#allocation339_spill] sm:$0xff] }
 0x89e   : > { %v10865_v0 = vadd.f32 %v10864_v36, %v10674_v50  ;;  %v10680_v57 = vmul.f32 %v9159_v32, %v22339_v46  ;;  %v9161_v29 = vpop.f32.mrb[55].mxu0  ;;  %v22348_v36 = vld [vmem:[#allocation358_spill] sm:$0xff] }
 0x89f   : > { %v10886_v33 = vadd.f32 %v10885_v47, %v10675_v56  ;;  %v10557_v53 = vpop.f32.mrb[54].mxu1  ;;  %v10681_v52 = vmul.f32 %v9161_v29, %v22340_v5  ;;  %v22353_v29 = vld [vmem:[#allocation342_spill] sm:$0xff] }
 0x8a0   : > { %v10824_v62 = vadd.f32 %v10823_v18, %v10680_v57  ;;  %v10682_v12 = vmul.f32 %v10557_v53, %v22341_v38  ;;  %v10559_v8 = vpop.f32.mrb[55].mxu1 }
 0x8a1   : > { %v10845_v44 = vadd.f32 %v10844_v1, %v10681_v52  ;;  %v10683_v59 = vmul.f32 %v10559_v8, %v22342_v20  ;;  %v9166_v40 = vpop.f32.mrb[56].mxu0  ;;  %v22354_v52 = vld [vmem:[#allocation332_spill] sm:$0xff] }
 0x8a2   : > { %v10866_v4 = vadd.f32 %v10865_v0, %v10682_v12  ;;  %v10688_v21 = vmul.f32 %v9166_v40, %v22343_v31  ;;  %v9168_v34 = vpop.f32.mrb[57].mxu0  ;;  %v22352_v0 = vld [vmem:[#allocation240_spill] sm:$0xff] }
 0x8a3   : > { %v10887_v37 = vadd.f32 %v10886_v33, %v10683_v59  ;;  %v10564_v17 = vpop.f32.mrb[56].mxu1  ;;  %v10689_v35 = vmul.f32 %v9168_v34, %v22344_v19  ;;  %v22355_v8 = vld [vmem:[#allocation340_spill] sm:$0xff] }
 0x8a4   : > { %v10825_v51 = vadd.f32 %v10824_v62, %v10688_v21  ;;  %v10690_v25 = vmul.f32 %v10564_v17, %v22345_v26  ;;  %v10566_v9 = vpop.f32.mrb[57].mxu1  ;;  %v22357_v34 = vld [vmem:[#allocation344_spill] sm:$0xff] }
 0x8a5   : > { %v10846_v14 = vadd.f32 %v10845_v44, %v10689_v35  ;;  %v10691_v41 = vmul.f32 %v10566_v9, %v22346_v45  ;;  %v9173_v15 = vpop.f32.mrb[58].mxu0  ;;  %v22358_v35 = vld [vmem:[#allocation338_spill] sm:$0xff] }
 0x8a6   : > { %v10867_v63 = vadd.f32 %v10866_v4, %v10690_v25  ;;  %v10696_v27 = vmul.f32 %v9173_v15, %v22347_v6  ;;  %v9175_v39 = vpop.f32.mrb[59].mxu0  ;;  %v22356_v4 = vld [vmem:[#allocation241_spill] sm:$0xff]  ;;  %v22359_v9 = vld [vmem:[#allocation350_spill] sm:$0xff] }
 0x8a7   : > { %v10888_v30 = vadd.f32 %v10887_v37, %v10691_v41  ;;  %v10571_v43 = vpop.f32.mrb[58].mxu1  ;;  %v10697_v58 = vmul.f32 %v9175_v39, %v22348_v36  ;;  %v22361_v39 = vld [vmem:[#allocation352_spill] sm:$0xff] }
 0x8a8   : > { %v10826_v11 = vadd.f32 %v10825_v51, %v10696_v27  ;;  %v10698_v47 = vmul.f32 %v10571_v43, %v22349_v24  ;;  %v10573_v2 = vpop.f32.mrb[59].mxu1 }
 0x8a9   : > { %v10847_v22 = vadd.f32 %v10846_v14, %v10697_v58  ;;  %v10699_v18 = vmul.f32 %v10573_v2, %v22350_v54  ;;  %v9180_v42 = vpop.f32.mrb[60].mxu0  ;;  %v22362_v58 = vld [vmem:[#allocation348_spill] sm:$0xff]  ;;  %v22363_v2 = vld [vmem:[#allocation351_spill] sm:$0xff] }
 0x8aa   : > { %v10868_v50 = vadd.f32 %v10867_v63, %v10698_v47  ;;  %v10704_v1 = vmul.f32 %v9180_v42, %v22351_v28  ;;  %v9182_v10 = vpop.f32.mrb[61].mxu0  ;;  %v22360_v63 = vld [vmem:[#allocation346_spill] sm:$0xff] }
 0x8ab   : > { %v10889_v56 = vadd.f32 %v10888_v30, %v10699_v18  ;;  %v10578_v32 = vpop.f32.mrb[60].mxu1  ;;  %v10705_v46 = vmul.f32 %v9182_v10, %v22352_v0  ;;  %v22365_v10 = vld [vmem:[#allocation353_spill] sm:$0xff] }
 0x8ac   : > { %v10827_v57 = vadd.f32 %v10826_v11, %v10704_v1  ;;  %v10706_v33 = vmul.f32 %v10578_v32, %v22353_v29  ;;  %v10580_v53 = vpop.f32.mrb[61].mxu1 }
 0x8ad   : > { %v10848_v5 = vadd.f32 %v10847_v22, %v10705_v46  ;;  %v10707_v62 = vmul.f32 %v10580_v53, %v22354_v52  ;;  %v9187_v38 = vpop.f32.mrb[62].mxu0  ;;  %v22366_v46 = vld [vmem:[#allocation349_spill] sm:$0xff] }
 0x8ae   : > { %v10869_v12 = vadd.f32 %v10868_v50, %v10706_v33  ;;  %v10712_v44 = vmul.f32 %v9187_v38, %v22355_v8  ;;  %v9189_v20 = vpop.f32.mrb[63].mxu0  ;;  %v22364_v50 = vld [vmem:[#allocation347_spill] sm:$0xff] }
 0x8af   : > { %v10890_v59 = vadd.f32 %v10889_v56, %v10707_v62  ;;  %v10585_v40 = vpop.f32.mrb[62].mxu1  ;;  %v10713_v31 = vmul.f32 %v9189_v20, %v22356_v4 }
 0x8b0   : > { %v10828_v21 = vadd.f32 %v10827_v57, %v10712_v44  ;;  %v10714_v37 = vmul.f32 %v10585_v40, %v22357_v34  ;;  %v10587_v17 = vpop.f32.mrb[63].mxu1 }
 0x8b1   : > { %v10849_v19 = vadd.f32 %v10848_v5, %v10713_v31  ;;  %v10715_v51 = vmul.f32 %v10587_v17, %v22358_v35  ;;  %v9194_v26 = vpop.f32.mrb[64].mxu0 }
 0x8b2   : > { %v10870_v25 = vadd.f32 %v10869_v12, %v10714_v37  ;;  %v10720_v14 = vmul.f32 %v9194_v26, %v22359_v9  ;;  %v9196_v45 = vpop.f32.mrb[65].mxu0 }
 0x8b3   : > { %v10891_v41 = vadd.f32 %v10890_v59, %v10715_v51  ;;  %v10592_v15 = vpop.f32.mrb[64].mxu1  ;;  %v10721_v6 = vmul.f32 %v9196_v45, %v22360_v63 }
 0x8b4   : > { %v10829_v27 = vadd.f32 %v10828_v21, %v10720_v14  ;;  %v10722_v30 = vmul.f32 %v10592_v15, %v22361_v39  ;;  %v10594_v43 = vpop.f32.mrb[65].mxu1  ;;  %v22367_v14 = vld [vmem:[#allocation175_spill] sm:$0xff] }
 0x8b5   : > { %v10850_v36 = vadd.f32 %v10849_v19, %v10721_v6  ;;  %v10723_v11 = vmul.f32 %v10594_v43, %v22362_v58  ;;  %v9201_v24 = vpop.f32.mrb[66].mxu0  ;;  %v11037_v45 = vrot.slane %v19637_v48, %v22367_v14  ;;  %v22368_v6 = vld [vmem:[#allocation177_spill] sm:$0xff]  ;;  %v22369_v58 = vld [vmem:[#allocation178_spill] sm:$0xff] }
 0x8b6   : > { %v10871_v47 = vadd.f32 %v10870_v25, %v10722_v30  ;;  %v10728_v22 = vmul.f32 %v9201_v24, %v22363_v2  ;;  %v9203_v54 = vpop.f32.mrb[67].mxu0  ;;  %v11091_v39 = vrot.slane %v19639_v7, %v22368_v6  ;;  %v11095_v24 = vrot.slane %v19639_v7, %v22369_v58 }
 0x8b7   : > { %v10892_v18 = vadd.f32 %v10891_v41, %v10723_v11  ;;  %v10599_v42 = vpop.f32.mrb[66].mxu1  ;;  %v10729_v28 = vmul.f32 %v9203_v54, %v22364_v50  ;;  %v11087_v41 = vrot.slane %v19639_v7, %v22367_v14  ;;  %v11045_v11 = vrot.slane %v19637_v48, %v22369_v58 }
 0x8b8   : > { %v10830_v1 = vadd.f32 %v10829_v27, %v10728_v22  ;;  %v10730_v56 = vmul.f32 %v10599_v42, %v22365_v10  ;;  %v10601_v32 = vpop.f32.mrb[67].mxu1  ;;  %v11041_v27 = vrot.slane %v19637_v48, %v22368_v6  ;;  %v22370_v22 = vld [vmem:[#allocation179_spill] sm:$0xff]  ;;  %v22371_v42 = vld [vmem:[#allocation180_spill] sm:$0xff]  ;;  %v22372_v10 = vld [vmem:[#allocation181_spill] sm:$0xff] }
 0x8b9   : > { %v10851_v0 = vadd.f32 %v10850_v36, %v10729_v28  ;;  %v10731_v57 = vmul.f32 %v10601_v32, %v22366_v46  ;;  %v11049_v54 = vrot.slane %v19637_v48, %v22370_v22  ;;  %v11120_v50 = vmul.f32 %v22371_v42, %v22371_v42  ;;  %v22373_v46 = vld [vmem:[#allocation182_spill] sm:$0xff] }
 0x8ba   : > { %v10831_v29 = vrot.slane %v10830_v1, 4  ;;  %v10872_v33 = vadd.f32 %v10871_v47, %v10730_v56  ;;  %v11121_v56 = vmul.f32 %v22372_v10, %v22372_v10  ;;  %v11279_v42 = vld [vmem:[#allocation4 + $0x8] sm:$0xff]  ;;  %v11281_v10 = vld [vmem:[#allocation4 + $0x18] sm:$0xff] }
 0x8bb   : > { %v10852_v53 = vrot.slane %v10851_v0, 4  ;;  %v10893_v5 = vadd.f32 %v10892_v18, %v10731_v57  ;;  %v11099_v18 = vrot.slane %v19639_v7, %v22370_v22  ;;  %v11122_v57 = vmul.f32 %v22373_v46, %v22373_v46 }
 0x8bc   : > { %v10832_v52 = vadd.f32 %v10831_v29, %v10830_v1  ;;  %v10873_v62 = vrot.slane %v10872_v33, 4 }
 0x8bd   : > { %v10853_v38 = vadd.f32 %v10852_v53, %v10851_v0  ;;  %v10894_v12 = vrot.slane %v10893_v5, 4  ;;  %v22374_v53 = vld [vmem:[#allocation22_spill] sm:$0xff] }
 0x8be   : > { %v10833_v8 = vrot.slane %v10832_v52, 2  ;;  %v10874_v44 = vadd.f32 %v10873_v62, %v10872_v33  ;;  %v11123_v48 = vmul.f32 %v22374_v53, %v22374_v53 }
 0x8bf   : > { %v10854_v20 = vrot.slane %v10853_v38, 2  ;;  %v10895_v59 = vadd.f32 %v10894_v12, %v10893_v5 }
 0x8c0   : > { %v10834_v40 = vadd.f32 %v10833_v8, %v10832_v52  ;;  %v10875_v4 = vrot.slane %v10874_v44, 2 }
 0x8c1   : > { %v10855_v31 = vadd.f32 %v10854_v20, %v10853_v38  ;;  %v10896_v21 = vrot.slane %v10895_v59, 2 }
 0x8c2   : > { %v10835_v34 = vrot.slane %v10834_v40, 1  ;;  %v10876_v37 = vadd.f32 %v10875_v4, %v10874_v44 }
 0x8c3   : > { %v10856_v17 = vrot.slane %v10855_v31, 1  ;;  %v10897_v19 = vadd.f32 %v10896_v21, %v10895_v59 }
 0x8c4   : > { %v10836_v35 = vadd.f32 %v10835_v34, %v10834_v40  ;;  %v10877_v51 = vrot.slane %v10876_v37, 1 }
 0x8c5   : > { %v10857_v26 = vadd.f32 %v10856_v17, %v10855_v31  ;;  %v10898_v25 = vrot.slane %v10897_v19, 1 }
 0x8c6   : > { %v10904_v9 = vmul.f32 0.00048828125, %v10836_v35  ;;  %v10878_v15 = vadd.f32 %v10877_v51, %v10876_v37 }
 0x8c7   : > { %v10905_v63 = vmul.f32 0.00048828125, %v10857_v26  ;;  %v10899_v30 = vadd.f32 %v10898_v25, %v10897_v19  ;;  %v11205_v25 = vrot.slane %v11197_v60, %v22286_v3 }
 0x8c8   : > { %v11062_v43 = vadd.f32 %v11037_v45, %v10904_v9  ;;  %v10906_v36 = vmul.f32 0.00048828125, %v10878_v15  ;;  %v11140_v45 = vld [vmem:[%s20042_s6] sm:$0xff] }
 0x8c9   : > { %v11063_v47 = vadd.f32 %v11041_v27, %v10905_v63  ;;  %v10907_v2 = vmul.f32 0.00048828125, %v10899_v30  ;;  %v14348_v15 = vld [vmem:[%s20041_s5] sm:$0xff]  ;;  %v22375_v63 = vld [vmem:[#allocation170_spill] sm:$0xff] }
 0x8ca   : > { %v11112_v28 = vadd.f32 %v11087_v41, %v11062_v43  ;;  %v11064_v1 = vadd.f32 %v11045_v11, %v10906_v36  ;;  %v22376_v27 = vld [vmem:[#allocation172_spill] sm:$0xff]  ;;  %v11278_v11 = vld [vmem:[#allocation4] sm:$0xff] }
 0x8cb   : > { %v11113_v32 = vadd.f32 %v11091_v39, %v11063_v47  ;;  %v11065_v0 = vadd.f32 %v11049_v54, %v10907_v2  ;;  %v22377_v39 = vcombine.low %v22375_v63, %v22376_v27 }
 0x8cc   : > { %v11128_v29 = vsub.f32 %v11112_v28, %v11120_v50  ;;  %v11114_v33 = vadd.f32 %v11095_v24, %v11064_v1  ;;  %v11280_v50 = vld [vmem:[#allocation4 + $0x10] sm:$0xff] }
 0x8cd   : > { %v11129_v5 = vsub.f32 %v11113_v32, %v11121_v56  ;;  %v11115_v7 = vadd.f32 %v11099_v18, %v11065_v0  ;;  %v11275_v30 = vsub.f32 %v14348_v15, %v22377_v39 }
 0x8ce   : > { %v11136_v52 = vmax.f32 %v11128_v29, 0.0  ;;  %v11130_v62 = vsub.f32 %v11114_v33, %v11122_v57  ;;  %v11372_v33 = vld [vmem:[#allocation5] sm:$0xff] }
 0x8cf   : > { %v11137_v38 = vmax.f32 %v11129_v5, 0.0  ;;  %v11131_v12 = vsub.f32 %v11115_v7, %v11123_v48 }
 0x8d0   : > { %v11145_v8 = vadd.f32 1e-05, %v11136_v52  ;;  %v11138_v44 = vmax.f32 %v11130_v62, 0.0  ;;  %v11373_v52 = vld [vmem:[#allocation5 + $0x8] sm:$0xff]  ;;  %v11374_v62 = vld [vmem:[#allocation5 + $0x10] sm:$0xff] }
 0x8d1   : > { %v11146_v20 = vadd.f32 1e-05, %v11137_v38  ;;  %v11139_v59 = vmax.f32 %v11131_v12, 0.0  ;;  %v11375_v38 = vld [vmem:[#allocation5 + $0x18] sm:$0xff] }
 0x8d2   : > { %14339 = vrsqrt.f32 %v11145_v8  ;;  %v11147_v40 = vadd.f32 1e-05, %v11138_v44 }
 0x8d3   : > { %14341 = vrsqrt.f32 %v11146_v20  ;;  %v11148_v4 = vadd.f32 1e-05, %v11139_v59 }
 0x8d4   : > { %14343 = vrsqrt.f32 %v11147_v40 }
 0x8d5   : > { %14345 = vrsqrt.f32 %v11148_v4 }
 0x8dc   : > { %v14340_v31 = vpop.eup %14339 }
 0x8dd   : > { %v14342_v21 = vpop.eup %14341 }
 0x8de   : > { %v14344_v34 = vpop.eup %14343  ;;  %v11167_v37 = vcombine.low %v14340_v31, %v14342_v21 }
 0x8df   : > { %v14346_v17 = vpop.eup %14345 }
 0x8e0   : > { %v11189_v19 = vrot.slane %v11167_v37, %v22286_v3  ;;  %v11168_v35 = vcombine.low %v14344_v34, %v14346_v17 }
 0x8e2   : > { %v11196_v51 = vrot.slane %v11168_v35, %v22286_v3 }
 0x8e4   : > { %v11198_v26 = vcombine.low %v11189_v19, %v11196_v51 }
 0x8e6   : > { %v11212_v9 = vrot.slane %v11198_v26, %v22286_v3 }
 0x8e8   : > { %v11213_v41 = vcombine.low %v11205_v25, %v11212_v9 }
 0x8ea   : > { %v11215_v43 = vmul.f32 %v11213_v41, %v11140_v45 }
 0x8ec   : > { %v11276_v13 = vmul.f32 %v11275_v30, %v11215_v43  ;;  %v11286_v3 = vrot.slane %v11215_v43, %v22271_v16  ;;  %v11290_v60 = vrot.slane %v11215_v43, %v22273_v49  ;;  %v11294_v36 = vrot.slane %v11215_v43, %v22274_v55 }
 0x8ed   : > { %v11298_v24 = vrot.slane %v11215_v43, %v22275_v23  ;;  %v11302_v47 = vrot.slane %v11215_v43, %v22367_v14  ;;  %v11306_v2 = vrot.slane %v11215_v43, %v22368_v6  ;;  %v11310_v54 = vrot.slane %v11215_v43, %v22369_v58 }
 0x8ee   : > { %v11277_v18 = vadd.f32 %v11276_v13, %v11216_v61  ;;  %v11314_v28 = vrot.slane %v11215_v43, %v22370_v22  ;;  %v11315_v1 = vcombine.low %v11286_v3, %v11290_v60 }
 0x8ef   : > { %v11316_v56 = vcombine.low %v11294_v36, %v11298_v24  ;;  %v11317_v32 = vcombine.low %v11302_v47, %v11306_v2 }
 0x8f0   : > { %v11318_v0 = vcombine.low %v11310_v54, %v11314_v28  ;;  %v11323_v46 = vmul.f32 %v11315_v1, %v11278_v11  ;;  %v11331_v57 = vrot.slane %v11277_v18, %v22271_v16  ;;  %v11335_v29 = vrot.slane %v11277_v18, %v22273_v49 }
 0x8f1   : > { %v11324_v53 = vmul.f32 %v11316_v56, %v11279_v42  ;;  %v11325_v48 = vmul.f32 %v11317_v32, %v11280_v50  ;;  %v11339_v5 = vrot.slane %v11277_v18, %v22274_v55  ;;  %v11343_v7 = vrot.slane %v11277_v18, %v22275_v23 }
 0x8f2   : > { %v11326_v12 = vmul.f32 %v11318_v0, %v11281_v10  ;;  %v11347_v8 = vrot.slane %v11277_v18, %v22367_v14  ;;  %v11351_v44 = vrot.slane %v11277_v18, %v22368_v6  ;;  %v11355_v20 = vrot.slane %v11277_v18, %v22369_v58 }
 0x8f3   : > { %v11359_v16 = vrot.slane %v11277_v18, %v22370_v22  ;;  %v11360_v49 = vcombine.low %v11331_v57, %v11335_v29  ;;  %v11361_v59 = vcombine.low %v11339_v5, %v11343_v7  ;;  %v11376_v40 = vmul.f32 %v11372_v33, %v11315_v1 }
 0x8f4   : > { %v11362_v4 = vcombine.low %v11347_v8, %v11351_v44  ;;  %v11377_v31 = vmul.f32 %v11373_v52, %v11316_v56  ;;  %v11378_v55 = vmul.f32 %v11374_v62, %v11317_v32  ;;  %v11379_v21 = vmul.f32 %v11375_v38, %v11318_v0 }
 0x8f5   : > { %v11363_v23 = vcombine.low %v11355_v20, %v11359_v16  ;;  %v11368_v34 = vadd.f32 %v11360_v49, %v11323_v46  ;;  %v11369_v37 = vadd.f32 %v11361_v59, %v11324_v53  ;;  %v11380_v17 = vadd.f32 %v11376_v40, %v11360_v49 }
 0x8f6   : > { %v11370_v19 = vadd.f32 %v11362_v4, %v11325_v48  ;;  %v11381_v35 = vadd.f32 %v11377_v31, %v11361_v59  ;;  %v11382_v14 = vadd.f32 %v11378_v55, %v11362_v4 }
 0x8f7   : > { %v11371_v51 = vadd.f32 %v11363_v23, %v11326_v12  ;;  %v11383_v6 = vadd.f32 %v11379_v21, %v11363_v23  ;;  %v11384_v26 = vmax.f32 %v11368_v34, %v11380_v17 }
 0x8f8   : > { %v11385_v58 = vmax.f32 %v11369_v37, %v11381_v35  ;;  %v11386_v25 = vmax.f32 %v11370_v19, %v11382_v14 }
 0x8f9   : > { %v11387_v22 = vmax.f32 %v11371_v51, %v11383_v6  ;;  %v11388_v9 = vmax.f32 %v11384_v26, 0.0 }
 0x8fa   : > { %v11389_v45 = vmax.f32 %v11385_v58, 0.0  ;;  %v11390_v41 = vmax.f32 %v11386_v25, 0.0 }
 0x8fb   : > { %v11391_v15 = vmax.f32 %v11387_v22, 0.0  ;;  %11392 = vst [vmem:[#allocation6] sm:$0xff] %v11388_v9 }
 0x8fc   : > { %11393 = vst [vmem:[#allocation6 + $0x8] sm:$0xff] %v11389_v45  ;;  %11394 = vst [vmem:[#allocation6 + $0x10] sm:$0xff] %v11390_v41 }
 0x8fd   : > { %11395 = vst [vmem:[#allocation6 + $0x18] sm:$0xff] %v11391_v15 }
 0x8fe PF: > { %p19995_p13 = scmp.eq.s32.totalorder %s11466_s10, 15  ;;  %s14425_s25 = smov [#allocation6]  }
 0x8ff   : > { %s11403_s26 = sshll.u32 %s14425_s25, 4  ;;  %s11404_s26 = int_to_ptr.vmem [resolvable:$true] %s11403_s26 }
 0x900   : > { %s14349_s27 = scalar_lea.vmem %s11404_s26, 512  ;;  %p14356_p3 = scmp.lt.s32.totalorder %s11404_s26, %s11404_s26 }
 0x901   : > { %p14350_p0 = scmp.ne.s32.totalorder %s11404_s26, %s14349_s27  ;;  %p14357_p4 = scmp.lt.s32.totalorder %s14349_s27, %s14349_s27 }
 0x903   : > { %p14351_p1 = pnand %p14350_p0, %p19995_p13  ;;  %p14358_p5 = por %p14357_p4, %p14356_p3 }
 0x905   : > { %p14352_p2 = pneg %p14351_p1 }
 0x907   : > { %p14359_p6 = pnand %p14358_p5, %p14352_p2 }
 0x909   : > { %14362 = shalt.err (!%p14359_p6)
}
 0x90a   : > { %s14363_s10 = scalar_lea.hbm %s20044_s8, 512 }
 0x90b   : > { %p14364_p7 = scmp.ne.s32.totalorder %s20044_s8, %s14363_s10  ;;  %p14369_p10 = scmp.lt.u32.totalorder %s14363_s10, %s20044_s8 }
 0x90d   : > { %p14365_p8 = pnand %p14364_p7, %p19995_p13 }
 0x90f   : > { %p14366_p9 = pneg %p14365_p8 }
 0x911   : > { %p14371_p11 = pnand %p14369_p10, %p14366_p9 }
 0x913   : > { %14374 = shalt.err (!%p14371_p11)
}
 0x914   : > { %14267 = dma.vmem_to_hbm [thread:$0]  (%p19995_p13), %s11404_s26, 512, %s20044_s8, [#allocation7]  }
 0x915   : > { %14396 = dma.done.wait (%p19995_p13), [#allocation7], 512  }
 0x916   : > { %14398 = vsyncadd (%p19995_p13), [#allocation7], 4294966784 }
 0x917 PF: > { %s19_s9 = sadd.s32 1, %s14417_s9   ;;  %s22379_s27 = smov %s14409_s29 }
 0x918   : > { %p16_p12 = scmp.ge.s32.totalorder %s19_s9, 18   ;;  %s22380_s28 = smov %s14413_s30 }
 0x919   : > { %s22381_s29 = smov %s22384_s11  ;;  %s22382_s30 = smov %s22388_s12 }
 0x91a   :  { %18 = sbr.rel (!%p16_p12) target bundleno = 3 (0x3), region = 89 }
 0x921   :  { %11416 = vsyncpa [#allocation7], 1 }
 0x922   :  { %11418 = vsyncpa [#allocation7 + $0x1], 1 }

</bundles_post_ra>
